<compile_context>
chip_gen: v7x
topology: tpu7x:2x2x1
jax: 0.10.0
libtpu: 0.0.40
codegen_flags: <defaults>
</compile_context>

<pallas_src>
import functools

import jax
import jax.numpy as jnp
from jax.experimental import pallas as pl
from jax.experimental.pallas import tpu as pltpu

NUM_CLASSES = 2
MXU_DTYPE = jnp.bfloat16          # MXU operand dtype; accumulation is f32
ACT_DTYPE = jnp.bfloat16          # dtype of conv-only intermediates
TM_MAX = 1024                     # max row tile for the single-conv path

SRC_CH = [16, 16, 16, 32, 32, 32]     # pal1 / pal2 source channels (stub config)
FEM_OUT = [16, 16, 16, 32, 32, 32]    # FEM conv output channels
LAT_OUT = [32, 32, 16, 16, 16]        # FPN lateral 1x1 output channels

_PARALLEL_1D = pltpu.CompilerParams(dimension_semantics=("parallel",))


def _round_up(x, m):
    return ((x + m - 1) // m) * m


def _cdiv(a, b):
    return (a + b - 1) // b


# ----------------------------------------------------------------------------
# Pallas kernels
# ----------------------------------------------------------------------------
def _mm_bias_relu_kernel(x_ref, w_ref, b_ref, o_ref):
    acc = jnp.dot(x_ref[...].astype(MXU_DTYPE), w_ref[...],
                  preferred_element_type=jnp.float32)
    o_ref[...] = jnp.maximum(acc + b_ref[...], 0.0).astype(o_ref.dtype)


def _mm_bias_sigmoid_kernel(x_ref, w_ref, b_ref, o_ref):
    acc = jnp.dot(x_ref[...].astype(MXU_DTYPE), w_ref[...],
                  preferred_element_type=jnp.float32)
    o_ref[...] = jax.nn.sigmoid(acc + b_ref[...]).astype(o_ref.dtype)


def _gmm_bias_kernel(x_ref, w_ref, b_ref, o_ref):
    # Level-batched conv: x [Mmax,Kp] @ w [Kp,Np] + b (heads, FPN laterals).
    acc = jnp.dot(x_ref[...].astype(MXU_DTYPE), w_ref[...],
                  preferred_element_type=jnp.float32)
    o_ref[...] = (acc + b_ref[...]).astype(o_ref.dtype)


def _gmm_bias_l2norm_kernel(x_ref, w_ref, b_ref, s_ref, o_ref, *, n_l2):
    # FEM: conv + bias; levels [0, n_l2) additionally get channel-wise L2Norm * scale.
    y = jnp.dot(x_ref[...].astype(MXU_DTYPE), w_ref[...],
                preferred_element_type=jnp.float32) + b_ref[...]
    inv = jax.lax.rsqrt(jnp.sum(y * y, axis=-1, keepdims=True) + 1e-20)  # EUP rsqrt
    yn = y * inv * s_ref[...]
    flag = (pl.program_id(0) < n_l2).astype(jnp.float32)
    o_ref[...] = (flag * yn + (1.0 - flag) * y).astype(o_ref.dtype)


def _g_l2norm_kernel(x_ref, s_ref, o_ref):
    x = x_ref[...].astype(jnp.float32)
    inv = jax.lax.rsqrt(jnp.sum(x * x, axis=-1, keepdims=True) + 1e-20)
    o_ref[...] = (x * inv * s_ref[...]).astype(o_ref.dtype)


# ----------------------------------------------------------------------------
# Pallas wrappers
# ----------------------------------------------------------------------------
def matmul_act(x, w, b, *, act="relu", out_dtype=ACT_DTYPE):
    """x:[M,K] @ w:[K,N](bf16) + b[N], fused activation.  Activation cast to bf16
    in-kernel; no wrapper pad/slice (cdiv grid, ragged last block masked)."""
    M, K = x.shape
    N = w.shape[1]
    if M >= 256:
        # at least 2 grid steps so both v7x TensorCores get work; cap at TM_MAX
        tm = min(TM_MAX, _round_up(_cdiv(M, 2), 8))
    else:
        tm = M
    kern = _mm_bias_relu_kernel if act == "relu" else _mm_bias_sigmoid_kernel
    return pl.pallas_call(
        kern,
        out_shape=jax.ShapeDtypeStruct((M, N), out_dtype),
        grid=(_cdiv(M, tm),),
        in_specs=[pl.BlockSpec((tm, K), lambda i: (i, 0)),
                  pl.BlockSpec((K, N), lambda i: (0, 0)),
                  pl.BlockSpec((1, N), lambda i: (0, 0))],
        out_specs=pl.BlockSpec((tm, N), lambda i: (i, 0)),
        compiler_params=_PARALLEL_1D,
    )(x, w, b.reshape(1, N).astype(jnp.float32))


def _im2col(x, kh, kw, stride, pad):
    # TODO(synk): replace with an in-kernel kh*kw reduction grid for the real backbone
    # (removes the kh*kw HBM expansion); negligible at stub sizes.
    B, H, W, C = x.shape
    xp = jnp.pad(x, ((0, 0), (pad, pad), (pad, pad), (0, 0)))
    Ho = (H + 2 * pad - kh) // stride + 1
    Wo = (W + 2 * pad - kw) // stride + 1
    cols = [xp[:, i:i + stride * Ho:stride, j:j + stride * Wo:stride, :]
            for i in range(kh) for j in range(kw)]
    return jnp.concatenate(cols, axis=-1), Ho, Wo


def conv2d(x, p, stride=1, pad=0, act="relu", out_dtype=ACT_DTYPE):
    """Single conv (backbone / extras / top-down).  p = (w[kh,kw,Cin,Cout] bf16, b f32)."""
    w, b = p
    kh, kw, cin, cout = w.shape
    B = x.shape[0]
    if kh == 1 and kw == 1 and stride == 1 and pad == 0:
        Ho, Wo = x.shape[1], x.shape[2]
        patches = x.reshape(-1, cin)
    else:
        patches, Ho, Wo = _im2col(x, kh, kw, stride, pad)
        patches = patches.reshape(-1, kh * kw * cin)
    y = matmul_act(patches, w.reshape(kh * kw * cin, cout), b,
                   act=act, out_dtype=out_dtype)
    return y.reshape(B, Ho, Wo, cout)


def group_conv(inputs, wstack, bstack, sstack=None, *, n_l2=0,
               out_dtype=ACT_DTYPE, kh=3, kw=3, stride=1, pad=1):
    """Run L same-kernel-size convs (heterogeneous spatial / channel sizes) as ONE
    pallas_call: patches / weights zero-padded to a common (Kp, Np) and stacked along
    a leading 'level' grid axis (parallel -> levels spread over both v7x TCs)."""
    L = len(inputs)
    Kp, Np = wstack.shape[1], wstack.shape[2]
    pats = []
    for x in inputs:
        if kh == 1 and kw == 1 and stride == 1 and pad == 0:
            p = x.reshape(-1, x.shape[3])
        else:
            p, _, _ = _im2col(x, kh, kw, stride, pad)
            p = p.reshape(-1, p.shape[-1])
        pats.append(p)
    Mmax = _round_up(max(p.shape[0] for p in pats), 8)
    xs = jnp.stack([jnp.pad(p.astype(MXU_DTYPE),
                            ((0, Mmax - p.shape[0]), (0, Kp - p.shape[1])))
                    for p in pats])

    in_specs = [pl.BlockSpec((None, Mmax, Kp), lambda l: (l, 0, 0)),
                pl.BlockSpec((None, Kp, Np), lambda l: (l, 0, 0)),
                pl.BlockSpec((None, 1, Np), lambda l: (l, 0, 0))]
    args = [xs, wstack, bstack]
    if sstack is not None:
        in_specs.append(pl.BlockSpec((None, 1, Np), lambda l: (l, 0, 0)))
        args.append(sstack)
        kern = functools.partial(_gmm_bias_l2norm_kernel, n_l2=n_l2)
    else:
        kern = _gmm_bias_kernel

    return pl.pallas_call(
        kern,
        out_shape=jax.ShapeDtypeStruct((L, Mmax, Np), out_dtype),
        grid=(L,),
        in_specs=in_specs,
        out_specs=pl.BlockSpec((None, Mmax, Np), lambda l: (l, 0, 0)),
        compiler_params=_PARALLEL_1D,
    )(*args)


def group_l2norm(inputs, scales):
    """Grouped channel-wise L2Norm * scale for same-channel-count NHWC inputs."""
    L = len(inputs)
    C = inputs[0].shape[-1]
    flats = [x.reshape(-1, C) for x in inputs]
    Mmax = _round_up(max(f.shape[0] for f in flats), 8)
    xs = jnp.stack([jnp.pad(f, ((0, Mmax - f.shape[0]), (0, 0))) for f in flats])
    ss = jnp.stack([s.reshape(1, C).astype(jnp.float32) for s in scales])
    out = pl.pallas_call(
        _g_l2norm_kernel,
        out_shape=jax.ShapeDtypeStruct((L, Mmax, C), ACT_DTYPE),
        grid=(L,),
        in_specs=[pl.BlockSpec((None, Mmax, C), lambda l: (l, 0, 0)),
                  pl.BlockSpec((None, 1, C), lambda l: (l, 0, 0))],
        out_specs=pl.BlockSpec((None, Mmax, C), lambda l: (l, 0, 0)),
        compiler_params=_PARALLEL_1D,
    )(xs, ss)
    return [out[l, :f.shape[0], :].reshape(x.shape)
            for l, (f, x) in enumerate(zip(flats, inputs))]


# ----------------------------------------------------------------------------
# Small ops kept in XLA (per perf guidance: launch cost >> arithmetic)
# ----------------------------------------------------------------------------
def _upsample_prod_relu(top, lat):
    """F.relu(F.interpolate(top, lat spatial, bilinear, align_corners=False) * lat)."""
    B, H, W, C = lat.shape
    up = jax.image.resize(top.astype(jnp.float32), (B, H, W, C), method="bilinear")
    return jnp.maximum(up * lat, 0.0).astype(ACT_DTYPE)


def distill_kl(y_s, y_t, T=4.0):
    """DistillKL(T=4): kl_div(log_softmax(s/T), softmax(t/T), 'sum') * T^2 / B."""
    log_ps = jax.nn.log_softmax(y_s / T, axis=-1)
    log_pt = jax.nn.log_softmax(y_t / T, axis=-1)
    pt = jnp.exp(log_pt)
    return jnp.sum(pt * (log_pt - log_ps)) * (T * T) / y_s.shape[0]


def cosine_sim(a, b, eps=1e-8):
    na = jnp.maximum(jnp.sqrt(jnp.sum(a * a, axis=1)), eps)
    nb = jnp.maximum(jnp.sqrt(jnp.sum(b * b, axis=1)), eps)
    return jnp.sum(a * b, axis=1) / (na * nb)


def prior_box(feature_maps, img_size, min_sizes):
    # TODO(synk): real PriorBox config (min/max sizes per level, steps) not available;
    # single square prior per cell, same ordering as the original.
    priors = []
    for (fh, fw), ms in zip(feature_maps, min_sizes):
        ys, xs = jnp.meshgrid(jnp.arange(fh, dtype=jnp.float32) + 0.5,
                              jnp.arange(fw, dtype=jnp.float32) + 0.5,
                              indexing="ij")
        cx = (xs / fw).reshape(-1)
        cy = (ys / fh).reshape(-1)
        s = jnp.full_like(cx, float(ms) / float(img_size))
        priors.append(jnp.stack([cx, cy, s, s], axis=-1))
    return jnp.clip(jnp.concatenate(priors, axis=0), 0.0, 1.0)


# ----------------------------------------------------------------------------
# Synthetic (scaled-down) parameters; weights stored bf16, grouped stacks prebuilt
# ----------------------------------------------------------------------------
def _conv_param(key, kh, kw, cin, cout):
    k1, k2 = jax.random.split(key)
    fan_in = kh * kw * cin
    w = (jax.random.normal(k1, (kh, kw, cin, cout), jnp.float32)
         / jnp.sqrt(fan_in)).astype(MXU_DTYPE)
    b = 0.01 * jax.random.normal(k2, (cout,), jnp.float32)
    return (w, b)


def _stack_group(plist, Kp, Np):
    """Stack per-level conv params into [L,Kp,Np] bf16 weights + [L,1,Np] f32 biases
    (zero-padded so one grouped matmul serves heterogeneous channel counts)."""
    ws, bs = [], []
    for w, b in plist:
        kh, kw, cin, cout = w.shape
        w2 = w.reshape(kh * kw * cin, cout).astype(jnp.float32)
        K, N = w2.shape
        ws.append(jnp.pad(w2, ((0, Kp - K), (0, Np - N))))
        bs.append(jnp.pad(b.reshape(1, N).astype(jnp.float32), ((0, 0), (0, Np - N))))
    return jnp.stack(ws).astype(MXU_DTYPE), jnp.stack(bs)


def init_params(key):
    keys = iter(jax.random.split(key, 64))

    def cp(kh, kw, cin, cout):
        return _conv_param(next(keys), kh, kw, cin, cout)

    params = {}
    # Synthetic BRNet backbone (Retinex-style stub): reflectance head + 5-level pyramid.
    params["brnet"] = {
        "r_conv": cp(3, 3, 3, 3),
        "enc": cp(3, 3, 3, 8),
        "f1": cp(3, 3, 8, 16),
        "f2": cp(3, 3, 16, 16),
        "f3": cp(3, 3, 16, 16),
        "f4": cp(3, 3, 16, 32),
    }
    # L2Normef{1,2,3} scales (init values 10, 8, 5 as in the module).
    params["l2norm_ef"] = [
        jnp.full((16,), 10.0, jnp.float32),
        jnp.full((16,), 8.0, jnp.float32),
        jnp.full((16,), 5.0, jnp.float32),
    ]
    params["extras"] = [cp(1, 1, 32, 16), cp(3, 3, 16, 32),
                        cp(1, 1, 32, 16), cp(3, 3, 16, 32)]
    params["fpn_topdown"] = [cp(1, 1, 32, 32), cp(1, 1, 32, 32), cp(1, 1, 32, 32),
                             cp(1, 1, 32, 16), cp(1, 1, 16, 16), cp(1, 1, 16, 16)]
    fpn_lat = [cp(1, 1, 32, 32), cp(1, 1, 32, 32), cp(1, 1, 16, 16),
               cp(1, 1, 16, 16), cp(1, 1, 16, 16)]
    # TODO(synk): real FEM is a 3-branch dilated-conv module; simplified to one 3x3 conv.
    fpn_fem = [cp(3, 3, 16, 16), cp(3, 3, 16, 16), cp(3, 3, 16, 16),
               cp(3, 3, 32, 32), cp(3, 3, 32, 32), cp(3, 3, 32, 32)]
    loc_pal1 = [cp(3, 3, c, 4) for c in SRC_CH]
    conf_pal1 = [cp(3, 3, c, NUM_CLASSES) for c in SRC_CH]
    loc_pal2 = [cp(3, 3, c, 4) for c in SRC_CH]
    conf_pal2 = [cp(3, 3, c, NUM_CLASSES) for c in SRC_CH]

    # --- grouped (stacked, zero-padded) weights built ONCE at init ----------------
    params["lat_w"], params["lat_b"] = _stack_group(fpn_lat, Kp=32, Np=32)
    params["fem_w"], params["fem_b"] = _stack_group(fpn_fem, Kp=9 * 32, Np=32)
    fem_s = [jnp.pad(params["l2norm_ef"][i].reshape(1, 16), ((0, 0), (0, 16)))
             for i in range(3)]
    fem_s += [jnp.zeros((1, 32), jnp.float32)] * 3
    params["fem_s"] = jnp.stack(fem_s)

    head_params = []
    for lp, cpr in list(zip(loc_pal1, conf_pal1)) + list(zip(loc_pal2, conf_pal2)):
        wl, bl = lp
        wc, bc = cpr
        head_params.append((jnp.concatenate([wl, wc], axis=-1),
                            jnp.concatenate([bl, bc], axis=-1)))
    params["head_w"], params["head_b"] = _stack_group(head_params, Kp=9 * 32,
                                                      Np=4 + NUM_CLASSES)
    return params


# ----------------------------------------------------------------------------
# DSFD_BRNet forward (train phase)
# ----------------------------------------------------------------------------
def _dsfd_brnet_forward(params, x, x_light, I, I_light, cfg):
    """Train-phase forward of DSFD_BRNet.  Inputs are NCHW float32."""
    to_nhwc = lambda a: jnp.transpose(a, (0, 2, 3, 1))
    x = to_nhwc(x)
    x_light = to_nhwc(x_light)
    I = to_nhwc(I)
    I_light = to_nhwc(I_light)
    B, H, W, _ = x.shape
    p = params
    bp = p["brnet"]

    # --- BRNet pass A: light(only_disentangle) + dark(full) share weights -> one
    #     batch-concatenated conv call per layer (same per-sample results).
    xa = jnp.concatenate([x_light, x], axis=0)
    Ra = conv2d(xa, bp["r_conv"], pad=1, act="sigmoid", out_dtype=jnp.float32)
    enc_a = conv2d(xa, bp["enc"], stride=2, pad=1, out_dtype=jnp.float32)
    R_light, R_dark = Ra[:B], Ra[B:]
    enc_light, enc_dark = enc_a[:B], enc_a[B:]
    darklevel_light = jnp.mean(x_light, axis=(1, 2, 3))
    darklevel_dark = jnp.mean(x, axis=(1, 2, 3))

    f1 = conv2d(enc_dark, bp["f1"], stride=2, pad=1)
    f2 = conv2d(f1, bp["f2"], stride=2, pad=1)
    f3 = conv2d(f2, bp["f3"], stride=2, pad=1)
    f4 = conv2d(f3, bp["f4"], stride=1, pad=1)

    # --- BRNet pass B (only_disentangle on the swapped-illumination images):
    #     only R is consumed downstream, so just the reflectance conv, batch-concat.
    x_dark_2 = jax.lax.stop_gradient(I * R_light)
    x_light_2 = jax.lax.stop_gradient(I_light * R_dark)
    xb = jnp.concatenate([x_dark_2, x_light_2], axis=0)
    Rb = conv2d(xb, bp["r_conv"], pad=1, act="sigmoid", out_dtype=jnp.float32)
    R_dark_2, R_light_2 = Rb[:B], Rb[B:]

    # --- mutual-consistency (KL) loss on tiny [B,C] vectors (plain jnp) -----------
    xl_vec = jnp.mean(enc_light, axis=(1, 2))
    xd_vec = jnp.mean(enc_dark, axis=(1, 2))
    xl2_vec = jnp.mean(x_light_2, axis=(1, 2))
    xd2_vec = jnp.mean(x_dark_2, axis=(1, 2))
    loss_mutual = cfg["MC"] * (distill_kl(xl_vec, xd_vec) + distill_kl(xd_vec, xl_vec)
                               + distill_kl(xl2_vec, xd2_vec) + distill_kl(xd2_vec, xl2_vec))

    # --- pal1 sources: grouped L2Norm (ef1..ef3 scales) ---------------------------
    pal1_sources = group_l2norm([f1, f2, f3], p["l2norm_ef"]) + [f4]

    xx = conv2d(f4, p["extras"][0])
    of5 = conv2d(xx, p["extras"][1], stride=2, pad=1)
    pal1_sources.append(of5)
    xx = conv2d(of5, p["extras"][2])
    of6 = conv2d(xx, p["extras"][3], stride=2, pad=1)
    pal1_sources.append(of6)

    # --- FPN: all 5 lateral 1x1 convs in ONE grouped call -------------------------
    lat_in = [of5, pal1_sources[3], pal1_sources[2], pal1_sources[1], pal1_sources[0]]
    lat_raw = group_conv(lat_in, p["lat_w"], p["lat_b"],
                         kh=1, kw=1, stride=1, pad=0, out_dtype=jnp.float32)
    lat = []
    for l, (xi, n) in enumerate(zip(lat_in, LAT_OUT)):
        Bh, Hh, Wh = xi.shape[:3]
        lat.append(lat_raw[l, :Bh * Hh * Wh, :n].reshape(Bh, Hh, Wh, n))

    td = p["fpn_topdown"]
    conv7 = conv2d(of6, td[0])
    xx = conv2d(conv7, td[1])
    conv6 = _upsample_prod_relu(xx, lat[0])
    xx = conv2d(conv6, td[2])
    convfc7_2 = _upsample_prod_relu(xx, lat[1])
    xx = conv2d(convfc7_2, td[3])
    conv5 = _upsample_prod_relu(xx, lat[2])
    xx = conv2d(conv5, td[4])
    conv4 = _upsample_prod_relu(xx, lat[3])
    xx = conv2d(conv4, td[5])
    conv3 = _upsample_prod_relu(xx, lat[4])

    # --- FEM: 6 convs (+fused L2Norm on ef1..ef3) in ONE grouped call --------------
    fem_in = [conv3, conv4, conv5, convfc7_2, conv6, conv7]
    fem_raw = group_conv(fem_in, p["fem_w"], p["fem_b"], sstack=p["fem_s"], n_l2=3)
    pal2_sources = []
    for l, (xi, n) in enumerate(zip(fem_in, FEM_OUT)):
        Bh, Hh, Wh = xi.shape[:3]
        pal2_sources.append(fem_raw[l, :Bh * Hh * Wh, :n].reshape(Bh, Hh, Wh, n))

    # --- orthogonality (SORT) loss --------------------------------------------------
    enc_feat = jax.lax.stop_gradient(jnp.mean(enc_dark, axis=(1, 2)))
    dec_feat = jax.lax.stop_gradient(jnp.mean(conv3.astype(jnp.float32), axis=(1, 2)))
    md = min(enc_feat.shape[1], dec_feat.shape[1])
    enc_feat = enc_feat[:, :md]
    dec_feat = dec_feat[:, :md]
    loss_sort = (cfg["SORT"] * jnp.mean(jnp.abs(cosine_sim(enc_feat, dec_feat)))
                 + cfg["SORT_M"] * jnp.mean(1.0 - jnp.abs(cosine_sim(enc_feat, enc_feat)))
                 + cfg["SORT_M"] * jnp.mean(1.0 - jnp.abs(cosine_sim(dec_feat, dec_feat))))

    # --- detection heads: all 12 (loc+conf) conv pairs in ONE grouped call ----------
    head_in = pal1_sources + pal2_sources
    head_raw = group_conv(head_in, p["head_w"], p["head_b"], out_dtype=jnp.float32)
    locs, confs = [], []
    for l, xi in enumerate(head_in):
        Bh, Hh, Wh = xi.shape[:3]
        y = head_raw[l, :Bh * Hh * Wh, :]
        locs.append(y[:, :4].reshape(Bh, -1))                # == permute(0,2,3,1).view(B,-1)
        confs.append(y[:, 4:4 + NUM_CLASSES].reshape(Bh, -1))
    loc_pal1 = jnp.concatenate(locs[:6], axis=1)
    conf_pal1 = jnp.concatenate(confs[:6], axis=1)
    loc_pal2 = jnp.concatenate(locs[6:], axis=1)
    conf_pal2 = jnp.concatenate(confs[6:], axis=1)

    feature_maps = [(s.shape[1], s.shape[2]) for s in pal1_sources]
    pal1_min = [4, 8, 16, 32, 64, 128]
    pal2_min = [8, 16, 32, 64, 128, 256]
    priors_pal1 = jax.lax.stop_gradient(prior_box(feature_maps, H, pal1_min))
    priors_pal2 = jax.lax.stop_gradient(prior_box(feature_maps, H, pal2_min))

    output = (loc_pal1.reshape(B, -1, 4),
              conf_pal1.reshape(B, -1, NUM_CLASSES),
              priors_pal1,
              loc_pal2.reshape(B, -1, 4),
              conf_pal2.reshape(B, -1, NUM_CLASSES),
              priors_pal2)
    return (output,
            [R_dark, R_light, R_dark_2, R_light_2],
            [darklevel_dark, darklevel_light],
            loss_mutual,
            loss_sort)


dsfd_brnet_forward = jax.jit(_dsfd_brnet_forward)


# ----------------------------------------------------------------------------
if __name__ == "__main__":
    key = jax.random.PRNGKey(0)
    kp, kx, kxl, ki, kil = jax.random.split(key, 5)
    params = init_params(kp)

    B, C, H, W = 2, 3, 32, 32
    x = jax.random.uniform(kx, (B, C, H, W), jnp.float32)
    x_light = jax.random.uniform(kxl, (B, C, H, W), jnp.float32)
    I = jax.random.uniform(ki, (B, C, H, W), jnp.float32)
    I_light = jax.random.uniform(kil, (B, C, H, W), jnp.float32)

    cfg = {"MC": 0.1, "SORT": 0.01, "SORT_M": 0.01}

    out = dsfd_brnet_forward(params, x, x_light, I, I_light, cfg)
    jax.block_until_ready(jax.tree_util.tree_leaves(out))
    print("KERNEL_OK")
</pallas_src>

<mosaic_0001>
module attributes {stable_mosaic.version = 11 : i64} {
  func.func @_mm_bias_relu_kernel(%arg0: i32, %arg1: memref<512x27xf32, #tpu.memory_space<vmem>>, %arg2: memref<27x8xbf16, #tpu.memory_space<vmem>>, %arg3: memref<1x8xf32, #tpu.memory_space<vmem>>, %arg4: memref<512x8xf32, #tpu.memory_space<vmem>>) attributes {dimension_semantics = [#tpu.dimension_semantics<parallel>], iteration_bounds = array<i64: 2>, scalar_prefetch = 0 : i64, scratch_operands = 0 : i64, tpu.core_type = #tpu.core_type<tc>, window_params = [{transform_indices = @transform_0, window_bounds = array<i64: 512, 27>}, {pipeline_mode = #tpu.pipeline_mode<synchronous>, transform_indices = @transform_1, window_bounds = array<i64: 27, 8>}, {pipeline_mode = #tpu.pipeline_mode<synchronous>, transform_indices = @transform_2, window_bounds = array<i64: 1, 8>}, {transform_indices = @transform_3, window_bounds = array<i64: 512, 8>}]} {
    %c0 = arith.constant 0 : index
    %c0_0 = arith.constant 0 : index
    %0 = vector.load %arg1[%c0, %c0_0] : memref<512x27xf32, #tpu.memory_space<vmem>>, vector<512x27xf32>
    %1 = arith.truncf %0 : vector<512x27xf32> to vector<512x27xbf16>
    %c0_1 = arith.constant 0 : index
    %c0_2 = arith.constant 0 : index
    %2 = vector.load %arg2[%c0_1, %c0_2] : memref<27x8xbf16, #tpu.memory_space<vmem>>, vector<27x8xbf16>
    %cst = arith.constant dense<0.000000e+00> : vector<512x8xf32>
    %3 = tpu.matmul %1, %2, %cst {dimension_numbers = #tpu.dot_dimension_numbers<[1], [0], [0], [1], [0, 0, 1, 1], [], []>} : vector<512x27xbf16>, vector<27x8xbf16>, vector<512x8xf32> -> vector<512x8xf32>
    %c0_3 = arith.constant 0 : index
    %c0_4 = arith.constant 0 : index
    %4 = vector.load %arg3[%c0_3, %c0_4] : memref<1x8xf32, #tpu.memory_space<vmem>>, vector<1x8xf32>
    %5 = vector.broadcast %4 : vector<1x8xf32> to vector<512x8xf32>
    %6 = arith.addf %3, %5 : vector<512x8xf32>
    %cst_5 = arith.constant 0.000000e+00 : f32
    %7 = vector.broadcast %cst_5 : f32 to vector<512x8xf32>
    %8 = arith.maximumf %6, %7 : vector<512x8xf32>
    %c0_6 = arith.constant 0 : index
    %c0_7 = arith.constant 0 : index
    %9 = vector.load %arg4[%c0_6, %c0_7] : memref<512x8xf32, #tpu.memory_space<vmem>>, vector<512x8xf32>
    tpu.vector_store %arg4[%c0_6, %c0_7], %8 {strides = array<i32>} : memref<512x8xf32, #tpu.memory_space<vmem>>, vector<512x8xf32>,
    return
  }
  func.func @transform_0(%arg0: i32) -> (i32, i32) {
    %c0_i32 = arith.constant 0 : i32
    %c0_i32_0 = arith.constant 0 : i32
    return %arg0, %c0_i32 : i32, i32
  }
  func.func @transform_1(%arg0: i32) -> (i32, i32) {
    %c0_i32 = arith.constant 0 : i32
    %c0_i32_0 = arith.constant 0 : i32
    %c0_i32_1 = arith.constant 0 : i32
    return %c0_i32, %c0_i32_0 : i32, i32
  }
  func.func @transform_2(%arg0: i32) -> (i32, i32) {
    %c0_i32 = arith.constant 0 : i32
    %c0_i32_0 = arith.constant 0 : i32
    %c0_i32_1 = arith.constant 0 : i32
    return %c0_i32, %c0_i32_0 : i32, i32
  }
  func.func @transform_3(%arg0: i32) -> (i32, i32) {
    %c0_i32 = arith.constant 0 : i32
    %c0_i32_0 = arith.constant 0 : i32
    return %arg0, %c0_i32 : i32, i32
  }
}

module attributes {stable_mosaic.version = 11 : i64} {
  func.func @_mm_bias_relu_kernel(%arg0: i32, %arg1: memref<128x72xf32, #tpu.memory_space<vmem>>, %arg2: memref<72x16xbf16, #tpu.memory_space<vmem>>, %arg3: memref<1x16xf32, #tpu.memory_space<vmem>>, %arg4: memref<128x16xbf16, #tpu.memory_space<vmem>>) attributes {dimension_semantics = [#tpu.dimension_semantics<parallel>], iteration_bounds = array<i64: 1>, scalar_prefetch = 0 : i64, scratch_operands = 0 : i64, tpu.core_type = #tpu.core_type<tc>, window_params = [{transform_indices = @transform_0, window_bounds = array<i64: 128, 72>}, {pipeline_mode = #tpu.pipeline_mode<synchronous>, transform_indices = @transform_1, window_bounds = array<i64: 72, 16>}, {pipeline_mode = #tpu.pipeline_mode<synchronous>, transform_indices = @transform_2, window_bounds = array<i64: 1, 16>}, {transform_indices = @transform_3, window_bounds = array<i64: 128, 16>}]} {
    %c0 = arith.constant 0 : index
    %c0_0 = arith.constant 0 : index
    %0 = vector.load %arg1[%c0, %c0_0] : memref<128x72xf32, #tpu.memory_space<vmem>>, vector<128x72xf32>
    %1 = arith.truncf %0 : vector<128x72xf32> to vector<128x72xbf16>
    %c0_1 = arith.constant 0 : index
    %c0_2 = arith.constant 0 : index
    %2 = vector.load %arg2[%c0_1, %c0_2] : memref<72x16xbf16, #tpu.memory_space<vmem>>, vector<72x16xbf16>
    %cst = arith.constant dense<0.000000e+00> : vector<128x16xf32>
    %3 = tpu.matmul %1, %2, %cst {dimension_numbers = #tpu.dot_dimension_numbers<[1], [0], [0], [1], [0, 0, 1, 1], [], []>} : vector<128x72xbf16>, vector<72x16xbf16>, vector<128x16xf32> -> vector<128x16xf32>
    %c0_3 = arith.constant 0 : index
    %c0_4 = arith.constant 0 : index
    %4 = vector.load %arg3[%c0_3, %c0_4] : memref<1x16xf32, #tpu.memory_space<vmem>>, vector<1x16xf32>
    %5 = vector.broadcast %4 : vector<1x16xf32> to vector<128x16xf32>
    %6 = arith.addf %3, %5 : vector<128x16xf32>
    %cst_5 = arith.constant 0.000000e+00 : f32
    %7 = vector.broadcast %cst_5 : f32 to vector<128x16xf32>
    %8 = arith.maximumf %6, %7 : vector<128x16xf32>
    %9 = arith.truncf %8 : vector<128x16xf32> to vector<128x16xbf16>
    %c0_6 = arith.constant 0 : index
    %c0_7 = arith.constant 0 : index
    %10 = vector.load %arg4[%c0_6, %c0_7] : memref<128x16xbf16, #tpu.memory_space<vmem>>, vector<128x16xbf16>
    tpu.vector_store %arg4[%c0_6, %c0_7], %9 {strides = array<i32>} : memref<128x16xbf16, #tpu.memory_space<vmem>>, vector<128x16xbf16>,
    return
  }
  func.func @transform_0(%arg0: i32) -> (i32, i32) {
    %c0_i32 = arith.constant 0 : i32
    %c0_i32_0 = arith.constant 0 : i32
    return %arg0, %c0_i32 : i32, i32
  }
  func.func @transform_1(%arg0: i32) -> (i32, i32) {
    %c0_i32 = arith.constant 0 : i32
    %c0_i32_0 = arith.constant 0 : i32
    %c0_i32_1 = arith.constant 0 : i32
    return %c0_i32, %c0_i32_0 : i32, i32
  }
  func.func @transform_2(%arg0: i32) -> (i32, i32) {
    %c0_i32 = arith.constant 0 : i32
    %c0_i32_0 = arith.constant 0 : i32
    %c0_i32_1 = arith.constant 0 : i32
    return %c0_i32, %c0_i32_0 : i32, i32
  }
  func.func @transform_3(%arg0: i32) -> (i32, i32) {
    %c0_i32 = arith.constant 0 : i32
    %c0_i32_0 = arith.constant 0 : i32
    return %arg0, %c0_i32 : i32, i32
  }
}

module attributes {stable_mosaic.version = 11 : i64} {
  func.func @_mm_bias_relu_kernel(%arg0: i32, %arg1: memref<32x144xbf16, #tpu.memory_space<vmem>>, %arg2: memref<144x16xbf16, #tpu.memory_space<vmem>>, %arg3: memref<1x16xf32, #tpu.memory_space<vmem>>, %arg4: memref<32x16xbf16, #tpu.memory_space<vmem>>) attributes {dimension_semantics = [#tpu.dimension_semantics<parallel>], iteration_bounds = array<i64: 1>, scalar_prefetch = 0 : i64, scratch_operands = 0 : i64, tpu.core_type = #tpu.core_type<tc>, window_params = [{transform_indices = @transform_0, window_bounds = array<i64: 32, 144>}, {pipeline_mode = #tpu.pipeline_mode<synchronous>, transform_indices = @transform_1, window_bounds = array<i64: 144, 16>}, {pipeline_mode = #tpu.pipeline_mode<synchronous>, transform_indices = @transform_2, window_bounds = array<i64: 1, 16>}, {transform_indices = @transform_3, window_bounds = array<i64: 32, 16>}]} {
    %c0 = arith.constant 0 : index
    %c0_0 = arith.constant 0 : index
    %0 = vector.load %arg1[%c0, %c0_0] : memref<32x144xbf16, #tpu.memory_space<vmem>>, vector<32x144xbf16>
    %c0_1 = arith.constant 0 : index
    %c0_2 = arith.constant 0 : index
    %1 = vector.load %arg2[%c0_1, %c0_2] : memref<144x16xbf16, #tpu.memory_space<vmem>>, vector<144x16xbf16>
    %cst = arith.constant dense<0.000000e+00> : vector<32x16xf32>
    %2 = tpu.matmul %0, %1, %cst {dimension_numbers = #tpu.dot_dimension_numbers<[1], [0], [0], [1], [0, 0, 1, 1], [], []>} : vector<32x144xbf16>, vector<144x16xbf16>, vector<32x16xf32> -> vector<32x16xf32>
    %c0_3 = arith.constant 0 : index
    %c0_4 = arith.constant 0 : index
    %3 = vector.load %arg3[%c0_3, %c0_4] : memref<1x16xf32, #tpu.memory_space<vmem>>, vector<1x16xf32>
    %4 = vector.broadcast %3 : vector<1x16xf32> to vector<32x16xf32>
    %5 = arith.addf %2, %4 : vector<32x16xf32>
    %cst_5 = arith.constant 0.000000e+00 : f32
    %6 = vector.broadcast %cst_5 : f32 to vector<32x16xf32>
    %7 = arith.maximumf %5, %6 : vector<32x16xf32>
    %8 = arith.truncf %7 : vector<32x16xf32> to vector<32x16xbf16>
    %c0_6 = arith.constant 0 : index
    %c0_7 = arith.constant 0 : index
    %9 = vector.load %arg4[%c0_6, %c0_7] : memref<32x16xbf16, #tpu.memory_space<vmem>>, vector<32x16xbf16>
    tpu.vector_store %arg4[%c0_6, %c0_7], %8 {strides = array<i32>} : memref<32x16xbf16, #tpu.memory_space<vmem>>, vector<32x16xbf16>,
    return
  }
  func.func @transform_0(%arg0: i32) -> (i32, i32) {
    %c0_i32 = arith.constant 0 : i32
    %c0_i32_0 = arith.constant 0 : i32
    return %arg0, %c0_i32 : i32, i32
  }
  func.func @transform_1(%arg0: i32) -> (i32, i32) {
    %c0_i32 = arith.constant 0 : i32
    %c0_i32_0 = arith.constant 0 : i32
    %c0_i32_1 = arith.constant 0 : i32
    return %c0_i32, %c0_i32_0 : i32, i32
  }
  func.func @transform_2(%arg0: i32) -> (i32, i32) {
    %c0_i32 = arith.constant 0 : i32
    %c0_i32_0 = arith.constant 0 : i32
    %c0_i32_1 = arith.constant 0 : i32
    return %c0_i32, %c0_i32_0 : i32, i32
  }
  func.func @transform_3(%arg0: i32) -> (i32, i32) {
    %c0_i32 = arith.constant 0 : i32
    %c0_i32_0 = arith.constant 0 : i32
    return %arg0, %c0_i32 : i32, i32
  }
}

module attributes {stable_mosaic.version = 11 : i64} {
  func.func @_mm_bias_relu_kernel(%arg0: i32, %arg1: memref<8x144xbf16, #tpu.memory_space<vmem>>, %arg2: memref<144x16xbf16, #tpu.memory_space<vmem>>, %arg3: memref<1x16xf32, #tpu.memory_space<vmem>>, %arg4: memref<8x16xbf16, #tpu.memory_space<vmem>>) attributes {dimension_semantics = [#tpu.dimension_semantics<parallel>], iteration_bounds = array<i64: 1>, scalar_prefetch = 0 : i64, scratch_operands = 0 : i64, tpu.core_type = #tpu.core_type<tc>, window_params = [{transform_indices = @transform_0, window_bounds = array<i64: 8, 144>}, {pipeline_mode = #tpu.pipeline_mode<synchronous>, transform_indices = @transform_1, window_bounds = array<i64: 144, 16>}, {pipeline_mode = #tpu.pipeline_mode<synchronous>, transform_indices = @transform_2, window_bounds = array<i64: 1, 16>}, {transform_indices = @transform_3, window_bounds = array<i64: 8, 16>}]} {
    %c0 = arith.constant 0 : index
    %c0_0 = arith.constant 0 : index
    %0 = vector.load %arg1[%c0, %c0_0] : memref<8x144xbf16, #tpu.memory_space<vmem>>, vector<8x144xbf16>
    %c0_1 = arith.constant 0 : index
    %c0_2 = arith.constant 0 : index
    %1 = vector.load %arg2[%c0_1, %c0_2] : memref<144x16xbf16, #tpu.memory_space<vmem>>, vector<144x16xbf16>
    %cst = arith.constant dense<0.000000e+00> : vector<8x16xf32>
    %2 = tpu.matmul %0, %1, %cst {dimension_numbers = #tpu.dot_dimension_numbers<[1], [0], [0], [1], [0, 0, 1, 1], [], []>} : vector<8x144xbf16>, vector<144x16xbf16>, vector<8x16xf32> -> vector<8x16xf32>
    %c0_3 = arith.constant 0 : index
    %c0_4 = arith.constant 0 : index
    %3 = vector.load %arg3[%c0_3, %c0_4] : memref<1x16xf32, #tpu.memory_space<vmem>>, vector<1x16xf32>
    %4 = vector.broadcast %3 : vector<1x16xf32> to vector<8x16xf32>
    %5 = arith.addf %2, %4 : vector<8x16xf32>
    %cst_5 = arith.constant 0.000000e+00 : f32
    %6 = vector.broadcast %cst_5 : f32 to vector<8x16xf32>
    %7 = arith.maximumf %5, %6 : vector<8x16xf32>
    %8 = arith.truncf %7 : vector<8x16xf32> to vector<8x16xbf16>
    %c0_6 = arith.constant 0 : index
    %c0_7 = arith.constant 0 : index
    %9 = vector.load %arg4[%c0_6, %c0_7] : memref<8x16xbf16, #tpu.memory_space<vmem>>, vector<8x16xbf16>
    tpu.vector_store %arg4[%c0_6, %c0_7], %8 {strides = array<i32>} : memref<8x16xbf16, #tpu.memory_space<vmem>>, vector<8x16xbf16>,
    return
  }
  func.func @transform_0(%arg0: i32) -> (i32, i32) {
    %c0_i32 = arith.constant 0 : i32
    %c0_i32_0 = arith.constant 0 : i32
    return %arg0, %c0_i32 : i32, i32
  }
  func.func @transform_1(%arg0: i32) -> (i32, i32) {
    %c0_i32 = arith.constant 0 : i32
    %c0_i32_0 = arith.constant 0 : i32
    %c0_i32_1 = arith.constant 0 : i32
    return %c0_i32, %c0_i32_0 : i32, i32
  }
  func.func @transform_2(%arg0: i32) -> (i32, i32) {
    %c0_i32 = arith.constant 0 : i32
    %c0_i32_0 = arith.constant 0 : i32
    %c0_i32_1 = arith.constant 0 : i32
    return %c0_i32, %c0_i32_0 : i32, i32
  }
  func.func @transform_3(%arg0: i32) -> (i32, i32) {
    %c0_i32 = arith.constant 0 : i32
    %c0_i32_0 = arith.constant 0 : i32
    return %arg0, %c0_i32 : i32, i32
  }
}

module attributes {stable_mosaic.version = 11 : i64} {
  func.func @_mm_bias_relu_kernel(%arg0: i32, %arg1: memref<8x32xbf16, #tpu.memory_space<vmem>>, %arg2: memref<32x16xbf16, #tpu.memory_space<vmem>>, %arg3: memref<1x16xf32, #tpu.memory_space<vmem>>, %arg4: memref<8x16xbf16, #tpu.memory_space<vmem>>) attributes {dimension_semantics = [#tpu.dimension_semantics<parallel>], iteration_bounds = array<i64: 1>, scalar_prefetch = 0 : i64, scratch_operands = 0 : i64, tpu.core_type = #tpu.core_type<tc>, window_params = [{transform_indices = @transform_0, window_bounds = array<i64: 8, 32>}, {pipeline_mode = #tpu.pipeline_mode<synchronous>, transform_indices = @transform_1, window_bounds = array<i64: 32, 16>}, {pipeline_mode = #tpu.pipeline_mode<synchronous>, transform_indices = @transform_2, window_bounds = array<i64: 1, 16>}, {transform_indices = @transform_3, window_bounds = array<i64: 8, 16>}]} {
    %c0 = arith.constant 0 : index
    %c0_0 = arith.constant 0 : index
    %0 = vector.load %arg1[%c0, %c0_0] : memref<8x32xbf16, #tpu.memory_space<vmem>>, vector<8x32xbf16>
    %c0_1 = arith.constant 0 : index
    %c0_2 = arith.constant 0 : index
    %1 = vector.load %arg2[%c0_1, %c0_2] : memref<32x16xbf16, #tpu.memory_space<vmem>>, vector<32x16xbf16>
    %cst = arith.constant dense<0.000000e+00> : vector<8x16xf32>
    %2 = tpu.matmul %0, %1, %cst {dimension_numbers = #tpu.dot_dimension_numbers<[1], [0], [0], [1], [0, 0, 1, 1], [], []>} : vector<8x32xbf16>, vector<32x16xbf16>, vector<8x16xf32> -> vector<8x16xf32>
    %c0_3 = arith.constant 0 : index
    %c0_4 = arith.constant 0 : index
    %3 = vector.load %arg3[%c0_3, %c0_4] : memref<1x16xf32, #tpu.memory_space<vmem>>, vector<1x16xf32>
    %4 = vector.broadcast %3 : vector<1x16xf32> to vector<8x16xf32>
    %5 = arith.addf %2, %4 : vector<8x16xf32>
    %cst_5 = arith.constant 0.000000e+00 : f32
    %6 = vector.broadcast %cst_5 : f32 to vector<8x16xf32>
    %7 = arith.maximumf %5, %6 : vector<8x16xf32>
    %8 = arith.truncf %7 : vector<8x16xf32> to vector<8x16xbf16>
    %c0_6 = arith.constant 0 : index
    %c0_7 = arith.constant 0 : index
    %9 = vector.load %arg4[%c0_6, %c0_7] : memref<8x16xbf16, #tpu.memory_space<vmem>>, vector<8x16xbf16>
    tpu.vector_store %arg4[%c0_6, %c0_7], %8 {strides = array<i32>} : memref<8x16xbf16, #tpu.memory_space<vmem>>, vector<8x16xbf16>,
    return
  }
  func.func @transform_0(%arg0: i32) -> (i32, i32) {
    %c0_i32 = arith.constant 0 : i32
    %c0_i32_0 = arith.constant 0 : i32
    return %arg0, %c0_i32 : i32, i32
  }
  func.func @transform_1(%arg0: i32) -> (i32, i32) {
    %c0_i32 = arith.constant 0 : i32
    %c0_i32_0 = arith.constant 0 : i32
    %c0_i32_1 = arith.constant 0 : i32
    return %c0_i32, %c0_i32_0 : i32, i32
  }
  func.func @transform_2(%arg0: i32) -> (i32, i32) {
    %c0_i32 = arith.constant 0 : i32
    %c0_i32_0 = arith.constant 0 : i32
    %c0_i32_1 = arith.constant 0 : i32
    return %c0_i32, %c0_i32_0 : i32, i32
  }
  func.func @transform_3(%arg0: i32) -> (i32, i32) {
    %c0_i32 = arith.constant 0 : i32
    %c0_i32_0 = arith.constant 0 : i32
    return %arg0, %c0_i32 : i32, i32
  }
}

module attributes {stable_mosaic.version = 11 : i64} {
  func.func @_mm_bias_relu_kernel(%arg0: i32, %arg1: memref<8x144xbf16, #tpu.memory_space<vmem>>, %arg2: memref<144x32xbf16, #tpu.memory_space<vmem>>, %arg3: memref<1x32xf32, #tpu.memory_space<vmem>>, %arg4: memref<8x32xbf16, #tpu.memory_space<vmem>>) attributes {dimension_semantics = [#tpu.dimension_semantics<parallel>], iteration_bounds = array<i64: 1>, scalar_prefetch = 0 : i64, scratch_operands = 0 : i64, tpu.core_type = #tpu.core_type<tc>, window_params = [{transform_indices = @transform_0, window_bounds = array<i64: 8, 144>}, {pipeline_mode = #tpu.pipeline_mode<synchronous>, transform_indices = @transform_1, window_bounds = array<i64: 144, 32>}, {pipeline_mode = #tpu.pipeline_mode<synchronous>, transform_indices = @transform_2, window_bounds = array<i64: 1, 32>}, {transform_indices = @transform_3, window_bounds = array<i64: 8, 32>}]} {
    %c0 = arith.constant 0 : index
    %c0_0 = arith.constant 0 : index
    %0 = vector.load %arg1[%c0, %c0_0] : memref<8x144xbf16, #tpu.memory_space<vmem>>, vector<8x144xbf16>
    %c0_1 = arith.constant 0 : index
    %c0_2 = arith.constant 0 : index
    %1 = vector.load %arg2[%c0_1, %c0_2] : memref<144x32xbf16, #tpu.memory_space<vmem>>, vector<144x32xbf16>
    %cst = arith.constant dense<0.000000e+00> : vector<8x32xf32>
    %2 = tpu.matmul %0, %1, %cst {dimension_numbers = #tpu.dot_dimension_numbers<[1], [0], [0], [1], [0, 0, 1, 1], [], []>} : vector<8x144xbf16>, vector<144x32xbf16>, vector<8x32xf32> -> vector<8x32xf32>
    %c0_3 = arith.constant 0 : index
    %c0_4 = arith.constant 0 : index
    %3 = vector.load %arg3[%c0_3, %c0_4] : memref<1x32xf32, #tpu.memory_space<vmem>>, vector<1x32xf32>
    %4 = vector.broadcast %3 : vector<1x32xf32> to vector<8x32xf32>
    %5 = arith.addf %2, %4 : vector<8x32xf32>
    %cst_5 = arith.constant 0.000000e+00 : f32
    %6 = vector.broadcast %cst_5 : f32 to vector<8x32xf32>
    %7 = arith.maximumf %5, %6 : vector<8x32xf32>
    %8 = arith.truncf %7 : vector<8x32xf32> to vector<8x32xbf16>
    %c0_6 = arith.constant 0 : index
    %c0_7 = arith.constant 0 : index
    %9 = vector.load %arg4[%c0_6, %c0_7] : memref<8x32xbf16, #tpu.memory_space<vmem>>, vector<8x32xbf16>
    tpu.vector_store %arg4[%c0_6, %c0_7], %8 {strides = array<i32>} : memref<8x32xbf16, #tpu.memory_space<vmem>>, vector<8x32xbf16>,
    return
  }
  func.func @transform_0(%arg0: i32) -> (i32, i32) {
    %c0_i32 = arith.constant 0 : i32
    %c0_i32_0 = arith.constant 0 : i32
    return %arg0, %c0_i32 : i32, i32
  }
  func.func @transform_1(%arg0: i32) -> (i32, i32) {
    %c0_i32 = arith.constant 0 : i32
    %c0_i32_0 = arith.constant 0 : i32
    %c0_i32_1 = arith.constant 0 : i32
    return %c0_i32, %c0_i32_0 : i32, i32
  }
  func.func @transform_2(%arg0: i32) -> (i32, i32) {
    %c0_i32 = arith.constant 0 : i32
    %c0_i32_0 = arith.constant 0 : i32
    %c0_i32_1 = arith.constant 0 : i32
    return %c0_i32, %c0_i32_0 : i32, i32
  }
  func.func @transform_3(%arg0: i32) -> (i32, i32) {
    %c0_i32 = arith.constant 0 : i32
    %c0_i32_0 = arith.constant 0 : i32
    return %arg0, %c0_i32 : i32, i32
  }
}

module attributes {stable_mosaic.version = 11 : i64} {
  func.func @_mm_bias_relu_kernel(%arg0: i32, %arg1: memref<2x32xbf16, #tpu.memory_space<vmem>>, %arg2: memref<32x16xbf16, #tpu.memory_space<vmem>>, %arg3: memref<1x16xf32, #tpu.memory_space<vmem>>, %arg4: memref<2x16xbf16, #tpu.memory_space<vmem>>) attributes {dimension_semantics = [#tpu.dimension_semantics<parallel>], iteration_bounds = array<i64: 1>, scalar_prefetch = 0 : i64, scratch_operands = 0 : i64, tpu.core_type = #tpu.core_type<tc>, window_params = [{transform_indices = @transform_0, window_bounds = array<i64: 2, 32>}, {pipeline_mode = #tpu.pipeline_mode<synchronous>, transform_indices = @transform_1, window_bounds = array<i64: 32, 16>}, {pipeline_mode = #tpu.pipeline_mode<synchronous>, transform_indices = @transform_2, window_bounds = array<i64: 1, 16>}, {transform_indices = @transform_3, window_bounds = array<i64: 2, 16>}]} {
    %c0 = arith.constant 0 : index
    %c0_0 = arith.constant 0 : index
    %0 = vector.load %arg1[%c0, %c0_0] : memref<2x32xbf16, #tpu.memory_space<vmem>>, vector<2x32xbf16>
    %c0_1 = arith.constant 0 : index
    %c0_2 = arith.constant 0 : index
    %1 = vector.load %arg2[%c0_1, %c0_2] : memref<32x16xbf16, #tpu.memory_space<vmem>>, vector<32x16xbf16>
    %cst = arith.constant dense<0.000000e+00> : vector<2x16xf32>
    %2 = tpu.matmul %0, %1, %cst {dimension_numbers = #tpu.dot_dimension_numbers<[1], [0], [0], [1], [0, 0, 1, 1], [], []>} : vector<2x32xbf16>, vector<32x16xbf16>, vector<2x16xf32> -> vector<2x16xf32>
    %c0_3 = arith.constant 0 : index
    %c0_4 = arith.constant 0 : index
    %3 = vector.load %arg3[%c0_3, %c0_4] : memref<1x16xf32, #tpu.memory_space<vmem>>, vector<1x16xf32>
    %4 = vector.broadcast %3 : vector<1x16xf32> to vector<2x16xf32>
    %5 = arith.addf %2, %4 : vector<2x16xf32>
    %cst_5 = arith.constant 0.000000e+00 : f32
    %6 = vector.broadcast %cst_5 : f32 to vector<2x16xf32>
    %7 = arith.maximumf %5, %6 : vector<2x16xf32>
    %8 = arith.truncf %7 : vector<2x16xf32> to vector<2x16xbf16>
    %c0_6 = arith.constant 0 : index
    %c0_7 = arith.constant 0 : index
    %9 = vector.load %arg4[%c0_6, %c0_7] : memref<2x16xbf16, #tpu.memory_space<vmem>>, vector<2x16xbf16>
    tpu.vector_store %arg4[%c0_6, %c0_7], %8 {strides = array<i32>} : memref<2x16xbf16, #tpu.memory_space<vmem>>, vector<2x16xbf16>,
    return
  }
  func.func @transform_0(%arg0: i32) -> (i32, i32) {
    %c0_i32 = arith.constant 0 : i32
    %c0_i32_0 = arith.constant 0 : i32
    return %arg0, %c0_i32 : i32, i32
  }
  func.func @transform_1(%arg0: i32) -> (i32, i32) {
    %c0_i32 = arith.constant 0 : i32
    %c0_i32_0 = arith.constant 0 : i32
    %c0_i32_1 = arith.constant 0 : i32
    return %c0_i32, %c0_i32_0 : i32, i32
  }
  func.func @transform_2(%arg0: i32) -> (i32, i32) {
    %c0_i32 = arith.constant 0 : i32
    %c0_i32_0 = arith.constant 0 : i32
    %c0_i32_1 = arith.constant 0 : i32
    return %c0_i32, %c0_i32_0 : i32, i32
  }
  func.func @transform_3(%arg0: i32) -> (i32, i32) {
    %c0_i32 = arith.constant 0 : i32
    %c0_i32_0 = arith.constant 0 : i32
    return %arg0, %c0_i32 : i32, i32
  }
}

module attributes {stable_mosaic.version = 11 : i64} {
  func.func @_mm_bias_relu_kernel(%arg0: i32, %arg1: memref<2x144xbf16, #tpu.memory_space<vmem>>, %arg2: memref<144x32xbf16, #tpu.memory_space<vmem>>, %arg3: memref<1x32xf32, #tpu.memory_space<vmem>>, %arg4: memref<2x32xbf16, #tpu.memory_space<vmem>>) attributes {dimension_semantics = [#tpu.dimension_semantics<parallel>], iteration_bounds = array<i64: 1>, scalar_prefetch = 0 : i64, scratch_operands = 0 : i64, tpu.core_type = #tpu.core_type<tc>, window_params = [{transform_indices = @transform_0, window_bounds = array<i64: 2, 144>}, {pipeline_mode = #tpu.pipeline_mode<synchronous>, transform_indices = @transform_1, window_bounds = array<i64: 144, 32>}, {pipeline_mode = #tpu.pipeline_mode<synchronous>, transform_indices = @transform_2, window_bounds = array<i64: 1, 32>}, {transform_indices = @transform_3, window_bounds = array<i64: 2, 32>}]} {
    %c0 = arith.constant 0 : index
    %c0_0 = arith.constant 0 : index
    %0 = vector.load %arg1[%c0, %c0_0] : memref<2x144xbf16, #tpu.memory_space<vmem>>, vector<2x144xbf16>
    %c0_1 = arith.constant 0 : index
    %c0_2 = arith.constant 0 : index
    %1 = vector.load %arg2[%c0_1, %c0_2] : memref<144x32xbf16, #tpu.memory_space<vmem>>, vector<144x32xbf16>
    %cst = arith.constant dense<0.000000e+00> : vector<2x32xf32>
    %2 = tpu.matmul %0, %1, %cst {dimension_numbers = #tpu.dot_dimension_numbers<[1], [0], [0], [1], [0, 0, 1, 1], [], []>} : vector<2x144xbf16>, vector<144x32xbf16>, vector<2x32xf32> -> vector<2x32xf32>
    %c0_3 = arith.constant 0 : index
    %c0_4 = arith.constant 0 : index
    %3 = vector.load %arg3[%c0_3, %c0_4] : memref<1x32xf32, #tpu.memory_space<vmem>>, vector<1x32xf32>
    %4 = vector.broadcast %3 : vector<1x32xf32> to vector<2x32xf32>
    %5 = arith.addf %2, %4 : vector<2x32xf32>
    %cst_5 = arith.constant 0.000000e+00 : f32
    %6 = vector.broadcast %cst_5 : f32 to vector<2x32xf32>
    %7 = arith.maximumf %5, %6 : vector<2x32xf32>
    %8 = arith.truncf %7 : vector<2x32xf32> to vector<2x32xbf16>
    %c0_6 = arith.constant 0 : index
    %c0_7 = arith.constant 0 : index
    %9 = vector.load %arg4[%c0_6, %c0_7] : memref<2x32xbf16, #tpu.memory_space<vmem>>, vector<2x32xbf16>
    tpu.vector_store %arg4[%c0_6, %c0_7], %8 {strides = array<i32>} : memref<2x32xbf16, #tpu.memory_space<vmem>>, vector<2x32xbf16>,
    return
  }
  func.func @transform_0(%arg0: i32) -> (i32, i32) {
    %c0_i32 = arith.constant 0 : i32
    %c0_i32_0 = arith.constant 0 : i32
    return %arg0, %c0_i32 : i32, i32
  }
  func.func @transform_1(%arg0: i32) -> (i32, i32) {
    %c0_i32 = arith.constant 0 : i32
    %c0_i32_0 = arith.constant 0 : i32
    %c0_i32_1 = arith.constant 0 : i32
    return %c0_i32, %c0_i32_0 : i32, i32
  }
  func.func @transform_2(%arg0: i32) -> (i32, i32) {
    %c0_i32 = arith.constant 0 : i32
    %c0_i32_0 = arith.constant 0 : i32
    %c0_i32_1 = arith.constant 0 : i32
    return %c0_i32, %c0_i32_0 : i32, i32
  }
  func.func @transform_3(%arg0: i32) -> (i32, i32) {
    %c0_i32 = arith.constant 0 : i32
    %c0_i32_0 = arith.constant 0 : i32
    return %arg0, %c0_i32 : i32, i32
  }
}

module attributes {stable_mosaic.version = 11 : i64} {
  func.func @_mm_bias_relu_kernel(%arg0: i32, %arg1: memref<2x32xbf16, #tpu.memory_space<vmem>>, %arg2: memref<32x32xbf16, #tpu.memory_space<vmem>>, %arg3: memref<1x32xf32, #tpu.memory_space<vmem>>, %arg4: memref<2x32xbf16, #tpu.memory_space<vmem>>) attributes {dimension_semantics = [#tpu.dimension_semantics<parallel>], iteration_bounds = array<i64: 1>, scalar_prefetch = 0 : i64, scratch_operands = 0 : i64, tpu.core_type = #tpu.core_type<tc>, window_params = [{transform_indices = @transform_0, window_bounds = array<i64: 2, 32>}, {pipeline_mode = #tpu.pipeline_mode<synchronous>, transform_indices = @transform_1, window_bounds = array<i64: 32, 32>}, {pipeline_mode = #tpu.pipeline_mode<synchronous>, transform_indices = @transform_2, window_bounds = array<i64: 1, 32>}, {transform_indices = @transform_3, window_bounds = array<i64: 2, 32>}]} {
    %c0 = arith.constant 0 : index
    %c0_0 = arith.constant 0 : index
    %0 = vector.load %arg1[%c0, %c0_0] : memref<2x32xbf16, #tpu.memory_space<vmem>>, vector<2x32xbf16>
    %c0_1 = arith.constant 0 : index
    %c0_2 = arith.constant 0 : index
    %1 = vector.load %arg2[%c0_1, %c0_2] : memref<32x32xbf16, #tpu.memory_space<vmem>>, vector<32x32xbf16>
    %cst = arith.constant dense<0.000000e+00> : vector<2x32xf32>
    %2 = tpu.matmul %0, %1, %cst {dimension_numbers = #tpu.dot_dimension_numbers<[1], [0], [0], [1], [0, 0, 1, 1], [], []>} : vector<2x32xbf16>, vector<32x32xbf16>, vector<2x32xf32> -> vector<2x32xf32>
    %c0_3 = arith.constant 0 : index
    %c0_4 = arith.constant 0 : index
    %3 = vector.load %arg3[%c0_3, %c0_4] : memref<1x32xf32, #tpu.memory_space<vmem>>, vector<1x32xf32>
    %4 = vector.broadcast %3 : vector<1x32xf32> to vector<2x32xf32>
    %5 = arith.addf %2, %4 : vector<2x32xf32>
    %cst_5 = arith.constant 0.000000e+00 : f32
    %6 = vector.broadcast %cst_5 : f32 to vector<2x32xf32>
    %7 = arith.maximumf %5, %6 : vector<2x32xf32>
    %8 = arith.truncf %7 : vector<2x32xf32> to vector<2x32xbf16>
    %c0_6 = arith.constant 0 : index
    %c0_7 = arith.constant 0 : index
    %9 = vector.load %arg4[%c0_6, %c0_7] : memref<2x32xbf16, #tpu.memory_space<vmem>>, vector<2x32xbf16>
    tpu.vector_store %arg4[%c0_6, %c0_7], %8 {strides = array<i32>} : memref<2x32xbf16, #tpu.memory_space<vmem>>, vector<2x32xbf16>,
    return
  }
  func.func @transform_0(%arg0: i32) -> (i32, i32) {
    %c0_i32 = arith.constant 0 : i32
    %c0_i32_0 = arith.constant 0 : i32
    return %arg0, %c0_i32 : i32, i32
  }
  func.func @transform_1(%arg0: i32) -> (i32, i32) {
    %c0_i32 = arith.constant 0 : i32
    %c0_i32_0 = arith.constant 0 : i32
    %c0_i32_1 = arith.constant 0 : i32
    return %c0_i32, %c0_i32_0 : i32, i32
  }
  func.func @transform_2(%arg0: i32) -> (i32, i32) {
    %c0_i32 = arith.constant 0 : i32
    %c0_i32_0 = arith.constant 0 : i32
    %c0_i32_1 = arith.constant 0 : i32
    return %c0_i32, %c0_i32_0 : i32, i32
  }
  func.func @transform_3(%arg0: i32) -> (i32, i32) {
    %c0_i32 = arith.constant 0 : i32
    %c0_i32_0 = arith.constant 0 : i32
    return %arg0, %c0_i32 : i32, i32
  }
}

module attributes {stable_mosaic.version = 11 : i64} {
  func.func @_g_l2norm_kernel(%arg0: i32, %arg1: memref<1x128x16xbf16, #tpu.memory_space<vmem>>, %arg2: memref<1x1x16xf32, #tpu.memory_space<vmem>>, %arg3: memref<1x128x16xbf16, #tpu.memory_space<vmem>>) attributes {dimension_semantics = [#tpu.dimension_semantics<parallel>], iteration_bounds = array<i64: 3>, scalar_prefetch = 0 : i64, scratch_operands = 0 : i64, tpu.core_type = #tpu.core_type<tc>, window_params = [{transform_indices = @transform_0, window_bounds = array<i64: 1, 128, 16>}, {transform_indices = @transform_1, window_bounds = array<i64: 1, 1, 16>}, {transform_indices = @transform_2, window_bounds = array<i64: 1, 128, 16>}]} {
    %c0 = arith.constant 0 : index
    %c0_0 = arith.constant 0 : index
    %c0_1 = arith.constant 0 : index
    %0 = vector.load %arg1[%c0, %c0_0, %c0_1] : memref<1x128x16xbf16, #tpu.memory_space<vmem>>, vector<1x128x16xbf16>
    %1 = vector.shape_cast %0 : vector<1x128x16xbf16> to vector<128x16xbf16>
    %2 = arith.extf %1 : vector<128x16xbf16> to vector<128x16xf32>
    %3 = arith.mulf %2, %2 : vector<128x16xf32>
    %cst = arith.constant dense<0.000000e+00> : vector<128xf32>
    %4 = vector.multi_reduction <add>, %3, %cst [1] : vector<128x16xf32> to vector<128xf32>
    %5 = vector.shape_cast %4 : vector<128xf32> to vector<128x1xf32>
    %cst_2 = arith.constant 9.99999968E-21 : f32
    %6 = vector.broadcast %cst_2 : f32 to vector<128x1xf32>
    %7 = arith.addf %5, %6 : vector<128x1xf32>
    %8 = math.rsqrt %7 : vector<128x1xf32>
    %9 = vector.broadcast %8 : vector<128x1xf32> to vector<128x16xf32>
    %10 = arith.mulf %2, %9 : vector<128x16xf32>
    %c0_3 = arith.constant 0 : index
    %c0_4 = arith.constant 0 : index
    %c0_5 = arith.constant 0 : index
    %11 = vector.load %arg2[%c0_3, %c0_4, %c0_5] : memref<1x1x16xf32, #tpu.memory_space<vmem>>, vector<1x1x16xf32>
    %12 = vector.shape_cast %11 : vector<1x1x16xf32> to vector<1x16xf32>
    %13 = vector.broadcast %12 : vector<1x16xf32> to vector<128x16xf32>
    %14 = arith.mulf %10, %13 : vector<128x16xf32>
    %15 = arith.truncf %14 : vector<128x16xf32> to vector<128x16xbf16>
    %c0_6 = arith.constant 0 : index
    %c0_7 = arith.constant 0 : index
    %c0_8 = arith.constant 0 : index
    %16 = vector.load %arg3[%c0_6, %c0_7, %c0_8] : memref<1x128x16xbf16, #tpu.memory_space<vmem>>, vector<1x128x16xbf16>
    %17 = vector.shape_cast %16 : vector<1x128x16xbf16> to vector<128x16xbf16>
    %18 = vector.shape_cast %15 : vector<128x16xbf16> to vector<1x128x16xbf16>
    tpu.vector_store %arg3[%c0_6, %c0_7, %c0_8], %18 {strides = array<i32>} : memref<1x128x16xbf16, #tpu.memory_space<vmem>>, vector<1x128x16xbf16>,
    return
  }
  func.func @transform_0(%arg0: i32) -> (i32, i32, i32) {
    %c0_i32 = arith.constant 0 : i32
    %c0_i32_0 = arith.constant 0 : i32
    %c0_i32_1 = arith.constant 0 : i32
    return %arg0, %c0_i32, %c0_i32_0 : i32, i32, i32
  }
  func.func @transform_1(%arg0: i32) -> (i32, i32, i32) {
    %c0_i32 = arith.constant 0 : i32
    %c0_i32_0 = arith.constant 0 : i32
    %c0_i32_1 = arith.constant 0 : i32
    return %arg0, %c0_i32, %c0_i32_0 : i32, i32, i32
  }
  func.func @transform_2(%arg0: i32) -> (i32, i32, i32) {
    %c0_i32 = arith.constant 0 : i32
    %c0_i32_0 = arith.constant 0 : i32
    %c0_i32_1 = arith.constant 0 : i32
    return %arg0, %c0_i32, %c0_i32_0 : i32, i32, i32
  }
}

module attributes {stable_mosaic.version = 11 : i64} {
  func.func @_gmm_bias_kernel(%arg0: i32, %arg1: memref<1x128x32xbf16, #tpu.memory_space<vmem>>, %arg2: memref<1x32x32xbf16, #tpu.memory_space<vmem>>, %arg3: memref<1x1x32xf32, #tpu.memory_space<vmem>>, %arg4: memref<1x128x32xf32, #tpu.memory_space<vmem>>) attributes {dimension_semantics = [#tpu.dimension_semantics<parallel>], iteration_bounds = array<i64: 5>, scalar_prefetch = 0 : i64, scratch_operands = 0 : i64, tpu.core_type = #tpu.core_type<tc>, window_params = [{transform_indices = @transform_0, window_bounds = array<i64: 1, 128, 32>}, {transform_indices = @transform_1, window_bounds = array<i64: 1, 32, 32>}, {transform_indices = @transform_2, window_bounds = array<i64: 1, 1, 32>}, {transform_indices = @transform_3, window_bounds = array<i64: 1, 128, 32>}]} {
    %c0 = arith.constant 0 : index
    %c0_0 = arith.constant 0 : index
    %c0_1 = arith.constant 0 : index
    %0 = vector.load %arg1[%c0, %c0_0, %c0_1] : memref<1x128x32xbf16, #tpu.memory_space<vmem>>, vector<1x128x32xbf16>
    %1 = vector.shape_cast %0 : vector<1x128x32xbf16> to vector<128x32xbf16>
    %c0_2 = arith.constant 0 : index
    %c0_3 = arith.constant 0 : index
    %c0_4 = arith.constant 0 : index
    %2 = vector.load %arg2[%c0_2, %c0_3, %c0_4] : memref<1x32x32xbf16, #tpu.memory_space<vmem>>, vector<1x32x32xbf16>
    %3 = vector.shape_cast %2 : vector<1x32x32xbf16> to vector<32x32xbf16>
    %cst = arith.constant dense<0.000000e+00> : vector<128x32xf32>
    %4 = tpu.matmul %1, %3, %cst {dimension_numbers = #tpu.dot_dimension_numbers<[1], [0], [0], [1], [0, 0, 1, 1], [], []>} : vector<128x32xbf16>, vector<32x32xbf16>, vector<128x32xf32> -> vector<128x32xf32>
    %c0_5 = arith.constant 0 : index
    %c0_6 = arith.constant 0 : index
    %c0_7 = arith.constant 0 : index
    %5 = vector.load %arg3[%c0_5, %c0_6, %c0_7] : memref<1x1x32xf32, #tpu.memory_space<vmem>>, vector<1x1x32xf32>
    %6 = vector.shape_cast %5 : vector<1x1x32xf32> to vector<1x32xf32>
    %7 = vector.broadcast %6 : vector<1x32xf32> to vector<128x32xf32>
    %8 = arith.addf %4, %7 : vector<128x32xf32>
    %c0_8 = arith.constant 0 : index
    %c0_9 = arith.constant 0 : index
    %c0_10 = arith.constant 0 : index
    %9 = vector.load %arg4[%c0_8, %c0_9, %c0_10] : memref<1x128x32xf32, #tpu.memory_space<vmem>>, vector<1x128x32xf32>
    %10 = vector.shape_cast %9 : vector<1x128x32xf32> to vector<128x32xf32>
    %11 = vector.shape_cast %8 : vector<128x32xf32> to vector<1x128x32xf32>
    tpu.vector_store %arg4[%c0_8, %c0_9, %c0_10], %11 {strides = array<i32>} : memref<1x128x32xf32, #tpu.memory_space<vmem>>, vector<1x128x32xf32>,
    return
  }
  func.func @transform_0(%arg0: i32) -> (i32, i32, i32) {
    %c0_i32 = arith.constant 0 : i32
    %c0_i32_0 = arith.constant 0 : i32
    %c0_i32_1 = arith.constant 0 : i32
    return %arg0, %c0_i32, %c0_i32_0 : i32, i32, i32
  }
  func.func @transform_1(%arg0: i32) -> (i32, i32, i32) {
    %c0_i32 = arith.constant 0 : i32
    %c0_i32_0 = arith.constant 0 : i32
    %c0_i32_1 = arith.constant 0 : i32
    return %arg0, %c0_i32, %c0_i32_0 : i32, i32, i32
  }
  func.func @transform_2(%arg0: i32) -> (i32, i32, i32) {
    %c0_i32 = arith.constant 0 : i32
    %c0_i32_0 = arith.constant 0 : i32
    %c0_i32_1 = arith.constant 0 : i32
    return %arg0, %c0_i32, %c0_i32_0 : i32, i32, i32
  }
  func.func @transform_3(%arg0: i32) -> (i32, i32, i32) {
    %c0_i32 = arith.constant 0 : i32
    %c0_i32_0 = arith.constant 0 : i32
    %c0_i32_1 = arith.constant 0 : i32
    return %arg0, %c0_i32, %c0_i32_0 : i32, i32, i32
  }
}

module attributes {stable_mosaic.version = 11 : i64} {
  func.func @_mm_bias_relu_kernel(%arg0: i32, %arg1: memref<8x16xbf16, #tpu.memory_space<vmem>>, %arg2: memref<16x16xbf16, #tpu.memory_space<vmem>>, %arg3: memref<1x16xf32, #tpu.memory_space<vmem>>, %arg4: memref<8x16xbf16, #tpu.memory_space<vmem>>) attributes {dimension_semantics = [#tpu.dimension_semantics<parallel>], iteration_bounds = array<i64: 1>, scalar_prefetch = 0 : i64, scratch_operands = 0 : i64, tpu.core_type = #tpu.core_type<tc>, window_params = [{transform_indices = @transform_0, window_bounds = array<i64: 8, 16>}, {pipeline_mode = #tpu.pipeline_mode<synchronous>, transform_indices = @transform_1, window_bounds = array<i64: 16, 16>}, {pipeline_mode = #tpu.pipeline_mode<synchronous>, transform_indices = @transform_2, window_bounds = array<i64: 1, 16>}, {transform_indices = @transform_3, window_bounds = array<i64: 8, 16>}]} {
    %c0 = arith.constant 0 : index
    %c0_0 = arith.constant 0 : index
    %0 = vector.load %arg1[%c0, %c0_0] : memref<8x16xbf16, #tpu.memory_space<vmem>>, vector<8x16xbf16>
    %c0_1 = arith.constant 0 : index
    %c0_2 = arith.constant 0 : index
    %1 = vector.load %arg2[%c0_1, %c0_2] : memref<16x16xbf16, #tpu.memory_space<vmem>>, vector<16x16xbf16>
    %cst = arith.constant dense<0.000000e+00> : vector<8x16xf32>
    %2 = tpu.matmul %0, %1, %cst {dimension_numbers = #tpu.dot_dimension_numbers<[1], [0], [0], [1], [0, 0, 1, 1], [], []>} : vector<8x16xbf16>, vector<16x16xbf16>, vector<8x16xf32> -> vector<8x16xf32>
    %c0_3 = arith.constant 0 : index
    %c0_4 = arith.constant 0 : index
    %3 = vector.load %arg3[%c0_3, %c0_4] : memref<1x16xf32, #tpu.memory_space<vmem>>, vector<1x16xf32>
    %4 = vector.broadcast %3 : vector<1x16xf32> to vector<8x16xf32>
    %5 = arith.addf %2, %4 : vector<8x16xf32>
    %cst_5 = arith.constant 0.000000e+00 : f32
    %6 = vector.broadcast %cst_5 : f32 to vector<8x16xf32>
    %7 = arith.maximumf %5, %6 : vector<8x16xf32>
    %8 = arith.truncf %7 : vector<8x16xf32> to vector<8x16xbf16>
    %c0_6 = arith.constant 0 : index
    %c0_7 = arith.constant 0 : index
    %9 = vector.load %arg4[%c0_6, %c0_7] : memref<8x16xbf16, #tpu.memory_space<vmem>>, vector<8x16xbf16>
    tpu.vector_store %arg4[%c0_6, %c0_7], %8 {strides = array<i32>} : memref<8x16xbf16, #tpu.memory_space<vmem>>, vector<8x16xbf16>,
    return
  }
  func.func @transform_0(%arg0: i32) -> (i32, i32) {
    %c0_i32 = arith.constant 0 : i32
    %c0_i32_0 = arith.constant 0 : i32
    return %arg0, %c0_i32 : i32, i32
  }
  func.func @transform_1(%arg0: i32) -> (i32, i32) {
    %c0_i32 = arith.constant 0 : i32
    %c0_i32_0 = arith.constant 0 : i32
    %c0_i32_1 = arith.constant 0 : i32
    return %c0_i32, %c0_i32_0 : i32, i32
  }
  func.func @transform_2(%arg0: i32) -> (i32, i32) {
    %c0_i32 = arith.constant 0 : i32
    %c0_i32_0 = arith.constant 0 : i32
    %c0_i32_1 = arith.constant 0 : i32
    return %c0_i32, %c0_i32_0 : i32, i32
  }
  func.func @transform_3(%arg0: i32) -> (i32, i32) {
    %c0_i32 = arith.constant 0 : i32
    %c0_i32_0 = arith.constant 0 : i32
    return %arg0, %c0_i32 : i32, i32
  }
}

module attributes {stable_mosaic.version = 11 : i64} {
  func.func @_mm_bias_relu_kernel(%arg0: i32, %arg1: memref<32x16xbf16, #tpu.memory_space<vmem>>, %arg2: memref<16x16xbf16, #tpu.memory_space<vmem>>, %arg3: memref<1x16xf32, #tpu.memory_space<vmem>>, %arg4: memref<32x16xbf16, #tpu.memory_space<vmem>>) attributes {dimension_semantics = [#tpu.dimension_semantics<parallel>], iteration_bounds = array<i64: 1>, scalar_prefetch = 0 : i64, scratch_operands = 0 : i64, tpu.core_type = #tpu.core_type<tc>, window_params = [{transform_indices = @transform_0, window_bounds = array<i64: 32, 16>}, {pipeline_mode = #tpu.pipeline_mode<synchronous>, transform_indices = @transform_1, window_bounds = array<i64: 16, 16>}, {pipeline_mode = #tpu.pipeline_mode<synchronous>, transform_indices = @transform_2, window_bounds = array<i64: 1, 16>}, {transform_indices = @transform_3, window_bounds = array<i64: 32, 16>}]} {
    %c0 = arith.constant 0 : index
    %c0_0 = arith.constant 0 : index
    %0 = vector.load %arg1[%c0, %c0_0] : memref<32x16xbf16, #tpu.memory_space<vmem>>, vector<32x16xbf16>
    %c0_1 = arith.constant 0 : index
    %c0_2 = arith.constant 0 : index
    %1 = vector.load %arg2[%c0_1, %c0_2] : memref<16x16xbf16, #tpu.memory_space<vmem>>, vector<16x16xbf16>
    %cst = arith.constant dense<0.000000e+00> : vector<32x16xf32>
    %2 = tpu.matmul %0, %1, %cst {dimension_numbers = #tpu.dot_dimension_numbers<[1], [0], [0], [1], [0, 0, 1, 1], [], []>} : vector<32x16xbf16>, vector<16x16xbf16>, vector<32x16xf32> -> vector<32x16xf32>
    %c0_3 = arith.constant 0 : index
    %c0_4 = arith.constant 0 : index
    %3 = vector.load %arg3[%c0_3, %c0_4] : memref<1x16xf32, #tpu.memory_space<vmem>>, vector<1x16xf32>
    %4 = vector.broadcast %3 : vector<1x16xf32> to vector<32x16xf32>
    %5 = arith.addf %2, %4 : vector<32x16xf32>
    %cst_5 = arith.constant 0.000000e+00 : f32
    %6 = vector.broadcast %cst_5 : f32 to vector<32x16xf32>
    %7 = arith.maximumf %5, %6 : vector<32x16xf32>
    %8 = arith.truncf %7 : vector<32x16xf32> to vector<32x16xbf16>
    %c0_6 = arith.constant 0 : index
    %c0_7 = arith.constant 0 : index
    %9 = vector.load %arg4[%c0_6, %c0_7] : memref<32x16xbf16, #tpu.memory_space<vmem>>, vector<32x16xbf16>
    tpu.vector_store %arg4[%c0_6, %c0_7], %8 {strides = array<i32>} : memref<32x16xbf16, #tpu.memory_space<vmem>>, vector<32x16xbf16>,
    return
  }
  func.func @transform_0(%arg0: i32) -> (i32, i32) {
    %c0_i32 = arith.constant 0 : i32
    %c0_i32_0 = arith.constant 0 : i32
    return %arg0, %c0_i32 : i32, i32
  }
  func.func @transform_1(%arg0: i32) -> (i32, i32) {
    %c0_i32 = arith.constant 0 : i32
    %c0_i32_0 = arith.constant 0 : i32
    %c0_i32_1 = arith.constant 0 : i32
    return %c0_i32, %c0_i32_0 : i32, i32
  }
  func.func @transform_2(%arg0: i32) -> (i32, i32) {
    %c0_i32 = arith.constant 0 : i32
    %c0_i32_0 = arith.constant 0 : i32
    %c0_i32_1 = arith.constant 0 : i32
    return %c0_i32, %c0_i32_0 : i32, i32
  }
  func.func @transform_3(%arg0: i32) -> (i32, i32) {
    %c0_i32 = arith.constant 0 : i32
    %c0_i32_0 = arith.constant 0 : i32
    return %arg0, %c0_i32 : i32, i32
  }
}

module attributes {stable_mosaic.version = 11 : i64} {
  func.func @_gmm_bias_l2norm_kernel(%arg0: i32, %arg1: memref<1x128x288xbf16, #tpu.memory_space<vmem>>, %arg2: memref<1x288x32xbf16, #tpu.memory_space<vmem>>, %arg3: memref<1x1x32xf32, #tpu.memory_space<vmem>>, %arg4: memref<1x1x32xf32, #tpu.memory_space<vmem>>, %arg5: memref<1x128x32xbf16, #tpu.memory_space<vmem>>) attributes {dimension_semantics = [#tpu.dimension_semantics<parallel>], iteration_bounds = array<i64: 6>, scalar_prefetch = 0 : i64, scratch_operands = 0 : i64, tpu.core_type = #tpu.core_type<tc>, window_params = [{transform_indices = @transform_0, window_bounds = array<i64: 1, 128, 288>}, {transform_indices = @transform_1, window_bounds = array<i64: 1, 288, 32>}, {transform_indices = @transform_2, window_bounds = array<i64: 1, 1, 32>}, {transform_indices = @transform_3, window_bounds = array<i64: 1, 1, 32>}, {transform_indices = @transform_4, window_bounds = array<i64: 1, 128, 32>}]} {
    %c0 = arith.constant 0 : index
    %c0_0 = arith.constant 0 : index
    %c0_1 = arith.constant 0 : index
    %0 = vector.load %arg1[%c0, %c0_0, %c0_1] : memref<1x128x288xbf16, #tpu.memory_space<vmem>>, vector<1x128x288xbf16>
    %1 = vector.shape_cast %0 : vector<1x128x288xbf16> to vector<128x288xbf16>
    %c0_2 = arith.constant 0 : index
    %c0_3 = arith.constant 0 : index
    %c0_4 = arith.constant 0 : index
    %2 = vector.load %arg2[%c0_2, %c0_3, %c0_4] : memref<1x288x32xbf16, #tpu.memory_space<vmem>>, vector<1x288x32xbf16>
    %3 = vector.shape_cast %2 : vector<1x288x32xbf16> to vector<288x32xbf16>
    %cst = arith.constant dense<0.000000e+00> : vector<128x32xf32>
    %4 = tpu.matmul %1, %3, %cst {dimension_numbers = #tpu.dot_dimension_numbers<[1], [0], [0], [1], [0, 0, 1, 1], [], []>} : vector<128x288xbf16>, vector<288x32xbf16>, vector<128x32xf32> -> vector<128x32xf32>
    %c0_5 = arith.constant 0 : index
    %c0_6 = arith.constant 0 : index
    %c0_7 = arith.constant 0 : index
    %5 = vector.load %arg3[%c0_5, %c0_6, %c0_7] : memref<1x1x32xf32, #tpu.memory_space<vmem>>, vector<1x1x32xf32>
    %6 = vector.shape_cast %5 : vector<1x1x32xf32> to vector<1x32xf32>
    %7 = vector.broadcast %6 : vector<1x32xf32> to vector<128x32xf32>
    %8 = arith.addf %4, %7 : vector<128x32xf32>
    %9 = arith.mulf %8, %8 : vector<128x32xf32>
    %cst_8 = arith.constant dense<0.000000e+00> : vector<128xf32>
    %10 = vector.multi_reduction <add>, %9, %cst_8 [1] : vector<128x32xf32> to vector<128xf32>
    %11 = vector.shape_cast %10 : vector<128xf32> to vector<128x1xf32>
    %cst_9 = arith.constant 9.99999968E-21 : f32
    %12 = vector.broadcast %cst_9 : f32 to vector<128x1xf32>
    %13 = arith.addf %11, %12 : vector<128x1xf32>
    %14 = math.rsqrt %13 : vector<128x1xf32>
    %15 = vector.broadcast %14 : vector<128x1xf32> to vector<128x32xf32>
    %16 = arith.mulf %8, %15 : vector<128x32xf32>
    %c0_10 = arith.constant 0 : index
    %c0_11 = arith.constant 0 : index
    %c0_12 = arith.constant 0 : index
    %17 = vector.load %arg4[%c0_10, %c0_11, %c0_12] : memref<1x1x32xf32, #tpu.memory_space<vmem>>, vector<1x1x32xf32>
    %18 = vector.shape_cast %17 : vector<1x1x32xf32> to vector<1x32xf32>
    %19 = vector.broadcast %18 : vector<1x32xf32> to vector<128x32xf32>
    %20 = arith.mulf %16, %19 : vector<128x32xf32>
    %c3_i32 = arith.constant 3 : i32
    %21 = arith.cmpi slt, %arg0, %c3_i32 : i32
    %22 = arith.extui %21 : i1 to i32
    %23 = arith.sitofp %22 : i32 to f32
    %24 = vector.broadcast %23 : f32 to vector<128x32xf32>
    %25 = arith.mulf %24, %20 : vector<128x32xf32>
    %cst_13 = arith.constant 1.000000e+00 : f32
    %26 = arith.subf %cst_13, %23 : f32
    %27 = vector.broadcast %26 : f32 to vector<128x32xf32>
    %28 = arith.mulf %27, %8 : vector<128x32xf32>
    %29 = arith.addf %25, %28 : vector<128x32xf32>
    %30 = arith.truncf %29 : vector<128x32xf32> to vector<128x32xbf16>
    %c0_14 = arith.constant 0 : index
    %c0_15 = arith.constant 0 : index
    %c0_16 = arith.constant 0 : index
    %31 = vector.load %arg5[%c0_14, %c0_15, %c0_16] : memref<1x128x32xbf16, #tpu.memory_space<vmem>>, vector<1x128x32xbf16>
    %32 = vector.shape_cast %31 : vector<1x128x32xbf16> to vector<128x32xbf16>
    %33 = vector.shape_cast %30 : vector<128x32xbf16> to vector<1x128x32xbf16>
    tpu.vector_store %arg5[%c0_14, %c0_15, %c0_16], %33 {strides = array<i32>} : memref<1x128x32xbf16, #tpu.memory_space<vmem>>, vector<1x128x32xbf16>,
    return
  }
  func.func @transform_0(%arg0: i32) -> (i32, i32, i32) {
    %c0_i32 = arith.constant 0 : i32
    %c0_i32_0 = arith.constant 0 : i32
    %c0_i32_1 = arith.constant 0 : i32
    return %arg0, %c0_i32, %c0_i32_0 : i32, i32, i32
  }
  func.func @transform_1(%arg0: i32) -> (i32, i32, i32) {
    %c0_i32 = arith.constant 0 : i32
    %c0_i32_0 = arith.constant 0 : i32
    %c0_i32_1 = arith.constant 0 : i32
    return %arg0, %c0_i32, %c0_i32_0 : i32, i32, i32
  }
  func.func @transform_2(%arg0: i32) -> (i32, i32, i32) {
    %c0_i32 = arith.constant 0 : i32
    %c0_i32_0 = arith.constant 0 : i32
    %c0_i32_1 = arith.constant 0 : i32
    return %arg0, %c0_i32, %c0_i32_0 : i32, i32, i32
  }
  func.func @transform_3(%arg0: i32) -> (i32, i32, i32) {
    %c0_i32 = arith.constant 0 : i32
    %c0_i32_0 = arith.constant 0 : i32
    %c0_i32_1 = arith.constant 0 : i32
    return %arg0, %c0_i32, %c0_i32_0 : i32, i32, i32
  }
  func.func @transform_4(%arg0: i32) -> (i32, i32, i32) {
    %c0_i32 = arith.constant 0 : i32
    %c0_i32_0 = arith.constant 0 : i32
    %c0_i32_1 = arith.constant 0 : i32
    return %arg0, %c0_i32, %c0_i32_0 : i32, i32, i32
  }
}

module attributes {stable_mosaic.version = 11 : i64} {
  func.func @_gmm_bias_kernel(%arg0: i32, %arg1: memref<1x128x288xbf16, #tpu.memory_space<vmem>>, %arg2: memref<1x288x6xbf16, #tpu.memory_space<vmem>>, %arg3: memref<1x1x6xf32, #tpu.memory_space<vmem>>, %arg4: memref<1x128x6xf32, #tpu.memory_space<vmem>>) attributes {dimension_semantics = [#tpu.dimension_semantics<parallel>], iteration_bounds = array<i64: 12>, scalar_prefetch = 0 : i64, scratch_operands = 0 : i64, tpu.core_type = #tpu.core_type<tc>, window_params = [{transform_indices = @transform_0, window_bounds = array<i64: 1, 128, 288>}, {transform_indices = @transform_1, window_bounds = array<i64: 1, 288, 6>}, {transform_indices = @transform_2, window_bounds = array<i64: 1, 1, 6>}, {transform_indices = @transform_3, window_bounds = array<i64: 1, 128, 6>}]} {
    %c0 = arith.constant 0 : index
    %c0_0 = arith.constant 0 : index
    %c0_1 = arith.constant 0 : index
    %0 = vector.load %arg1[%c0, %c0_0, %c0_1] : memref<1x128x288xbf16, #tpu.memory_space<vmem>>, vector<1x128x288xbf16>
    %1 = vector.shape_cast %0 : vector<1x128x288xbf16> to vector<128x288xbf16>
    %c0_2 = arith.constant 0 : index
    %c0_3 = arith.constant 0 : index
    %c0_4 = arith.constant 0 : index
    %2 = vector.load %arg2[%c0_2, %c0_3, %c0_4] : memref<1x288x6xbf16, #tpu.memory_space<vmem>>, vector<1x288x6xbf16>
    %3 = vector.shape_cast %2 : vector<1x288x6xbf16> to vector<288x6xbf16>
    %cst = arith.constant dense<0.000000e+00> : vector<128x6xf32>
    %4 = tpu.matmul %1, %3, %cst {dimension_numbers = #tpu.dot_dimension_numbers<[1], [0], [0], [1], [0, 0, 1, 1], [], []>} : vector<128x288xbf16>, vector<288x6xbf16>, vector<128x6xf32> -> vector<128x6xf32>
    %c0_5 = arith.constant 0 : index
    %c0_6 = arith.constant 0 : index
    %c0_7 = arith.constant 0 : index
    %5 = vector.load %arg3[%c0_5, %c0_6, %c0_7] : memref<1x1x6xf32, #tpu.memory_space<vmem>>, vector<1x1x6xf32>
    %6 = vector.shape_cast %5 : vector<1x1x6xf32> to vector<1x6xf32>
    %7 = vector.broadcast %6 : vector<1x6xf32> to vector<128x6xf32>
    %8 = arith.addf %4, %7 : vector<128x6xf32>
    %c0_8 = arith.constant 0 : index
    %c0_9 = arith.constant 0 : index
    %c0_10 = arith.constant 0 : index
    %9 = vector.load %arg4[%c0_8, %c0_9, %c0_10] : memref<1x128x6xf32, #tpu.memory_space<vmem>>, vector<1x128x6xf32>
    %10 = vector.shape_cast %9 : vector<1x128x6xf32> to vector<128x6xf32>
    %11 = vector.shape_cast %8 : vector<128x6xf32> to vector<1x128x6xf32>
    tpu.vector_store %arg4[%c0_8, %c0_9, %c0_10], %11 {strides = array<i32>} : memref<1x128x6xf32, #tpu.memory_space<vmem>>, vector<1x128x6xf32>,
    return
  }
  func.func @transform_0(%arg0: i32) -> (i32, i32, i32) {
    %c0_i32 = arith.constant 0 : i32
    %c0_i32_0 = arith.constant 0 : i32
    %c0_i32_1 = arith.constant 0 : i32
    return %arg0, %c0_i32, %c0_i32_0 : i32, i32, i32
  }
  func.func @transform_1(%arg0: i32) -> (i32, i32, i32) {
    %c0_i32 = arith.constant 0 : i32
    %c0_i32_0 = arith.constant 0 : i32
    %c0_i32_1 = arith.constant 0 : i32
    return %arg0, %c0_i32, %c0_i32_0 : i32, i32, i32
  }
  func.func @transform_2(%arg0: i32) -> (i32, i32, i32) {
    %c0_i32 = arith.constant 0 : i32
    %c0_i32_0 = arith.constant 0 : i32
    %c0_i32_1 = arith.constant 0 : i32
    return %arg0, %c0_i32, %c0_i32_0 : i32, i32, i32
  }
  func.func @transform_3(%arg0: i32) -> (i32, i32, i32) {
    %c0_i32 = arith.constant 0 : i32
    %c0_i32_0 = arith.constant 0 : i32
    %c0_i32_1 = arith.constant 0 : i32
    return %arg0, %c0_i32, %c0_i32_0 : i32, i32, i32
  }
}

module attributes {stable_mosaic.version = 11 : i64} {
  func.func @_mm_bias_sigmoid_kernel(%arg0: i32, %arg1: memref<1024x27xf32, #tpu.memory_space<vmem>>, %arg2: memref<27x3xbf16, #tpu.memory_space<vmem>>, %arg3: memref<1x3xf32, #tpu.memory_space<vmem>>, %arg4: memref<1024x3xf32, #tpu.memory_space<vmem>>) attributes {dimension_semantics = [#tpu.dimension_semantics<parallel>], iteration_bounds = array<i64: 4>, scalar_prefetch = 0 : i64, scratch_operands = 0 : i64, tpu.core_type = #tpu.core_type<tc>, window_params = [{transform_indices = @transform_0, window_bounds = array<i64: 1024, 27>}, {pipeline_mode = #tpu.pipeline_mode<synchronous>, transform_indices = @transform_1, window_bounds = array<i64: 27, 3>}, {pipeline_mode = #tpu.pipeline_mode<synchronous>, transform_indices = @transform_2, window_bounds = array<i64: 1, 3>}, {transform_indices = @transform_3, window_bounds = array<i64: 1024, 3>}]} {
    %c0 = arith.constant 0 : index
    %c0_0 = arith.constant 0 : index
    %0 = vector.load %arg1[%c0, %c0_0] : memref<1024x27xf32, #tpu.memory_space<vmem>>, vector<1024x27xf32>
    %1 = arith.truncf %0 : vector<1024x27xf32> to vector<1024x27xbf16>
    %c0_1 = arith.constant 0 : index
    %c0_2 = arith.constant 0 : index
    %2 = vector.load %arg2[%c0_1, %c0_2] : memref<27x3xbf16, #tpu.memory_space<vmem>>, vector<27x3xbf16>
    %cst = arith.constant dense<0.000000e+00> : vector<1024x3xf32>
    %3 = tpu.matmul %1, %2, %cst {dimension_numbers = #tpu.dot_dimension_numbers<[1], [0], [0], [1], [0, 0, 1, 1], [], []>} : vector<1024x27xbf16>, vector<27x3xbf16>, vector<1024x3xf32> -> vector<1024x3xf32>
    %c0_3 = arith.constant 0 : index
    %c0_4 = arith.constant 0 : index
    %4 = vector.load %arg3[%c0_3, %c0_4] : memref<1x3xf32, #tpu.memory_space<vmem>>, vector<1x3xf32>
    %5 = vector.broadcast %4 : vector<1x3xf32> to vector<1024x3xf32>
    %6 = arith.addf %3, %5 : vector<1024x3xf32>
    %7 = arith.negf %6 : vector<1024x3xf32>
    %8 = math.exp %7 : vector<1024x3xf32>
    %cst_5 = arith.constant 1.000000e+00 : f32
    %9 = vector.broadcast %cst_5 : f32 to vector<1024x3xf32>
    %10 = arith.addf %9, %8 : vector<1024x3xf32>
    %11 = arith.divf %9, %10 : vector<1024x3xf32>
    %c0_6 = arith.constant 0 : index
    %c0_7 = arith.constant 0 : index
    %12 = vector.load %arg4[%c0_6, %c0_7] : memref<1024x3xf32, #tpu.memory_space<vmem>>, vector<1024x3xf32>
    tpu.vector_store %arg4[%c0_6, %c0_7], %11 {strides = array<i32>} : memref<1024x3xf32, #tpu.memory_space<vmem>>, vector<1024x3xf32>,
    return
  }
  func.func @transform_0(%arg0: i32) -> (i32, i32) {
    %c0_i32 = arith.constant 0 : i32
    %c0_i32_0 = arith.constant 0 : i32
    return %arg0, %c0_i32 : i32, i32
  }
  func.func @transform_1(%arg0: i32) -> (i32, i32) {
    %c0_i32 = arith.constant 0 : i32
    %c0_i32_0 = arith.constant 0 : i32
    %c0_i32_1 = arith.constant 0 : i32
    return %c0_i32, %c0_i32_0 : i32, i32
  }
  func.func @transform_2(%arg0: i32) -> (i32, i32) {
    %c0_i32 = arith.constant 0 : i32
    %c0_i32_0 = arith.constant 0 : i32
    %c0_i32_1 = arith.constant 0 : i32
    return %c0_i32, %c0_i32_0 : i32, i32
  }
  func.func @transform_3(%arg0: i32) -> (i32, i32) {
    %c0_i32 = arith.constant 0 : i32
    %c0_i32_0 = arith.constant 0 : i32
    return %arg0, %c0_i32 : i32, i32
  }
}

</mosaic_0001>

<bundles_post_ra>
// kernel: _dsfd_brnet_forward.22
= control target key start
LH: loop header
LB: loop body
LE: loop exit
PB: predicated region body
PF: predicated region fallthrough
CT: control target
= control target key end

     0   :  { %s1063_s12 = smov 0   ;;  %s1390_s0 = inlined_call_operand.vmem [shape: f32[1024,27], index: 0, kind: input, shape index: {}]   ;;  %s1391_s1 = inlined_call_operand.vmem [shape: bf16[27,8], index: 1, kind: input, shape index: {}]   ;;  %s1392_s2 = inlined_call_operand.vmem [shape: f32[1,8], index: 2, kind: input, shape index: {}]   ;;  %s1393_s3 = inlined_call_operand.vmem [shape: f32[1024,8], index: 3, kind: output, shape index: {}]  }
   0x1 LB: > { %s871_s13 = sadd.s32 4294967295, %s1040_s12   ;;  %p875_p0 = scmp.ge.s32.totalorder %s1040_s12, 1  ;;  %s1040_s12 = sphi %s1063_s12, %s13_s12  }
   0x2   : > { %p138_p1 = scmp.lt.s32.totalorder %s1040_s12, 3 }
   0x4   : > { %p139_p2 = pnand %p875_p0, %p138_p1 }
   0x5   : > { %v1032_v0 = vld [vmem:[%s1391_s1] sm:$0xff] (!%p139_p2)   ;;  %vm390_vm0 = vcmask (!%p139_p2), 1044480   ;;  %v1033_v1 = vld [vmem:[%s1391_s1 + $0x8] sm:$0x3f] (!%p139_p2)   ;;  %vm391_vm1 = vcmask (!%p139_p2), 1045504   ;;  %s876_s18 = sshll.u32 (!%p139_p2), %s871_s13, 6 }
   0x6   : > { %142 = sbr.rel (%p139_p2) target bundleno = 297 (0x129), region = 32  ;;  %951 = vmatprep.subr.bf16.mxu0 (!%p139_p2), %v1032_v0  ;;  %1019 = vmatprep.subr.bf16.mxu1 (!%p139_p2), %v1032_v0  ;;  %v1042_v2 = vmov (!%p139_p2), 65535   ;;  %p163_p3 = scmp.lt.s32.totalorder (!%p139_p2), %s876_s18, 127  ;;  %vm293_vm2 = vcmask (!%p139_p2), 220160   ;;  %vm750_vm3 = vcmask (!%p139_p2), 64512  }
   0x7   : > { %952 = vmatpush3.bf16.msra.mxu0 (!%p139_p2), %v1032_v0  ;;  %1021 = vmatpush3.bf16.msra.mxu1 (!%p139_p2), %v1032_v0  ;;  %v392_v3 = vsel (!%p139_p2), %vm390_vm0, 4294967295, %v1042_v2 }
   0x8   : > { %v393_v4 = vsel (!%p139_p2), %vm391_vm1, %v392_v3, 0 }
   0x9   : > { %v395_v5 = vand.u32 (!%p139_p2), %v1033_v1, %v393_v4 }
   0xb   : > { %953 = vmatprep.subr.bf16.mxu0 (!%p139_p2), %v395_v5  ;;  %1020 = vmatprep.subr.bf16.mxu1 (!%p139_p2), %v395_v5 }
   0xc   : > { %954 = vmatpush3.bf16.msra.mxu0 (!%p139_p2), %v395_v5  ;;  %1022 = vmatpush3.bf16.msra.mxu1 (!%p139_p2), %v395_v5 }
   0xd   : > { %s1395_s18 = smov (!%p163_p3, %s876_s18), 127 }
   0xe   : > { %s877_s19 = sshll.u32 %s1395_s18, 3 }
   0xf   : > { %s1085_s22 = scalar_lea.vmem %s1390_s0, %s877_s19  ;;  %s1194_s27 = scalar_lea.vmem %s1393_s3, %s877_s19 }
  0x10   : > { %v175_v6 = vld [vmem:[%s1085_s22] sm:$0xff]  ;;  %v176_v7 = vld [vmem:[%s1085_s22 + $0x8] sm:$0xff]  ;;  %v177_v11 = vld [vmem:[%s1085_s22 + $0x10] sm:$0xff] }
  0x11   : > { %v207_v8 = vld [vmem:[%s1085_s22 + $0x100] sm:$0xff]  ;;  %v239_v9 = vpack.c.bf16 %v176_v7, %v175_v6  ;;  %v208_v10 = vld [vmem:[%s1085_s22 + $0x108] sm:$0xff]  ;;  %v178_v12 = vld [vmem:[%s1085_s22 + $0x18] sm:$0xff] }
  0x12   : > { %v255_v13 = vpack.c.bf16 %v208_v10, %v207_v8  ;;  %v240_v14 = vpack.c.bf16 %v178_v12, %v177_v11  ;;  %v209_v15 = vld [vmem:[%s1085_s22 + $0x110] sm:$0xff]  ;;  %v210_v16 = vld [vmem:[%s1085_s22 + $0x118] sm:$0xff]  ;;  %v179_v17 = vld [vmem:[%s1085_s22 + $0x20] sm:$0xff] }
  0x13   : > { %955 = vmatprep.mubr.msk.bf16.mxu0 %vm293_vm2, %v239_v9  ;;  %v256_v18 = vpack.c.bf16 %v210_v16, %v209_v15  ;;  %v180_v19 = vld [vmem:[%s1085_s22 + $0x28] sm:$0xff]  ;;  %v211_v20 = vld [vmem:[%s1085_s22 + $0x120] sm:$0xff]  ;;  %v181_v24 = vld [vmem:[%s1085_s22 + $0x30] sm:$0xff] }
  0x14   : > { %v212_v21 = vld [vmem:[%s1085_s22 + $0x128] sm:$0xff]  ;;  %987 = vmatprep.mubr.msk.bf16.mxu1 %vm293_vm2, %v255_v13  ;;  %956 = vmatmul.mubr.msk.bf16.vlgmr.msra.gmra.mrb[0].mxu0 %vm293_vm2, %v240_v14  ;;  %v241_v22 = vpack.c.bf16 %v180_v19, %v179_v17  ;;  %v182_v25 = vld [vmem:[%s1085_s22 + $0x38] sm:$0xff]  ;;  %v213_v26 = vld [vmem:[%s1085_s22 + $0x130] sm:$0xff] }
  0x15   : > { %v257_v23 = vpack.c.bf16 %v212_v21, %v211_v20  ;;  %988 = vmatmul.mubr.msk.bf16.vlgmr.msra.gmra.mrb[0].mxu1 %vm293_vm2, %v256_v18  ;;  %v214_v27 = vld [vmem:[%s1085_s22 + $0x138] sm:$0xff]  ;;  %v183_v28 = vld [vmem:[%s1085_s22 + $0x40] sm:$0xff]  ;;  %v184_v29 = vld [vmem:[%s1085_s22 + $0x48] sm:$0xff]  ;;  %v242_v32 = vpack.c.bf16 %v182_v25, %v181_v24 }
  0x16   : > { %959 = vmatprep.mubr.msk.bf16.mxu0 %vm293_vm2, %v241_v22  ;;  %v215_v30 = vld [vmem:[%s1085_s22 + $0x140] sm:$0xff]  ;;  %v216_v31 = vld [vmem:[%s1085_s22 + $0x148] sm:$0xff]  ;;  %v258_v33 = vpack.c.bf16 %v214_v27, %v213_v26  ;;  %v243_v34 = vpack.c.bf16 %v184_v29, %v183_v28  ;;  %v185_v36 = vld [vmem:[%s1085_s22 + $0x50] sm:$0xff] }
  0x17   : > { %991 = vmatprep.mubr.msk.bf16.mxu1 %vm293_vm2, %v257_v23  ;;  %v259_v35 = vpack.c.bf16 %v216_v31, %v215_v30  ;;  %v186_v37 = vld [vmem:[%s1085_s22 + $0x58] sm:$0xff]  ;;  %v217_v38 = vld [vmem:[%s1085_s22 + $0x150] sm:$0xff]  ;;  %v187_v40 = vld [vmem:[%s1085_s22 + $0x60] sm:$0xff] }
  0x18   : > { %v218_v39 = vld [vmem:[%s1085_s22 + $0x158] sm:$0xff]  ;;  %v188_v41 = vld [vmem:[%s1085_s22 + $0x68] sm:$0xff]  ;;  %v219_v42 = vld [vmem:[%s1085_s22 + $0x160] sm:$0xff]  ;;  %v244_v44 = vpack.c.bf16 %v186_v37, %v185_v36 }
  0x19   : > { %v220_v43 = vld [vmem:[%s1085_s22 + $0x168] sm:$0xff]  ;;  %v260_v45 = vpack.c.bf16 %v218_v39, %v217_v38  ;;  %v245_v46 = vpack.c.bf16 %v188_v41, %v187_v40  ;;  %v189_v48 = vld [vmem:[%s1085_s22 + $0x70] sm:$0xff]  ;;  %v190_v49 = vld [vmem:[%s1085_s22 + $0x78] sm:$0xff] }
  0x1a   : > { %v261_v47 = vpack.c.bf16 %v220_v43, %v219_v42  ;;  %v221_v50 = vld [vmem:[%s1085_s22 + $0x170] sm:$0xff]  ;;  %v222_v51 = vld [vmem:[%s1085_s22 + $0x178] sm:$0xff]  ;;  %v191_v52 = vld [vmem:[%s1085_s22 + $0x80] sm:$0xff]  ;;  %v246_v56 = vpack.c.bf16 %v190_v49, %v189_v48 }
  0x1b   : > { %v192_v53 = vld [vmem:[%s1085_s22 + $0x88] sm:$0xff]  ;;  %v223_v54 = vld [vmem:[%s1085_s22 + $0x180] sm:$0xff]  ;;  %v262_v57 = vpack.c.bf16 %v222_v51, %v221_v50  ;;  %v193_v60 = vld [vmem:[%s1085_s22 + $0x90] sm:$0xff] }
  0x1c   : > { %960 = vmatmul.mubr.msk.bf16.gmra.mrb[4].mxu0 %vm293_vm2, %v242_v32  ;;  %v224_v55 = vld [vmem:[%s1085_s22 + $0x188] sm:$0xff]  ;;  %v247_v58 = vpack.c.bf16 %v192_v53, %v191_v52  ;;  %v194_v61 = vld [vmem:[%s1085_s22 + $0x98] sm:$0xff]  ;;  %v225_v62 = vld [vmem:[%s1085_s22 + $0x190] sm:$0xff] }
  0x1d   : > { %992 = vmatmul.mubr.msk.bf16.gmra.mrb[4].mxu1 %vm293_vm2, %v258_v33  ;;  %963 = vmatprep.mubr.msk.bf16.mxu0 %vm293_vm2, %v243_v34  ;;  %v263_v59 = vpack.c.bf16 %v224_v55, %v223_v54  ;;  %v226_v63 = vld [vmem:[%s1085_s22 + $0x198] sm:$0xff]  ;;  %v195_v0 = vld [vmem:[%s1085_s22 + $0xa0] sm:$0xff]  ;;  %v196_v1 = vld [vmem:[%s1085_s22 + $0xa8] sm:$0xff]  ;;  %v248_v4 = vpack.c.bf16 %v194_v61, %v193_v60 }
  0x1e   : > { %995 = vmatprep.mubr.msk.bf16.mxu1 %vm293_vm2, %v259_v35  ;;  %v227_v2 = vld [vmem:[%s1085_s22 + $0x1a0] sm:$0xff]  ;;  %v228_v3 = vld [vmem:[%s1085_s22 + $0x1a8] sm:$0xff]  ;;  %v264_v5 = vpack.c.bf16 %v226_v63, %v225_v62  ;;  %v249_v6 = vpack.c.bf16 %v196_v1, %v195_v0  ;;  %v197_v8 = vld [vmem:[%s1085_s22 + $0xb0] sm:$0xff] }
  0x1f   : > { %v265_v7 = vpack.c.bf16 %v228_v3, %v227_v2  ;;  %v198_v9 = vld [vmem:[%s1085_s22 + $0xb8] sm:$0xff]  ;;  %v229_v10 = vld [vmem:[%s1085_s22 + $0x1b0] sm:$0xff]  ;;  %v199_v12 = vld [vmem:[%s1085_s22 + $0xc0] sm:$0xff] }
  0x20   : > { %v230_v11 = vld [vmem:[%s1085_s22 + $0x1b8] sm:$0xff]  ;;  %v200_v13 = vld [vmem:[%s1085_s22 + $0xc8] sm:$0xff]  ;;  %v231_v14 = vld [vmem:[%s1085_s22 + $0x1c0] sm:$0xff]  ;;  %v250_v16 = vpack.c.bf16 %v198_v9, %v197_v8 }
  0x21   : > { %v232_v15 = vld [vmem:[%s1085_s22 + $0x1c8] sm:$0xff]  ;;  %v266_v17 = vpack.c.bf16 %v230_v11, %v229_v10  ;;  %v251_v18 = vpack.c.bf16 %v200_v13, %v199_v12  ;;  %v201_v20 = vld [vmem:[%s1085_s22 + $0xd0] sm:$0xff]  ;;  %v202_v21 = vld [vmem:[%s1085_s22 + $0xd8] sm:$0xff] }
  0x22   : > { %v267_v19 = vpack.c.bf16 %v232_v15, %v231_v14  ;;  %v233_v22 = vld [vmem:[%s1085_s22 + $0x1d0] sm:$0xff]  ;;  %v234_v23 = vld [vmem:[%s1085_s22 + $0x1d8] sm:$0xff]  ;;  %v203_v24 = vld [vmem:[%s1085_s22 + $0xe0] sm:$0xff]  ;;  %v252_v28 = vpack.c.bf16 %v202_v21, %v201_v20 }
  0x23   : > { %v204_v25 = vld [vmem:[%s1085_s22 + $0xe8] sm:$0xff]  ;;  %v235_v26 = vld [vmem:[%s1085_s22 + $0x1e0] sm:$0xff]  ;;  %v268_v29 = vpack.c.bf16 %v234_v23, %v233_v22  ;;  %v205_v32 = vld [vmem:[%s1085_s22 + $0xf0] sm:$0xff] }
  0x24   : > { %964 = vmatmul.mubr.msk.bf16.gmra.mrb[8].mxu0 %vm293_vm2, %v244_v44  ;;  %v236_v27 = vld [vmem:[%s1085_s22 + $0x1e8] sm:$0xff]  ;;  %v253_v30 = vpack.c.bf16 %v204_v25, %v203_v24  ;;  %v206_v33 = vld [vmem:[%s1085_s22 + $0xf8] sm:$0xff]  ;;  %v237_v34 = vld [vmem:[%s1085_s22 + $0x1f0] sm:$0xff] }
  0x25   : > { %996 = vmatmul.mubr.msk.bf16.gmra.mrb[8].mxu1 %vm293_vm2, %v260_v45  ;;  %967 = vmatprep.mubr.msk.bf16.mxu0 %vm293_vm2, %v245_v46  ;;  %v269_v31 = vpack.c.bf16 %v236_v27, %v235_v26  ;;  %v238_v35 = vld [vmem:[%s1085_s22 + $0x1f8] sm:$0xff]  ;;  %v254_v36 = vpack.c.bf16 %v206_v33, %v205_v32  ;;  %v1186_v38 = vld [vmem:[%s1392_s2] ss:$0 sm:$0xff] }
  0x26   : > { %999 = vmatprep.mubr.msk.bf16.mxu1 %vm293_vm2, %v261_v47  ;;  %v270_v37 = vpack.c.bf16 %v238_v35, %v237_v34 }
  0x2c   : > { %968 = vmatmul.mubr.msk.bf16.gmra.mrb[12].mxu0 %vm293_vm2, %v246_v56 }
  0x2d   : > { %1000 = vmatmul.mubr.msk.bf16.gmra.mrb[12].mxu1 %vm293_vm2, %v262_v57  ;;  %971 = vmatprep.mubr.msk.bf16.mxu0 %vm293_vm2, %v247_v58 }
  0x2e   : > { %1003 = vmatprep.mubr.msk.bf16.mxu1 %vm293_vm2, %v263_v59 }
  0x34   : > { %972 = vmatmul.mubr.msk.bf16.gmra.mrb[16].mxu0 %vm293_vm2, %v248_v4 }
  0x35   : > { %1004 = vmatmul.mubr.msk.bf16.gmra.mrb[16].mxu1 %vm293_vm2, %v264_v5  ;;  %975 = vmatprep.mubr.msk.bf16.mxu0 %vm293_vm2, %v249_v6 }
  0x36   : > { %1007 = vmatprep.mubr.msk.bf16.mxu1 %vm293_vm2, %v265_v7 }
  0x3c   : > { %976 = vmatmul.mubr.msk.bf16.gmra.mrb[20].mxu0 %vm293_vm2, %v250_v16 }
  0x3d   : > { %1008 = vmatmul.mubr.msk.bf16.gmra.mrb[20].mxu1 %vm293_vm2, %v266_v17  ;;  %979 = vmatprep.mubr.msk.bf16.mxu0 %vm293_vm2, %v251_v18 }
  0x3e   : > { %1011 = vmatprep.mubr.msk.bf16.mxu1 %vm293_vm2, %v267_v19 }
  0x44   : > { %980 = vmatmul.mubr.msk.bf16.gmra.mrb[24].mxu0 %vm293_vm2, %v252_v28 }
  0x45   : > { %1012 = vmatmul.mubr.msk.bf16.gmra.mrb[24].mxu1 %vm293_vm2, %v268_v29  ;;  %983 = vmatprep.mubr.msk.bf16.mxu0 %vm293_vm2, %v253_v30 }
  0x46   : > { %1015 = vmatprep.mubr.msk.bf16.mxu1 %vm293_vm2, %v269_v31 }
  0x4c   : > { %984 = vmatmul.mubr.msk.bf16.gmra.mrb[28].mxu0 %vm293_vm2, %v254_v36 }
  0x4d   : > { %1016 = vmatmul.mubr.msk.bf16.gmra.mrb[28].mxu1 %vm293_vm2, %v270_v37 }
  0xe7   : > { %v957_v39 = vpop.f32.mrb[0].mxu0 }
  0xe8   : > { %v440_v40 = vadd.f32 %v957_v39, %v1186_v38  ;;  %v989_v41 = vpop.f32.mrb[0].mxu1  ;;  %v431_v42 = vpop.f32.mrb[1].mxu0 }
  0xe9   : > { %v568_v43 = vadd.f32 %v989_v41, %v1186_v38  ;;  %v432_v44 = vadd.f32 %v1186_v38, %v431_v42  ;;  %v559_v45 = vpop.f32.mrb[1].mxu1  ;;  %v958_v46 = vpop.f32.mrb[2].mxu0 }
  0xea   : > { %v688_v47 = vmax.f32 %v440_v40, 0.0  ;;  %v560_v48 = vadd.f32 %v1186_v38, %v559_v45  ;;  %v443_v49 = vadd.f32 %v958_v46, %v1186_v38  ;;  %v990_v50 = vpop.f32.mrb[2].mxu1  ;;  %v434_v51 = vpop.f32.mrb[3].mxu0 }
  0xeb   : > { %v720_v52 = vmax.f32 %v568_v43, 0.0  ;;  %v686_v53 = vmax.f32 %v432_v44, 0.0  ;;  %v571_v54 = vadd.f32 %v990_v50, %v1186_v38  ;;  %v435_v55 = vadd.f32 %v1186_v38, %v434_v51  ;;  %v562_v56 = vpop.f32.mrb[3].mxu1 }
  0xec   : > { %753 = vst.msk [vmem:[%s1194_s27 + $0x10] sm:$0xff] %vm750_vm3, %v688_v47  ;;  %v718_v57 = vmax.f32 %v560_v48, 0.0  ;;  %v689_v58 = vmax.f32 %v443_v49, 0.0  ;;  %v563_v59 = vadd.f32 %v1186_v38, %v562_v56 }
  0xed   : > { %785 = vst.msk [vmem:[%s1194_s27 + $0x110] sm:$0xff] %vm750_vm3, %v720_v52  ;;  %751 = vst.msk [vmem:[%s1194_s27] sm:$0xff] %vm750_vm3, %v686_v53  ;;  %v721_v60 = vmax.f32 %v571_v54, 0.0  ;;  %v687_v61 = vmax.f32 %v435_v55, 0.0 }
  0xee   : > { %783 = vst.msk [vmem:[%s1194_s27 + $0x100] sm:$0xff] %vm750_vm3, %v718_v57  ;;  %754 = vst.msk [vmem:[%s1194_s27 + $0x18] sm:$0xff] %vm750_vm3, %v689_v58  ;;  %v719_v62 = vmax.f32 %v563_v59, 0.0 }
  0xef   : > { %786 = vst.msk [vmem:[%s1194_s27 + $0x118] sm:$0xff] %vm750_vm3, %v721_v60  ;;  %752 = vst.msk [vmem:[%s1194_s27 + $0x8] sm:$0xff] %vm750_vm3, %v687_v61  ;;  %v961_v63 = vpop.f32.mrb[4].mxu0 }
  0xf0   : > { %784 = vst.msk [vmem:[%s1194_s27 + $0x108] sm:$0xff] %vm750_vm3, %v719_v62  ;;  %v456_v0 = vadd.f32 %v961_v63, %v1186_v38  ;;  %v993_v1 = vpop.f32.mrb[4].mxu1  ;;  %v447_v2 = vpop.f32.mrb[5].mxu0 }
  0xf1   : > { %v584_v3 = vadd.f32 %v993_v1, %v1186_v38  ;;  %v448_v4 = vadd.f32 %v1186_v38, %v447_v2  ;;  %v575_v5 = vpop.f32.mrb[5].mxu1  ;;  %v962_v6 = vpop.f32.mrb[6].mxu0 }
  0xf2   : > { %v692_v7 = vmax.f32 %v456_v0, 0.0  ;;  %v576_v8 = vadd.f32 %v1186_v38, %v575_v5  ;;  %v459_v9 = vadd.f32 %v962_v6, %v1186_v38  ;;  %v994_v10 = vpop.f32.mrb[6].mxu1  ;;  %v450_v11 = vpop.f32.mrb[7].mxu0 }
  0xf3   : > { %v724_v12 = vmax.f32 %v584_v3, 0.0  ;;  %v690_v13 = vmax.f32 %v448_v4, 0.0  ;;  %v587_v14 = vadd.f32 %v994_v10, %v1186_v38  ;;  %v451_v15 = vadd.f32 %v1186_v38, %v450_v11  ;;  %v578_v16 = vpop.f32.mrb[7].mxu1 }
  0xf4   : > { %757 = vst.msk [vmem:[%s1194_s27 + $0x30] sm:$0xff] %vm750_vm3, %v692_v7  ;;  %v722_v17 = vmax.f32 %v576_v8, 0.0  ;;  %v693_v18 = vmax.f32 %v459_v9, 0.0  ;;  %v579_v19 = vadd.f32 %v1186_v38, %v578_v16 }
  0xf5   : > { %789 = vst.msk [vmem:[%s1194_s27 + $0x130] sm:$0xff] %vm750_vm3, %v724_v12  ;;  %755 = vst.msk [vmem:[%s1194_s27 + $0x20] sm:$0xff] %vm750_vm3, %v690_v13  ;;  %v725_v20 = vmax.f32 %v587_v14, 0.0  ;;  %v691_v21 = vmax.f32 %v451_v15, 0.0 }
  0xf6   : > { %787 = vst.msk [vmem:[%s1194_s27 + $0x120] sm:$0xff] %vm750_vm3, %v722_v17  ;;  %758 = vst.msk [vmem:[%s1194_s27 + $0x38] sm:$0xff] %vm750_vm3, %v693_v18  ;;  %v723_v22 = vmax.f32 %v579_v19, 0.0 }
  0xf7   : > { %790 = vst.msk [vmem:[%s1194_s27 + $0x138] sm:$0xff] %vm750_vm3, %v725_v20  ;;  %756 = vst.msk [vmem:[%s1194_s27 + $0x28] sm:$0xff] %vm750_vm3, %v691_v21  ;;  %v965_v23 = vpop.f32.mrb[8].mxu0 }
  0xf8   : > { %788 = vst.msk [vmem:[%s1194_s27 + $0x128] sm:$0xff] %vm750_vm3, %v723_v22  ;;  %v472_v24 = vadd.f32 %v965_v23, %v1186_v38  ;;  %v997_v25 = vpop.f32.mrb[8].mxu1  ;;  %v463_v26 = vpop.f32.mrb[9].mxu0 }
  0xf9   : > { %v600_v27 = vadd.f32 %v997_v25, %v1186_v38  ;;  %v464_v28 = vadd.f32 %v1186_v38, %v463_v26  ;;  %v591_v29 = vpop.f32.mrb[9].mxu1  ;;  %v966_v30 = vpop.f32.mrb[10].mxu0 }
  0xfa   : > { %v696_v31 = vmax.f32 %v472_v24, 0.0  ;;  %v592_v32 = vadd.f32 %v1186_v38, %v591_v29  ;;  %v475_v33 = vadd.f32 %v966_v30, %v1186_v38  ;;  %v998_v34 = vpop.f32.mrb[10].mxu1  ;;  %v466_v35 = vpop.f32.mrb[11].mxu0 }
  0xfb   : > { %v728_v36 = vmax.f32 %v600_v27, 0.0  ;;  %v694_v37 = vmax.f32 %v464_v28, 0.0  ;;  %v603_v39 = vadd.f32 %v998_v34, %v1186_v38  ;;  %v467_v40 = vadd.f32 %v1186_v38, %v466_v35  ;;  %v594_v41 = vpop.f32.mrb[11].mxu1 }
  0xfc   : > { %761 = vst.msk [vmem:[%s1194_s27 + $0x50] sm:$0xff] %vm750_vm3, %v696_v31  ;;  %v726_v42 = vmax.f32 %v592_v32, 0.0  ;;  %v697_v43 = vmax.f32 %v475_v33, 0.0  ;;  %v595_v44 = vadd.f32 %v1186_v38, %v594_v41 }
  0xfd   : > { %793 = vst.msk [vmem:[%s1194_s27 + $0x150] sm:$0xff] %vm750_vm3, %v728_v36  ;;  %759 = vst.msk [vmem:[%s1194_s27 + $0x40] sm:$0xff] %vm750_vm3, %v694_v37  ;;  %v729_v45 = vmax.f32 %v603_v39, 0.0  ;;  %v695_v46 = vmax.f32 %v467_v40, 0.0 }
  0xfe   : > { %791 = vst.msk [vmem:[%s1194_s27 + $0x140] sm:$0xff] %vm750_vm3, %v726_v42  ;;  %762 = vst.msk [vmem:[%s1194_s27 + $0x58] sm:$0xff] %vm750_vm3, %v697_v43  ;;  %v727_v47 = vmax.f32 %v595_v44, 0.0 }
  0xff   : > { %794 = vst.msk [vmem:[%s1194_s27 + $0x158] sm:$0xff] %vm750_vm3, %v729_v45  ;;  %760 = vst.msk [vmem:[%s1194_s27 + $0x48] sm:$0xff] %vm750_vm3, %v695_v46  ;;  %v969_v48 = vpop.f32.mrb[12].mxu0 }
 0x100   : > { %792 = vst.msk [vmem:[%s1194_s27 + $0x148] sm:$0xff] %vm750_vm3, %v727_v47  ;;  %v488_v49 = vadd.f32 %v969_v48, %v1186_v38  ;;  %v1001_v50 = vpop.f32.mrb[12].mxu1  ;;  %v479_v51 = vpop.f32.mrb[13].mxu0 }
 0x101   : > { %v616_v52 = vadd.f32 %v1001_v50, %v1186_v38  ;;  %v480_v53 = vadd.f32 %v1186_v38, %v479_v51  ;;  %v607_v54 = vpop.f32.mrb[13].mxu1  ;;  %v970_v55 = vpop.f32.mrb[14].mxu0 }
 0x102   : > { %v700_v56 = vmax.f32 %v488_v49, 0.0  ;;  %v608_v57 = vadd.f32 %v1186_v38, %v607_v54  ;;  %v491_v58 = vadd.f32 %v970_v55, %v1186_v38  ;;  %v1002_v59 = vpop.f32.mrb[14].mxu1  ;;  %v482_v60 = vpop.f32.mrb[15].mxu0 }
 0x103   : > { %v732_v61 = vmax.f32 %v616_v52, 0.0  ;;  %v698_v62 = vmax.f32 %v480_v53, 0.0  ;;  %v619_v63 = vadd.f32 %v1002_v59, %v1186_v38  ;;  %v483_v0 = vadd.f32 %v1186_v38, %v482_v60  ;;  %v610_v1 = vpop.f32.mrb[15].mxu1 }
 0x104   : > { %765 = vst.msk [vmem:[%s1194_s27 + $0x70] sm:$0xff] %vm750_vm3, %v700_v56  ;;  %v730_v2 = vmax.f32 %v608_v57, 0.0  ;;  %v701_v3 = vmax.f32 %v491_v58, 0.0  ;;  %v611_v4 = vadd.f32 %v1186_v38, %v610_v1 }
 0x105   : > { %797 = vst.msk [vmem:[%s1194_s27 + $0x170] sm:$0xff] %vm750_vm3, %v732_v61  ;;  %763 = vst.msk [vmem:[%s1194_s27 + $0x60] sm:$0xff] %vm750_vm3, %v698_v62  ;;  %v733_v5 = vmax.f32 %v619_v63, 0.0  ;;  %v699_v6 = vmax.f32 %v483_v0, 0.0 }
 0x106   : > { %795 = vst.msk [vmem:[%s1194_s27 + $0x160] sm:$0xff] %vm750_vm3, %v730_v2  ;;  %766 = vst.msk [vmem:[%s1194_s27 + $0x78] sm:$0xff] %vm750_vm3, %v701_v3  ;;  %v731_v7 = vmax.f32 %v611_v4, 0.0 }
 0x107   : > { %798 = vst.msk [vmem:[%s1194_s27 + $0x178] sm:$0xff] %vm750_vm3, %v733_v5  ;;  %764 = vst.msk [vmem:[%s1194_s27 + $0x68] sm:$0xff] %vm750_vm3, %v699_v6  ;;  %v973_v8 = vpop.f32.mrb[16].mxu0 }
 0x108   : > { %796 = vst.msk [vmem:[%s1194_s27 + $0x168] sm:$0xff] %vm750_vm3, %v731_v7  ;;  %v504_v9 = vadd.f32 %v973_v8, %v1186_v38  ;;  %v1005_v10 = vpop.f32.mrb[16].mxu1  ;;  %v495_v11 = vpop.f32.mrb[17].mxu0 }
 0x109   : > { %v632_v12 = vadd.f32 %v1005_v10, %v1186_v38  ;;  %v496_v13 = vadd.f32 %v1186_v38, %v495_v11  ;;  %v623_v14 = vpop.f32.mrb[17].mxu1  ;;  %v974_v15 = vpop.f32.mrb[18].mxu0 }
 0x10a   : > { %v704_v16 = vmax.f32 %v504_v9, 0.0  ;;  %v624_v17 = vadd.f32 %v1186_v38, %v623_v14  ;;  %v507_v18 = vadd.f32 %v974_v15, %v1186_v38  ;;  %v1006_v19 = vpop.f32.mrb[18].mxu1  ;;  %v498_v20 = vpop.f32.mrb[19].mxu0 }
 0x10b   : > { %v736_v21 = vmax.f32 %v632_v12, 0.0  ;;  %v702_v22 = vmax.f32 %v496_v13, 0.0  ;;  %v635_v23 = vadd.f32 %v1006_v19, %v1186_v38  ;;  %v499_v24 = vadd.f32 %v1186_v38, %v498_v20  ;;  %v626_v25 = vpop.f32.mrb[19].mxu1 }
 0x10c   : > { %769 = vst.msk [vmem:[%s1194_s27 + $0x90] sm:$0xff] %vm750_vm3, %v704_v16  ;;  %v734_v26 = vmax.f32 %v624_v17, 0.0  ;;  %v705_v27 = vmax.f32 %v507_v18, 0.0  ;;  %v627_v28 = vadd.f32 %v1186_v38, %v626_v25 }
 0x10d   : > { %801 = vst.msk [vmem:[%s1194_s27 + $0x190] sm:$0xff] %vm750_vm3, %v736_v21  ;;  %767 = vst.msk [vmem:[%s1194_s27 + $0x80] sm:$0xff] %vm750_vm3, %v702_v22  ;;  %v737_v29 = vmax.f32 %v635_v23, 0.0  ;;  %v703_v30 = vmax.f32 %v499_v24, 0.0 }
 0x10e   : > { %799 = vst.msk [vmem:[%s1194_s27 + $0x180] sm:$0xff] %vm750_vm3, %v734_v26  ;;  %770 = vst.msk [vmem:[%s1194_s27 + $0x98] sm:$0xff] %vm750_vm3, %v705_v27  ;;  %v735_v31 = vmax.f32 %v627_v28, 0.0 }
 0x10f   : > { %802 = vst.msk [vmem:[%s1194_s27 + $0x198] sm:$0xff] %vm750_vm3, %v737_v29  ;;  %768 = vst.msk [vmem:[%s1194_s27 + $0x88] sm:$0xff] %vm750_vm3, %v703_v30  ;;  %v977_v32 = vpop.f32.mrb[20].mxu0 }
 0x110   : > { %800 = vst.msk [vmem:[%s1194_s27 + $0x188] sm:$0xff] %vm750_vm3, %v735_v31  ;;  %v520_v33 = vadd.f32 %v977_v32, %v1186_v38  ;;  %v1009_v34 = vpop.f32.mrb[20].mxu1  ;;  %v511_v35 = vpop.f32.mrb[21].mxu0 }
 0x111   : > { %v648_v36 = vadd.f32 %v1009_v34, %v1186_v38  ;;  %v512_v37 = vadd.f32 %v1186_v38, %v511_v35  ;;  %v639_v39 = vpop.f32.mrb[21].mxu1  ;;  %v978_v40 = vpop.f32.mrb[22].mxu0 }
 0x112   : > { %v708_v41 = vmax.f32 %v520_v33, 0.0  ;;  %v640_v42 = vadd.f32 %v1186_v38, %v639_v39  ;;  %v523_v43 = vadd.f32 %v978_v40, %v1186_v38  ;;  %v1010_v44 = vpop.f32.mrb[22].mxu1  ;;  %v514_v45 = vpop.f32.mrb[23].mxu0 }
 0x113   : > { %v740_v46 = vmax.f32 %v648_v36, 0.0  ;;  %v706_v47 = vmax.f32 %v512_v37, 0.0  ;;  %v651_v48 = vadd.f32 %v1010_v44, %v1186_v38  ;;  %v515_v49 = vadd.f32 %v1186_v38, %v514_v45  ;;  %v642_v50 = vpop.f32.mrb[23].mxu1 }
 0x114   : > { %773 = vst.msk [vmem:[%s1194_s27 + $0xb0] sm:$0xff] %vm750_vm3, %v708_v41  ;;  %v738_v51 = vmax.f32 %v640_v42, 0.0  ;;  %v709_v52 = vmax.f32 %v523_v43, 0.0  ;;  %v643_v53 = vadd.f32 %v1186_v38, %v642_v50 }
 0x115   : > { %805 = vst.msk [vmem:[%s1194_s27 + $0x1b0] sm:$0xff] %vm750_vm3, %v740_v46  ;;  %771 = vst.msk [vmem:[%s1194_s27 + $0xa0] sm:$0xff] %vm750_vm3, %v706_v47  ;;  %v741_v54 = vmax.f32 %v651_v48, 0.0  ;;  %v707_v55 = vmax.f32 %v515_v49, 0.0 }
 0x116   : > { %803 = vst.msk [vmem:[%s1194_s27 + $0x1a0] sm:$0xff] %vm750_vm3, %v738_v51  ;;  %774 = vst.msk [vmem:[%s1194_s27 + $0xb8] sm:$0xff] %vm750_vm3, %v709_v52  ;;  %v739_v56 = vmax.f32 %v643_v53, 0.0 }
 0x117   : > { %806 = vst.msk [vmem:[%s1194_s27 + $0x1b8] sm:$0xff] %vm750_vm3, %v741_v54  ;;  %772 = vst.msk [vmem:[%s1194_s27 + $0xa8] sm:$0xff] %vm750_vm3, %v707_v55  ;;  %v981_v57 = vpop.f32.mrb[24].mxu0 }
 0x118   : > { %804 = vst.msk [vmem:[%s1194_s27 + $0x1a8] sm:$0xff] %vm750_vm3, %v739_v56  ;;  %v536_v58 = vadd.f32 %v981_v57, %v1186_v38  ;;  %v1013_v59 = vpop.f32.mrb[24].mxu1  ;;  %v527_v60 = vpop.f32.mrb[25].mxu0 }
 0x119   : > { %v664_v61 = vadd.f32 %v1013_v59, %v1186_v38  ;;  %v528_v62 = vadd.f32 %v1186_v38, %v527_v60  ;;  %v655_v63 = vpop.f32.mrb[25].mxu1  ;;  %v982_v0 = vpop.f32.mrb[26].mxu0 }
 0x11a   : > { %v712_v1 = vmax.f32 %v536_v58, 0.0  ;;  %v656_v2 = vadd.f32 %v1186_v38, %v655_v63  ;;  %v539_v3 = vadd.f32 %v982_v0, %v1186_v38  ;;  %v1014_v4 = vpop.f32.mrb[26].mxu1  ;;  %v530_v5 = vpop.f32.mrb[27].mxu0 }
 0x11b   : > { %v744_v6 = vmax.f32 %v664_v61, 0.0  ;;  %v710_v7 = vmax.f32 %v528_v62, 0.0  ;;  %v667_v8 = vadd.f32 %v1014_v4, %v1186_v38  ;;  %v531_v9 = vadd.f32 %v1186_v38, %v530_v5  ;;  %v658_v10 = vpop.f32.mrb[27].mxu1 }
 0x11c   : > { %777 = vst.msk [vmem:[%s1194_s27 + $0xd0] sm:$0xff] %vm750_vm3, %v712_v1  ;;  %v742_v11 = vmax.f32 %v656_v2, 0.0  ;;  %v713_v12 = vmax.f32 %v539_v3, 0.0  ;;  %v659_v13 = vadd.f32 %v1186_v38, %v658_v10 }
 0x11d   : > { %809 = vst.msk [vmem:[%s1194_s27 + $0x1d0] sm:$0xff] %vm750_vm3, %v744_v6  ;;  %775 = vst.msk [vmem:[%s1194_s27 + $0xc0] sm:$0xff] %vm750_vm3, %v710_v7  ;;  %v745_v14 = vmax.f32 %v667_v8, 0.0  ;;  %v711_v15 = vmax.f32 %v531_v9, 0.0 }
 0x11e   : > { %807 = vst.msk [vmem:[%s1194_s27 + $0x1c0] sm:$0xff] %vm750_vm3, %v742_v11  ;;  %778 = vst.msk [vmem:[%s1194_s27 + $0xd8] sm:$0xff] %vm750_vm3, %v713_v12  ;;  %v743_v16 = vmax.f32 %v659_v13, 0.0 }
 0x11f   : > { %810 = vst.msk [vmem:[%s1194_s27 + $0x1d8] sm:$0xff] %vm750_vm3, %v745_v14  ;;  %776 = vst.msk [vmem:[%s1194_s27 + $0xc8] sm:$0xff] %vm750_vm3, %v711_v15  ;;  %v985_v17 = vpop.f32.mrb[28].mxu0 }
 0x120   : > { %808 = vst.msk [vmem:[%s1194_s27 + $0x1c8] sm:$0xff] %vm750_vm3, %v743_v16  ;;  %v552_v18 = vadd.f32 %v985_v17, %v1186_v38  ;;  %v1017_v19 = vpop.f32.mrb[28].mxu1  ;;  %v543_v20 = vpop.f32.mrb[29].mxu0 }
 0x121   : > { %v680_v21 = vadd.f32 %v1017_v19, %v1186_v38  ;;  %v544_v22 = vadd.f32 %v1186_v38, %v543_v20  ;;  %v671_v23 = vpop.f32.mrb[29].mxu1  ;;  %v986_v24 = vpop.f32.mrb[30].mxu0 }
 0x122   : > { %v716_v25 = vmax.f32 %v552_v18, 0.0  ;;  %v672_v26 = vadd.f32 %v1186_v38, %v671_v23  ;;  %v555_v27 = vadd.f32 %v986_v24, %v1186_v38  ;;  %v1018_v28 = vpop.f32.mrb[30].mxu1  ;;  %v546_v29 = vpop.f32.mrb[31].mxu0 }
 0x123   : > { %v748_v30 = vmax.f32 %v680_v21, 0.0  ;;  %v714_v31 = vmax.f32 %v544_v22, 0.0  ;;  %v683_v32 = vadd.f32 %v1018_v28, %v1186_v38  ;;  %v547_v33 = vadd.f32 %v1186_v38, %v546_v29  ;;  %v674_v34 = vpop.f32.mrb[31].mxu1 }
 0x124   : > { %781 = vst.msk [vmem:[%s1194_s27 + $0xf0] sm:$0xff] %vm750_vm3, %v716_v25  ;;  %v746_v35 = vmax.f32 %v672_v26, 0.0  ;;  %v717_v36 = vmax.f32 %v555_v27, 0.0  ;;  %v675_v37 = vadd.f32 %v1186_v38, %v674_v34 }
 0x125   : > { %813 = vst.msk [vmem:[%s1194_s27 + $0x1f0] sm:$0xff] %vm750_vm3, %v748_v30  ;;  %779 = vst.msk [vmem:[%s1194_s27 + $0xe0] sm:$0xff] %vm750_vm3, %v714_v31  ;;  %v749_v39 = vmax.f32 %v683_v32, 0.0  ;;  %v715_v40 = vmax.f32 %v547_v33, 0.0 }
 0x126   : > { %811 = vst.msk [vmem:[%s1194_s27 + $0x1e0] sm:$0xff] %vm750_vm3, %v746_v35  ;;  %782 = vst.msk [vmem:[%s1194_s27 + $0xf8] sm:$0xff] %vm750_vm3, %v717_v36  ;;  %v747_v41 = vmax.f32 %v675_v37, 0.0 }
 0x127   : > { %814 = vst.msk [vmem:[%s1194_s27 + $0x1f8] sm:$0xff] %vm750_vm3, %v749_v39  ;;  %780 = vst.msk [vmem:[%s1194_s27 + $0xe8] sm:$0xff] %vm750_vm3, %v715_v40 }
 0x128   : > { %812 = vst.msk [vmem:[%s1194_s27 + $0x1e8] sm:$0xff] %vm750_vm3, %v747_v41 }
 0x129 PF: > { %s13_s12 = sadd.s32 1, %s1040_s12  }
 0x12a   : > { %p10_p4 = scmp.ge.s32.totalorder %s13_s12, 4  }
 0x12c   :  { %12 = sbr.rel (!%p10_p4) target bundleno = 1 (0x1), region = 62 }

// kernel: _dsfd_brnet_forward.23
= control target key start
LH: loop header
LB: loop body
LE: loop exit
PB: predicated region body
PF: predicated region fallthrough
CT: control target
= control target key end

     0   :  { %vm82_vm0 = vcmask 588800   ;;  %vm107_vm1 = vcmask 1043456   ;;  %vm288_vm2 = vcmask 125952   ;;  %s569_s1 = inlined_call_operand.vmem [shape: bf16[72,16], index: 1, kind: input, shape index: {}]   ;;  %s570_s0 = inlined_call_operand.vmem [shape: f32[128,72], index: 0, kind: input, shape index: {}]   ;;  %s571_s2 = inlined_call_operand.vmem [shape: f32[1,16], index: 2, kind: input, shape index: {}]   ;;  %s572_s3 = inlined_call_operand.vmem [shape: bf16[128,16], index: 3, kind: output, shape index: {}]  }
   0x1   :  { %v406_v0 = vld [vmem:[%s569_s1] sm:$0xff]   ;;  %v407_v1 = vld [vmem:[%s569_s1 + $0x8] sm:$0xff]   ;;  %v408_v2 = vld [vmem:[%s569_s1 + $0x10] sm:$0xff]  }
   0x2   :  { %368 = vmatprep.subr.bf16.mxu0 %v406_v0  ;;  %394 = vmatprep.subr.bf16.mxu1 %v406_v0  ;;  %v15_v3 = vld [vmem:[%s570_s0] sm:$0xff]  ;;  %v16_v4 = vld [vmem:[%s570_s0 + $0x8] sm:$0xff]  ;;  %v409_v9 = vld [vmem:[%s569_s1 + $0x18] sm:$0xff]  }
   0x3   :  { %369 = vmatpush3.bf16.msra.mxu0 %v406_v0  ;;  %399 = vmatpush3.bf16.msra.mxu1 %v406_v0  ;;  %v23_v5 = vld [vmem:[%s570_s0 + $0x40] sm:$0xff]  ;;  %v24_v6 = vld [vmem:[%s570_s0 + $0x48] sm:$0xff]  ;;  %v31_v7 = vpack.c.bf16 %v16_v4, %v15_v3  ;;  %v17_v11 = vld [vmem:[%s570_s0 + $0x10] sm:$0xff] }
   0x4   :  { %370 = vmatprep.subr.bf16.mxu0 %v407_v1  ;;  %395 = vmatprep.subr.bf16.mxu1 %v407_v1  ;;  %v35_v8 = vpack.c.bf16 %v24_v6, %v23_v5  ;;  %v410_v10 = vld [vmem:[%s569_s1 + $0x20] ss:$0 sps:$4 sm:$0xff]   ;;  %v18_v12 = vld [vmem:[%s570_s0 + $0x18] sm:$0xff]  ;;  %v25_v13 = vld [vmem:[%s570_s0 + $0x50] sm:$0xff] }
   0x5   :  { %378 = vmatprep.mubr.msk.bf16.mxu0 %vm82_vm0, %v31_v7  ;;  %v26_v14 = vld [vmem:[%s570_s0 + $0x58] sm:$0xff]  ;;  %v19_v15 = vld [vmem:[%s570_s0 + $0x20] sm:$0xff]  ;;  %v109_v16 = vsel %vm107_vm1, %v410_v10, 0  ;;  %v20_v17 = vld [vmem:[%s570_s0 + $0x28] sm:$0xff]  ;;  %v32_v20 = vpack.c.bf16 %v18_v12, %v17_v11 }
   0x6   :  { %386 = vmatprep.mubr.msk.bf16.mxu1 %vm82_vm0, %v35_v8  ;;  %v27_v18 = vld [vmem:[%s570_s0 + $0x60] sm:$0xff]  ;;  %v28_v19 = vld [vmem:[%s570_s0 + $0x68] sm:$0xff]  ;;  %v36_v21 = vpack.c.bf16 %v26_v14, %v25_v13  ;;  %v33_v22 = vpack.c.bf16 %v20_v17, %v19_v15  ;;  %v21_v24 = vld [vmem:[%s570_s0 + $0x30] sm:$0xff] }
   0x7   :  { %371 = vmatpush3.bf16.msra.mxu0 %v407_v1  ;;  %400 = vmatpush3.bf16.msra.mxu1 %v407_v1  ;;  %v37_v23 = vpack.c.bf16 %v28_v19, %v27_v18  ;;  %v22_v25 = vld [vmem:[%s570_s0 + $0x38] sm:$0xff]  ;;  %v29_v26 = vld [vmem:[%s570_s0 + $0x70] sm:$0xff]  ;;  %v309_v30 = vld [vmem:[%s571_s2] ss:$0 sm:$0xff] }
   0x8   :  { %372 = vmatprep.subr.bf16.mxu0 %v408_v2  ;;  %396 = vmatprep.subr.bf16.mxu1 %v408_v2  ;;  %v30_v27 = vld [vmem:[%s570_s0 + $0x78] sm:$0xff]  ;;  %v34_v28 = vpack.c.bf16 %v22_v25, %v21_v24 }
   0x9   :  { %v38_v29 = vpack.c.bf16 %v30_v27, %v29_v26 }
   0xb   :  { %373 = vmatpush3.bf16.msra.mxu0 %v408_v2  ;;  %401 = vmatpush3.bf16.msra.mxu1 %v408_v2 }
   0xc   :  { %374 = vmatprep.subr.bf16.mxu0 %v409_v9  ;;  %397 = vmatprep.subr.bf16.mxu1 %v409_v9 }
   0xf   :  { %375 = vmatpush3.bf16.msra.mxu0 %v409_v9  ;;  %402 = vmatpush3.bf16.msra.mxu1 %v409_v9 }
  0x10   :  { %404 = vmatprep.subr.msk.bf16.mxu0 %vm107_vm1, %v410_v10  ;;  %405 = vmatprep.subr.msk.bf16.mxu1 %vm107_vm1, %v410_v10 }
  0x13   :  { %377 = vmatpush3.bf16.msra.mxu0 %v109_v16  ;;  %403 = vmatpush3.bf16.msra.mxu1 %v109_v16 }
  0x16   :  { %379 = vmatmul.mubr.msk.bf16.vlgmr.msra.gmra.mrb[0].mxu0 %vm82_vm0, %v32_v20  ;;  %387 = vmatmul.mubr.msk.bf16.vlgmr.msra.gmra.mrb[0].mxu1 %vm82_vm0, %v36_v21 }
  0x17   :  { %382 = vmatprep.mubr.msk.bf16.mxu0 %vm82_vm0, %v33_v22  ;;  %390 = vmatprep.mubr.msk.bf16.mxu1 %vm82_vm0, %v37_v23 }
  0x1e   :  { %383 = vmatmul.mubr.msk.bf16.gmra.mrb[4].mxu0 %vm82_vm0, %v34_v28  ;;  %391 = vmatmul.mubr.msk.bf16.gmra.mrb[4].mxu1 %vm82_vm0, %v38_v29 }
  0xe9   :  { %v380_v31 = vpop.f32.mrb[0].mxu0  ;;  %v388_v32 = vpop.f32.mrb[0].mxu1 }
  0xea   :  { %v154_v33 = vadd.f32 %v380_v31, %v309_v30  ;;  %v186_v34 = vadd.f32 %v388_v32, %v309_v30  ;;  %v145_v35 = vpop.f32.mrb[1].mxu0  ;;  %v177_v36 = vpop.f32.mrb[1].mxu1 }
  0xeb   :  { %v146_v37 = vadd.f32 %v309_v30, %v145_v35  ;;  %v178_v38 = vadd.f32 %v309_v30, %v177_v36  ;;  %v381_v39 = vpop.f32.mrb[2].mxu0  ;;  %v389_v40 = vpop.f32.mrb[2].mxu1 }
  0xec   :  { %v210_v41 = vmax.f32 %v154_v33, 0.0  ;;  %v218_v42 = vmax.f32 %v186_v34, 0.0  ;;  %v157_v43 = vadd.f32 %v381_v39, %v309_v30  ;;  %v189_v44 = vadd.f32 %v389_v40, %v309_v30  ;;  %v148_v45 = vpop.f32.mrb[3].mxu0  ;;  %v180_v46 = vpop.f32.mrb[3].mxu1 }
  0xed   :  { %v208_v47 = vmax.f32 %v146_v37, 0.0  ;;  %v216_v48 = vmax.f32 %v178_v38, 0.0  ;;  %v149_v49 = vadd.f32 %v309_v30, %v148_v45  ;;  %v181_v50 = vadd.f32 %v309_v30, %v180_v46 }
  0xee   :  { %v341_v51 = vpack.c.bf16 %v210_v41, %v210_v41  ;;  %v349_v52 = vpack.c.bf16 %v218_v42, %v218_v42  ;;  %v211_v53 = vmax.f32 %v157_v43, 0.0  ;;  %v219_v54 = vmax.f32 %v189_v44, 0.0 }
  0xef   :  { %v339_v55 = vpack.c.bf16 %v208_v47, %v208_v47  ;;  %v347_v56 = vpack.c.bf16 %v216_v48, %v216_v48  ;;  %v209_v57 = vmax.f32 %v149_v49, 0.0  ;;  %v217_v58 = vmax.f32 %v181_v50, 0.0 }
  0xf0   :  { %291 = vst.msk [vmem:[%s572_s3 + $0x8] sm:$0xf] %vm288_vm2, %v341_v51  ;;  %299 = vst.msk [vmem:[%s572_s3 + $0x28] sm:$0xf] %vm288_vm2, %v349_v52  ;;  %v342_v59 = vpack.c.bf16 %v211_v53, %v211_v53  ;;  %v350_v60 = vpack.c.bf16 %v219_v54, %v219_v54 }
  0xf1   :  { %289 = vst.msk [vmem:[%s572_s3] sm:$0xf] %vm288_vm2, %v339_v55  ;;  %297 = vst.msk [vmem:[%s572_s3 + $0x20] sm:$0xf] %vm288_vm2, %v347_v56  ;;  %v340_v61 = vpack.c.bf16 %v209_v57, %v209_v57  ;;  %v348_v62 = vpack.c.bf16 %v217_v58, %v217_v58  ;;  %v384_v63 = vpop.f32.mrb[4].mxu0  ;;  %v392_v0 = vpop.f32.mrb[4].mxu1 }
  0xf2   :  { %292 = vst.msk [vmem:[%s572_s3 + $0xc] sm:$0xf] %vm288_vm2, %v342_v59  ;;  %300 = vst.msk [vmem:[%s572_s3 + $0x2c] sm:$0xf] %vm288_vm2, %v350_v60  ;;  %v170_v1 = vadd.f32 %v384_v63, %v309_v30  ;;  %v202_v2 = vadd.f32 %v392_v0, %v309_v30  ;;  %v161_v3 = vpop.f32.mrb[5].mxu0  ;;  %v193_v4 = vpop.f32.mrb[5].mxu1 }
  0xf3   :  { %290 = vst.msk [vmem:[%s572_s3 + $0x4] sm:$0xf] %vm288_vm2, %v340_v61  ;;  %298 = vst.msk [vmem:[%s572_s3 + $0x24] sm:$0xf] %vm288_vm2, %v348_v62  ;;  %v162_v5 = vadd.f32 %v309_v30, %v161_v3  ;;  %v194_v6 = vadd.f32 %v309_v30, %v193_v4  ;;  %v385_v7 = vpop.f32.mrb[6].mxu0  ;;  %v393_v8 = vpop.f32.mrb[6].mxu1 }
  0xf4   :  { %v214_v9 = vmax.f32 %v170_v1, 0.0  ;;  %v222_v10 = vmax.f32 %v202_v2, 0.0  ;;  %v173_v11 = vadd.f32 %v385_v7, %v309_v30  ;;  %v205_v12 = vadd.f32 %v393_v8, %v309_v30  ;;  %v164_v13 = vpop.f32.mrb[7].mxu0  ;;  %v196_v14 = vpop.f32.mrb[7].mxu1 }
  0xf5   :  { %v212_v15 = vmax.f32 %v162_v5, 0.0  ;;  %v220_v16 = vmax.f32 %v194_v6, 0.0  ;;  %v165_v17 = vadd.f32 %v309_v30, %v164_v13  ;;  %v197_v18 = vadd.f32 %v309_v30, %v196_v14 }
  0xf6   :  { %v345_v19 = vpack.c.bf16 %v214_v9, %v214_v9  ;;  %v353_v20 = vpack.c.bf16 %v222_v10, %v222_v10  ;;  %v215_v21 = vmax.f32 %v173_v11, 0.0  ;;  %v223_v22 = vmax.f32 %v205_v12, 0.0 }
  0xf7   :  { %v343_v23 = vpack.c.bf16 %v212_v15, %v212_v15  ;;  %v351_v24 = vpack.c.bf16 %v220_v16, %v220_v16  ;;  %v213_v25 = vmax.f32 %v165_v17, 0.0  ;;  %v221_v26 = vmax.f32 %v197_v18, 0.0 }
  0xf8   :  { %295 = vst.msk [vmem:[%s572_s3 + $0x18] sm:$0xf] %vm288_vm2, %v345_v19  ;;  %303 = vst.msk [vmem:[%s572_s3 + $0x38] sm:$0xf] %vm288_vm2, %v353_v20  ;;  %v346_v27 = vpack.c.bf16 %v215_v21, %v215_v21  ;;  %v354_v28 = vpack.c.bf16 %v223_v22, %v223_v22 }
  0xf9   :  { %293 = vst.msk [vmem:[%s572_s3 + $0x10] sm:$0xf] %vm288_vm2, %v343_v23  ;;  %301 = vst.msk [vmem:[%s572_s3 + $0x30] sm:$0xf] %vm288_vm2, %v351_v24  ;;  %v344_v29 = vpack.c.bf16 %v213_v25, %v213_v25  ;;  %v352_v30 = vpack.c.bf16 %v221_v26, %v221_v26 }
  0xfa   :  { %296 = vst.msk [vmem:[%s572_s3 + $0x1c] sm:$0xf] %vm288_vm2, %v346_v27  ;;  %304 = vst.msk [vmem:[%s572_s3 + $0x3c] sm:$0xf] %vm288_vm2, %v354_v28 }
  0xfb   :  { %294 = vst.msk [vmem:[%s572_s3 + $0x14] sm:$0xf] %vm288_vm2, %v344_v29  ;;  %302 = vst.msk [vmem:[%s572_s3 + $0x34] sm:$0xf] %vm288_vm2, %v352_v30 }

// kernel: _dsfd_brnet_forward.24
= control target key start
LH: loop header
LB: loop body
LE: loop exit
PB: predicated region body
PF: predicated region fallthrough
CT: control target
= control target key end

     0   :  { %v259_v0 = vmov 0   ;;  %vm116_vm0 = vcmask 130048   ;;  %vm192_vm1 = vcmask 125952   ;;  %s334_s1 = inlined_call_operand.vmem [shape: bf16[144,16], index: 1, kind: input, shape index: {}]   ;;  %s335_s0 = inlined_call_operand.vmem [shape: bf16[32,144], index: 0, kind: input, shape index: {}]   ;;  %s336_s2 = inlined_call_operand.vmem [shape: f32[1,16], index: 2, kind: input, shape index: {}]   ;;  %s337_s3 = inlined_call_operand.vmem [shape: bf16[32,16], index: 3, kind: output, shape index: {}]  }
   0x1   :  { %123 = vmatprep.subr.bf16.mxu0 %v259_v0  ;;  %225 = vmatprep.subr.bf16.mxu1 %v259_v0  ;;  %v244_v1 = vld [vmem:[%s334_s1] sm:$0xff]   ;;  %v245_v2 = vld [vmem:[%s334_s1 + $0x8] sm:$0xff]   ;;  %v246_v3 = vld [vmem:[%s334_s1 + $0x10] sm:$0xff]  }
   0x2   :  { %124 = vmatpush1.bf16.msra.mxu0 %v244_v1  ;;  %234 = vmatpush1.bf16.msra.mxu1 %v244_v1  ;;  %v247_v4 = vld [vmem:[%s334_s1 + $0x18] sm:$0xff]   ;;  %v255_v5 = vld [vmem:[%s335_s0 + $0x4] ss:$8 sps:$4 sm:$0xff]   ;;  %v250_v9 = vld [vmem:[%s334_s1 + $0x30] sm:$0xff]  }
   0x3   :  { %125 = vmatprep.subr.bf16.mxu0 %v259_v0  ;;  %226 = vmatprep.subr.bf16.mxu1 %v259_v0  ;;  %v258_v6 = vld [vmem:[%s335_s0 + $0x14] ss:$8 sps:$4 sm:$0xff]   ;;  %v248_v7 = vld [vmem:[%s334_s1 + $0x20] sm:$0xff]   ;;  %v249_v8 = vld [vmem:[%s334_s1 + $0x28] sm:$0xff]  }
   0x4   :  { %215 = vmatprep.mubr.msk.bf16.mxu0 %vm116_vm0, %v255_v5  ;;  %216 = vmatprep.mubr.msk.bf16.mxu1 %vm116_vm0, %v258_v6  ;;  %v251_v10 = vld [vmem:[%s334_s1 + $0x38] sm:$0xff]   ;;  %v252_v11 = vld [vmem:[%s334_s1 + $0x40] sm:$0xff]  }
   0x5   :  { %v253_v12 = vld [vmem:[%s335_s0] ss:$8 sps:$4 sm:$0xff]   ;;  %v256_v13 = vld [vmem:[%s335_s0 + $0x10] ss:$8 sps:$4 sm:$0xff]  }
   0x6   :  { %126 = vmatpush1.bf16.msra.mxu0 %v245_v2  ;;  %235 = vmatpush1.bf16.msra.mxu1 %v245_v2  ;;  %v201_v14 = vld [vmem:[%s336_s2] ss:$0 sm:$0xff] }
   0x7   :  { %127 = vmatprep.subr.bf16.mxu0 %v259_v0  ;;  %227 = vmatprep.subr.bf16.mxu1 %v259_v0 }
   0xa   :  { %128 = vmatpush1.bf16.msra.mxu0 %v246_v3  ;;  %236 = vmatpush1.bf16.msra.mxu1 %v246_v3 }
   0xb   :  { %129 = vmatprep.subr.bf16.mxu0 %v259_v0  ;;  %228 = vmatprep.subr.bf16.mxu1 %v259_v0 }
   0xe   :  { %130 = vmatpush1.bf16.msra.mxu0 %v247_v4  ;;  %237 = vmatpush1.bf16.msra.mxu1 %v247_v4 }
   0xf   :  { %131 = vmatprep.subr.bf16.mxu0 %v259_v0  ;;  %229 = vmatprep.subr.bf16.mxu1 %v259_v0 }
  0x12   :  { %132 = vmatpush1.bf16.msra.mxu0 %v248_v7  ;;  %238 = vmatpush1.bf16.msra.mxu1 %v248_v7 }
  0x13   :  { %133 = vmatprep.subr.bf16.mxu0 %v259_v0  ;;  %230 = vmatprep.subr.bf16.mxu1 %v259_v0 }
  0x16   :  { %134 = vmatpush1.bf16.msra.mxu0 %v249_v8  ;;  %239 = vmatpush1.bf16.msra.mxu1 %v249_v8 }
  0x17   :  { %135 = vmatprep.subr.bf16.mxu0 %v259_v0  ;;  %231 = vmatprep.subr.bf16.mxu1 %v259_v0 }
  0x1a   :  { %136 = vmatpush1.bf16.msra.mxu0 %v250_v9  ;;  %240 = vmatpush1.bf16.msra.mxu1 %v250_v9 }
  0x1b   :  { %137 = vmatprep.subr.bf16.mxu0 %v259_v0  ;;  %232 = vmatprep.subr.bf16.mxu1 %v259_v0 }
  0x1e   :  { %138 = vmatpush1.bf16.msra.mxu0 %v251_v10  ;;  %241 = vmatpush1.bf16.msra.mxu1 %v251_v10 }
  0x1f   :  { %139 = vmatprep.subr.bf16.mxu0 %v259_v0  ;;  %233 = vmatprep.subr.bf16.mxu1 %v259_v0 }
  0x22   :  { %140 = vmatpush1.bf16.msra.mxu0 %v252_v11  ;;  %242 = vmatpush1.bf16.msra.mxu1 %v252_v11 }
  0x25   :  { %156 = vmatmul.mubr.bf16.vlgmr.msra.gmra.mrb[0].mxu0 %v253_v12  ;;  %164 = vmatmul.mubr.bf16.vlgmr.msra.gmra.mrb[0].mxu1 %v256_v13 }
  0xf8   :  { %v157_v15 = vpop.f32.mrb[0].mxu0  ;;  %v165_v16 = vpop.f32.mrb[0].mxu1 }
  0xf9   :  { %v158_v17 = vadd.f32 %v201_v14, %v157_v15  ;;  %v166_v18 = vadd.f32 %v201_v14, %v165_v16  ;;  %v159_v19 = vpop.f32.mrb[1].mxu0  ;;  %v167_v20 = vpop.f32.mrb[1].mxu1 }
  0xfa   :  { %v160_v21 = vpop.f32.mrb[2].mxu0  ;;  %v168_v22 = vpop.f32.mrb[2].mxu1 }
  0xfb   :  { %v172_v23 = vmax.f32 %v158_v17, 0.0  ;;  %v174_v24 = vmax.f32 %v166_v18, 0.0  ;;  %v161_v25 = vadd.f32 %v201_v14, %v160_v21  ;;  %v169_v26 = vadd.f32 %v201_v14, %v168_v22  ;;  %v162_v27 = vpop.f32.mrb[3].mxu0  ;;  %v170_v28 = vpop.f32.mrb[3].mxu1 }
  0xfd   :  { %v221_v29 = vpack.c.bf16 %v172_v23, %v172_v23  ;;  %v223_v30 = vpack.c.bf16 %v174_v24, %v174_v24  ;;  %v173_v31 = vmax.f32 %v161_v25, 0.0  ;;  %v175_v32 = vmax.f32 %v169_v26, 0.0 }
  0xff   :  { %193 = vst.msk [vmem:[%s337_s3] sm:$0xf] %vm192_vm1, %v221_v29  ;;  %195 = vst.msk [vmem:[%s337_s3 + $0x8] sm:$0xf] %vm192_vm1, %v223_v30  ;;  %v222_v33 = vpack.c.bf16 %v173_v31, %v173_v31  ;;  %v224_v34 = vpack.c.bf16 %v175_v32, %v175_v32 }
 0x101   :  { %194 = vst.msk [vmem:[%s337_s3 + $0x4] sm:$0xf] %vm192_vm1, %v222_v33  ;;  %196 = vst.msk [vmem:[%s337_s3 + $0xc] sm:$0xf] %vm192_vm1, %v224_v34 }

// kernel: _dsfd_brnet_forward.25
= control target key start
LH: loop header
LB: loop body
LE: loop exit
PB: predicated region body
PF: predicated region fallthrough
CT: control target
= control target key end

     0   :  { %v178_v0 = vmov 0   ;;  %vm101_vm0 = vcmask 130048   ;;  %vm147_vm1 = vcmask 125952   ;;  %s235_s1 = inlined_call_operand.vmem [shape: bf16[144,16], index: 1, kind: input, shape index: {}]   ;;  %s236_s0 = inlined_call_operand.vmem [shape: bf16[8,144], index: 0, kind: input, shape index: {}]   ;;  %s237_s2 = inlined_call_operand.vmem [shape: f32[1,16], index: 2, kind: input, shape index: {}]   ;;  %s238_s3 = inlined_call_operand.vmem [shape: bf16[8,16], index: 3, kind: output, shape index: {}]  }
   0x1   :  { %105 = vmatprep.subr.bf16.mxu0 %v178_v0  ;;  %v167_v1 = vld [vmem:[%s235_s1] sm:$0xff]   ;;  %v168_v2 = vld [vmem:[%s235_s1 + $0x8] sm:$0xff]   ;;  %v169_v3 = vld [vmem:[%s235_s1 + $0x10] sm:$0xff]  }
   0x2   :  { %106 = vmatpush1.bf16.msra.mxu0 %v167_v1  ;;  %v15_v4 = vld [vmem:[%s236_s0] sm:$0xff]  ;;  %v170_v5 = vld [vmem:[%s235_s1 + $0x18] sm:$0xff]   ;;  %v172_v8 = vld [vmem:[%s235_s1 + $0x28] sm:$0xff]  }
   0x3   :  { %107 = vmatprep.subr.bf16.mxu0 %v178_v0  ;;  %v155_v6 = vcombine.high %v15_v4, %v15_v4  ;;  %v171_v7 = vld [vmem:[%s235_s1 + $0x20] sm:$0xff]   ;;  %v173_v9 = vld [vmem:[%s235_s1 + $0x30] sm:$0xff]   ;;  %v174_v10 = vld [vmem:[%s235_s1 + $0x38] sm:$0xff]   ;;  %v154_v12 = vcombine.low %v15_v4, %v15_v4 }
   0x4   :  { %v175_v11 = vld [vmem:[%s235_s1 + $0x40] sm:$0xff]  }
   0x5   :  { %165 = vmatprep.mubr.msk.bf16.mxu0 %vm101_vm0, %v155_v6  ;;  %v153_v13 = vld [vmem:[%s237_s2] ss:$0 sm:$0xff] }
   0x6   :  { %108 = vmatpush1.bf16.msra.mxu0 %v168_v2 }
   0x7   :  { %109 = vmatprep.subr.bf16.mxu0 %v178_v0 }
   0xa   :  { %110 = vmatpush1.bf16.msra.mxu0 %v169_v3 }
   0xb   :  { %111 = vmatprep.subr.bf16.mxu0 %v178_v0 }
   0xe   :  { %112 = vmatpush1.bf16.msra.mxu0 %v170_v5 }
   0xf   :  { %113 = vmatprep.subr.bf16.mxu0 %v178_v0 }
  0x12   :  { %114 = vmatpush1.bf16.msra.mxu0 %v171_v7 }
  0x13   :  { %115 = vmatprep.subr.bf16.mxu0 %v178_v0 }
  0x16   :  { %116 = vmatpush1.bf16.msra.mxu0 %v172_v8 }
  0x17   :  { %117 = vmatprep.subr.bf16.mxu0 %v178_v0 }
  0x1a   :  { %118 = vmatpush1.bf16.msra.mxu0 %v173_v9 }
  0x1b   :  { %119 = vmatprep.subr.bf16.mxu0 %v178_v0 }
  0x1e   :  { %120 = vmatpush1.bf16.msra.mxu0 %v174_v10 }
  0x1f   :  { %121 = vmatprep.subr.bf16.mxu0 %v178_v0 }
  0x22   :  { %122 = vmatpush1.bf16.msra.mxu0 %v175_v11 }
  0x25   :  { %138 = vmatmul.mubr.bf16.vlgmr.msra.gmra.mrb[0].mxu0 %v154_v12 }
  0xf8   :  { %v139_v14 = vpop.f32.mrb[0].mxu0 }
  0xf9   :  { %v140_v15 = vadd.f32 %v153_v13, %v139_v14  ;;  %v141_v16 = vpop.f32.mrb[1].mxu0 }
  0xfa   :  { %v142_v17 = vpop.f32.mrb[2].mxu0 }
  0xfb   :  { %v145_v18 = vmax.f32 %v140_v15, 0.0  ;;  %v143_v19 = vpop.f32.mrb[3].mxu0 }
  0xfd   :  { %v146_v20 = vpack.c.bf16 %v145_v18, %v145_v18 }
  0xff   :  { %148 = vst.msk [vmem:[%s238_s3] sm:$0xf] %vm147_vm1, %v146_v20 }

// kernel: _dsfd_brnet_forward.29
= control target key start
LH: loop header
LB: loop body
LE: loop exit
PB: predicated region body
PF: predicated region fallthrough
CT: control target
= control target key end

     0   :  { %v110_v0 = vmov 0.0   ;;  %vm111_vm0 = vmmov 0   ;;  %vm39_vm1 = vcmask 261120   ;;  %vm85_vm2 = vcmask 125952   ;;  %s147_s1 = inlined_call_operand.vmem [shape: bf16[32,16], index: 1, kind: input, shape index: {}]   ;;  %s148_s0 = inlined_call_operand.vmem [shape: bf16[8,32], index: 0, kind: input, shape index: {}]   ;;  %s149_s2 = inlined_call_operand.vmem [shape: f32[1,16], index: 2, kind: input, shape index: {}]   ;;  %s150_s3 = inlined_call_operand.vmem [shape: bf16[8,16], index: 3, kind: output, shape index: {}]  }
   0x1   :  { %98 = vmatprep.subr.bf16.mxu0 %v110_v0  ;;  %v108_v1 = vld [vmem:[%s147_s1] sm:$0xff]   ;;  %102 = vmatprep.mubr.msk.bf16.mxu0 %vm111_vm0, %v110_v0  ;;  %v109_v2 = vld [vmem:[%s147_s1 + $0x8] sm:$0xff]  }
   0x2   :  { %99 = vmatpush3.bf16.msra.mxu0 %v108_v1  ;;  %v15_v3 = vld [vmem:[%s148_s0] sm:$0xf] }
   0x3   :  { %100 = vmatprep.subr.bf16.mxu0 %v110_v0  ;;  %v91_v4 = vld [vmem:[%s149_s2] ss:$0 sm:$0xff] }
   0x6   :  { %101 = vmatpush3.bf16.msra.mxu0 %v109_v2 }
   0x9   :  { %103 = vmatmul.mubr.msk.bf16.vlgmr.msra.gmra.mrb[0].mxu0 %vm39_vm1, %v15_v3 }
  0xdc   :  { %v77_v5 = vpop.f32.mrb[0].mxu0 }
  0xdd   :  { %v78_v6 = vadd.f32 %v91_v4, %v77_v5  ;;  %v104_v7 = vpop.f32.mrb[1].mxu0 }
  0xde   :  { %v80_v8 = vpop.f32.mrb[2].mxu0 }
  0xdf   :  { %v83_v9 = vmax.f32 %v78_v6, 0.0  ;;  %v105_v10 = vpop.f32.mrb[3].mxu0 }
  0xe1   :  { %v84_v11 = vpack.c.bf16 %v83_v9, %v83_v9 }
  0xe3   :  { %86 = vst.msk [vmem:[%s150_s3] sm:$0xf] %vm85_vm2, %v84_v11 }

// kernel: _dsfd_brnet_forward.26
= control target key start
LH: loop header
LB: loop body
LE: loop exit
PB: predicated region body
PF: predicated region fallthrough
CT: control target
= control target key end

     0   :  { %v178_v0 = vmov 0   ;;  %vm101_vm0 = vcmask 130048   ;;  %vm147_vm1 = vcmask 257024   ;;  %s235_s1 = inlined_call_operand.vmem [shape: bf16[144,32], index: 1, kind: input, shape index: {}]   ;;  %s236_s0 = inlined_call_operand.vmem [shape: bf16[8,144], index: 0, kind: input, shape index: {}]   ;;  %s237_s2 = inlined_call_operand.vmem [shape: f32[1,32], index: 2, kind: input, shape index: {}]   ;;  %s238_s3 = inlined_call_operand.vmem [shape: bf16[8,32], index: 3, kind: output, shape index: {}]  }
   0x1   :  { %105 = vmatprep.subr.bf16.mxu0 %v178_v0  ;;  %v167_v1 = vld [vmem:[%s235_s1] sm:$0xff]   ;;  %v168_v2 = vld [vmem:[%s235_s1 + $0x8] sm:$0xff]   ;;  %v169_v3 = vld [vmem:[%s235_s1 + $0x10] sm:$0xff]  }
   0x2   :  { %106 = vmatpush1.bf16.msra.mxu0 %v167_v1  ;;  %v15_v4 = vld [vmem:[%s236_s0] sm:$0xff]  ;;  %v170_v5 = vld [vmem:[%s235_s1 + $0x18] sm:$0xff]   ;;  %v172_v8 = vld [vmem:[%s235_s1 + $0x28] sm:$0xff]  }
   0x3   :  { %107 = vmatprep.subr.bf16.mxu0 %v178_v0  ;;  %v155_v6 = vcombine.high %v15_v4, %v15_v4  ;;  %v171_v7 = vld [vmem:[%s235_s1 + $0x20] sm:$0xff]   ;;  %v173_v9 = vld [vmem:[%s235_s1 + $0x30] sm:$0xff]   ;;  %v174_v10 = vld [vmem:[%s235_s1 + $0x38] sm:$0xff]   ;;  %v154_v12 = vcombine.low %v15_v4, %v15_v4 }
   0x4   :  { %v175_v11 = vld [vmem:[%s235_s1 + $0x40] sm:$0xff]  }
   0x5   :  { %165 = vmatprep.mubr.msk.bf16.mxu0 %vm101_vm0, %v155_v6  ;;  %v153_v13 = vld [vmem:[%s237_s2] ss:$0 sm:$0xff] }
   0x6   :  { %108 = vmatpush1.bf16.msra.mxu0 %v168_v2 }
   0x7   :  { %109 = vmatprep.subr.bf16.mxu0 %v178_v0 }
   0xa   :  { %110 = vmatpush1.bf16.msra.mxu0 %v169_v3 }
   0xb   :  { %111 = vmatprep.subr.bf16.mxu0 %v178_v0 }
   0xe   :  { %112 = vmatpush1.bf16.msra.mxu0 %v170_v5 }
   0xf   :  { %113 = vmatprep.subr.bf16.mxu0 %v178_v0 }
  0x12   :  { %114 = vmatpush1.bf16.msra.mxu0 %v171_v7 }
  0x13   :  { %115 = vmatprep.subr.bf16.mxu0 %v178_v0 }
  0x16   :  { %116 = vmatpush1.bf16.msra.mxu0 %v172_v8 }
  0x17   :  { %117 = vmatprep.subr.bf16.mxu0 %v178_v0 }
  0x1a   :  { %118 = vmatpush1.bf16.msra.mxu0 %v173_v9 }
  0x1b   :  { %119 = vmatprep.subr.bf16.mxu0 %v178_v0 }
  0x1e   :  { %120 = vmatpush1.bf16.msra.mxu0 %v174_v10 }
  0x1f   :  { %121 = vmatprep.subr.bf16.mxu0 %v178_v0 }
  0x22   :  { %122 = vmatpush1.bf16.msra.mxu0 %v175_v11 }
  0x25   :  { %138 = vmatmul.mubr.bf16.vlgmr.msra.gmra.mrb[0].mxu0 %v154_v12 }
  0xf8   :  { %v139_v14 = vpop.f32.mrb[0].mxu0 }
  0xf9   :  { %v140_v15 = vadd.f32 %v153_v13, %v139_v14  ;;  %v141_v16 = vpop.f32.mrb[1].mxu0 }
  0xfa   :  { %v142_v17 = vpop.f32.mrb[2].mxu0 }
  0xfb   :  { %v145_v18 = vmax.f32 %v140_v15, 0.0  ;;  %v143_v19 = vpop.f32.mrb[3].mxu0 }
  0xfd   :  { %v146_v20 = vpack.c.bf16 %v145_v18, %v145_v18 }
  0xff   :  { %148 = vst.msk [vmem:[%s238_s3] sm:$0xf] %vm147_vm1, %v146_v20 }

// kernel: _dsfd_brnet_forward.31
= control target key start
LH: loop header
LB: loop body
LE: loop exit
PB: predicated region body
PF: predicated region fallthrough
CT: control target
= control target key end

     0   :  { %v110_v0 = vmov 0.0   ;;  %vm111_vm0 = vmmov 0   ;;  %vm39_vm1 = vcmask 261120   ;;  %vm85_vm2 = vcmask 122880   ;;  %s147_s1 = inlined_call_operand.vmem [shape: bf16[32,16], index: 1, kind: input, shape index: {}]   ;;  %s148_s0 = inlined_call_operand.vmem [shape: bf16[2,32], index: 0, kind: input, shape index: {}]   ;;  %s149_s2 = inlined_call_operand.vmem [shape: f32[1,16], index: 2, kind: input, shape index: {}]   ;;  %s150_s3 = inlined_call_operand.vmem [shape: bf16[2,16], index: 3, kind: output, shape index: {}]  }
   0x1   :  { %98 = vmatprep.subr.bf16.mxu0 %v110_v0  ;;  %v108_v1 = vld [vmem:[%s147_s1] sm:$0xff]   ;;  %102 = vmatprep.mubr.msk.bf16.mxu0 %vm111_vm0, %v110_v0  ;;  %v109_v2 = vld [vmem:[%s147_s1 + $0x8] sm:$0xff]  }
   0x2   :  { %99 = vmatpush3.bf16.msra.mxu0 %v108_v1  ;;  %v15_v3 = vld [vmem:[%s148_s0] sm:$0x1] }
   0x3   :  { %100 = vmatprep.subr.bf16.mxu0 %v110_v0  ;;  %v91_v4 = vld [vmem:[%s149_s2] ss:$0 sm:$0xff] }
   0x6   :  { %101 = vmatpush3.bf16.msra.mxu0 %v109_v2 }
   0x9   :  { %103 = vmatmul.mubr.msk.bf16.vlgmr.msra.gmra.mrb[0].mxu0 %vm39_vm1, %v15_v3 }
  0xdc   :  { %v77_v5 = vpop.f32.mrb[0].mxu0 }
  0xdd   :  { %v78_v6 = vadd.f32 %v91_v4, %v77_v5  ;;  %v104_v7 = vpop.f32.mrb[1].mxu0 }
  0xde   :  { %v80_v8 = vpop.f32.mrb[2].mxu0 }
  0xdf   :  { %v83_v9 = vmax.f32 %v78_v6, 0.0  ;;  %v105_v10 = vpop.f32.mrb[3].mxu0 }
  0xe1   :  { %v84_v11 = vpack.c.bf16 %v83_v9, %v83_v9 }
  0xe3   :  { %86 = vst.msk [vmem:[%s150_s3] sm:$0x1] %vm85_vm2, %v84_v11 }

// kernel: _dsfd_brnet_forward.34
= control target key start
LH: loop header
LB: loop body
LE: loop exit
PB: predicated region body
PF: predicated region fallthrough
CT: control target
= control target key end

     0   :  { %v110_v0 = vmov 0.0   ;;  %vm111_vm0 = vmmov 0   ;;  %vm39_vm1 = vcmask 261120   ;;  %vm85_vm2 = vcmask 253952   ;;  %s147_s1 = inlined_call_operand.vmem [shape: bf16[32,32], index: 1, kind: input, shape index: {}]   ;;  %s148_s0 = inlined_call_operand.vmem [shape: bf16[2,32], index: 0, kind: input, shape index: {}]   ;;  %s149_s2 = inlined_call_operand.vmem [shape: f32[1,32], index: 2, kind: input, shape index: {}]   ;;  %s150_s3 = inlined_call_operand.vmem [shape: bf16[2,32], index: 3, kind: output, shape index: {}]  }
   0x1   :  { %98 = vmatprep.subr.bf16.mxu0 %v110_v0  ;;  %v108_v1 = vld [vmem:[%s147_s1] sm:$0xff]   ;;  %102 = vmatprep.mubr.msk.bf16.mxu0 %vm111_vm0, %v110_v0  ;;  %v109_v2 = vld [vmem:[%s147_s1 + $0x8] sm:$0xff]  }
   0x2   :  { %99 = vmatpush3.bf16.msra.mxu0 %v108_v1  ;;  %v15_v3 = vld [vmem:[%s148_s0] sm:$0x1] }
   0x3   :  { %100 = vmatprep.subr.bf16.mxu0 %v110_v0  ;;  %v91_v4 = vld [vmem:[%s149_s2] ss:$0 sm:$0xff] }
   0x6   :  { %101 = vmatpush3.bf16.msra.mxu0 %v109_v2 }
   0x9   :  { %103 = vmatmul.mubr.msk.bf16.vlgmr.msra.gmra.mrb[0].mxu0 %vm39_vm1, %v15_v3 }
  0xdc   :  { %v77_v5 = vpop.f32.mrb[0].mxu0 }
  0xdd   :  { %v78_v6 = vadd.f32 %v91_v4, %v77_v5  ;;  %v104_v7 = vpop.f32.mrb[1].mxu0 }
  0xde   :  { %v80_v8 = vpop.f32.mrb[2].mxu0 }
  0xdf   :  { %v83_v9 = vmax.f32 %v78_v6, 0.0  ;;  %v105_v10 = vpop.f32.mrb[3].mxu0 }
  0xe1   :  { %v84_v11 = vpack.c.bf16 %v83_v9, %v83_v9 }
  0xe3   :  { %86 = vst.msk [vmem:[%s150_s3] sm:$0x1] %vm85_vm2, %v84_v11 }

// kernel: _dsfd_brnet_forward.30
= control target key start
LH: loop header
LB: loop body
LE: loop exit
PB: predicated region body
PF: predicated region fallthrough
CT: control target
= control target key end

     0   :  { %v194_v0 = vmov 0   ;;  %v195_v2 = vmov 1966171168   ;;  %v53_v4 = vlaneseq  ;;  %vm119_vm0 = vcmask 130048   ;;  %s252_s1 = inlined_call_operand.vmem [shape: bf16[144,32], index: 1, kind: input, shape index: {}]   ;;  %s253_s0 = inlined_call_operand.vmem [shape: bf16[2,144], index: 0, kind: input, shape index: {}]   ;;  %s254_s2 = inlined_call_operand.vmem [shape: f32[1,32], index: 2, kind: input, shape index: {}]   ;;  %s255_s3 = inlined_call_operand.vmem [shape: bf16[2,32], index: 3, kind: output, shape index: {}]  }
   0x1   :  { %123 = vmatprep.subr.bf16.mxu0 %v194_v0  ;;  %v185_v1 = vld [vmem:[%s252_s1] sm:$0xff]   ;;  %v51_v3 = vunpack.c.l.s4 %v195_v2  ;;  %v186_v5 = vld [vmem:[%s252_s1 + $0x8] sm:$0xff]   ;;  %v187_v8 = vld [vmem:[%s252_s1 + $0x10] sm:$0xff]   ;;  %vm165_vm1 = vcmask 253952  }
   0x2   :  { %124 = vmatpush1.bf16.msra.mxu0 %v185_v1  ;;  %v54_v7 = vshrl.u32 %v53_v4, 7  ;;  %v172_v10 = vld.sshfl [vmem:[%s253_s0] sm:$0x11 pattern:$0x75316420]  ;;  %v188_v11 = vld [vmem:[%s252_s1 + $0x18] sm:$0xff]  }
   0x3   :  { %125 = vmatprep.subr.bf16.mxu0 %v194_v0  ;;  %v52_v6 = vunpack.c.0.s8 %v51_v3  ;;  %v49_v12 = vcombine.high %v172_v10, %v172_v10  ;;  %v189_v14 = vld [vmem:[%s252_s1 + $0x20] sm:$0xff]   ;;  %v190_v15 = vld [vmem:[%s252_s1 + $0x28] sm:$0xff]   ;;  %v191_v16 = vld [vmem:[%s252_s1 + $0x30] sm:$0xff]  }
   0x4   :  { %v192_v17 = vld [vmem:[%s252_s1 + $0x38] sm:$0xff]   ;;  %v193_v18 = vld [vmem:[%s252_s1 + $0x40] sm:$0xff]  }
   0x5   :  { %v55_v9 = vsub.s32 %v52_v6, %v54_v7  ;;  %v171_v20 = vld [vmem:[%s254_s2] ss:$0 sm:$0xff] }
   0x6   :  { %126 = vmatpush1.bf16.msra.mxu0 %v186_v5 }
   0x7   :  { %127 = vmatprep.subr.bf16.mxu0 %v194_v0  ;;  %v63_v13 = vrot.slane %v49_v12, %v55_v9  ;;  %v56_v19 = vrot.slane %v172_v10, %v55_v9 }
   0x9   :  { %182 = vmatprep.mubr.msk.bf16.mxu0 %vm119_vm0, %v63_v13 }
   0xa   :  { %128 = vmatpush1.bf16.msra.mxu0 %v187_v8 }
   0xb   :  { %129 = vmatprep.subr.bf16.mxu0 %v194_v0 }
   0xe   :  { %130 = vmatpush1.bf16.msra.mxu0 %v188_v11 }
   0xf   :  { %131 = vmatprep.subr.bf16.mxu0 %v194_v0 }
  0x12   :  { %132 = vmatpush1.bf16.msra.mxu0 %v189_v14 }
  0x13   :  { %133 = vmatprep.subr.bf16.mxu0 %v194_v0 }
  0x16   :  { %134 = vmatpush1.bf16.msra.mxu0 %v190_v15 }
  0x17   :  { %135 = vmatprep.subr.bf16.mxu0 %v194_v0 }
  0x1a   :  { %136 = vmatpush1.bf16.msra.mxu0 %v191_v16 }
  0x1b   :  { %137 = vmatprep.subr.bf16.mxu0 %v194_v0 }
  0x1e   :  { %138 = vmatpush1.bf16.msra.mxu0 %v192_v17 }
  0x1f   :  { %139 = vmatprep.subr.bf16.mxu0 %v194_v0 }
  0x22   :  { %140 = vmatpush1.bf16.msra.mxu0 %v193_v18 }
  0x25   :  { %156 = vmatmul.mubr.bf16.vlgmr.msra.gmra.mrb[0].mxu0 %v56_v19 }
  0xf8   :  { %v157_v21 = vpop.f32.mrb[0].mxu0 }
  0xf9   :  { %v158_v22 = vadd.f32 %v171_v20, %v157_v21  ;;  %v159_v23 = vpop.f32.mrb[1].mxu0 }
  0xfa   :  { %v160_v24 = vpop.f32.mrb[2].mxu0 }
  0xfb   :  { %v163_v25 = vmax.f32 %v158_v22, 0.0  ;;  %v161_v26 = vpop.f32.mrb[3].mxu0 }
  0xfd   :  { %v164_v27 = vpack.c.bf16 %v163_v25, %v163_v25 }
  0xff   :  { %166 = vst.msk [vmem:[%s255_s3] sm:$0x1] %vm165_vm1, %v164_v27 }

// kernel: _dsfd_brnet_forward.28
= control target key start
LH: loop header
LB: loop body
LE: loop exit
PB: predicated region body
PF: predicated region fallthrough
CT: control target
= control target key end

     0   :  { %s619_s9 = smov 0   ;;  %s805_s0 = inlined_call_operand.vmem [shape: bf16[3,128,16], index: 0, kind: input, shape index: {}]   ;;  %s806_s1 = inlined_call_operand.vmem [shape: f32[3,1,16], index: 1, kind: input, shape index: {}]   ;;  %s807_s2 = inlined_call_operand.vmem [shape: bf16[3,128,16], index: 2, kind: output, shape index: {}]  }
   0x1 LB: > { %s471_s10 = sadd.s32 4294967295, %s602_s9   ;;  %p475_p0 = scmp.ge.s32.totalorder %s602_s9, 1  ;;  %s602_s9 = sphi %s619_s9, %s12_s9  }
   0x2   : > { %p120_p1 = scmp.lt.s32.totalorder %s602_s9, 4 }
   0x4   : > { %p121_p2 = pnand %p475_p0, %p120_p1 }
   0x5   : > { %p145_p3 = scmp.lt.s32.totalorder (!%p121_p2), %s471_s10, 2  ;;  %vm206_vm0 = vcmask (!%p121_p2), 130048   ;;  %vm390_vm1 = vcmask (!%p121_p2), 125952  }
   0x6   : > { %124 = sbr.rel (%p121_p2) target bundleno = 213 (0xd5), region = 28 }
   0xd   : > { %s809_s10 = smov (!%p145_p3, %s471_s10), 2 }
   0xe   : > { %s499_s11 = sshll.u32 %s809_s10, 6  ;;  %s152_s17 = scalar_lea.vmem %s806_s1, %s809_s10 }
   0xf   : > { %s635_s14 = scalar_lea.vmem %s805_s0, %s499_s11  ;;  %s739_s20 = scalar_lea.vmem %s807_s2, %s499_s11 }
  0x10   : > { %v549_v0 = vld [vmem:[%s635_s14 + $0x8] sm:$0xff]   ;;  %v518_v1 = vld [vmem:[%s635_s14] sm:$0xff]   ;;  %v550_v2 = vld [vmem:[%s635_s14 + $0x10] sm:$0xff]  }
  0x11   : > { %v640_v3 = vunpack.c.l.bf16 %v549_v0  ;;  %v642_v4 = vunpack.c.l.bf16 %v518_v1  ;;  %v644_v5 = vunpack.c.h.bf16 %v549_v0  ;;  %v646_v6 = vunpack.c.h.bf16 %v518_v1  ;;  %v551_v13 = vld [vmem:[%s635_s14 + $0x18] sm:$0xff]   ;;  %v552_v22 = vld [vmem:[%s635_s14 + $0x20] sm:$0xff]   ;;  %v553_v29 = vld [vmem:[%s635_s14 + $0x28] sm:$0xff]  }
  0x12   : > { %v648_v7 = vunpack.c.h.bf16 %v550_v2  ;;  %v650_v8 = vunpack.c.l.bf16 %v550_v2  ;;  %v663_v16 = vunpack.c.h.bf16 %v551_v13  ;;  %v665_v17 = vunpack.c.l.bf16 %v551_v13  ;;  %v554_v36 = vld [vmem:[%s635_s14 + $0x30] sm:$0xff]   ;;  %v555_v43 = vld [vmem:[%s635_s14 + $0x38] sm:$0xff]   ;;  %v729_v13 = vld [vmem:[%s152_s17] ss:$0 sm:$0xff] }
  0x13   : > { %v192_v9 = vmul.f32 %v640_v3, %v640_v3  ;;  %v190_v10 = vmul.f32 %v642_v4, %v642_v4  ;;  %v193_v11 = vmul.f32 %v644_v5, %v644_v5  ;;  %v191_v12 = vmul.f32 %v646_v6, %v646_v6 }
  0x14   : > { %v195_v20 = vmul.f32 %v648_v7, %v648_v7  ;;  %v194_v21 = vmul.f32 %v650_v8, %v650_v8  ;;  %v197_v23 = vmul.f32 %v663_v16, %v663_v16  ;;  %v196_v24 = vmul.f32 %v665_v17, %v665_v17 }
  0x15   : > { %v213_v14 = vsel %vm206_vm0, %v192_v9, 0.0  ;;  %v207_v15 = vsel %vm206_vm0, %v190_v10, 0.0  ;;  %v216_v18 = vsel %vm206_vm0, %v193_v11, 0.0  ;;  %v210_v19 = vsel %vm206_vm0, %v191_v12, 0.0 }
  0x16   : > { %214 = vadd.xlane.f32.xlu1 %v213_v14  ;;  %208 = vadd.xlane.f32.xlu0 %v207_v15  ;;  %v222_v25 = vsel %vm206_vm0, %v195_v20, 0.0  ;;  %v219_v26 = vsel %vm206_vm0, %v194_v21, 0.0  ;;  %v680_v27 = vunpack.c.h.bf16 %v552_v22  ;;  %v682_v28 = vunpack.c.l.bf16 %v552_v22 }
  0x17   : > { %v228_v30 = vsel %vm206_vm0, %v197_v23, 0.0  ;;  %v225_v31 = vsel %vm206_vm0, %v196_v24, 0.0  ;;  %v691_v34 = vunpack.c.h.bf16 %v553_v29  ;;  %v693_v35 = vunpack.c.l.bf16 %v553_v29 }
  0x18   : > { %v199_v32 = vmul.f32 %v680_v27, %v680_v27  ;;  %v198_v33 = vmul.f32 %v682_v28, %v682_v28  ;;  %v696_v37 = vunpack.c.h.bf16 %v554_v36  ;;  %v698_v38 = vunpack.c.l.bf16 %v554_v36 }
  0x19   : > { %v201_v41 = vmul.f32 %v691_v34, %v691_v34  ;;  %v200_v42 = vmul.f32 %v693_v35, %v693_v35  ;;  %v707_v44 = vunpack.c.h.bf16 %v555_v43  ;;  %v709_v45 = vunpack.c.l.bf16 %v555_v43 }
  0x1a   : > { %217 = vadd.xlane.f32.xlu1 %v216_v18  ;;  %211 = vadd.xlane.f32.xlu0 %v210_v19  ;;  %v234_v39 = vsel %vm206_vm0, %v199_v32, 0.0  ;;  %v231_v40 = vsel %vm206_vm0, %v198_v33, 0.0  ;;  %v203_v48 = vmul.f32 %v696_v37, %v696_v37  ;;  %v202_v49 = vmul.f32 %v698_v38, %v698_v38 }
  0x1b   : > { %v240_v46 = vsel %vm206_vm0, %v201_v41, 0.0  ;;  %v237_v47 = vsel %vm206_vm0, %v200_v42, 0.0  ;;  %v205_v52 = vmul.f32 %v707_v44, %v707_v44  ;;  %v204_v53 = vmul.f32 %v709_v45, %v709_v45 }
  0x1c   : > { %v246_v50 = vsel %vm206_vm0, %v203_v48, 0.0  ;;  %v243_v51 = vsel %vm206_vm0, %v202_v49, 0.0 }
  0x1d   : > { %v252_v54 = vsel %vm206_vm0, %v205_v52, 0.0  ;;  %v249_v55 = vsel %vm206_vm0, %v204_v53, 0.0 }
  0x1e   : > { %223 = vadd.xlane.f32.xlu1 %v222_v25  ;;  %220 = vadd.xlane.f32.xlu0 %v219_v26 }
  0x22   : > { %229 = vadd.xlane.f32.xlu1 %v228_v30  ;;  %226 = vadd.xlane.f32.xlu0 %v225_v31 }
  0x26   : > { %235 = vadd.xlane.f32.xlu1 %v234_v39  ;;  %232 = vadd.xlane.f32.xlu0 %v231_v40 }
  0x2a   : > { %241 = vadd.xlane.f32.xlu1 %v240_v46  ;;  %238 = vadd.xlane.f32.xlu0 %v237_v47 }
  0x2e   : > { %247 = vadd.xlane.f32.xlu1 %v246_v50  ;;  %244 = vadd.xlane.f32.xlu0 %v243_v51 }
  0x32   : > { %253 = vadd.xlane.f32.xlu1 %v252_v54  ;;  %250 = vadd.xlane.f32.xlu0 %v249_v55 }
  0xa3   : > { %v215_v56 = vpop.xlane.xlu1 %214  ;;  %v209_v57 = vpop.xlane.xlu0 %208 }
  0xa4   : > { %v257_v58 = vadd.f32 1e-20, %v215_v56  ;;  %v255_v59 = vadd.f32 1e-20, %v209_v57 }
  0xa6   : > { %564 = vrsqrt.f32 %v257_v58 }
  0xa7   : > { %566 = vrsqrt.f32 %v255_v59  ;;  %v218_v60 = vpop.xlane.xlu1 %217  ;;  %v212_v61 = vpop.xlane.xlu0 %211 }
  0xa8   : > { %v258_v62 = vadd.f32 1e-20, %v218_v60  ;;  %v256_v63 = vadd.f32 1e-20, %v212_v61 }
  0xaa   : > { %568 = vrsqrt.f32 %v258_v62 }
  0xab   : > { %570 = vrsqrt.f32 %v256_v63  ;;  %v224_v0 = vpop.xlane.xlu1 %223  ;;  %v221_v1 = vpop.xlane.xlu0 %220 }
  0xac   : > { %v260_v2 = vadd.f32 1e-20, %v224_v0  ;;  %v259_v9 = vadd.f32 1e-20, %v221_v1 }
  0xae   : > { %572 = vrsqrt.f32 %v260_v2 }
  0xaf   : > { %574 = vrsqrt.f32 %v259_v9  ;;  %v230_v10 = vpop.xlane.xlu1 %229  ;;  %v227_v11 = vpop.xlane.xlu0 %226 }
  0xb0   : > { %v565_v12 = vpop.eup %564  ;;  %v262_v14 = vadd.f32 1e-20, %v230_v10  ;;  %v261_v15 = vadd.f32 1e-20, %v227_v11 }
  0xb1   : > { %v567_v18 = vpop.eup %566  ;;  %v289_v19 = vmul.f32 %v565_v12, %v640_v3 }
  0xb2   : > { %v287_v20 = vmul.f32 %v567_v18, %v642_v4  ;;  %576 = vrsqrt.f32 %v262_v14 }
  0xb3   : > { %v312_v21 = vmul.f32 %v729_v13, %v289_v19  ;;  %578 = vrsqrt.f32 %v261_v15  ;;  %v236_v22 = vpop.xlane.xlu1 %235  ;;  %v233_v23 = vpop.xlane.xlu0 %232 }
  0xb4   : > { %v569_v24 = vpop.eup %568  ;;  %v310_v3 = vmul.f32 %v729_v13, %v287_v20  ;;  %v264_v25 = vadd.f32 1e-20, %v236_v22  ;;  %v263_v4 = vadd.f32 1e-20, %v233_v23 }
  0xb5   : > { %v571_v26 = vpop.eup %570  ;;  %v503_v29 = vpack.c.bf16 %v312_v21, %v312_v21  ;;  %v290_v30 = vmul.f32 %v569_v24, %v644_v5 }
  0xb6   : > { %v501_v31 = vpack.c.bf16 %v310_v3, %v310_v3  ;;  %v288_v32 = vmul.f32 %v571_v26, %v646_v6  ;;  %580 = vrsqrt.f32 %v264_v25 }
  0xb7   : > { %393 = vst.msk [vmem:[%s739_s20 + $0x8] sm:$0xf] %vm390_vm1, %v503_v29  ;;  %v313_v33 = vmul.f32 %v729_v13, %v290_v30  ;;  %582 = vrsqrt.f32 %v263_v4  ;;  %v242_v36 = vpop.xlane.xlu1 %241  ;;  %v239_v39 = vpop.xlane.xlu0 %238 }
  0xb8   : > { %v573_v40 = vpop.eup %572  ;;  %391 = vst.msk [vmem:[%s739_s20] sm:$0xf] %vm390_vm1, %v501_v31  ;;  %v311_v41 = vmul.f32 %v729_v13, %v288_v32  ;;  %v266_v42 = vadd.f32 1e-20, %v242_v36  ;;  %v265_v5 = vadd.f32 1e-20, %v239_v39 }
  0xb9   : > { %v575_v43 = vpop.eup %574  ;;  %v504_v46 = vpack.c.bf16 %v313_v33, %v313_v33  ;;  %v292_v6 = vmul.f32 %v573_v40, %v648_v7 }
  0xba   : > { %v502_v47 = vpack.c.bf16 %v311_v41, %v311_v41  ;;  %v291_v48 = vmul.f32 %v575_v43, %v650_v8  ;;  %584 = vrsqrt.f32 %v266_v42 }
  0xbb   : > { %394 = vst.msk [vmem:[%s739_s20 + $0xc] sm:$0xf] %vm390_vm1, %v504_v46  ;;  %v315_v49 = vmul.f32 %v729_v13, %v292_v6  ;;  %586 = vrsqrt.f32 %v265_v5  ;;  %v248_v50 = vpop.xlane.xlu1 %247  ;;  %v245_v51 = vpop.xlane.xlu0 %244 }
  0xbc   : > { %v577_v52 = vpop.eup %576  ;;  %392 = vst.msk [vmem:[%s739_s20 + $0x4] sm:$0xf] %vm390_vm1, %v502_v47  ;;  %v314_v53 = vmul.f32 %v729_v13, %v291_v48  ;;  %v268_v54 = vadd.f32 1e-20, %v248_v50  ;;  %v267_v7 = vadd.f32 1e-20, %v245_v51 }
  0xbd   : > { %v579_v55 = vpop.eup %578  ;;  %v506_v56 = vpack.c.bf16 %v315_v49, %v315_v49  ;;  %v294_v8 = vmul.f32 %v577_v52, %v663_v16 }
  0xbe   : > { %v505_v57 = vpack.c.bf16 %v314_v53, %v314_v53  ;;  %v293_v58 = vmul.f32 %v579_v55, %v665_v17  ;;  %588 = vrsqrt.f32 %v268_v54 }
  0xbf   : > { %396 = vst.msk [vmem:[%s739_s20 + $0x14] sm:$0xf] %vm390_vm1, %v506_v56  ;;  %v317_v59 = vmul.f32 %v729_v13, %v294_v8  ;;  %590 = vrsqrt.f32 %v267_v7  ;;  %v254_v60 = vpop.xlane.xlu1 %253  ;;  %v251_v61 = vpop.xlane.xlu0 %250 }
  0xc0   : > { %v581_v62 = vpop.eup %580  ;;  %395 = vst.msk [vmem:[%s739_s20 + $0x10] sm:$0xf] %vm390_vm1, %v505_v57  ;;  %v316_v63 = vmul.f32 %v729_v13, %v293_v58  ;;  %v270_v0 = vadd.f32 1e-20, %v254_v60  ;;  %v269_v16 = vadd.f32 1e-20, %v251_v61 }
  0xc1   : > { %v583_v1 = vpop.eup %582  ;;  %v508_v2 = vpack.c.bf16 %v317_v59, %v317_v59  ;;  %v296_v17 = vmul.f32 %v581_v62, %v680_v27 }
  0xc2   : > { %v507_v9 = vpack.c.bf16 %v316_v63, %v316_v63  ;;  %v295_v10 = vmul.f32 %v583_v1, %v682_v28  ;;  %592 = vrsqrt.f32 %v270_v0 }
  0xc3   : > { %398 = vst.msk [vmem:[%s739_s20 + $0x1c] sm:$0xf] %vm390_vm1, %v508_v2  ;;  %v319_v11 = vmul.f32 %v729_v13, %v296_v17  ;;  %594 = vrsqrt.f32 %v269_v16 }
  0xc4   : > { %v585_v12 = vpop.eup %584  ;;  %397 = vst.msk [vmem:[%s739_s20 + $0x18] sm:$0xf] %vm390_vm1, %v507_v9  ;;  %v318_v14 = vmul.f32 %v729_v13, %v295_v10 }
  0xc5   : > { %v587_v15 = vpop.eup %586  ;;  %v510_v18 = vpack.c.bf16 %v319_v11, %v319_v11  ;;  %v298_v27 = vmul.f32 %v585_v12, %v691_v34 }
  0xc6   : > { %v509_v19 = vpack.c.bf16 %v318_v14, %v318_v14  ;;  %v297_v28 = vmul.f32 %v587_v15, %v693_v35 }
  0xc7   : > { %400 = vst.msk [vmem:[%s739_s20 + $0x24] sm:$0xf] %vm390_vm1, %v510_v18  ;;  %v321_v20 = vmul.f32 %v729_v13, %v298_v27 }
  0xc8   : > { %v589_v21 = vpop.eup %588  ;;  %399 = vst.msk [vmem:[%s739_s20 + $0x20] sm:$0xf] %vm390_vm1, %v509_v19  ;;  %v320_v22 = vmul.f32 %v729_v13, %v297_v28 }
  0xc9   : > { %v591_v23 = vpop.eup %590  ;;  %v512_v24 = vpack.c.bf16 %v321_v20, %v321_v20  ;;  %v300_v3 = vmul.f32 %v589_v21, %v696_v37 }
  0xca   : > { %v511_v34 = vpack.c.bf16 %v320_v22, %v320_v22  ;;  %v299_v25 = vmul.f32 %v591_v23, %v698_v38 }
  0xcb   : > { %402 = vst.msk [vmem:[%s739_s20 + $0x2c] sm:$0xf] %vm390_vm1, %v512_v24  ;;  %v323_v35 = vmul.f32 %v729_v13, %v300_v3 }
  0xcc   : > { %v593_v4 = vpop.eup %592  ;;  %401 = vst.msk [vmem:[%s739_s20 + $0x28] sm:$0xf] %vm390_vm1, %v511_v34  ;;  %v322_v26 = vmul.f32 %v729_v13, %v299_v25 }
  0xcd   : > { %v595_v29 = vpop.eup %594  ;;  %v514_v30 = vpack.c.bf16 %v323_v35, %v323_v35  ;;  %v302_v31 = vmul.f32 %v593_v4, %v707_v44 }
  0xce   : > { %v513_v32 = vpack.c.bf16 %v322_v26, %v322_v26  ;;  %v301_v37 = vmul.f32 %v595_v29, %v709_v45 }
  0xcf   : > { %404 = vst.msk [vmem:[%s739_s20 + $0x34] sm:$0xf] %vm390_vm1, %v514_v30  ;;  %v325_v38 = vmul.f32 %v729_v13, %v302_v31 }
  0xd0   : > { %403 = vst.msk [vmem:[%s739_s20 + $0x30] sm:$0xf] %vm390_vm1, %v513_v32  ;;  %v324_v33 = vmul.f32 %v729_v13, %v301_v37 }
  0xd1   : > { %v516_v36 = vpack.c.bf16 %v325_v38, %v325_v38 }
  0xd2   : > { %v515_v39 = vpack.c.bf16 %v324_v33, %v324_v33 }
  0xd3   : > { %406 = vst.msk [vmem:[%s739_s20 + $0x3c] sm:$0xf] %vm390_vm1, %v516_v36 }
  0xd4   : > { %405 = vst.msk [vmem:[%s739_s20 + $0x38] sm:$0xf] %vm390_vm1, %v515_v39 }
  0xd5 PF: > { %s12_s9 = sadd.s32 1, %s602_s9  }
  0xd6   : > { %p9_p4 = scmp.ge.s32.totalorder %s12_s9, 5  }
  0xd8   :  { %11 = sbr.rel (!%p9_p4) target bundleno = 1 (0x1), region = 61 }

// kernel: _dsfd_brnet_forward.33
= control target key start
LH: loop header
LB: loop body
LE: loop exit
PB: predicated region body
PF: predicated region fallthrough
CT: control target
= control target key end

     0   :  { %s614_s12 = smov 0   ;;  %s685_s0 = inlined_call_operand.vmem [shape: bf16[5,128,32], index: 0, kind: input, shape index: {}]   ;;  %s686_s1 = inlined_call_operand.vmem [shape: bf16[5,32,32], index: 1, kind: input, shape index: {}]   ;;  %s687_s2 = inlined_call_operand.vmem [shape: f32[5,1,32], index: 2, kind: input, shape index: {}]   ;;  %s688_s3 = inlined_call_operand.vmem [shape: f32[5,128,32], index: 3, kind: output, shape index: {}]  }
   0x1 LB: > { %s499_s13 = sadd.s32 4294967295, %s592_s12   ;;  %p503_p0 = scmp.ge.s32.totalorder %s592_s12, 1  ;;  %s592_s12 = sphi %s614_s12, %s13_s12  }
   0x2   : > { %p155_p1 = scmp.lt.s32.totalorder %s592_s12, 6 }
   0x4   : > { %p156_p2 = pnand %p503_p0, %p155_p1 }
   0x5   : > { %p187_p3 = scmp.lt.s32.totalorder (!%p156_p2), %s499_s13, 4  ;;  %vm285_vm0 = vcmask (!%p156_p2), 261120  }
   0x6   : > { %159 = sbr.rel (%p156_p2) target bundleno = 251 (0xfb), region = 32 }
   0xd   : > { %s690_s13 = smov (!%p187_p3, %s499_s13), 4 }
   0xe   : > { %s531_s14 = sshll.u32 %s690_s13, 6  ;;  %s532_s15 = sshll.u32 %s690_s13, 4 }
   0xf   : > { %s196_s18 = scalar_lea.vmem %s686_s1, %s532_s15  ;;  %s191_s21 = scalar_lea.vmem %s685_s0, %s531_s14 }
  0x10   : > { %v576_v0 = vld [vmem:[%s196_s18] sm:$0xff]   ;;  %v577_v1 = vld [vmem:[%s196_s18 + $0x8] sm:$0xff]   ;;  %v582_v6 = vld [vmem:[%s191_s21 + $0x10] sm:$0xff]   ;;  %s199_s24 = scalar_lea.vmem %s687_s2, %s690_s13  ;;  %s533_s25 = sshll.u32 %s690_s13, 7 }
  0x11   : > { %544 = vmatprep.subr.bf16.mxu0 %v576_v0  ;;  %564 = vmatprep.subr.bf16.mxu1 %v576_v0  ;;  %v578_v2 = vld [vmem:[%s191_s21] sm:$0xff]   ;;  %v580_v4 = vld [vmem:[%s191_s21 + $0x8] sm:$0xff]   ;;  %v583_v7 = vld [vmem:[%s191_s21 + $0x30] sm:$0xff]   ;;  %s648_s28 = scalar_lea.vmem %s688_s3, %s533_s25 }
  0x12   : > { %545 = vmatpush3.bf16.msra.mxu0 %v576_v0  ;;  %566 = vmatpush3.bf16.msra.mxu1 %v576_v0  ;;  %v579_v3 = vld [vmem:[%s191_s21 + $0x20] sm:$0xff]   ;;  %v581_v5 = vld [vmem:[%s191_s21 + $0x28] sm:$0xff]   ;;  %v584_v8 = vld [vmem:[%s191_s21 + $0x18] sm:$0xff]  }
  0x13   : > { %546 = vmatprep.subr.bf16.mxu0 %v577_v1  ;;  %565 = vmatprep.subr.bf16.mxu1 %v577_v1  ;;  %v585_v9 = vld [vmem:[%s191_s21 + $0x38] sm:$0xff]   ;;  %v510_v10 = vld [vmem:[%s199_s24] ss:$0 sm:$0xff] }
  0x14   : > { %548 = vmatprep.mubr.msk.bf16.mxu0 %vm285_vm0, %v578_v2  ;;  %556 = vmatprep.mubr.msk.bf16.mxu1 %vm285_vm0, %v579_v3 }
  0x16   : > { %547 = vmatpush3.bf16.msra.mxu0 %v577_v1  ;;  %567 = vmatpush3.bf16.msra.mxu1 %v577_v1 }
  0x19   : > { %549 = vmatmul.mubr.msk.bf16.vlgmr.msra.gmra.mrb[0].mxu0 %vm285_vm0, %v580_v4  ;;  %557 = vmatmul.mubr.msk.bf16.vlgmr.msra.gmra.mrb[0].mxu1 %vm285_vm0, %v581_v5 }
  0x1a   : > { %552 = vmatprep.mubr.msk.bf16.mxu0 %vm285_vm0, %v582_v6  ;;  %560 = vmatprep.mubr.msk.bf16.mxu1 %vm285_vm0, %v583_v7 }
  0x21   : > { %553 = vmatmul.mubr.msk.bf16.gmra.mrb[4].mxu0 %vm285_vm0, %v584_v8  ;;  %561 = vmatmul.mubr.msk.bf16.gmra.mrb[4].mxu1 %vm285_vm0, %v585_v9 }
  0xec   : > { %v550_v11 = vpop.f32.mrb[0].mxu0  ;;  %v558_v12 = vpop.f32.mrb[0].mxu1 }
  0xed   : > { %v353_v13 = vadd.f32 %v550_v11, %v510_v10  ;;  %v385_v14 = vadd.f32 %v558_v12, %v510_v10  ;;  %v344_v15 = vpop.f32.mrb[1].mxu0  ;;  %v376_v16 = vpop.f32.mrb[1].mxu1 }
  0xee   : > { %v345_v17 = vadd.f32 %v510_v10, %v344_v15  ;;  %v377_v18 = vadd.f32 %v510_v10, %v376_v16  ;;  %v551_v19 = vpop.f32.mrb[2].mxu0  ;;  %v559_v20 = vpop.f32.mrb[2].mxu1 }
  0xef   : > { %409 = vst.msk [vmem:[%s648_s28 + $0x10] sm:$0xff] %vm285_vm0, %v353_v13  ;;  %417 = vst.msk [vmem:[%s648_s28 + $0x50] sm:$0xff] %vm285_vm0, %v385_v14  ;;  %v356_v21 = vadd.f32 %v551_v19, %v510_v10  ;;  %v388_v22 = vadd.f32 %v559_v20, %v510_v10  ;;  %v347_v23 = vpop.f32.mrb[3].mxu0  ;;  %v379_v24 = vpop.f32.mrb[3].mxu1 }
  0xf0   : > { %407 = vst.msk [vmem:[%s648_s28] sm:$0xff] %vm285_vm0, %v345_v17  ;;  %415 = vst.msk [vmem:[%s648_s28 + $0x40] sm:$0xff] %vm285_vm0, %v377_v18  ;;  %v348_v25 = vadd.f32 %v510_v10, %v347_v23  ;;  %v380_v26 = vadd.f32 %v510_v10, %v379_v24 }
  0xf1   : > { %410 = vst.msk [vmem:[%s648_s28 + $0x18] sm:$0xff] %vm285_vm0, %v356_v21  ;;  %418 = vst.msk [vmem:[%s648_s28 + $0x58] sm:$0xff] %vm285_vm0, %v388_v22 }
  0xf2   : > { %408 = vst.msk [vmem:[%s648_s28 + $0x8] sm:$0xff] %vm285_vm0, %v348_v25  ;;  %416 = vst.msk [vmem:[%s648_s28 + $0x48] sm:$0xff] %vm285_vm0, %v380_v26 }
  0xf4   : > { %v554_v27 = vpop.f32.mrb[4].mxu0  ;;  %v562_v28 = vpop.f32.mrb[4].mxu1 }
  0xf5   : > { %v369_v29 = vadd.f32 %v554_v27, %v510_v10  ;;  %v401_v30 = vadd.f32 %v562_v28, %v510_v10  ;;  %v360_v31 = vpop.f32.mrb[5].mxu0  ;;  %v392_v32 = vpop.f32.mrb[5].mxu1 }
  0xf6   : > { %v361_v33 = vadd.f32 %v510_v10, %v360_v31  ;;  %v393_v34 = vadd.f32 %v510_v10, %v392_v32  ;;  %v555_v35 = vpop.f32.mrb[6].mxu0  ;;  %v563_v36 = vpop.f32.mrb[6].mxu1 }
  0xf7   : > { %413 = vst.msk [vmem:[%s648_s28 + $0x30] sm:$0xff] %vm285_vm0, %v369_v29  ;;  %421 = vst.msk [vmem:[%s648_s28 + $0x70] sm:$0xff] %vm285_vm0, %v401_v30  ;;  %v372_v37 = vadd.f32 %v555_v35, %v510_v10  ;;  %v404_v38 = vadd.f32 %v563_v36, %v510_v10  ;;  %v363_v39 = vpop.f32.mrb[7].mxu0  ;;  %v395_v40 = vpop.f32.mrb[7].mxu1 }
  0xf8   : > { %411 = vst.msk [vmem:[%s648_s28 + $0x20] sm:$0xff] %vm285_vm0, %v361_v33  ;;  %419 = vst.msk [vmem:[%s648_s28 + $0x60] sm:$0xff] %vm285_vm0, %v393_v34  ;;  %v364_v41 = vadd.f32 %v510_v10, %v363_v39  ;;  %v396_v42 = vadd.f32 %v510_v10, %v395_v40 }
  0xf9   : > { %414 = vst.msk [vmem:[%s648_s28 + $0x38] sm:$0xff] %vm285_vm0, %v372_v37  ;;  %422 = vst.msk [vmem:[%s648_s28 + $0x78] sm:$0xff] %vm285_vm0, %v404_v38 }
  0xfa   : > { %412 = vst.msk [vmem:[%s648_s28 + $0x28] sm:$0xff] %vm285_vm0, %v364_v41  ;;  %420 = vst.msk [vmem:[%s648_s28 + $0x68] sm:$0xff] %vm285_vm0, %v396_v42 }
  0xfb PF: > { %s13_s12 = sadd.s32 1, %s592_s12  }
  0xfc   : > { %p10_p4 = scmp.ge.s32.totalorder %s13_s12, 7  }
  0xfe   :  { %12 = sbr.rel (!%p10_p4) target bundleno = 1 (0x1), region = 68 }

// kernel: _dsfd_brnet_forward.38
= control target key start
LH: loop header
LB: loop body
LE: loop exit
PB: predicated region body
PF: predicated region fallthrough
CT: control target
= control target key end

     0   :  { %v97_v0 = vmov 0.0   ;;  %vm98_vm0 = vmmov 0   ;;  %vm31_vm1 = vcmask 130048   ;;  %vm77_vm2 = vcmask 125952   ;;  %s131_s1 = inlined_call_operand.vmem [shape: bf16[16,16], index: 1, kind: input, shape index: {}]   ;;  %s132_s0 = inlined_call_operand.vmem [shape: bf16[8,16], index: 0, kind: input, shape index: {}]   ;;  %s133_s2 = inlined_call_operand.vmem [shape: f32[1,16], index: 2, kind: input, shape index: {}]   ;;  %s134_s3 = inlined_call_operand.vmem [shape: bf16[8,16], index: 3, kind: output, shape index: {}]  }
   0x1   :  { %88 = vmatprep.subr.bf16.mxu0 %v97_v0  ;;  %v96_v1 = vld [vmem:[%s131_s1] sm:$0xff]   ;;  %90 = vmatprep.mubr.msk.bf16.mxu0 %vm98_vm0, %v97_v0 }
   0x2   :  { %89 = vmatpush3.bf16.msra.mxu0 %v96_v1  ;;  %v15_v2 = vld [vmem:[%s132_s0] sm:$0xf] }
   0x3   :  { %v83_v3 = vld [vmem:[%s133_s2] ss:$0 sm:$0xff] }
   0x5   :  { %91 = vmatmul.mubr.msk.bf16.vlgmr.msra.gmra.mrb[0].mxu0 %vm31_vm1, %v15_v2 }
  0xd8   :  { %v69_v4 = vpop.f32.mrb[0].mxu0 }
  0xd9   :  { %v70_v5 = vadd.f32 %v83_v3, %v69_v4  ;;  %v92_v6 = vpop.f32.mrb[1].mxu0 }
  0xda   :  { %v72_v7 = vpop.f32.mrb[2].mxu0 }
  0xdb   :  { %v75_v8 = vmax.f32 %v70_v5, 0.0  ;;  %v93_v9 = vpop.f32.mrb[3].mxu0 }
  0xdd   :  { %v76_v10 = vpack.c.bf16 %v75_v8, %v75_v8 }
  0xdf   :  { %78 = vst.msk [vmem:[%s134_s3] sm:$0xf] %vm77_vm2, %v76_v10 }

// kernel: _dsfd_brnet_forward.39
= control target key start
LH: loop header
LB: loop body
LE: loop exit
PB: predicated region body
PF: predicated region fallthrough
CT: control target
= control target key end

     0   :  { %vm44_vm0 = vcmask 130048   ;;  %vm120_vm1 = vcmask 125952   ;;  %s199_s1 = inlined_call_operand.vmem [shape: bf16[16,16], index: 1, kind: input, shape index: {}]   ;;  %s200_s0 = inlined_call_operand.vmem [shape: bf16[32,16], index: 0, kind: input, shape index: {}]   ;;  %s201_s2 = inlined_call_operand.vmem [shape: f32[1,16], index: 2, kind: input, shape index: {}]   ;;  %s202_s3 = inlined_call_operand.vmem [shape: bf16[32,16], index: 3, kind: output, shape index: {}]  }
   0x1   :  { %v152_v0 = vld [vmem:[%s199_s1] sm:$0xff]   ;;  %v154_v2 = vld [vmem:[%s200_s0 + $0x8] sm:$0xff]  }
   0x2   :  { %v153_v1 = vld [vmem:[%s200_s0] sm:$0xff]   ;;  %146 = vmatprep.subr.bf16.mxu0 %v152_v0 }
   0x3   :  { %147 = vmatpush3.bf16.msra.mxu0 %v152_v0  ;;  %148 = vmatprep.mubr.msk.bf16.mxu0 %vm44_vm0, %v153_v1  ;;  %v129_v3 = vld [vmem:[%s201_s2] ss:$0 sm:$0xff] }
   0x6   :  { %149 = vmatmul.mubr.msk.bf16.vlgmr.msra.gmra.mrb[0].mxu0 %vm44_vm0, %v154_v2 }
  0xd9   :  { %v150_v4 = vpop.f32.mrb[0].mxu0 }
  0xda   :  { %v94_v5 = vadd.f32 %v150_v4, %v129_v3  ;;  %v85_v6 = vpop.f32.mrb[1].mxu0 }
  0xdb   :  { %v86_v7 = vadd.f32 %v129_v3, %v85_v6  ;;  %v151_v8 = vpop.f32.mrb[2].mxu0 }
  0xdc   :  { %v102_v9 = vmax.f32 %v94_v5, 0.0  ;;  %v97_v10 = vadd.f32 %v151_v8, %v129_v3  ;;  %v88_v11 = vpop.f32.mrb[3].mxu0 }
  0xdd   :  { %v100_v12 = vmax.f32 %v86_v7, 0.0  ;;  %v89_v13 = vadd.f32 %v129_v3, %v88_v11 }
  0xde   :  { %v141_v14 = vpack.c.bf16 %v102_v9, %v102_v9  ;;  %v103_v15 = vmax.f32 %v97_v10, 0.0 }
  0xdf   :  { %v139_v16 = vpack.c.bf16 %v100_v12, %v100_v12  ;;  %v101_v17 = vmax.f32 %v89_v13, 0.0 }
  0xe0   :  { %123 = vst.msk [vmem:[%s202_s3 + $0x8] sm:$0xf] %vm120_vm1, %v141_v14  ;;  %v142_v18 = vpack.c.bf16 %v103_v15, %v103_v15 }
  0xe1   :  { %121 = vst.msk [vmem:[%s202_s3] sm:$0xf] %vm120_vm1, %v139_v16  ;;  %v140_v19 = vpack.c.bf16 %v101_v17, %v101_v17 }
  0xe2   :  { %124 = vst.msk [vmem:[%s202_s3 + $0xc] sm:$0xf] %vm120_vm1, %v142_v18 }
  0xe3   :  { %122 = vst.msk [vmem:[%s202_s3 + $0x4] sm:$0xf] %vm120_vm1, %v140_v19 }

// kernel: _dsfd_brnet_forward.40
= control target key start
LH: loop header
LB: loop body
LE: loop exit
PB: predicated region body
PF: predicated region fallthrough
CT: control target
= control target key end

     0   :  { %s1455_s15 = smov 0   ;;  %s1777_s0 = inlined_call_operand.vmem [shape: bf16[6,128,288], index: 0, kind: input, shape index: {}]   ;;  %s1778_s1 = inlined_call_operand.vmem [shape: bf16[6,288,32], index: 1, kind: input, shape index: {}]   ;;  %s1779_s2 = inlined_call_operand.vmem [shape: f32[6,1,32], index: 2, kind: input, shape index: {}]   ;;  %s1780_s3 = inlined_call_operand.vmem [shape: f32[6,1,32], index: 3, kind: input, shape index: {}]   ;;  %s1781_s4 = inlined_call_operand.vmem [shape: bf16[6,128,32], index: 4, kind: output, shape index: {}]  }
   0x1 LB: > { %s1461_s16 = sadd.s32 4294967295, %s1428_s15   ;;  %p1128_p0 = scmp.ge.s32.totalorder %s1428_s15, 1  ;;  %s1428_s15 = sphi %s1455_s15, %s14_s15  }
   0x2   : > { %p188_p1 = scmp.lt.s32.totalorder %s1428_s15, 7 }
   0x4   : > { %p189_p2 = pnand %p1128_p0, %p188_p1 }
   0x5   : > { %p225_p3 = scmp.lt.s32.totalorder (!%p189_p2), %s1461_s16, 5  ;;  %vm550_vm0 = vcmask (!%p189_p2), 261120   ;;  %p904_p4 = scmp.lt.s32.totalorder (!%p189_p2), %s1461_s16, 3  ;;  %vm1022_vm1 = vcmask (!%p189_p2), 257024  }
   0x6   : > { %192 = sbr.rel (%p189_p2) target bundleno = 485 (0x1e5), region = 36 }
   0xd   : > { %s1467_s17 = scalar_select %p225_p3, %s1461_s16, 5 }
   0xe   : > { %s905_s29 = scalar_select %p904_p4, 1, 0 }
   0xf   : > { %s1331_s18 = smul.u32 144, %s1467_s17  ;;  %s237_s28 = scalar_lea.vmem %s1779_s2, %s1467_s17 }
  0x10   : > { %s1330_s22 = smul.u32 192, %s1467_s17  ;;  %s906_s30 = scvt.s32.f32 %s905_s29 }
  0x11   : > { %s1473_s21 = scalar_lea.vmem %s1778_s1, %s1331_s18  ;;  %s240_s7 = scalar_lea.vmem %s1780_s3, %s1467_s17 }
  0x12   : > { %v1340_v0 = vld [vmem:[%s1473_s21 + $0x40] sm:$0xff]   ;;  %v1342_v2 = vld [vmem:[%s1473_s21 + $0x48] sm:$0xff]   ;;  %v1344_v4 = vld [vmem:[%s1473_s21 + $0x50] sm:$0xff]   ;;  %s1488_s25 = scalar_lea.vmem %s1777_s0, %s1330_s22  ;;  %s924_s8 = ssub.f32 1.0, %s906_s30 }
  0x13   : > { %v1341_v1 = vld [vmem:[%s1473_s21] sm:$0xff]   ;;  %1220 = vmatprep.subr.bf16.mxu0 %v1340_v0  ;;  %1314 = vmatprep.subr.bf16.mxu1 %v1340_v0  ;;  %v1343_v3 = vld [vmem:[%s1473_s21 + $0x8] sm:$0xff]   ;;  %v1345_v5 = vld [vmem:[%s1473_s21 + $0x10] sm:$0xff]   ;;  %s1203_s9 = sshll.u32 %s1467_s17, 6 }
  0x14   : > { %1221 = vmatpush3.bf16.msra.mxu0 %v1341_v1  ;;  %1322 = vmatpush3.bf16.msra.mxu1 %v1341_v1  ;;  %v1346_v6 = vld [vmem:[%s1473_s21 + $0x58] sm:$0xff]   ;;  %v1348_v8 = vld [vmem:[%s1473_s21 + $0x60] sm:$0xff]   ;;  %v1350_v10 = vld [vmem:[%s1473_s21 + $0x68] sm:$0xff]   ;;  %s1673_s12 = scalar_lea.vmem %s1781_s4, %s1203_s9 }
  0x15   : > { %1222 = vmatprep.subr.bf16.mxu0 %v1342_v2  ;;  %1315 = vmatprep.subr.bf16.mxu1 %v1342_v2  ;;  %v1347_v7 = vld [vmem:[%s1473_s21 + $0x18] sm:$0xff]   ;;  %v1349_v9 = vld [vmem:[%s1473_s21 + $0x20] sm:$0xff]   ;;  %v1351_v13 = vld [vmem:[%s1473_s21 + $0x28] sm:$0xff]  }
  0x16   : > { %v1358_v11 = vld [vmem:[%s1488_s25 + $0x4] ss:$12 sps:$4 sm:$0xff]   ;;  %v1361_v12 = vld [vmem:[%s1488_s25 + $0x94] ss:$12 sps:$4 sm:$0xff]   ;;  %v1354_v16 = vld [vmem:[%s1473_s21 + $0x78] sm:$0xff]  }
  0x17   : > { %v1352_v14 = vld [vmem:[%s1473_s21 + $0x70] sm:$0xff]   ;;  %607 = vmatprep.mubr.bf16.mxu0 %v1358_v11  ;;  %655 = vmatprep.mubr.bf16.mxu1 %v1361_v12  ;;  %v1355_v17 = vld [vmem:[%s1473_s21 + $0x38] sm:$0xff]   ;;  %v1356_v18 = vld [vmem:[%s1488_s25] ss:$12 sps:$4 sm:$0xff]  }
  0x18   : > { %1223 = vmatpush3.bf16.msra.mxu0 %v1343_v3  ;;  %1323 = vmatpush3.bf16.msra.mxu1 %v1343_v3  ;;  %v1353_v15 = vld [vmem:[%s1473_s21 + $0x30] sm:$0xff]   ;;  %v1362_v19 = vld [vmem:[%s1473_s21 + $0x80] sm:$0xff]   ;;  %v1363_v21 = vld [vmem:[%s1488_s25 + $0x1c] ss:$12 sps:$4 sm:$0xff]  }
  0x19   : > { %1224 = vmatprep.subr.bf16.mxu0 %v1344_v4  ;;  %1316 = vmatprep.subr.bf16.mxu1 %v1344_v4  ;;  %v1359_v20 = vld [vmem:[%s1488_s25 + $0x90] ss:$12 sps:$4 sm:$0xff]   ;;  %v1365_v22 = vld [vmem:[%s1488_s25 + $0xac] ss:$12 sps:$4 sm:$0xff]   ;;  %v1368_v25 = vld [vmem:[%s1488_s25 + $0xa8] ss:$12 sps:$4 sm:$0xff]  }
  0x1a   : > { %v1369_v23 = vld [vmem:[%s1473_s21 + $0x88] sm:$0xff]   ;;  %v1367_v24 = vld [vmem:[%s1488_s25 + $0x18] ss:$12 sps:$4 sm:$0xff]   ;;  %v1370_v26 = vld [vmem:[%s1488_s25 + $0x34] ss:$12 sps:$4 sm:$0xff]  }
  0x1b   : > { %v1372_v27 = vld [vmem:[%s1488_s25 + $0x8] ss:$12 sps:$4 sm:$0xff]   ;;  %v1373_v28 = vld [vmem:[%s1488_s25 + $0x30] ss:$12 sps:$4 sm:$0xff]   ;;  %v1374_v29 = vld [vmem:[%s1488_s25 + $0x20] ss:$12 sps:$4 sm:$0xff]  }
  0x1c   : > { %1225 = vmatpush3.bf16.msra.mxu0 %v1345_v5  ;;  %1324 = vmatpush3.bf16.msra.mxu1 %v1345_v5  ;;  %v1375_v30 = vld [vmem:[%s1488_s25 + $0x4c] ss:$12 sps:$4 sm:$0xff]   ;;  %v1378_v32 = vld [vmem:[%s1488_s25 + $0x48] ss:$12 sps:$4 sm:$0xff]   ;;  %v1379_v33 = vld [vmem:[%s1488_s25 + $0x50] ss:$12 sps:$4 sm:$0xff]  }
  0x1d   : > { %1226 = vmatprep.subr.bf16.mxu0 %v1346_v6  ;;  %1317 = vmatprep.subr.bf16.mxu1 %v1346_v6  ;;  %v1377_v31 = vld [vmem:[%s1488_s25 + $0x38] ss:$12 sps:$4 sm:$0xff]   ;;  %v1382_v35 = vld [vmem:[%s1488_s25 + $0x68] ss:$12 sps:$4 sm:$0xff]   ;;  %v1383_v36 = vld [vmem:[%s1488_s25 + $0x60] ss:$12 sps:$4 sm:$0xff]  }
  0x1e   : > { %v1380_v34 = vld [vmem:[%s1488_s25 + $0x64] ss:$12 sps:$4 sm:$0xff]   ;;  %v1384_v37 = vld [vmem:[%s1488_s25 + $0x80] ss:$12 sps:$4 sm:$0xff]   ;;  %v1385_v38 = vld [vmem:[%s1488_s25 + $0x7c] ss:$12 sps:$4 sm:$0xff]  }
  0x1f   : > { %v1387_v39 = vld [vmem:[%s1488_s25 + $0x98] ss:$12 sps:$4 sm:$0xff]   ;;  %v1389_v41 = vld [vmem:[%s1488_s25 + $0xb0] ss:$12 sps:$4 sm:$0xff]   ;;  %v1543_v2 = vld [vmem:[%s237_s28] ss:$0 sm:$0xff] }
  0x20   : > { %1227 = vmatpush3.bf16.msra.mxu0 %v1347_v7  ;;  %1325 = vmatpush3.bf16.msra.mxu1 %v1347_v7  ;;  %v1388_v40 = vld [vmem:[%s1488_s25 + $0x78] ss:$12 sps:$4 sm:$0xff]  }
  0x21   : > { %1228 = vmatprep.subr.bf16.mxu0 %v1348_v8  ;;  %1318 = vmatprep.subr.bf16.mxu1 %v1348_v8 }
  0x24   : > { %1229 = vmatpush3.bf16.msra.mxu0 %v1349_v9  ;;  %1326 = vmatpush3.bf16.msra.mxu1 %v1349_v9 }
  0x25   : > { %1230 = vmatprep.subr.bf16.mxu0 %v1350_v10  ;;  %1319 = vmatprep.subr.bf16.mxu1 %v1350_v10 }
  0x28   : > { %1231 = vmatpush3.bf16.msra.mxu0 %v1351_v13  ;;  %1327 = vmatpush3.bf16.msra.mxu1 %v1351_v13 }
  0x29   : > { %1232 = vmatprep.subr.bf16.mxu0 %v1352_v14  ;;  %1320 = vmatprep.subr.bf16.mxu1 %v1352_v14 }
  0x2c   : > { %1233 = vmatpush3.bf16.msra.mxu0 %v1353_v15  ;;  %1328 = vmatpush3.bf16.msra.mxu1 %v1353_v15 }
  0x2d   : > { %1234 = vmatprep.subr.bf16.mxu0 %v1354_v16  ;;  %1321 = vmatprep.subr.bf16.mxu1 %v1354_v16 }
  0x30   : > { %1235 = vmatpush3.bf16.msra.mxu0 %v1355_v17  ;;  %1329 = vmatpush3.bf16.msra.mxu1 %v1355_v17 }
  0x31   : > { %1294 = vmatprep.subr.bf16.mxu1 %v1362_v19 }
  0x33   : > { %608 = vmatmul.mubr.bf16.vlgmr.msra.gmra.mrb[0].mxu0 %v1356_v18  ;;  %656 = vmatmul.mubr.bf16.vlgmr.msra.gmra.mrb[0].mxu1 %v1359_v20 }
  0x34   : > { %1295 = vmatpush3.bf16.msra.mxu1 %v1362_v19  ;;  %615 = vmatprep.mubr.bf16.mxu0 %v1363_v21 }
  0x35   : > { %663 = vmatprep.mubr.bf16.mxu1 %v1365_v22  ;;  %1296 = vmatprep.subr.bf16.mxu1 %v1369_v23 }
  0x38   : > { %1297 = vmatpush3.bf16.msra.mxu1 %v1369_v23 }
  0x3b   : > { %616 = vmatmul.mubr.bf16.gmra.mrb[4].mxu0 %v1367_v24  ;;  %664 = vmatmul.mubr.bf16.gmra.mrb[4].mxu1 %v1368_v25 }
  0x3c   : > { %623 = vmatprep.mubr.bf16.mxu0 %v1370_v26  ;;  %1298 = vmatprep.mubr.msk.bf16.mxu1 %vm550_vm0, %v1372_v27 }
  0x43   : > { %624 = vmatmul.mubr.bf16.gmra.mrb[8].mxu0 %v1373_v28  ;;  %1299 = vmatmul.mubr.msk.bf16.vlgmr.msra.gmra.mrb[8].mxu1 %vm550_vm0, %v1374_v29 }
  0x44   : > { %631 = vmatprep.mubr.bf16.mxu0 %v1375_v30  ;;  %1302 = vmatprep.mubr.msk.bf16.mxu1 %vm550_vm0, %v1377_v31 }
  0x4b   : > { %632 = vmatmul.mubr.bf16.gmra.mrb[12].mxu0 %v1378_v32  ;;  %1303 = vmatmul.mubr.msk.bf16.gmra.mrb[12].mxu1 %vm550_vm0, %v1379_v33 }
  0x4c   : > { %639 = vmatprep.mubr.bf16.mxu0 %v1380_v34  ;;  %1306 = vmatprep.mubr.msk.bf16.mxu1 %vm550_vm0, %v1382_v35 }
  0x53   : > { %640 = vmatmul.mubr.bf16.gmra.mrb[16].mxu0 %v1383_v36  ;;  %1307 = vmatmul.mubr.msk.bf16.gmra.mrb[16].mxu1 %vm550_vm0, %v1384_v37 }
  0x54   : > { %647 = vmatprep.mubr.bf16.mxu0 %v1385_v38  ;;  %1310 = vmatprep.mubr.msk.bf16.mxu1 %vm550_vm0, %v1387_v39 }
  0x5b   : > { %648 = vmatmul.mubr.bf16.gmra.mrb[20].mxu0 %v1388_v40  ;;  %1311 = vmatmul.mubr.msk.bf16.gmra.mrb[20].mxu1 %vm550_vm0, %v1389_v41 }
 0x106   : > { %v1236_v42 = vpop.f32.mrb[0].mxu0  ;;  %v1272_v43 = vpop.f32.mrb[0].mxu1 }
 0x107   : > { %v1237_v44 = vpop.f32.mrb[1].mxu0  ;;  %v1273_v45 = vpop.f32.mrb[1].mxu1 }
 0x108   : > { %v1238_v46 = vadd.f32 %v1237_v44, %v1236_v42  ;;  %v1531_v47 = vadd.f32 %v1273_v45, %v1272_v43  ;;  %v1239_v48 = vpop.f32.mrb[2].mxu0  ;;  %v1275_v49 = vpop.f32.mrb[2].mxu1 }
 0x109   : > { %v1240_v50 = vpop.f32.mrb[3].mxu0  ;;  %v1276_v51 = vpop.f32.mrb[3].mxu1 }
 0x10a   : > { %v1241_v52 = vadd.f32 %v1240_v50, %v1239_v48  ;;  %v1533_v53 = vadd.f32 %v1276_v51, %v1275_v49  ;;  %v610_v6 = vadd.f32 %v1238_v46, %v1543_v2 }
 0x10c   : > { %v613_v15 = vadd.f32 %v1241_v52, %v1543_v2 }
 0x10e   : > { %v1242_v54 = vpop.f32.mrb[4].mxu0  ;;  %v1278_v55 = vpop.f32.mrb[4].mxu1 }
 0x10f   : > { %v1243_v56 = vpop.f32.mrb[5].mxu0  ;;  %v1279_v57 = vpop.f32.mrb[5].mxu1 }
 0x110   : > { %v1244_v58 = vadd.f32 %v1243_v56, %v1242_v54  ;;  %v1535_v59 = vadd.f32 %v1279_v57, %v1278_v55  ;;  %v1245_v60 = vpop.f32.mrb[6].mxu0  ;;  %v1281_v61 = vpop.f32.mrb[6].mxu1 }
 0x111   : > { %v1246_v62 = vpop.f32.mrb[7].mxu0  ;;  %v1282_v63 = vpop.f32.mrb[7].mxu1 }
 0x112   : > { %v1247_v0 = vadd.f32 %v1246_v62, %v1245_v60  ;;  %v1541_v1 = vadd.f32 %v1282_v63, %v1281_v61  ;;  %v618_v3 = vadd.f32 %v1244_v58, %v1543_v2 }
 0x114   : > { %v621_v10 = vadd.f32 %v1247_v0, %v1543_v2 }
 0x116   : > { %v1248_v4 = vpop.f32.mrb[8].mxu0  ;;  %v1300_v5 = vpop.f32.mrb[8].mxu1 }
 0x117   : > { %v1547_v7 = vadd.f32 %v1300_v5, %v618_v3  ;;  %v1249_v8 = vpop.f32.mrb[9].mxu0  ;;  %v706_v9 = vpop.f32.mrb[9].mxu1 }
 0x118   : > { %v1250_v11 = vadd.f32 %v1249_v8, %v1248_v4  ;;  %v1550_v12 = vadd.f32 %v706_v9, %v610_v6  ;;  %v1251_v13 = vpop.f32.mrb[10].mxu0  ;;  %v1301_v14 = vpop.f32.mrb[10].mxu1 }
 0x119   : > { %v1553_v16 = vadd.f32 %v1301_v14, %v621_v10  ;;  %v1252_v17 = vpop.f32.mrb[11].mxu0  ;;  %v709_v18 = vpop.f32.mrb[11].mxu1  ;;  %v771_v19 = vmul.f32 %v1547_v7, %v1547_v7  ;;  %v666_v10 = vadd.f32 %v1535_v59, %v1543_v2 }
 0x11a   : > { %v1253_v20 = vadd.f32 %v1252_v17, %v1251_v13  ;;  %v1557_v21 = vadd.f32 %v709_v18, %v613_v15  ;;  %v769_v22 = vmul.f32 %v1550_v12, %v1550_v12  ;;  %v626_v29 = vadd.f32 %v1250_v11, %v1543_v2 }
 0x11b   : > { %v791_v23 = vsel %vm550_vm0, %v771_v19, 0.0  ;;  %v772_v24 = vmul.f32 %v1553_v16, %v1553_v16  ;;  %v658_v15 = vadd.f32 %v1531_v47, %v1543_v2 }
 0x11c   : > { %792 = vadd.xlane.f32.xlu1 %v791_v23  ;;  %v785_v25 = vsel %vm550_vm0, %v769_v22, 0.0  ;;  %v770_v26 = vmul.f32 %v1557_v21, %v1557_v21  ;;  %v629_v37 = vadd.f32 %v1253_v20, %v1543_v2  ;;  %v669_v22 = vadd.f32 %v1541_v1, %v1543_v2 }
 0x11d   : > { %786 = vadd.xlane.f32.xlu0 %v785_v25  ;;  %v794_v32 = vsel %vm550_vm0, %v772_v24, 0.0 }
 0x11e   : > { %v1254_v27 = vpop.f32.mrb[12].mxu0  ;;  %v1304_v28 = vpop.f32.mrb[12].mxu1  ;;  %v788_v38 = vsel %vm550_vm0, %v770_v26, 0.0  ;;  %v661_v26 = vadd.f32 %v1533_v53, %v1543_v2 }
 0x11f   : > { %v1255_v30 = vpop.f32.mrb[13].mxu0  ;;  %v722_v31 = vpop.f32.mrb[13].mxu1 }
 0x120   : > { %v1256_v33 = vadd.f32 %v1255_v30, %v1254_v27  ;;  %v1569_v34 = vadd.f32 %v722_v31, %v626_v29  ;;  %v1257_v35 = vpop.f32.mrb[14].mxu0  ;;  %v1305_v36 = vpop.f32.mrb[14].mxu1  ;;  %795 = vadd.xlane.f32.xlu1 %v794_v32 }
 0x121   : > { %v1258_v39 = vpop.f32.mrb[15].mxu0  ;;  %v725_v40 = vpop.f32.mrb[15].mxu1  ;;  %789 = vadd.xlane.f32.xlu0 %v788_v38 }
 0x122   : > { %v634_v41 = vadd.f32 %v1256_v33, %v1543_v2  ;;  %v1259_v42 = vadd.f32 %v1258_v39, %v1257_v35  ;;  %v1574_v43 = vadd.f32 %v725_v40, %v629_v37  ;;  %v773_v44 = vmul.f32 %v1569_v34, %v1569_v34 }
 0x124   : > { %v1578_v45 = vadd.f32 %v1304_v28, %v634_v41  ;;  %v637_v46 = vadd.f32 %v1259_v42, %v1543_v2  ;;  %v774_v48 = vmul.f32 %v1574_v43, %v1574_v43  ;;  %v797_v49 = vsel %vm550_vm0, %v773_v44, 0.0 }
 0x125   : > { %798 = vadd.xlane.f32.xlu0 %v797_v49 }
 0x126   : > { %v1584_v50 = vadd.f32 %v1305_v36, %v637_v46  ;;  %v1260_v51 = vpop.f32.mrb[16].mxu0  ;;  %v1308_v52 = vpop.f32.mrb[16].mxu1  ;;  %v800_v54 = vsel %vm550_vm0, %v774_v48, 0.0  ;;  %v775_v55 = vmul.f32 %v1578_v45, %v1578_v45 }
 0x127   : > { %v1261_v56 = vpop.f32.mrb[17].mxu0  ;;  %v738_v57 = vpop.f32.mrb[17].mxu1  ;;  %801 = vadd.xlane.f32.xlu1 %v800_v54 }
 0x128   : > { %v1262_v58 = vadd.f32 %v1261_v56, %v1260_v51  ;;  %v1263_v60 = vpop.f32.mrb[18].mxu0  ;;  %v1309_v61 = vpop.f32.mrb[18].mxu1  ;;  %v803_v62 = vsel %vm550_vm0, %v775_v55, 0.0  ;;  %v776_v63 = vmul.f32 %v1584_v50, %v1584_v50 }
 0x129   : > { %v1264_v0 = vpop.f32.mrb[19].mxu0  ;;  %v741_v3 = vpop.f32.mrb[19].mxu1  ;;  %804 = vadd.xlane.f32.xlu0 %v803_v62 }
 0x12a   : > { %v642_v4 = vadd.f32 %v1262_v58, %v1543_v2  ;;  %v1265_v5 = vadd.f32 %v1264_v0, %v1263_v60  ;;  %v806_v6 = vsel %vm550_vm0, %v776_v63, 0.0 }
 0x12b   : > { %807 = vadd.xlane.f32.xlu1 %v806_v6 }
 0x12c   : > { %v1594_v8 = vadd.f32 %v738_v57, %v642_v4  ;;  %v645_v9 = vadd.f32 %v1265_v5, %v1543_v2  ;;  %v1650_v5 = vld [vmem:[%s240_s7] ss:$0 sm:$0xff] }
 0x12e   : > { %v1599_v11 = vadd.f32 %v741_v3, %v645_v9  ;;  %v1266_v13 = vpop.f32.mrb[20].mxu0  ;;  %v1312_v14 = vpop.f32.mrb[20].mxu1  ;;  %v777_v17 = vmul.f32 %v1594_v8, %v1594_v8 }
 0x12f   : > { %v1605_v18 = vadd.f32 %v1312_v14, %v666_v10  ;;  %v1267_v19 = vpop.f32.mrb[21].mxu0  ;;  %v754_v20 = vpop.f32.mrb[21].mxu1  ;;  %v1655_v14 = vstv %s924_s8 }
 0x130   : > { %v1268_v23 = vadd.f32 %v1267_v19, %v1266_v13  ;;  %v1609_v24 = vadd.f32 %v754_v20, %v658_v15  ;;  %v1269_v59 = vpop.f32.mrb[22].mxu0  ;;  %v1313_v25 = vpop.f32.mrb[22].mxu1  ;;  %v809_v47 = vsel %vm550_vm0, %v777_v17, 0.0  ;;  %v778_v30 = vmul.f32 %v1599_v11, %v1599_v11 }
 0x131   : > { %v1614_v27 = vadd.f32 %v1313_v25, %v669_v22  ;;  %v1270_v28 = vpop.f32.mrb[23].mxu0  ;;  %v757_v29 = vpop.f32.mrb[23].mxu1  ;;  %810 = vadd.xlane.f32.xlu0 %v809_v47  ;;  %v783_v44 = vmul.f32 %v1605_v18, %v1605_v18  ;;  %v1653_v13 = vstv %s906_s30 }
 0x132   : > { %v650_v1 = vadd.f32 %v1268_v23, %v1543_v2  ;;  %v1271_v31 = vadd.f32 %v1270_v28, %v1269_v59  ;;  %v1619_v32 = vadd.f32 %v757_v29, %v661_v26  ;;  %v812_v33 = vsel %vm550_vm0, %v778_v30, 0.0 }
 0x133   : > { %v781_v53 = vmul.f32 %v1609_v24, %v1609_v24  ;;  %813 = vadd.xlane.f32.xlu1 %v812_v33  ;;  %v784_v48 = vmul.f32 %v1614_v27, %v1614_v27  ;;  %v827_v49 = vsel %vm550_vm0, %v783_v44, 0.0  ;;  %v928_v26 = vmul.f32 %v1655_v14, %v1547_v7 }
 0x134   : > { %v1624_v35 = vadd.f32 %v1308_v52, %v650_v1  ;;  %v653_v36 = vadd.f32 %v1271_v31, %v1543_v2  ;;  %v782_v37 = vmul.f32 %v1619_v32, %v1619_v32  ;;  %v926_v29 = vmul.f32 %v1655_v14, %v1550_v12 }
 0x135   : > { %v821_v38 = vsel %vm550_vm0, %v781_v53, 0.0  ;;  %v830_v51 = vsel %vm550_vm0, %v784_v48, 0.0 }
 0x136   : > { %v1630_v39 = vadd.f32 %v1309_v61, %v653_v36  ;;  %822 = vadd.xlane.f32.xlu0 %v821_v38  ;;  %v824_v40 = vsel %vm550_vm0, %v782_v37, 0.0  ;;  %v779_v41 = vmul.f32 %v1624_v35, %v1624_v35 }
 0x137   : > { %825 = vadd.xlane.f32.xlu1 %v824_v40 }
 0x138   : > { %v815_v42 = vsel %vm550_vm0, %v779_v41, 0.0  ;;  %v780_v2 = vmul.f32 %v1630_v39, %v1630_v39 }
 0x13a   : > { %816 = vadd.xlane.f32.xlu0 %v815_v42  ;;  %v818_v46 = vsel %vm550_vm0, %v780_v2, 0.0  ;;  %v927_v42 = vmul.f32 %v1655_v14, %v1557_v21 }
 0x13b   : > { %819 = vadd.xlane.f32.xlu1 %v818_v46 }
 0x13e   : > { %828 = vadd.xlane.f32.xlu0 %v827_v49 }
 0x13f   : > { %831 = vadd.xlane.f32.xlu1 %v830_v51 }
 0x1a9   : > { %v793_v52 = vpop.xlane.xlu1 %792 }
 0x1aa   : > { %v835_v54 = vadd.f32 1e-20, %v793_v52  ;;  %v787_v55 = vpop.xlane.xlu0 %786 }
 0x1ab   : > { %v833_v56 = vadd.f32 1e-20, %v787_v55 }
 0x1ac   : > { %1390 = vrsqrt.f32 %v835_v54 }
 0x1ad   : > { %1392 = vrsqrt.f32 %v833_v56  ;;  %v796_v57 = vpop.xlane.xlu1 %795 }
 0x1ae   : > { %v836_v58 = vadd.f32 1e-20, %v796_v57  ;;  %v790_v60 = vpop.xlane.xlu0 %789 }
 0x1af   : > { %v834_v61 = vadd.f32 1e-20, %v790_v60 }
 0x1b0   : > { %1394 = vrsqrt.f32 %v836_v58 }
 0x1b1   : > { %1396 = vrsqrt.f32 %v834_v61 }
 0x1b2   : > { %v799_v62 = vpop.xlane.xlu0 %798 }
 0x1b3   : > { %v837_v63 = vadd.f32 1e-20, %v799_v62 }
 0x1b4   : > { %v802_v0 = vpop.xlane.xlu1 %801 }
 0x1b5   : > { %v838_v3 = vadd.f32 1e-20, %v802_v0  ;;  %1398 = vrsqrt.f32 %v837_v63  ;;  %v930_v63 = vmul.f32 %v1655_v14, %v1569_v34  ;;  %v931_v0 = vmul.f32 %v1655_v14, %v1574_v43 }
 0x1b6   : > { %v1391_v4 = vpop.eup %1390  ;;  %v805_v10 = vpop.xlane.xlu0 %804 }
 0x1b7   : > { %v1393_v6 = vpop.eup %1392  ;;  %v867_v9 = vmul.f32 %v1391_v4, %v1547_v7  ;;  %1400 = vrsqrt.f32 %v838_v3  ;;  %v839_v17 = vadd.f32 1e-20, %v805_v10 }
 0x1b8   : > { %v865_v15 = vmul.f32 %v1393_v6, %v1550_v12  ;;  %v808_v19 = vpop.xlane.xlu1 %807  ;;  %v929_v12 = vmul.f32 %v1655_v14, %v1553_v16 }
 0x1b9   : > { %v890_v20 = vmul.f32 %v1650_v5, %v867_v9  ;;  %v840_v22 = vadd.f32 1e-20, %v808_v19  ;;  %1402 = vrsqrt.f32 %v839_v17 }
 0x1ba   : > { %v1395_v23 = vpop.eup %1394  ;;  %v888_v59 = vmul.f32 %v1650_v5, %v865_v15 }
 0x1bb   : > { %v1397_v25 = vpop.eup %1396  ;;  %v910_v47 = vmul.f32 %v1653_v13, %v890_v20  ;;  %v868_v28 = vmul.f32 %v1395_v23, %v1553_v16  ;;  %1404 = vrsqrt.f32 %v840_v22  ;;  %v932_v23 = vmul.f32 %v1655_v14, %v1578_v45 }
 0x1bc   : > { %v908_v30 = vmul.f32 %v1653_v13, %v888_v59  ;;  %v866_v1 = vmul.f32 %v1397_v25, %v1557_v21  ;;  %v933_v59 = vmul.f32 %v1655_v14, %v1584_v50 }
 0x1bd   : > { %v944_v31 = vadd.f32 %v928_v26, %v910_v47  ;;  %v891_v33 = vmul.f32 %v1650_v5, %v868_v28 }
 0x1be   : > { %v942_v7 = vadd.f32 %v926_v29, %v908_v30  ;;  %v889_v53 = vmul.f32 %v1650_v5, %v866_v1  ;;  %v811_v36 = vpop.xlane.xlu0 %810 }
 0x1bf   : > { %v1206_v37 = vpack.c.bf16 %v944_v31, %v944_v31  ;;  %v911_v38 = vmul.f32 %v1653_v13, %v891_v33  ;;  %v841_v40 = vadd.f32 1e-20, %v811_v36  ;;  %v1399_v41 = vpop.eup %1398 }
 0x1c0   : > { %v1204_v2 = vpack.c.bf16 %v942_v7, %v942_v7  ;;  %v909_v44 = vmul.f32 %v1653_v13, %v889_v53  ;;  %v869_v49 = vmul.f32 %v1399_v41, %v1569_v34  ;;  %v814_v51 = vpop.xlane.xlu1 %813 }
 0x1c1   : > { %v1401_v46 = vpop.eup %1400  ;;  %1025 = vst.msk [vmem:[%s1673_s12 + $0x8] sm:$0xf] %vm1022_vm1, %v1206_v37  ;;  %v945_v48 = vadd.f32 %v929_v12, %v911_v38  ;;  %1406 = vrsqrt.f32 %v841_v40  ;;  %v842_v54 = vadd.f32 1e-20, %v814_v51 }
 0x1c2   : > { %1023 = vst.msk [vmem:[%s1673_s12] sm:$0xf] %vm1022_vm1, %v1204_v2  ;;  %v943_v16 = vadd.f32 %v927_v42, %v909_v44  ;;  %v870_v52 = vmul.f32 %v1401_v46, %v1574_v43  ;;  %v892_v55 = vmul.f32 %v1650_v5, %v869_v49  ;;  %v934_v2 = vmul.f32 %v1655_v14, %v1594_v8 }
 0x1c3   : > { %v1207_v21 = vpack.c.bf16 %v945_v48, %v945_v48  ;;  %v823_v56 = vpop.xlane.xlu0 %822  ;;  %v1403_v57 = vpop.eup %1402  ;;  %1408 = vrsqrt.f32 %v842_v54 }
 0x1c4   : > { %v1205_v58 = vpack.c.bf16 %v943_v16, %v943_v16  ;;  %v893_v60 = vmul.f32 %v1650_v5, %v870_v52  ;;  %v845_v61 = vadd.f32 1e-20, %v823_v56  ;;  %v912_v3 = vmul.f32 %v1653_v13, %v892_v55  ;;  %v826_v6 = vpop.xlane.xlu1 %825 }
 0x1c5   : > { %v1405_v62 = vpop.eup %1404  ;;  %1026 = vst.msk [vmem:[%s1673_s12 + $0xc] sm:$0xf] %vm1022_vm1, %v1207_v21  ;;  %v871_v4 = vmul.f32 %v1403_v57, %v1578_v45  ;;  %v846_v15 = vadd.f32 1e-20, %v826_v6  ;;  %v935_v16 = vmul.f32 %v1655_v14, %v1599_v11  ;;  %v938_v55 = vmul.f32 %v1655_v14, %v1609_v24 }
 0x1c6   : > { %1024 = vst.msk [vmem:[%s1673_s12 + $0x4] sm:$0xf] %vm1022_vm1, %v1205_v58  ;;  %v913_v9 = vmul.f32 %v1653_v13, %v893_v60  ;;  %v872_v10 = vmul.f32 %v1405_v62, %v1584_v50  ;;  %1410 = vrsqrt.f32 %v845_v61  ;;  %v946_v17 = vadd.f32 %v930_v63, %v912_v3 }
 0x1c7   : > { %v894_v34 = vmul.f32 %v1650_v5, %v871_v4  ;;  %v817_v43 = vpop.xlane.xlu0 %816  ;;  %1412 = vrsqrt.f32 %v846_v15  ;;  %v939_v62 = vmul.f32 %v1655_v14, %v1619_v32  ;;  %v936_v6 = vmul.f32 %v1655_v14, %v1624_v35 }
 0x1c8   : > { %v947_v19 = vadd.f32 %v931_v0, %v913_v9  ;;  %v895_v20 = vmul.f32 %v1650_v5, %v872_v10  ;;  %v843_v22 = vadd.f32 1e-20, %v817_v43  ;;  %v1208_v25 = vpack.c.bf16 %v946_v17, %v946_v17  ;;  %v820_v47 = vpop.xlane.xlu1 %819 }
 0x1c9   : > { %v914_v26 = vmul.f32 %v1653_v13, %v894_v34  ;;  %v844_v30 = vadd.f32 1e-20, %v820_v47 }
 0x1ca   : > { %v1209_v28 = vpack.c.bf16 %v947_v19, %v947_v19  ;;  %v915_v29 = vmul.f32 %v1653_v13, %v895_v20  ;;  %1414 = vrsqrt.f32 %v843_v22  ;;  %1027 = vst.msk [vmem:[%s1673_s12 + $0x10] sm:$0xf] %vm1022_vm1, %v1208_v25  ;;  %v940_v25 = vmul.f32 %v1655_v14, %v1605_v18 }
 0x1cb   : > { %v1407_v1 = vpop.eup %1406  ;;  %v948_v31 = vadd.f32 %v932_v23, %v914_v26  ;;  %v829_v33 = vpop.xlane.xlu0 %828  ;;  %1416 = vrsqrt.f32 %v844_v30  ;;  %v937_v23 = vmul.f32 %v1655_v14, %v1630_v39  ;;  %v941_v30 = vmul.f32 %v1655_v14, %v1614_v27 }
 0x1cc   : > { %1028 = vst.msk [vmem:[%s1673_s12 + $0x14] sm:$0xf] %vm1022_vm1, %v1209_v28  ;;  %v949_v45 = vadd.f32 %v933_v59, %v915_v29  ;;  %v873_v50 = vmul.f32 %v1407_v1, %v1594_v8  ;;  %v847_v7 = vadd.f32 1e-20, %v829_v33  ;;  %v832_v36 = vpop.xlane.xlu1 %831 }
 0x1cd   : > { %v1210_v53 = vpack.c.bf16 %v948_v31, %v948_v31  ;;  %v1409_v12 = vpop.eup %1408  ;;  %v848_v40 = vadd.f32 1e-20, %v832_v36 }
 0x1ce   : > { %v1211_v37 = vpack.c.bf16 %v949_v45, %v949_v45  ;;  %v896_v38 = vmul.f32 %v1650_v5, %v873_v50  ;;  %1418 = vrsqrt.f32 %v847_v7  ;;  %v874_v41 = vmul.f32 %v1409_v12, %v1599_v11 }
 0x1cf   : > { %1029 = vst.msk [vmem:[%s1673_s12 + $0x18] sm:$0xf] %vm1022_vm1, %v1210_v53  ;;  %1420 = vrsqrt.f32 %v848_v40 }
 0x1d0   : > { %v1411_v42 = vpop.eup %1410  ;;  %1030 = vst.msk [vmem:[%s1673_s12 + $0x1c] sm:$0xf] %vm1022_vm1, %v1211_v37  ;;  %v916_v44 = vmul.f32 %v1653_v13, %v896_v38  ;;  %v897_v46 = vmul.f32 %v1650_v5, %v874_v41 }
 0x1d1   : > { %v877_v48 = vmul.f32 %v1411_v42, %v1609_v24  ;;  %v1413_v49 = vpop.eup %1412 }
 0x1d2   : > { %v950_v51 = vadd.f32 %v934_v2, %v916_v44  ;;  %v917_v52 = vmul.f32 %v1653_v13, %v897_v46  ;;  %v878_v8 = vmul.f32 %v1413_v49, %v1619_v32 }
 0x1d3   : > { %v900_v54 = vmul.f32 %v1650_v5, %v877_v48 }
 0x1d4   : > { %v1415_v21 = vpop.eup %1414  ;;  %v1212_v56 = vpack.c.bf16 %v950_v51, %v950_v51  ;;  %v951_v57 = vadd.f32 %v935_v16, %v917_v52  ;;  %v901_v60 = vmul.f32 %v1650_v5, %v878_v8 }
 0x1d5   : > { %v920_v58 = vmul.f32 %v1653_v13, %v900_v54  ;;  %v875_v61 = vmul.f32 %v1415_v21, %v1624_v35  ;;  %v1417_v11 = vpop.eup %1416 }
 0x1d6   : > { %1031 = vst.msk [vmem:[%s1673_s12 + $0x20] sm:$0xf] %vm1022_vm1, %v1212_v56  ;;  %v1213_v63 = vpack.c.bf16 %v951_v57, %v951_v57  ;;  %v921_v24 = vmul.f32 %v1653_v13, %v901_v60  ;;  %v876_v9 = vmul.f32 %v1417_v11, %v1630_v39 }
 0x1d7   : > { %v954_v0 = vadd.f32 %v938_v55, %v920_v58  ;;  %v898_v3 = vmul.f32 %v1650_v5, %v875_v61 }
 0x1d8   : > { %v1419_v4 = vpop.eup %1418  ;;  %1032 = vst.msk [vmem:[%s1673_s12 + $0x24] sm:$0xf] %vm1022_vm1, %v1213_v63  ;;  %v955_v32 = vadd.f32 %v939_v62, %v921_v24  ;;  %v899_v43 = vmul.f32 %v1650_v5, %v876_v9 }
 0x1d9   : > { %v1216_v10 = vpack.c.bf16 %v954_v0, %v954_v0  ;;  %v918_v15 = vmul.f32 %v1653_v13, %v898_v3  ;;  %v879_v17 = vmul.f32 %v1419_v4, %v1605_v18  ;;  %v1421_v34 = vpop.eup %1420 }
 0x1da   : > { %v1217_v19 = vpack.c.bf16 %v955_v32, %v955_v32  ;;  %v880_v22 = vmul.f32 %v1421_v34, %v1614_v27  ;;  %v919_v59 = vmul.f32 %v1653_v13, %v899_v43 }
 0x1db   : > { %1035 = vst.msk [vmem:[%s1673_s12 + $0x30] sm:$0xf] %vm1022_vm1, %v1216_v10  ;;  %v952_v20 = vadd.f32 %v936_v6, %v918_v15  ;;  %v902_v35 = vmul.f32 %v1650_v5, %v879_v17 }
 0x1dc   : > { %1036 = vst.msk [vmem:[%s1673_s12 + $0x34] sm:$0xf] %vm1022_vm1, %v1217_v19  ;;  %v903_v28 = vmul.f32 %v1650_v5, %v880_v22  ;;  %v953_v29 = vadd.f32 %v937_v23, %v919_v59 }
 0x1dd   : > { %v1214_v26 = vpack.c.bf16 %v952_v20, %v952_v20  ;;  %v922_v47 = vmul.f32 %v1653_v13, %v902_v35 }
 0x1de   : > { %v923_v1 = vmul.f32 %v1653_v13, %v903_v28  ;;  %v1215_v31 = vpack.c.bf16 %v953_v29, %v953_v29 }
 0x1df   : > { %1033 = vst.msk [vmem:[%s1673_s12 + $0x28] sm:$0xf] %vm1022_vm1, %v1214_v26  ;;  %v956_v39 = vadd.f32 %v940_v25, %v922_v47 }
 0x1e0   : > { %v957_v18 = vadd.f32 %v941_v30, %v923_v1  ;;  %1034 = vst.msk [vmem:[%s1673_s12 + $0x2c] sm:$0xf] %vm1022_vm1, %v1215_v31 }
 0x1e1   : > { %v1218_v33 = vpack.c.bf16 %v956_v39, %v956_v39 }
 0x1e2   : > { %v1219_v45 = vpack.c.bf16 %v957_v18, %v957_v18 }
 0x1e3   : > { %1037 = vst.msk [vmem:[%s1673_s12 + $0x38] sm:$0xf] %vm1022_vm1, %v1218_v33 }
 0x1e4   : > { %1038 = vst.msk [vmem:[%s1673_s12 + $0x3c] sm:$0xf] %vm1022_vm1, %v1219_v45 }
 0x1e5 PF: > { %s14_s15 = sadd.s32 1, %s1428_s15  }
 0x1e6   : > { %p11_p5 = scmp.ge.s32.totalorder %s14_s15, 8  }
 0x1e8   :  { %13 = sbr.rel (!%p11_p5) target bundleno = 1 (0x1), region = 75 }

// kernel: _dsfd_brnet_forward.41
= control target key start
LH: loop header
LB: loop body
LE: loop exit
PB: predicated region body
PF: predicated region fallthrough
CT: control target
= control target key end

     0   :  { %s1082_s12 = smov 0   ;;  %s1229_s0 = inlined_call_operand.vmem [shape: bf16[12,128,288], index: 0, kind: input, shape index: {}]   ;;  %s1230_s1 = inlined_call_operand.vmem [shape: bf16[12,288,6], index: 1, kind: input, shape index: {}]   ;;  %s1231_s2 = inlined_call_operand.vmem [shape: f32[12,1,6], index: 2, kind: input, shape index: {}]   ;;  %s1232_s3 = inlined_call_operand.vmem [shape: f32[12,128,6], index: 3, kind: output, shape index: {}]  }
   0x1 LB: > { %s821_s13 = sadd.s32 4294967295, %s1060_s12   ;;  %p825_p0 = scmp.ge.s32.totalorder %s1060_s12, 1  ;;  %s1060_s12 = sphi %s1082_s12, %s13_s12  }
   0x2   : > { %p155_p1 = scmp.lt.s32.totalorder %s1060_s12, 13 }
   0x4   : > { %p156_p2 = pnand %p825_p0, %p155_p1 }
   0x5   : > { %p187_p3 = scmp.lt.s32.totalorder (!%p156_p2), %s821_s13, 11  ;;  %vm509_vm0 = vcmask (!%p156_p2), 261120   ;;  %vm728_vm1 = vcmask (!%p156_p2), 48128  }
   0x6   : > { %159 = sbr.rel (%p156_p2) target bundleno = 312 (0x138), region = 32 }
   0xd   : > { %s1234_s13 = smov (!%p187_p3, %s821_s13), 11 }
   0xe   : > { %s995_s14 = smul.u32 144, %s1234_s13  ;;  %s199_s24 = scalar_lea.vmem %s1231_s2, %s1234_s13 }
   0xf   : > { %s994_s18 = smul.u32 192, %s1234_s13  ;;  %s883_s25 = sshll.u32 %s1234_s13, 7 }
  0x10   : > { %s1096_s17 = scalar_lea.vmem %s1230_s1, %s995_s14  ;;  %s1173_s28 = scalar_lea.vmem %s1232_s3, %s883_s25 }
  0x11   : > { %v1004_v0 = vld [vmem:[%s1096_s17 + $0x40] sm:$0xff]   ;;  %v1006_v2 = vld [vmem:[%s1096_s17 + $0x48] sm:$0xff]   ;;  %v1008_v4 = vld [vmem:[%s1096_s17 + $0x50] sm:$0xff]   ;;  %s1111_s21 = scalar_lea.vmem %s1229_s0, %s994_s18 }
  0x12   : > { %v1005_v1 = vld [vmem:[%s1096_s17] sm:$0xff]   ;;  %884 = vmatprep.subr.bf16.mxu0 %v1004_v0  ;;  %978 = vmatprep.subr.bf16.mxu1 %v1004_v0  ;;  %v1007_v3 = vld [vmem:[%s1096_s17 + $0x8] sm:$0xff]   ;;  %v1009_v5 = vld [vmem:[%s1096_s17 + $0x10] sm:$0xff]  }
  0x13   : > { %885 = vmatpush3.bf16.msra.mxu0 %v1005_v1  ;;  %986 = vmatpush3.bf16.msra.mxu1 %v1005_v1  ;;  %v1010_v6 = vld [vmem:[%s1096_s17 + $0x58] sm:$0xff]   ;;  %v1012_v8 = vld [vmem:[%s1096_s17 + $0x60] sm:$0xff]   ;;  %v1014_v10 = vld [vmem:[%s1096_s17 + $0x68] sm:$0xff]  }
  0x14   : > { %886 = vmatprep.subr.bf16.mxu0 %v1006_v2  ;;  %979 = vmatprep.subr.bf16.mxu1 %v1006_v2  ;;  %v1011_v7 = vld [vmem:[%s1096_s17 + $0x18] sm:$0xff]   ;;  %v1013_v9 = vld [vmem:[%s1096_s17 + $0x20] sm:$0xff]   ;;  %v1015_v13 = vld [vmem:[%s1096_s17 + $0x28] sm:$0xff]  }
  0x15   : > { %v1022_v11 = vld [vmem:[%s1111_s21 + $0x4] ss:$12 sps:$4 sm:$0xff]   ;;  %v1025_v12 = vld [vmem:[%s1111_s21 + $0x94] ss:$12 sps:$4 sm:$0xff]   ;;  %v1018_v16 = vld [vmem:[%s1096_s17 + $0x78] sm:$0xff]  }
  0x16   : > { %v1016_v14 = vld [vmem:[%s1096_s17 + $0x70] sm:$0xff]   ;;  %566 = vmatprep.mubr.bf16.mxu0 %v1022_v11  ;;  %614 = vmatprep.mubr.bf16.mxu1 %v1025_v12  ;;  %v1019_v17 = vld [vmem:[%s1096_s17 + $0x38] sm:$0xff]   ;;  %v1020_v18 = vld [vmem:[%s1111_s21] ss:$12 sps:$4 sm:$0xff]  }
  0x17   : > { %887 = vmatpush3.bf16.msra.mxu0 %v1007_v3  ;;  %987 = vmatpush3.bf16.msra.mxu1 %v1007_v3  ;;  %v1017_v15 = vld [vmem:[%s1096_s17 + $0x30] sm:$0xff]   ;;  %v1026_v19 = vld [vmem:[%s1096_s17 + $0x80] sm:$0xff]   ;;  %v1027_v21 = vld [vmem:[%s1111_s21 + $0x1c] ss:$12 sps:$4 sm:$0xff]  }
  0x18   : > { %888 = vmatprep.subr.bf16.mxu0 %v1008_v4  ;;  %980 = vmatprep.subr.bf16.mxu1 %v1008_v4  ;;  %v1023_v20 = vld [vmem:[%s1111_s21 + $0x90] ss:$12 sps:$4 sm:$0xff]   ;;  %v1029_v22 = vld [vmem:[%s1111_s21 + $0xac] ss:$12 sps:$4 sm:$0xff]   ;;  %v1032_v25 = vld [vmem:[%s1111_s21 + $0xa8] ss:$12 sps:$4 sm:$0xff]  }
  0x19   : > { %v1033_v23 = vld [vmem:[%s1096_s17 + $0x88] sm:$0xff]   ;;  %v1031_v24 = vld [vmem:[%s1111_s21 + $0x18] ss:$12 sps:$4 sm:$0xff]   ;;  %v1034_v26 = vld [vmem:[%s1111_s21 + $0x34] ss:$12 sps:$4 sm:$0xff]  }
  0x1a   : > { %v1036_v27 = vld [vmem:[%s1111_s21 + $0x8] ss:$12 sps:$4 sm:$0xff]   ;;  %v1037_v28 = vld [vmem:[%s1111_s21 + $0x30] ss:$12 sps:$4 sm:$0xff]   ;;  %v1038_v29 = vld [vmem:[%s1111_s21 + $0x20] ss:$12 sps:$4 sm:$0xff]  }
  0x1b   : > { %889 = vmatpush3.bf16.msra.mxu0 %v1009_v5  ;;  %988 = vmatpush3.bf16.msra.mxu1 %v1009_v5  ;;  %v1039_v30 = vld [vmem:[%s1111_s21 + $0x4c] ss:$12 sps:$4 sm:$0xff]   ;;  %v1042_v32 = vld [vmem:[%s1111_s21 + $0x48] ss:$12 sps:$4 sm:$0xff]   ;;  %v1043_v33 = vld [vmem:[%s1111_s21 + $0x50] ss:$12 sps:$4 sm:$0xff]  }
  0x1c   : > { %890 = vmatprep.subr.bf16.mxu0 %v1010_v6  ;;  %981 = vmatprep.subr.bf16.mxu1 %v1010_v6  ;;  %v1041_v31 = vld [vmem:[%s1111_s21 + $0x38] ss:$12 sps:$4 sm:$0xff]   ;;  %v1046_v35 = vld [vmem:[%s1111_s21 + $0x68] ss:$12 sps:$4 sm:$0xff]   ;;  %v1047_v36 = vld [vmem:[%s1111_s21 + $0x60] ss:$12 sps:$4 sm:$0xff]  }
  0x1d   : > { %v1044_v34 = vld [vmem:[%s1111_s21 + $0x64] ss:$12 sps:$4 sm:$0xff]   ;;  %v1048_v37 = vld [vmem:[%s1111_s21 + $0x80] ss:$12 sps:$4 sm:$0xff]   ;;  %v1049_v38 = vld [vmem:[%s1111_s21 + $0x7c] ss:$12 sps:$4 sm:$0xff]  }
  0x1e   : > { %v1051_v39 = vld [vmem:[%s1111_s21 + $0x98] ss:$12 sps:$4 sm:$0xff]   ;;  %v1053_v41 = vld [vmem:[%s1111_s21 + $0xb0] ss:$12 sps:$4 sm:$0xff]   ;;  %v1167_v2 = vld [vmem:[%s199_s24] ss:$0 sm:$0xff] }
  0x1f   : > { %891 = vmatpush3.bf16.msra.mxu0 %v1011_v7  ;;  %989 = vmatpush3.bf16.msra.mxu1 %v1011_v7  ;;  %v1052_v40 = vld [vmem:[%s1111_s21 + $0x78] ss:$12 sps:$4 sm:$0xff]  }
  0x20   : > { %892 = vmatprep.subr.bf16.mxu0 %v1012_v8  ;;  %982 = vmatprep.subr.bf16.mxu1 %v1012_v8 }
  0x23   : > { %893 = vmatpush3.bf16.msra.mxu0 %v1013_v9  ;;  %990 = vmatpush3.bf16.msra.mxu1 %v1013_v9 }
  0x24   : > { %894 = vmatprep.subr.bf16.mxu0 %v1014_v10  ;;  %983 = vmatprep.subr.bf16.mxu1 %v1014_v10 }
  0x27   : > { %895 = vmatpush3.bf16.msra.mxu0 %v1015_v13  ;;  %991 = vmatpush3.bf16.msra.mxu1 %v1015_v13 }
  0x28   : > { %896 = vmatprep.subr.bf16.mxu0 %v1016_v14  ;;  %984 = vmatprep.subr.bf16.mxu1 %v1016_v14 }
  0x2b   : > { %897 = vmatpush3.bf16.msra.mxu0 %v1017_v15  ;;  %992 = vmatpush3.bf16.msra.mxu1 %v1017_v15 }
  0x2c   : > { %898 = vmatprep.subr.bf16.mxu0 %v1018_v16  ;;  %985 = vmatprep.subr.bf16.mxu1 %v1018_v16 }
  0x2f   : > { %899 = vmatpush3.bf16.msra.mxu0 %v1019_v17  ;;  %993 = vmatpush3.bf16.msra.mxu1 %v1019_v17 }
  0x30   : > { %958 = vmatprep.subr.bf16.mxu1 %v1026_v19 }
  0x32   : > { %567 = vmatmul.mubr.bf16.vlgmr.msra.gmra.mrb[0].mxu0 %v1020_v18  ;;  %615 = vmatmul.mubr.bf16.vlgmr.msra.gmra.mrb[0].mxu1 %v1023_v20 }
  0x33   : > { %959 = vmatpush3.bf16.msra.mxu1 %v1026_v19  ;;  %574 = vmatprep.mubr.bf16.mxu0 %v1027_v21 }
  0x34   : > { %622 = vmatprep.mubr.bf16.mxu1 %v1029_v22  ;;  %960 = vmatprep.subr.bf16.mxu1 %v1033_v23 }
  0x37   : > { %961 = vmatpush3.bf16.msra.mxu1 %v1033_v23 }
  0x3a   : > { %575 = vmatmul.mubr.bf16.gmra.mrb[4].mxu0 %v1031_v24  ;;  %623 = vmatmul.mubr.bf16.gmra.mrb[4].mxu1 %v1032_v25 }
  0x3b   : > { %582 = vmatprep.mubr.bf16.mxu0 %v1034_v26  ;;  %962 = vmatprep.mubr.msk.bf16.mxu1 %vm509_vm0, %v1036_v27 }
  0x42   : > { %583 = vmatmul.mubr.bf16.gmra.mrb[8].mxu0 %v1037_v28  ;;  %963 = vmatmul.mubr.msk.bf16.vlgmr.msra.gmra.mrb[8].mxu1 %vm509_vm0, %v1038_v29 }
  0x43   : > { %590 = vmatprep.mubr.bf16.mxu0 %v1039_v30  ;;  %966 = vmatprep.mubr.msk.bf16.mxu1 %vm509_vm0, %v1041_v31 }
  0x4a   : > { %591 = vmatmul.mubr.bf16.gmra.mrb[12].mxu0 %v1042_v32  ;;  %967 = vmatmul.mubr.msk.bf16.gmra.mrb[12].mxu1 %vm509_vm0, %v1043_v33 }
  0x4b   : > { %598 = vmatprep.mubr.bf16.mxu0 %v1044_v34  ;;  %970 = vmatprep.mubr.msk.bf16.mxu1 %vm509_vm0, %v1046_v35 }
  0x52   : > { %599 = vmatmul.mubr.bf16.gmra.mrb[16].mxu0 %v1047_v36  ;;  %971 = vmatmul.mubr.msk.bf16.gmra.mrb[16].mxu1 %vm509_vm0, %v1048_v37 }
  0x53   : > { %606 = vmatprep.mubr.bf16.mxu0 %v1049_v38  ;;  %974 = vmatprep.mubr.msk.bf16.mxu1 %vm509_vm0, %v1051_v39 }
  0x5a   : > { %607 = vmatmul.mubr.bf16.gmra.mrb[20].mxu0 %v1052_v40  ;;  %975 = vmatmul.mubr.msk.bf16.gmra.mrb[20].mxu1 %vm509_vm0, %v1053_v41 }
 0x105   : > { %v900_v42 = vpop.f32.mrb[0].mxu0  ;;  %v936_v43 = vpop.f32.mrb[0].mxu1 }
 0x106   : > { %v901_v44 = vpop.f32.mrb[1].mxu0  ;;  %v937_v45 = vpop.f32.mrb[1].mxu1 }
 0x107   : > { %v902_v46 = vadd.f32 %v901_v44, %v900_v42  ;;  %v903_v47 = vpop.f32.mrb[2].mxu0  ;;  %v1154_v48 = vadd.f32 %v937_v45, %v936_v43  ;;  %v939_v49 = vpop.f32.mrb[2].mxu1 }
 0x108   : > { %v904_v50 = vpop.f32.mrb[3].mxu0  ;;  %v940_v51 = vpop.f32.mrb[3].mxu1 }
 0x109   : > { %v905_v52 = vadd.f32 %v904_v50, %v903_v47  ;;  %v1156_v53 = vadd.f32 %v940_v51, %v939_v49  ;;  %v569_v6 = vadd.f32 %v902_v46, %v1167_v2 }
 0x10b   : > { %v572_v15 = vadd.f32 %v905_v52, %v1167_v2 }
 0x10d   : > { %v906_v54 = vpop.f32.mrb[4].mxu0  ;;  %v942_v55 = vpop.f32.mrb[4].mxu1 }
 0x10e   : > { %v907_v56 = vpop.f32.mrb[5].mxu0  ;;  %v943_v57 = vpop.f32.mrb[5].mxu1 }
 0x10f   : > { %v908_v58 = vadd.f32 %v907_v56, %v906_v54  ;;  %v909_v59 = vpop.f32.mrb[6].mxu0  ;;  %v1158_v60 = vadd.f32 %v943_v57, %v942_v55  ;;  %v945_v61 = vpop.f32.mrb[6].mxu1 }
 0x110   : > { %v910_v62 = vpop.f32.mrb[7].mxu0  ;;  %v946_v63 = vpop.f32.mrb[7].mxu1 }
 0x111   : > { %v911_v0 = vadd.f32 %v910_v62, %v909_v59  ;;  %v1164_v1 = vadd.f32 %v946_v63, %v945_v61  ;;  %v577_v3 = vadd.f32 %v908_v58, %v1167_v2  ;;  %v625_v54 = vadd.f32 %v1158_v60, %v1167_v2 }
 0x112   : > { %v617_v58 = vadd.f32 %v1154_v48, %v1167_v2  ;;  %v620_v48 = vadd.f32 %v1156_v53, %v1167_v2 }
 0x113   : > { %v580_v10 = vadd.f32 %v911_v0, %v1167_v2  ;;  %v628_v63 = vadd.f32 %v1164_v1, %v1167_v2 }
 0x115   : > { %v912_v4 = vpop.f32.mrb[8].mxu0  ;;  %v964_v5 = vpop.f32.mrb[8].mxu1 }
 0x116   : > { %v674_v7 = vadd.f32 %v964_v5, %v577_v3  ;;  %v913_v8 = vpop.f32.mrb[9].mxu0  ;;  %v665_v9 = vpop.f32.mrb[9].mxu1 }
 0x117   : > { %v914_v11 = vadd.f32 %v913_v8, %v912_v4  ;;  %v666_v12 = vadd.f32 %v665_v9, %v569_v6  ;;  %v915_v13 = vpop.f32.mrb[10].mxu0  ;;  %v965_v14 = vpop.f32.mrb[10].mxu1 }
 0x118   : > { %731 = vst.msk [vmem:[%s1173_s28 + $0x10] sm:$0xff] %vm728_vm1, %v674_v7  ;;  %v677_v16 = vadd.f32 %v965_v14, %v580_v10  ;;  %v916_v17 = vpop.f32.mrb[11].mxu0  ;;  %v668_v18 = vpop.f32.mrb[11].mxu1 }
 0x119   : > { %729 = vst.msk [vmem:[%s1173_s28] sm:$0xff] %vm728_vm1, %v666_v12  ;;  %v917_v19 = vadd.f32 %v916_v17, %v915_v13  ;;  %v669_v20 = vadd.f32 %v668_v18, %v572_v15  ;;  %v585_v23 = vadd.f32 %v914_v11, %v1167_v2 }
 0x11a   : > { %732 = vst.msk [vmem:[%s1173_s28 + $0x18] sm:$0xff] %vm728_vm1, %v677_v16 }
 0x11b   : > { %730 = vst.msk [vmem:[%s1173_s28 + $0x8] sm:$0xff] %vm728_vm1, %v669_v20  ;;  %v588_v30 = vadd.f32 %v917_v19, %v1167_v2 }
 0x11d   : > { %v918_v21 = vpop.f32.mrb[12].mxu0  ;;  %v968_v22 = vpop.f32.mrb[12].mxu1 }
 0x11e   : > { %v919_v24 = vpop.f32.mrb[13].mxu0  ;;  %v681_v25 = vpop.f32.mrb[13].mxu1 }
 0x11f   : > { %v920_v26 = vadd.f32 %v919_v24, %v918_v21  ;;  %v682_v27 = vadd.f32 %v681_v25, %v585_v23  ;;  %v921_v28 = vpop.f32.mrb[14].mxu0  ;;  %v969_v29 = vpop.f32.mrb[14].mxu1 }
 0x120   : > { %v922_v31 = vpop.f32.mrb[15].mxu0  ;;  %v684_v32 = vpop.f32.mrb[15].mxu1 }
 0x121   : > { %v593_v33 = vadd.f32 %v920_v26, %v1167_v2  ;;  %733 = vst.msk [vmem:[%s1173_s28 + $0x20] sm:$0xff] %vm728_vm1, %v682_v27  ;;  %v923_v34 = vadd.f32 %v922_v31, %v921_v28  ;;  %v685_v35 = vadd.f32 %v684_v32, %v588_v30 }
 0x123   : > { %v690_v36 = vadd.f32 %v968_v22, %v593_v33  ;;  %v596_v37 = vadd.f32 %v923_v34, %v1167_v2  ;;  %734 = vst.msk [vmem:[%s1173_s28 + $0x28] sm:$0xff] %vm728_vm1, %v685_v35 }
 0x125   : > { %735 = vst.msk [vmem:[%s1173_s28 + $0x30] sm:$0xff] %vm728_vm1, %v690_v36  ;;  %v693_v38 = vadd.f32 %v969_v29, %v596_v37  ;;  %v924_v39 = vpop.f32.mrb[16].mxu0  ;;  %v972_v40 = vpop.f32.mrb[16].mxu1 }
 0x126   : > { %v925_v41 = vpop.f32.mrb[17].mxu0  ;;  %v697_v42 = vpop.f32.mrb[17].mxu1 }
 0x127   : > { %736 = vst.msk [vmem:[%s1173_s28 + $0x38] sm:$0xff] %vm728_vm1, %v693_v38  ;;  %v926_v43 = vadd.f32 %v925_v41, %v924_v39  ;;  %v927_v44 = vpop.f32.mrb[18].mxu0  ;;  %v973_v45 = vpop.f32.mrb[18].mxu1 }
 0x128   : > { %v928_v46 = vpop.f32.mrb[19].mxu0  ;;  %v700_v47 = vpop.f32.mrb[19].mxu1 }
 0x129   : > { %v601_v49 = vadd.f32 %v926_v43, %v1167_v2  ;;  %v929_v50 = vadd.f32 %v928_v46, %v927_v44 }
 0x12b   : > { %v698_v51 = vadd.f32 %v697_v42, %v601_v49  ;;  %v604_v52 = vadd.f32 %v929_v50, %v1167_v2 }
 0x12d   : > { %737 = vst.msk [vmem:[%s1173_s28 + $0x40] sm:$0xff] %vm728_vm1, %v698_v51  ;;  %v701_v55 = vadd.f32 %v700_v47, %v604_v52  ;;  %v930_v56 = vpop.f32.mrb[20].mxu0  ;;  %v976_v57 = vpop.f32.mrb[20].mxu1 }
 0x12e   : > { %v722_v59 = vadd.f32 %v976_v57, %v625_v54  ;;  %v931_v61 = vpop.f32.mrb[21].mxu0  ;;  %v713_v62 = vpop.f32.mrb[21].mxu1 }
 0x12f   : > { %738 = vst.msk [vmem:[%s1173_s28 + $0x48] sm:$0xff] %vm728_vm1, %v701_v55  ;;  %v932_v60 = vadd.f32 %v931_v61, %v930_v56  ;;  %v714_v0 = vadd.f32 %v713_v62, %v617_v58  ;;  %v933_v3 = vpop.f32.mrb[22].mxu0  ;;  %v977_v4 = vpop.f32.mrb[22].mxu1 }
 0x130   : > { %743 = vst.msk [vmem:[%s1173_s28 + $0x70] sm:$0xff] %vm728_vm1, %v722_v59  ;;  %v725_v5 = vadd.f32 %v977_v4, %v628_v63  ;;  %v934_v6 = vpop.f32.mrb[23].mxu0  ;;  %v716_v7 = vpop.f32.mrb[23].mxu1 }
 0x131   : > { %v609_v8 = vadd.f32 %v932_v60, %v1167_v2  ;;  %741 = vst.msk [vmem:[%s1173_s28 + $0x60] sm:$0xff] %vm728_vm1, %v714_v0  ;;  %v935_v1 = vadd.f32 %v934_v6, %v933_v3  ;;  %v717_v9 = vadd.f32 %v716_v7, %v620_v48 }
 0x132   : > { %744 = vst.msk [vmem:[%s1173_s28 + $0x78] sm:$0xff] %vm728_vm1, %v725_v5 }
 0x133   : > { %v706_v10 = vadd.f32 %v972_v40, %v609_v8  ;;  %v612_v11 = vadd.f32 %v935_v1, %v1167_v2  ;;  %742 = vst.msk [vmem:[%s1173_s28 + $0x68] sm:$0xff] %vm728_vm1, %v717_v9 }
 0x135   : > { %739 = vst.msk [vmem:[%s1173_s28 + $0x50] sm:$0xff] %vm728_vm1, %v706_v10  ;;  %v709_v53 = vadd.f32 %v973_v45, %v612_v11 }
 0x137   : > { %740 = vst.msk [vmem:[%s1173_s28 + $0x58] sm:$0xff] %vm728_vm1, %v709_v53 }
 0x138 PF: > { %s13_s12 = sadd.s32 1, %s1060_s12  }
 0x139   : > { %p10_p4 = scmp.ge.s32.totalorder %s13_s12, 14  }
 0x13b   :  { %12 = sbr.rel (!%p10_p4) target bundleno = 1 (0x1), region = 68 }

// kernel: _dsfd_brnet_forward.21
= control target key start
LH: loop header
LB: loop body
LE: loop exit
PB: predicated region body
PF: predicated region fallthrough
CT: control target
= control target key end

     0   :  { %s3049_s12 = smov 0   ;;  %s3973_s0 = inlined_call_operand.vmem [shape: f32[4096,27], index: 0, kind: input, shape index: {}]   ;;  %s3974_s1 = inlined_call_operand.vmem [shape: bf16[27,3], index: 1, kind: input, shape index: {}]   ;;  %s3975_s2 = inlined_call_operand.vmem [shape: f32[1,3], index: 2, kind: input, shape index: {}]   ;;  %s3976_s3 = inlined_call_operand.vmem [shape: f32[4096,3], index: 3, kind: output, shape index: {}]  }
   0x1 LB: > { %s2087_s13 = sadd.s32 4294967295, %s3026_s12   ;;  %p2091_p0 = scmp.ge.s32.totalorder %s3026_s12, 1  ;;  %s3026_s12 = sphi %s3049_s12, %s13_s12  }
   0x2   : > { %p138_p1 = scmp.lt.s32.totalorder %s3026_s12, 5 }
   0x4   : > { %p139_p2 = pnand %p2091_p0, %p138_p1 }
   0x6   : > { %142 = sbr.rel (%p139_p2) target bundleno = 510 (0x1fe), region = 32 }
   0xd   : > { %v2504_v0 = vld [vmem:[%s3974_s1] sm:$0xff]   ;;  %vm582_vm0 = vcmask 1044480   ;;  %v2505_v1 = vld [vmem:[%s3974_s1 + $0x8] sm:$0x3f]   ;;  %vm583_vm1 = vcmask 1045504   ;;  %s2092_s18 = sshll.u32 %s2087_s13, 7 }
   0xe   : > { %2359 = vmatprep.subr.bf16.mxu0 %v2504_v0  ;;  %2491 = vmatprep.subr.bf16.mxu1 %v2504_v0  ;;  %v3028_v2 = vmov 65535   ;;  %p163_p3 = scmp.lt.s32.totalorder %s2092_s18, 511  ;;  %vm389_vm2 = vcmask 220160   ;;  %vm1902_vm3 = vcmask 23552  }
   0xf   : > { %2360 = vmatpush3.bf16.msra.mxu0 %v2504_v0  ;;  %2493 = vmatpush3.bf16.msra.mxu1 %v2504_v0  ;;  %v584_v3 = vsel %vm582_vm0, 4294967295, %v3028_v2 }
  0x10   : > { %v585_v4 = vsel %vm583_vm1, %v584_v3, 0  ;;  %s4008_s18 = smov (!%p163_p3, %s2092_s18), 511 }
  0x11   : > { %v587_v5 = vand.u32 %v2505_v1, %v585_v4  ;;  %s2093_s19 = sshll.u32 %s4008_s18, 3 }
  0x12   : > { %s3071_s22 = scalar_lea.vmem %s3973_s0, %s2093_s19  ;;  %s3297_s27 = scalar_lea.vmem %s3976_s3, %s2093_s19 }
  0x13   : > { %2361 = vmatprep.subr.bf16.mxu0 %v587_v5  ;;  %2492 = vmatprep.subr.bf16.mxu1 %v587_v5  ;;  %v175_v6 = vld [vmem:[%s3071_s22] sm:$0xff]  ;;  %v176_v7 = vld [vmem:[%s3071_s22 + $0x8] sm:$0xff]  ;;  %v177_v11 = vld [vmem:[%s3071_s22 + $0x10] sm:$0xff] }
  0x14   : > { %2362 = vmatpush3.bf16.msra.mxu0 %v587_v5  ;;  %2494 = vmatpush3.bf16.msra.mxu1 %v587_v5  ;;  %v239_v8 = vld [vmem:[%s3071_s22 + $0x200] sm:$0xff]  ;;  %v303_v9 = vpack.c.bf16 %v176_v7, %v175_v6  ;;  %v240_v10 = vld [vmem:[%s3071_s22 + $0x208] sm:$0xff]  ;;  %v178_v12 = vld [vmem:[%s3071_s22 + $0x18] sm:$0xff] }
  0x15   : > { %v335_v13 = vpack.c.bf16 %v240_v10, %v239_v8  ;;  %v304_v14 = vpack.c.bf16 %v178_v12, %v177_v11  ;;  %v241_v15 = vld [vmem:[%s3071_s22 + $0x210] sm:$0xff]  ;;  %v242_v16 = vld [vmem:[%s3071_s22 + $0x218] sm:$0xff]  ;;  %v179_v17 = vld [vmem:[%s3071_s22 + $0x20] sm:$0xff] }
  0x16   : > { %2363 = vmatprep.mubr.msk.bf16.mxu0 %vm389_vm2, %v303_v9  ;;  %v336_v18 = vpack.c.bf16 %v242_v16, %v241_v15  ;;  %v180_v19 = vld [vmem:[%s3071_s22 + $0x28] sm:$0xff]  ;;  %v243_v20 = vld [vmem:[%s3071_s22 + $0x220] sm:$0xff]  ;;  %v181_v24 = vld [vmem:[%s3071_s22 + $0x30] sm:$0xff] }
  0x17   : > { %v244_v21 = vld [vmem:[%s3071_s22 + $0x228] sm:$0xff]  ;;  %2427 = vmatprep.mubr.msk.bf16.mxu1 %vm389_vm2, %v335_v13  ;;  %2364 = vmatmul.mubr.msk.bf16.vlgmr.msra.gmra.mrb[0].mxu0 %vm389_vm2, %v304_v14  ;;  %v305_v22 = vpack.c.bf16 %v180_v19, %v179_v17  ;;  %v182_v25 = vld [vmem:[%s3071_s22 + $0x38] sm:$0xff]  ;;  %v245_v26 = vld [vmem:[%s3071_s22 + $0x230] sm:$0xff] }
  0x18   : > { %v337_v23 = vpack.c.bf16 %v244_v21, %v243_v20  ;;  %2428 = vmatmul.mubr.msk.bf16.vlgmr.msra.gmra.mrb[0].mxu1 %vm389_vm2, %v336_v18  ;;  %v246_v27 = vld [vmem:[%s3071_s22 + $0x238] sm:$0xff]  ;;  %v183_v28 = vld [vmem:[%s3071_s22 + $0x40] sm:$0xff]  ;;  %v184_v29 = vld [vmem:[%s3071_s22 + $0x48] sm:$0xff]  ;;  %v306_v32 = vpack.c.bf16 %v182_v25, %v181_v24 }
  0x19   : > { %2367 = vmatprep.mubr.msk.bf16.mxu0 %vm389_vm2, %v305_v22  ;;  %v247_v30 = vld [vmem:[%s3071_s22 + $0x240] sm:$0xff]  ;;  %v248_v31 = vld [vmem:[%s3071_s22 + $0x248] sm:$0xff]  ;;  %v338_v33 = vpack.c.bf16 %v246_v27, %v245_v26  ;;  %v307_v34 = vpack.c.bf16 %v184_v29, %v183_v28  ;;  %v185_v36 = vld [vmem:[%s3071_s22 + $0x50] sm:$0xff] }
  0x1a   : > { %2431 = vmatprep.mubr.msk.bf16.mxu1 %vm389_vm2, %v337_v23  ;;  %v339_v35 = vpack.c.bf16 %v248_v31, %v247_v30  ;;  %v186_v37 = vld [vmem:[%s3071_s22 + $0x58] sm:$0xff]  ;;  %v249_v38 = vld [vmem:[%s3071_s22 + $0x250] sm:$0xff]  ;;  %v187_v40 = vld [vmem:[%s3071_s22 + $0x60] sm:$0xff] }
  0x1b   : > { %v250_v39 = vld [vmem:[%s3071_s22 + $0x258] sm:$0xff]  ;;  %v188_v41 = vld [vmem:[%s3071_s22 + $0x68] sm:$0xff]  ;;  %v251_v42 = vld [vmem:[%s3071_s22 + $0x260] sm:$0xff]  ;;  %v308_v44 = vpack.c.bf16 %v186_v37, %v185_v36 }
  0x1c   : > { %v252_v43 = vld [vmem:[%s3071_s22 + $0x268] sm:$0xff]  ;;  %v340_v45 = vpack.c.bf16 %v250_v39, %v249_v38  ;;  %v309_v46 = vpack.c.bf16 %v188_v41, %v187_v40  ;;  %v189_v48 = vld [vmem:[%s3071_s22 + $0x70] sm:$0xff]  ;;  %v190_v49 = vld [vmem:[%s3071_s22 + $0x78] sm:$0xff] }
  0x1d   : > { %v341_v47 = vpack.c.bf16 %v252_v43, %v251_v42  ;;  %v253_v50 = vld [vmem:[%s3071_s22 + $0x270] sm:$0xff]  ;;  %v254_v51 = vld [vmem:[%s3071_s22 + $0x278] sm:$0xff]  ;;  %v191_v52 = vld [vmem:[%s3071_s22 + $0x80] sm:$0xff]  ;;  %v310_v56 = vpack.c.bf16 %v190_v49, %v189_v48 }
  0x1e   : > { %v192_v53 = vld [vmem:[%s3071_s22 + $0x88] sm:$0xff]  ;;  %v255_v54 = vld [vmem:[%s3071_s22 + $0x280] sm:$0xff]  ;;  %v342_v57 = vpack.c.bf16 %v254_v51, %v253_v50  ;;  %v193_v60 = vld [vmem:[%s3071_s22 + $0x90] sm:$0xff] }
  0x1f   : > { %2368 = vmatmul.mubr.msk.bf16.gmra.mrb[4].mxu0 %vm389_vm2, %v306_v32  ;;  %v256_v55 = vld [vmem:[%s3071_s22 + $0x288] sm:$0xff]  ;;  %v311_v58 = vpack.c.bf16 %v192_v53, %v191_v52  ;;  %v194_v61 = vld [vmem:[%s3071_s22 + $0x98] sm:$0xff]  ;;  %v257_v62 = vld [vmem:[%s3071_s22 + $0x290] sm:$0xff] }
  0x20   : > { %2432 = vmatmul.mubr.msk.bf16.gmra.mrb[4].mxu1 %vm389_vm2, %v338_v33  ;;  %2371 = vmatprep.mubr.msk.bf16.mxu0 %vm389_vm2, %v307_v34  ;;  %v343_v59 = vpack.c.bf16 %v256_v55, %v255_v54  ;;  %v258_v63 = vld [vmem:[%s3071_s22 + $0x298] sm:$0xff]  ;;  %v195_v0 = vld [vmem:[%s3071_s22 + $0xa0] sm:$0xff]  ;;  %v196_v1 = vld [vmem:[%s3071_s22 + $0xa8] sm:$0xff]  ;;  %v312_v4 = vpack.c.bf16 %v194_v61, %v193_v60 }
  0x21   : > { %2435 = vmatprep.mubr.msk.bf16.mxu1 %vm389_vm2, %v339_v35  ;;  %v259_v2 = vld [vmem:[%s3071_s22 + $0x2a0] sm:$0xff]  ;;  %v260_v3 = vld [vmem:[%s3071_s22 + $0x2a8] sm:$0xff]  ;;  %v344_v5 = vpack.c.bf16 %v258_v63, %v257_v62  ;;  %v313_v6 = vpack.c.bf16 %v196_v1, %v195_v0  ;;  %v197_v8 = vld [vmem:[%s3071_s22 + $0xb0] sm:$0xff] }
  0x22   : > { %v345_v7 = vpack.c.bf16 %v260_v3, %v259_v2  ;;  %v198_v9 = vld [vmem:[%s3071_s22 + $0xb8] sm:$0xff]  ;;  %v261_v10 = vld [vmem:[%s3071_s22 + $0x2b0] sm:$0xff]  ;;  %v199_v12 = vld [vmem:[%s3071_s22 + $0xc0] sm:$0xff] }
  0x23   : > { %v262_v11 = vld [vmem:[%s3071_s22 + $0x2b8] sm:$0xff]  ;;  %v200_v13 = vld [vmem:[%s3071_s22 + $0xc8] sm:$0xff]  ;;  %v263_v14 = vld [vmem:[%s3071_s22 + $0x2c0] sm:$0xff]  ;;  %v314_v16 = vpack.c.bf16 %v198_v9, %v197_v8 }
  0x24   : > { %v264_v15 = vld [vmem:[%s3071_s22 + $0x2c8] sm:$0xff]  ;;  %v346_v17 = vpack.c.bf16 %v262_v11, %v261_v10  ;;  %v315_v18 = vpack.c.bf16 %v200_v13, %v199_v12  ;;  %v201_v20 = vld [vmem:[%s3071_s22 + $0xd0] sm:$0xff]  ;;  %v202_v21 = vld [vmem:[%s3071_s22 + $0xd8] sm:$0xff] }
  0x25   : > { %v347_v19 = vpack.c.bf16 %v264_v15, %v263_v14  ;;  %v265_v22 = vld [vmem:[%s3071_s22 + $0x2d0] sm:$0xff]  ;;  %v266_v23 = vld [vmem:[%s3071_s22 + $0x2d8] sm:$0xff]  ;;  %v203_v24 = vld [vmem:[%s3071_s22 + $0xe0] sm:$0xff]  ;;  %v316_v28 = vpack.c.bf16 %v202_v21, %v201_v20 }
  0x26   : > { %v204_v25 = vld [vmem:[%s3071_s22 + $0xe8] sm:$0xff]  ;;  %v267_v26 = vld [vmem:[%s3071_s22 + $0x2e0] sm:$0xff]  ;;  %v348_v29 = vpack.c.bf16 %v266_v23, %v265_v22  ;;  %v205_v32 = vld [vmem:[%s3071_s22 + $0xf0] sm:$0xff] }
  0x27   : > { %2372 = vmatmul.mubr.msk.bf16.gmra.mrb[8].mxu0 %vm389_vm2, %v308_v44  ;;  %v268_v27 = vld [vmem:[%s3071_s22 + $0x2e8] sm:$0xff]  ;;  %v317_v30 = vpack.c.bf16 %v204_v25, %v203_v24  ;;  %v206_v33 = vld [vmem:[%s3071_s22 + $0xf8] sm:$0xff]  ;;  %v269_v34 = vld [vmem:[%s3071_s22 + $0x2f0] sm:$0xff] }
  0x28   : > { %2436 = vmatmul.mubr.msk.bf16.gmra.mrb[8].mxu1 %vm389_vm2, %v340_v45  ;;  %2375 = vmatprep.mubr.msk.bf16.mxu0 %vm389_vm2, %v309_v46  ;;  %v349_v31 = vpack.c.bf16 %v268_v27, %v267_v26  ;;  %v270_v35 = vld [vmem:[%s3071_s22 + $0x2f8] sm:$0xff]  ;;  %v207_v36 = vld [vmem:[%s3071_s22 + $0x100] sm:$0xff]  ;;  %v208_v37 = vld [vmem:[%s3071_s22 + $0x108] sm:$0xff]  ;;  %v318_v40 = vpack.c.bf16 %v206_v33, %v205_v32 }
  0x29   : > { %2439 = vmatprep.mubr.msk.bf16.mxu1 %vm389_vm2, %v341_v47  ;;  %v271_v38 = vld [vmem:[%s3071_s22 + $0x300] sm:$0xff]  ;;  %v272_v39 = vld [vmem:[%s3071_s22 + $0x308] sm:$0xff]  ;;  %v350_v41 = vpack.c.bf16 %v270_v35, %v269_v34  ;;  %v319_v42 = vpack.c.bf16 %v208_v37, %v207_v36  ;;  %v209_v44 = vld [vmem:[%s3071_s22 + $0x110] sm:$0xff] }
  0x2a   : > { %v351_v43 = vpack.c.bf16 %v272_v39, %v271_v38  ;;  %v210_v45 = vld [vmem:[%s3071_s22 + $0x118] sm:$0xff]  ;;  %v273_v46 = vld [vmem:[%s3071_s22 + $0x310] sm:$0xff]  ;;  %v211_v48 = vld [vmem:[%s3071_s22 + $0x120] sm:$0xff] }
  0x2b   : > { %v274_v47 = vld [vmem:[%s3071_s22 + $0x318] sm:$0xff]  ;;  %v212_v49 = vld [vmem:[%s3071_s22 + $0x128] sm:$0xff]  ;;  %v275_v50 = vld [vmem:[%s3071_s22 + $0x320] sm:$0xff]  ;;  %v320_v52 = vpack.c.bf16 %v210_v45, %v209_v44 }
  0x2c   : > { %v276_v51 = vld [vmem:[%s3071_s22 + $0x328] sm:$0xff]  ;;  %v352_v53 = vpack.c.bf16 %v274_v47, %v273_v46  ;;  %v321_v54 = vpack.c.bf16 %v212_v49, %v211_v48  ;;  %v215_v60 = vld [vmem:[%s3071_s22 + $0x140] sm:$0xff] }
  0x2d   : > { %v353_v55 = vpack.c.bf16 %v276_v51, %v275_v50  ;;  %v216_v61 = vld [vmem:[%s3071_s22 + $0x148] sm:$0xff]  ;;  %v279_v62 = vld [vmem:[%s3071_s22 + $0x340] sm:$0xff] }
  0x2e   : > { %v280_v63 = vld [vmem:[%s3071_s22 + $0x348] sm:$0xff]  ;;  %v323_v2 = vpack.c.bf16 %v216_v61, %v215_v60  ;;  %v219_v8 = vld [vmem:[%s3071_s22 + $0x160] sm:$0xff] }
  0x2f   : > { %2376 = vmatmul.mubr.msk.bf16.gmra.mrb[12].mxu0 %vm389_vm2, %v310_v56  ;;  %v213_v56 = vld [vmem:[%s3071_s22 + $0x130] sm:$0xff]  ;;  %v355_v3 = vpack.c.bf16 %v280_v63, %v279_v62  ;;  %v220_v9 = vld [vmem:[%s3071_s22 + $0x168] sm:$0xff]  ;;  %v283_v10 = vld [vmem:[%s3071_s22 + $0x360] sm:$0xff] }
  0x30   : > { %2440 = vmatmul.mubr.msk.bf16.gmra.mrb[12].mxu1 %vm389_vm2, %v342_v57  ;;  %2379 = vmatprep.mubr.msk.bf16.mxu0 %vm389_vm2, %v311_v58  ;;  %v214_v57 = vld [vmem:[%s3071_s22 + $0x138] sm:$0xff]  ;;  %v277_v58 = vld [vmem:[%s3071_s22 + $0x330] sm:$0xff]  ;;  %v284_v11 = vld [vmem:[%s3071_s22 + $0x368] sm:$0xff]  ;;  %v325_v14 = vpack.c.bf16 %v220_v9, %v219_v8 }
  0x31   : > { %2443 = vmatprep.mubr.msk.bf16.mxu1 %vm389_vm2, %v343_v59  ;;  %v278_v59 = vld [vmem:[%s3071_s22 + $0x338] sm:$0xff]  ;;  %v322_v0 = vpack.c.bf16 %v214_v57, %v213_v56  ;;  %v357_v15 = vpack.c.bf16 %v284_v11, %v283_v10  ;;  %v223_v20 = vld [vmem:[%s3071_s22 + $0x180] sm:$0xff]  ;;  %v224_v21 = vld [vmem:[%s3071_s22 + $0x188] sm:$0xff] }
  0x32   : > { %v354_v1 = vpack.c.bf16 %v278_v59, %v277_v58  ;;  %v287_v22 = vld [vmem:[%s3071_s22 + $0x380] sm:$0xff]  ;;  %v288_v23 = vld [vmem:[%s3071_s22 + $0x388] sm:$0xff]  ;;  %v327_v26 = vpack.c.bf16 %v224_v21, %v223_v20 }
  0x33   : > { %v359_v27 = vpack.c.bf16 %v288_v23, %v287_v22  ;;  %v227_v32 = vld [vmem:[%s3071_s22 + $0x1a0] sm:$0xff]  ;;  %v228_v33 = vld [vmem:[%s3071_s22 + $0x1a8] sm:$0xff] }
  0x34   : > { %v291_v34 = vld [vmem:[%s3071_s22 + $0x3a0] sm:$0xff]  ;;  %v292_v35 = vld [vmem:[%s3071_s22 + $0x3a8] sm:$0xff]  ;;  %v329_v38 = vpack.c.bf16 %v228_v33, %v227_v32 }
  0x35   : > { %v361_v39 = vpack.c.bf16 %v292_v35, %v291_v34  ;;  %v231_v44 = vld [vmem:[%s3071_s22 + $0x1c0] sm:$0xff]  ;;  %v232_v45 = vld [vmem:[%s3071_s22 + $0x1c8] sm:$0xff] }
  0x36   : > { %v295_v46 = vld [vmem:[%s3071_s22 + $0x3c0] sm:$0xff]  ;;  %v296_v47 = vld [vmem:[%s3071_s22 + $0x3c8] sm:$0xff]  ;;  %v331_v50 = vpack.c.bf16 %v232_v45, %v231_v44 }
  0x37   : > { %2380 = vmatmul.mubr.msk.bf16.gmra.mrb[16].mxu0 %vm389_vm2, %v312_v4  ;;  %v217_v4 = vld [vmem:[%s3071_s22 + $0x150] sm:$0xff]  ;;  %v363_v51 = vpack.c.bf16 %v296_v47, %v295_v46  ;;  %v235_v56 = vld [vmem:[%s3071_s22 + $0x1e0] sm:$0xff]  ;;  %v236_v57 = vld [vmem:[%s3071_s22 + $0x1e8] sm:$0xff] }
  0x38   : > { %2444 = vmatmul.mubr.msk.bf16.gmra.mrb[16].mxu1 %vm389_vm2, %v344_v5  ;;  %2383 = vmatprep.mubr.msk.bf16.mxu0 %vm389_vm2, %v313_v6  ;;  %v218_v5 = vld [vmem:[%s3071_s22 + $0x158] sm:$0xff]  ;;  %v281_v6 = vld [vmem:[%s3071_s22 + $0x350] sm:$0xff]  ;;  %v299_v58 = vld [vmem:[%s3071_s22 + $0x3e0] sm:$0xff]  ;;  %v333_v62 = vpack.c.bf16 %v236_v57, %v235_v56 }
  0x39   : > { %2447 = vmatprep.mubr.msk.bf16.mxu1 %vm389_vm2, %v345_v7  ;;  %v282_v7 = vld [vmem:[%s3071_s22 + $0x358] sm:$0xff]  ;;  %v324_v12 = vpack.c.bf16 %v218_v5, %v217_v4  ;;  %v300_v59 = vld [vmem:[%s3071_s22 + $0x3e8] sm:$0xff] }
  0x3a   : > { %v356_v13 = vpack.c.bf16 %v282_v7, %v281_v6  ;;  %v365_v63 = vpack.c.bf16 %v300_v59, %v299_v58  ;;  %v3268_v6 = vld [vmem:[%s3975_s2] ss:$0 sm:$0xff] }
  0x3f   : > { %2384 = vmatmul.mubr.msk.bf16.gmra.mrb[20].mxu0 %vm389_vm2, %v314_v16  ;;  %v221_v16 = vld [vmem:[%s3071_s22 + $0x170] sm:$0xff] }
  0x40   : > { %2448 = vmatmul.mubr.msk.bf16.gmra.mrb[20].mxu1 %vm389_vm2, %v346_v17  ;;  %2387 = vmatprep.mubr.msk.bf16.mxu0 %vm389_vm2, %v315_v18  ;;  %v222_v17 = vld [vmem:[%s3071_s22 + $0x178] sm:$0xff]  ;;  %v285_v18 = vld [vmem:[%s3071_s22 + $0x370] sm:$0xff] }
  0x41   : > { %2451 = vmatprep.mubr.msk.bf16.mxu1 %vm389_vm2, %v347_v19  ;;  %v286_v19 = vld [vmem:[%s3071_s22 + $0x378] sm:$0xff]  ;;  %v326_v24 = vpack.c.bf16 %v222_v17, %v221_v16 }
  0x42   : > { %v358_v25 = vpack.c.bf16 %v286_v19, %v285_v18 }
  0x47   : > { %2388 = vmatmul.mubr.msk.bf16.gmra.mrb[24].mxu0 %vm389_vm2, %v316_v28  ;;  %v225_v28 = vld [vmem:[%s3071_s22 + $0x190] sm:$0xff] }
  0x48   : > { %2452 = vmatmul.mubr.msk.bf16.gmra.mrb[24].mxu1 %vm389_vm2, %v348_v29  ;;  %2391 = vmatprep.mubr.msk.bf16.mxu0 %vm389_vm2, %v317_v30  ;;  %v226_v29 = vld [vmem:[%s3071_s22 + $0x198] sm:$0xff]  ;;  %v289_v30 = vld [vmem:[%s3071_s22 + $0x390] sm:$0xff] }
  0x49   : > { %2455 = vmatprep.mubr.msk.bf16.mxu1 %vm389_vm2, %v349_v31  ;;  %v290_v31 = vld [vmem:[%s3071_s22 + $0x398] sm:$0xff]  ;;  %v328_v36 = vpack.c.bf16 %v226_v29, %v225_v28 }
  0x4a   : > { %v360_v37 = vpack.c.bf16 %v290_v31, %v289_v30 }
  0x4f   : > { %2392 = vmatmul.mubr.msk.bf16.gmra.mrb[28].mxu0 %vm389_vm2, %v318_v40  ;;  %v229_v40 = vld [vmem:[%s3071_s22 + $0x1b0] sm:$0xff] }
  0x50   : > { %2456 = vmatmul.mubr.msk.bf16.gmra.mrb[28].mxu1 %vm389_vm2, %v350_v41  ;;  %2395 = vmatprep.mubr.msk.bf16.mxu0 %vm389_vm2, %v319_v42  ;;  %v230_v41 = vld [vmem:[%s3071_s22 + $0x1b8] sm:$0xff]  ;;  %v293_v42 = vld [vmem:[%s3071_s22 + $0x3b0] sm:$0xff] }
  0x51   : > { %2459 = vmatprep.mubr.msk.bf16.mxu1 %vm389_vm2, %v351_v43  ;;  %v294_v43 = vld [vmem:[%s3071_s22 + $0x3b8] sm:$0xff]  ;;  %v330_v48 = vpack.c.bf16 %v230_v41, %v229_v40 }
  0x52   : > { %v362_v49 = vpack.c.bf16 %v294_v43, %v293_v42 }
  0x57   : > { %2396 = vmatmul.mubr.msk.bf16.gmra.mrb[32].mxu0 %vm389_vm2, %v320_v52  ;;  %v233_v52 = vld [vmem:[%s3071_s22 + $0x1d0] sm:$0xff] }
  0x58   : > { %2460 = vmatmul.mubr.msk.bf16.gmra.mrb[32].mxu1 %vm389_vm2, %v352_v53  ;;  %2399 = vmatprep.mubr.msk.bf16.mxu0 %vm389_vm2, %v321_v54  ;;  %v234_v53 = vld [vmem:[%s3071_s22 + $0x1d8] sm:$0xff]  ;;  %v297_v54 = vld [vmem:[%s3071_s22 + $0x3d0] sm:$0xff] }
  0x59   : > { %2463 = vmatprep.mubr.msk.bf16.mxu1 %vm389_vm2, %v353_v55  ;;  %v298_v55 = vld [vmem:[%s3071_s22 + $0x3d8] sm:$0xff]  ;;  %v332_v60 = vpack.c.bf16 %v234_v53, %v233_v52 }
  0x5a   : > { %v364_v61 = vpack.c.bf16 %v298_v55, %v297_v54 }
  0x5f   : > { %2400 = vmatmul.mubr.msk.bf16.gmra.mrb[36].mxu0 %vm389_vm2, %v322_v0  ;;  %v237_v0 = vld [vmem:[%s3071_s22 + $0x1f0] sm:$0xff] }
  0x60   : > { %2464 = vmatmul.mubr.msk.bf16.gmra.mrb[36].mxu1 %vm389_vm2, %v354_v1  ;;  %2403 = vmatprep.mubr.msk.bf16.mxu0 %vm389_vm2, %v323_v2  ;;  %v238_v1 = vld [vmem:[%s3071_s22 + $0x1f8] sm:$0xff]  ;;  %v301_v2 = vld [vmem:[%s3071_s22 + $0x3f0] sm:$0xff] }
  0x61   : > { %2467 = vmatprep.mubr.msk.bf16.mxu1 %vm389_vm2, %v355_v3  ;;  %v302_v3 = vld [vmem:[%s3071_s22 + $0x3f8] sm:$0xff]  ;;  %v334_v4 = vpack.c.bf16 %v238_v1, %v237_v0 }
  0x62   : > { %v366_v5 = vpack.c.bf16 %v302_v3, %v301_v2 }
  0x67   : > { %2404 = vmatmul.mubr.msk.bf16.gmra.mrb[40].mxu0 %vm389_vm2, %v324_v12 }
  0x68   : > { %2468 = vmatmul.mubr.msk.bf16.gmra.mrb[40].mxu1 %vm389_vm2, %v356_v13  ;;  %2407 = vmatprep.mubr.msk.bf16.mxu0 %vm389_vm2, %v325_v14 }
  0x69   : > { %2471 = vmatprep.mubr.msk.bf16.mxu1 %vm389_vm2, %v357_v15 }
  0x6f   : > { %2408 = vmatmul.mubr.msk.bf16.gmra.mrb[44].mxu0 %vm389_vm2, %v326_v24 }
  0x70   : > { %2472 = vmatmul.mubr.msk.bf16.gmra.mrb[44].mxu1 %vm389_vm2, %v358_v25  ;;  %2411 = vmatprep.mubr.msk.bf16.mxu0 %vm389_vm2, %v327_v26 }
  0x71   : > { %2475 = vmatprep.mubr.msk.bf16.mxu1 %vm389_vm2, %v359_v27 }
  0x77   : > { %2412 = vmatmul.mubr.msk.bf16.gmra.mrb[48].mxu0 %vm389_vm2, %v328_v36 }
  0x78   : > { %2476 = vmatmul.mubr.msk.bf16.gmra.mrb[48].mxu1 %vm389_vm2, %v360_v37  ;;  %2415 = vmatprep.mubr.msk.bf16.mxu0 %vm389_vm2, %v329_v38 }
  0x79   : > { %2479 = vmatprep.mubr.msk.bf16.mxu1 %vm389_vm2, %v361_v39 }
  0x7f   : > { %2416 = vmatmul.mubr.msk.bf16.gmra.mrb[52].mxu0 %vm389_vm2, %v330_v48 }
  0x80   : > { %2480 = vmatmul.mubr.msk.bf16.gmra.mrb[52].mxu1 %vm389_vm2, %v362_v49  ;;  %2419 = vmatprep.mubr.msk.bf16.mxu0 %vm389_vm2, %v331_v50 }
  0x81   : > { %2483 = vmatprep.mubr.msk.bf16.mxu1 %vm389_vm2, %v363_v51 }
  0x87   : > { %2420 = vmatmul.mubr.msk.bf16.gmra.mrb[56].mxu0 %vm389_vm2, %v332_v60 }
  0x88   : > { %2484 = vmatmul.mubr.msk.bf16.gmra.mrb[56].mxu1 %vm389_vm2, %v364_v61  ;;  %2423 = vmatprep.mubr.msk.bf16.mxu0 %vm389_vm2, %v333_v62 }
  0x89   : > { %2487 = vmatprep.mubr.msk.bf16.mxu1 %vm389_vm2, %v365_v63 }
  0x8f   : > { %2424 = vmatmul.mubr.msk.bf16.gmra.mrb[60].mxu0 %vm389_vm2, %v334_v4 }
  0x90   : > { %2488 = vmatmul.mubr.msk.bf16.gmra.mrb[60].mxu1 %vm389_vm2, %v366_v5 }
  0xea   : > { %v2365_v7 = vpop.f32.mrb[0].mxu0 }
  0xeb   : > { %v632_v8 = vadd.f32 %v2365_v7, %v3268_v6  ;;  %v2429_v9 = vpop.f32.mrb[0].mxu1  ;;  %v623_v10 = vpop.f32.mrb[1].mxu0 }
  0xec   : > { %v888_v11 = vadd.f32 %v2429_v9, %v3268_v6  ;;  %v624_v12 = vadd.f32 %v3268_v6, %v623_v10  ;;  %v879_v13 = vpop.f32.mrb[1].mxu1  ;;  %v2366_v14 = vpop.f32.mrb[2].mxu0 }
  0xed   : > { %v2165_v15 = vmul.f32 -1.442695, %v632_v8  ;;  %v880_v16 = vadd.f32 %v3268_v6, %v879_v13  ;;  %v635_v17 = vadd.f32 %v2366_v14, %v3268_v6  ;;  %v2430_v18 = vpop.f32.mrb[2].mxu1  ;;  %v626_v19 = vpop.f32.mrb[3].mxu0 }
  0xee   : > { %v2229_v20 = vmul.f32 -1.442695, %v888_v11  ;;  %v2163_v21 = vmul.f32 -1.442695, %v624_v12  ;;  %v891_v22 = vadd.f32 %v2430_v18, %v3268_v6  ;;  %v627_v23 = vadd.f32 %v3268_v6, %v626_v19  ;;  %v882_v24 = vpop.f32.mrb[3].mxu1 }
  0xef   : > { %2506 = vpow2.f32 %v2165_v15  ;;  %v2227_v25 = vmul.f32 -1.442695, %v880_v16  ;;  %v2166_v26 = vmul.f32 -1.442695, %v635_v17  ;;  %v883_v27 = vadd.f32 %v3268_v6, %v882_v24 }
  0xf0   : > { %2508 = vpow2.f32 %v2229_v20  ;;  %v2230_v28 = vmul.f32 -1.442695, %v891_v22  ;;  %v2164_v29 = vmul.f32 -1.442695, %v627_v23 }
  0xf1   : > { %2510 = vpow2.f32 %v2163_v21  ;;  %v2228_v30 = vmul.f32 -1.442695, %v883_v27 }
  0xf2   : > { %2512 = vpow2.f32 %v2227_v25  ;;  %v2369_v31 = vpop.f32.mrb[4].mxu0 }
  0xf3   : > { %2514 = vpow2.f32 %v2166_v26  ;;  %v648_v32 = vadd.f32 %v2369_v31, %v3268_v6  ;;  %v2433_v33 = vpop.f32.mrb[4].mxu1  ;;  %v639_v34 = vpop.f32.mrb[5].mxu0 }
  0xf4   : > { %2516 = vpow2.f32 %v2230_v28  ;;  %v904_v35 = vadd.f32 %v2433_v33, %v3268_v6  ;;  %v640_v36 = vadd.f32 %v3268_v6, %v639_v34  ;;  %v895_v37 = vpop.f32.mrb[5].mxu1  ;;  %v2370_v38 = vpop.f32.mrb[6].mxu0 }
  0xf5   : > { %2518 = vpow2.f32 %v2164_v29  ;;  %v2169_v39 = vmul.f32 -1.442695, %v648_v32  ;;  %v896_v40 = vadd.f32 %v3268_v6, %v895_v37  ;;  %v651_v41 = vadd.f32 %v2370_v38, %v3268_v6  ;;  %v2434_v42 = vpop.f32.mrb[6].mxu1  ;;  %v642_v43 = vpop.f32.mrb[7].mxu0 }
  0xf6   : > { %2520 = vpow2.f32 %v2228_v30  ;;  %v2233_v44 = vmul.f32 -1.442695, %v904_v35  ;;  %v2167_v45 = vmul.f32 -1.442695, %v640_v36  ;;  %v898_v46 = vpop.f32.mrb[7].mxu1  ;;  %v907_v11 = vadd.f32 %v2434_v42, %v3268_v6 }
  0xf7   : > { %2522 = vpow2.f32 %v2169_v39  ;;  %v2231_v47 = vmul.f32 -1.442695, %v896_v40  ;;  %v2170_v48 = vmul.f32 -1.442695, %v651_v41  ;;  %v643_v14 = vadd.f32 %v3268_v6, %v642_v43 }
  0xf8   : > { %2524 = vpow2.f32 %v2233_v44  ;;  %v899_v18 = vadd.f32 %v3268_v6, %v898_v46  ;;  %v2234_v28 = vmul.f32 -1.442695, %v907_v11 }
  0xf9   : > { %v2507_v49 = vpop.eup %2506  ;;  %2526 = vpow2.f32 %v2167_v45  ;;  %v2168_v34 = vmul.f32 -1.442695, %v643_v14 }
  0xfa   : > { %v2509_v50 = vpop.eup %2508  ;;  %v1520_v51 = vadd.f32 1.0, %v2507_v49  ;;  %2528 = vpow2.f32 %v2231_v47  ;;  %v2373_v52 = vpop.f32.mrb[8].mxu0  ;;  %v2232_v38 = vmul.f32 -1.442695, %v899_v18 }
  0xfb   : > { %v2511_v53 = vpop.eup %2510  ;;  %v1584_v54 = vadd.f32 1.0, %v2509_v50  ;;  %2530 = vpow2.f32 %v2170_v48  ;;  %v2437_v55 = vpop.f32.mrb[8].mxu1  ;;  %v664_v23 = vadd.f32 %v2373_v52, %v3268_v6 }
  0xfc   : > { %v655_v56 = vpop.f32.mrb[9].mxu0  ;;  %v2513_v57 = vpop.eup %2512  ;;  %2532 = vrcp.f32 %v1520_v51  ;;  %v1518_v58 = vadd.f32 1.0, %v2511_v53  ;;  %v920_v29 = vadd.f32 %v2437_v55, %v3268_v6 }
  0xfd   : > { %v911_v59 = vpop.f32.mrb[9].mxu1  ;;  %v2374_v60 = vpop.f32.mrb[10].mxu0  ;;  %2534 = vrcp.f32 %v1584_v54  ;;  %v1582_v62 = vadd.f32 1.0, %v2513_v57  ;;  %v656_v35 = vadd.f32 %v3268_v6, %v655_v56  ;;  %v2173_v41 = vmul.f32 -1.442695, %v664_v23 }
  0xfe   : > { %v2515_v61 = vpop.eup %2514  ;;  %v2438_v63 = vpop.f32.mrb[10].mxu1  ;;  %2536 = vrcp.f32 %v1518_v58  ;;  %v912_v39 = vadd.f32 %v3268_v6, %v911_v59  ;;  %v667_v42 = vadd.f32 %v2374_v60, %v3268_v6  ;;  %v2237_v44 = vmul.f32 -1.442695, %v920_v29 }
  0xff   : > { %v3283_v0 = vpop.f32.mrb[11].mxu0  ;;  %v2517_v1 = vpop.eup %2516  ;;  %v1521_v2 = vadd.f32 1.0, %v2515_v61  ;;  %2538 = vrcp.f32 %v1582_v62  ;;  %v923_v45 = vadd.f32 %v2438_v63, %v3268_v6  ;;  %v2171_v47 = vmul.f32 -1.442695, %v656_v35 }
 0x100   : > { %v3285_v3 = vpop.f32.mrb[11].mxu1  ;;  %v2519_v4 = vpop.eup %2518  ;;  %v1585_v5 = vadd.f32 1.0, %v2517_v1  ;;  %v659_v48 = vadd.f32 %v3268_v6, %v3283_v0  ;;  %v2235_v51 = vmul.f32 -1.442695, %v912_v39  ;;  %v2174_v56 = vmul.f32 -1.442695, %v667_v42 }
 0x101   : > { %v2521_v7 = vpop.eup %2520  ;;  %2540 = vrcp.f32 %v1521_v2  ;;  %v1519_v8 = vadd.f32 1.0, %v2519_v4  ;;  %v915_v52 = vadd.f32 %v3268_v6, %v3285_v3  ;;  %v2238_v61 = vmul.f32 -1.442695, %v923_v45 }
 0x102   : > { %v2523_v9 = vpop.eup %2522  ;;  %2542 = vrcp.f32 %v1585_v5  ;;  %v1583_v10 = vadd.f32 1.0, %v2521_v7  ;;  %v2377_v15 = vpop.f32.mrb[12].mxu0  ;;  %v2172_v2 = vmul.f32 -1.442695, %v659_v48 }
 0x103   : > { %v2525_v12 = vpop.eup %2524  ;;  %2544 = vrcp.f32 %v1519_v8  ;;  %v1524_v13 = vadd.f32 1.0, %v2523_v9  ;;  %v2441_v19 = vpop.f32.mrb[12].mxu1  ;;  %v680_v57 = vadd.f32 %v2377_v15, %v3268_v6  ;;  %v2236_v5 = vmul.f32 -1.442695, %v915_v52 }
 0x104   : > { %v2527_v16 = vpop.eup %2526  ;;  %2546 = vrcp.f32 %v1583_v10  ;;  %v1588_v17 = vadd.f32 1.0, %v2525_v12  ;;  %v3290_v20 = vpop.f32.mrb[13].mxu0  ;;  %v936_v62 = vadd.f32 %v2441_v19, %v3268_v6 }
 0x105   : > { %v2529_v21 = vpop.eup %2528  ;;  %2548 = vrcp.f32 %v1524_v13  ;;  %v1522_v22 = vadd.f32 1.0, %v2527_v16  ;;  %v3300_v24 = vpop.f32.mrb[13].mxu1  ;;  %v2177_v8 = vmul.f32 -1.442695, %v680_v57 }
 0x106   : > { %v3302_v25 = vpop.f32.mrb[14].mxu0  ;;  %v2531_v26 = vpop.eup %2530  ;;  %2550 = vrcp.f32 %v1588_v17  ;;  %v1586_v27 = vadd.f32 1.0, %v2529_v21  ;;  %v2241_v10 = vmul.f32 -1.442695, %v936_v62 }
 0x107   : > { %v3305_v30 = vpop.f32.mrb[14].mxu1  ;;  %v3307_v31 = vpop.f32.mrb[15].mxu0  ;;  %2552 = vrcp.f32 %v1522_v22  ;;  %v1525_v33 = vadd.f32 1.0, %v2531_v26 }
 0x108   : > { %v2533_v32 = vpop.eup %2532  ;;  %v3310_v36 = vpop.f32.mrb[15].mxu1  ;;  %2554 = vrcp.f32 %v1586_v27 }
 0x109   : > { %v2535_v37 = vpop.eup %2534  ;;  %1905 = vst.msk [vmem:[%s3297_s27 + $0x10] sm:$0xff] %vm1902_vm3, %v2533_v32  ;;  %2556 = vrcp.f32 %v1525_v33 }
 0x10a   : > { %v2537_v40 = vpop.eup %2536  ;;  %1969 = vst.msk [vmem:[%s3297_s27 + $0x210] sm:$0xff] %vm1902_vm3, %v2535_v37  ;;  %2558 = vpow2.f32 %v2234_v28  ;;  %v3325_v49 = vpop.f32.mrb[16].mxu0 }
 0x10b   : > { %v2539_v43 = vpop.eup %2538  ;;  %1903 = vst.msk [vmem:[%s3297_s27] sm:$0xff] %vm1902_vm3, %v2537_v40  ;;  %2560 = vpow2.f32 %v2168_v34  ;;  %v3331_v53 = vpop.f32.mrb[16].mxu1 }
 0x10c   : > { %v2541_v46 = vpop.eup %2540  ;;  %1967 = vst.msk [vmem:[%s3297_s27 + $0x200] sm:$0xff] %vm1902_vm3, %v2539_v43  ;;  %2562 = vpow2.f32 %v2232_v38  ;;  %v3333_v54 = vpop.f32.mrb[17].mxu0 }
 0x10d   : > { %v2543_v50 = vpop.eup %2542  ;;  %1906 = vst.msk [vmem:[%s3297_s27 + $0x18] sm:$0xff] %vm1902_vm3, %v2541_v46  ;;  %2564 = vpow2.f32 %v2173_v41  ;;  %v3338_v58 = vpop.f32.mrb[17].mxu1 }
 0x10e   : > { %v2545_v55 = vpop.eup %2544  ;;  %1970 = vst.msk [vmem:[%s3297_s27 + $0x218] sm:$0xff] %vm1902_vm3, %v2543_v50  ;;  %v3340_v59 = vpop.f32.mrb[18].mxu0  ;;  %2566 = vpow2.f32 %v2237_v44  ;;  %v672_v44 = vadd.f32 %v3268_v6, %v3290_v20  ;;  %v928_v50 = vadd.f32 %v3268_v6, %v3300_v24  ;;  %v683_v20 = vadd.f32 %v3302_v25, %v3268_v6 }
 0x10f   : > { %v2547_v60 = vpop.eup %2546  ;;  %1904 = vst.msk [vmem:[%s3297_s27 + $0x8] sm:$0xff] %vm1902_vm3, %v2545_v55  ;;  %v3345_v63 = vpop.f32.mrb[18].mxu1  ;;  %2568 = vpow2.f32 %v2171_v47  ;;  %v939_v24 = vadd.f32 %v3305_v30, %v3268_v6  ;;  %v675_v25 = vadd.f32 %v3268_v6, %v3307_v31 }
 0x110   : > { %v3347_v0 = vpop.f32.mrb[19].mxu0  ;;  %v2549_v1 = vpop.eup %2548  ;;  %1968 = vst.msk [vmem:[%s3297_s27 + $0x208] sm:$0xff] %vm1902_vm3, %v2547_v60  ;;  %2570 = vpow2.f32 %v2235_v51  ;;  %v2178_v30 = vmul.f32 -1.442695, %v683_v20 }
 0x111   : > { %v3351_v3 = vpop.f32.mrb[19].mxu1  ;;  %v2551_v4 = vpop.eup %2550  ;;  %1909 = vst.msk [vmem:[%s3297_s27 + $0x30] sm:$0xff] %vm1902_vm3, %v2549_v1  ;;  %2572 = vpow2.f32 %v2174_v56  ;;  %v2242_v31 = vmul.f32 -1.442695, %v939_v24 }
 0x112   : > { %v2553_v7 = vpop.eup %2552  ;;  %1973 = vst.msk [vmem:[%s3297_s27 + $0x230] sm:$0xff] %vm1902_vm3, %v2551_v4  ;;  %2574 = vpow2.f32 %v2238_v61  ;;  %v3361_v12 = vpop.f32.mrb[20].mxu0 }
 0x113   : > { %v2555_v9 = vpop.eup %2554  ;;  %1907 = vst.msk [vmem:[%s3297_s27 + $0x20] sm:$0xff] %vm1902_vm3, %v2553_v7  ;;  %2576 = vpow2.f32 %v2172_v2  ;;  %v3365_v14 = vpop.f32.mrb[20].mxu1 }
 0x114   : > { %v2557_v11 = vpop.eup %2556  ;;  %1971 = vst.msk [vmem:[%s3297_s27 + $0x220] sm:$0xff] %vm1902_vm3, %v2555_v9  ;;  %2578 = vpow2.f32 %v2236_v5  ;;  %v3367_v15 = vpop.f32.mrb[21].mxu0  ;;  %v2175_v5 = vmul.f32 -1.442695, %v672_v44  ;;  %v2239_v9 = vmul.f32 -1.442695, %v928_v50 }
 0x115   : > { %v2559_v13 = vpop.eup %2558  ;;  %1910 = vst.msk [vmem:[%s3297_s27 + $0x38] sm:$0xff] %vm1902_vm3, %v2557_v11  ;;  %2580 = vpow2.f32 %v2177_v8  ;;  %v3369_v18 = vpop.f32.mrb[21].mxu1 }
 0x116   : > { %v2561_v16 = vpop.eup %2560  ;;  %v1589_v17 = vadd.f32 1.0, %v2559_v13  ;;  %v3371_v19 = vpop.f32.mrb[22].mxu0  ;;  %2582 = vpow2.f32 %v2241_v10  ;;  %v931_v10 = vadd.f32 %v3268_v6, %v3310_v36  ;;  %v696_v13 = vadd.f32 %v3325_v49, %v3268_v6 }
 0x117   : > { %v2563_v21 = vpop.eup %2562  ;;  %v1523_v22 = vadd.f32 1.0, %v2561_v16  ;;  %v3373_v23 = vpop.f32.mrb[22].mxu1 }
 0x118   : > { %v3375_v26 = vpop.f32.mrb[23].mxu0  ;;  %v2565_v27 = vpop.eup %2564  ;;  %2584 = vrcp.f32 %v1589_v17  ;;  %v1587_v28 = vadd.f32 1.0, %v2563_v21  ;;  %v952_v17 = vadd.f32 %v3331_v53, %v3268_v6  ;;  %v2240_v53 = vmul.f32 -1.442695, %v931_v10 }
 0x119   : > { %v3377_v29 = vpop.f32.mrb[23].mxu1  ;;  %v2567_v32 = vpop.eup %2566  ;;  %2586 = vrcp.f32 %v1523_v22  ;;  %v1528_v33 = vadd.f32 1.0, %v2565_v27  ;;  %v2176_v22 = vmul.f32 -1.442695, %v675_v25  ;;  %v688_v27 = vadd.f32 %v3268_v6, %v3333_v54 }
 0x11a   : > { %v2569_v34 = vpop.eup %2568  ;;  %2588 = vrcp.f32 %v1587_v28  ;;  %v1592_v35 = vadd.f32 1.0, %v2567_v32  ;;  %v3379_v41 = vpop.f32.mrb[24].mxu0  ;;  %v2181_v54 = vmul.f32 -1.442695, %v696_v13 }
 0x11b   : > { %v2571_v37 = vpop.eup %2570  ;;  %2590 = vrcp.f32 %v1528_v33  ;;  %v1526_v38 = vadd.f32 1.0, %v2569_v34  ;;  %v3383_v45 = vpop.f32.mrb[24].mxu1  ;;  %v944_v33 = vadd.f32 %v3268_v6, %v3338_v58  ;;  %v2245_v58 = vmul.f32 -1.442695, %v952_v17 }
 0x11c   : > { %v2573_v39 = vpop.eup %2572  ;;  %2592 = vrcp.f32 %v1592_v35  ;;  %v1590_v40 = vadd.f32 1.0, %v2571_v37  ;;  %v3385_v46 = vpop.f32.mrb[25].mxu0 }
 0x11d   : > { %v2575_v42 = vpop.eup %2574  ;;  %2594 = vrcp.f32 %v1526_v38  ;;  %v1529_v43 = vadd.f32 1.0, %v2573_v39  ;;  %v3389_v51 = vpop.f32.mrb[25].mxu1  ;;  %v699_v38 = vadd.f32 %v3340_v59, %v3268_v6  ;;  %v2179_v59 = vmul.f32 -1.442695, %v688_v27 }
 0x11e   : > { %v2577_v47 = vpop.eup %2576  ;;  %2596 = vrcp.f32 %v1590_v40  ;;  %v1593_v48 = vadd.f32 1.0, %v2575_v42  ;;  %v3391_v52 = vpop.f32.mrb[26].mxu0 }
 0x11f   : > { %v2579_v55 = vpop.eup %2578  ;;  %2598 = vrcp.f32 %v1529_v43  ;;  %v1527_v56 = vadd.f32 1.0, %v2577_v47  ;;  %v3395_v57 = vpop.f32.mrb[26].mxu1  ;;  %v955_v43 = vadd.f32 %v3345_v63, %v3268_v6  ;;  %v2182_v63 = vmul.f32 -1.442695, %v699_v38 }
 0x120   : > { %v3397_v60 = vpop.f32.mrb[27].mxu0  ;;  %v2581_v61 = vpop.eup %2580  ;;  %2600 = vrcp.f32 %v1593_v48  ;;  %v1591_v62 = vadd.f32 1.0, %v2579_v55  ;;  %v691_v48 = vadd.f32 %v3268_v6, %v3347_v0  ;;  %v2243_v55 = vmul.f32 -1.442695, %v944_v33 }
 0x121   : > { %v3401_v1 = vpop.f32.mrb[27].mxu1  ;;  %v2583_v2 = vpop.eup %2582  ;;  %2602 = vrcp.f32 %v1527_v56  ;;  %v1532_v4 = vadd.f32 1.0, %v2581_v61  ;;  %v2246_v61 = vmul.f32 -1.442695, %v955_v43 }
 0x122   : > { %v2585_v7 = vpop.eup %2584  ;;  %2604 = vrcp.f32 %v1591_v62  ;;  %v1596_v8 = vadd.f32 1.0, %v2583_v2  ;;  %v3415_v21 = vpop.f32.mrb[28].mxu0  ;;  %v2180_v24 = vmul.f32 -1.442695, %v691_v48 }
 0x123   : > { %v2587_v11 = vpop.eup %2586  ;;  %1974 = vst.msk [vmem:[%s3297_s27 + $0x238] sm:$0xff] %vm1902_vm3, %v2585_v7  ;;  %2606 = vrcp.f32 %v1532_v4  ;;  %v3421_v49 = vpop.f32.mrb[28].mxu1 }
 0x124   : > { %v2589_v16 = vpop.eup %2588  ;;  %1908 = vst.msk [vmem:[%s3297_s27 + $0x28] sm:$0xff] %vm1902_vm3, %v2587_v11  ;;  %2608 = vrcp.f32 %v1596_v8  ;;  %v3423_v28 = vpop.f32.mrb[29].mxu0 }
 0x125   : > { %v2591_v36 = vpop.eup %2590  ;;  %1972 = vst.msk [vmem:[%s3297_s27 + $0x228] sm:$0xff] %vm1902_vm3, %v2589_v16  ;;  %2610 = vpow2.f32 %v2175_v5  ;;  %v3429_v34 = vpop.f32.mrb[29].mxu1 }
 0x126   : > { %v2593_v32 = vpop.eup %2592  ;;  %1913 = vst.msk [vmem:[%s3297_s27 + $0x50] sm:$0xff] %vm1902_vm3, %v2591_v36  ;;  %2612 = vpow2.f32 %v2239_v9  ;;  %v3431_v35 = vpop.f32.mrb[30].mxu0 }
 0x127   : > { %v2595_v37 = vpop.eup %2594  ;;  %1977 = vst.msk [vmem:[%s3297_s27 + $0x250] sm:$0xff] %vm1902_vm3, %v2593_v32  ;;  %2614 = vpow2.f32 %v2178_v30  ;;  %v3437_v39 = vpop.f32.mrb[30].mxu1 }
 0x128   : > { %v3439_v40 = vpop.f32.mrb[31].mxu0  ;;  %v2597_v42 = vpop.eup %2596  ;;  %1911 = vst.msk [vmem:[%s3297_s27 + $0x40] sm:$0xff] %vm1902_vm3, %v2595_v37  ;;  %2616 = vpow2.f32 %v2242_v31 }
 0x129   : > { %v3445_v44 = vpop.f32.mrb[31].mxu1  ;;  %v2599_v47 = vpop.eup %2598  ;;  %1975 = vst.msk [vmem:[%s3297_s27 + $0x240] sm:$0xff] %vm1902_vm3, %v2597_v42  ;;  %2618 = vpow2.f32 %v2176_v22 }
 0x12a   : > { %v2601_v50 = vpop.eup %2600  ;;  %1914 = vst.msk [vmem:[%s3297_s27 + $0x58] sm:$0xff] %vm1902_vm3, %v2599_v47  ;;  %2620 = vpow2.f32 %v2240_v53  ;;  %v3457_v62 = vpop.f32.mrb[32].mxu0 }
 0x12b   : > { %v2603_v56 = vpop.eup %2602  ;;  %1978 = vst.msk [vmem:[%s3297_s27 + $0x258] sm:$0xff] %vm1902_vm3, %v2601_v50  ;;  %2622 = vpow2.f32 %v2181_v54  ;;  %v3461_v2 = vpop.f32.mrb[32].mxu1 }
 0x12c   : > { %v2605_v20 = vpop.eup %2604  ;;  %1912 = vst.msk [vmem:[%s3297_s27 + $0x48] sm:$0xff] %vm1902_vm3, %v2603_v56  ;;  %2624 = vpow2.f32 %v2245_v58  ;;  %v3463_v4 = vpop.f32.mrb[33].mxu0 }
 0x12d   : > { %v2607_v0 = vpop.eup %2606  ;;  %1976 = vst.msk [vmem:[%s3297_s27 + $0x248] sm:$0xff] %vm1902_vm3, %v2605_v20  ;;  %2626 = vpow2.f32 %v2179_v59  ;;  %v3467_v25 = vpop.f32.mrb[33].mxu1 }
 0x12e   : > { %v2609_v5 = vpop.eup %2608  ;;  %1917 = vst.msk [vmem:[%s3297_s27 + $0x70] sm:$0xff] %vm1902_vm3, %v2607_v0  ;;  %2628 = vpow2.f32 %v2243_v55  ;;  %v3469_v7 = vpop.f32.mrb[34].mxu0  ;;  %v947_v55 = vadd.f32 %v3268_v6, %v3351_v3  ;;  %v712_v0 = vadd.f32 %v3361_v12, %v3268_v6  ;;  %v960_v12 = vadd.f32 %v3268_v6, %v3369_v18 }
 0x12f   : > { %v2611_v8 = vpop.eup %2610  ;;  %1981 = vst.msk [vmem:[%s3297_s27 + $0x270] sm:$0xff] %vm1902_vm3, %v2609_v5  ;;  %2630 = vpow2.f32 %v2182_v63  ;;  %v3473_v9 = vpop.f32.mrb[34].mxu1 }
 0x130   : > { %v3475_v10 = vpop.f32.mrb[35].mxu0  ;;  %v2613_v11 = vpop.eup %2612  ;;  %v1530_v30 = vadd.f32 1.0, %v2611_v8  ;;  %2632 = vpow2.f32 %v2246_v61 }
 0x131   : > { %v3477_v13 = vpop.f32.mrb[35].mxu1  ;;  %v2615_v16 = vpop.eup %2614  ;;  %v1594_v31 = vadd.f32 1.0, %v2613_v11  ;;  %2634 = vpow2.f32 %v2180_v24  ;;  %v968_v11 = vadd.f32 %v3365_v14, %v3268_v6  ;;  %v715_v14 = vadd.f32 %v3371_v19, %v3268_v6 }
 0x132   : > { %v2617_v17 = vpop.eup %2616  ;;  %2636 = vrcp.f32 %v1530_v30  ;;  %v1533_v36 = vadd.f32 1.0, %v2615_v16  ;;  %v3479_v33 = vpop.f32.mrb[36].mxu0  ;;  %v704_v16 = vadd.f32 %v3268_v6, %v3367_v15 }
 0x133   : > { %v2619_v22 = vpop.eup %2618  ;;  %2638 = vrcp.f32 %v1594_v31  ;;  %v1597_v27 = vadd.f32 1.0, %v2617_v17  ;;  %v3481_v38 = vpop.f32.mrb[36].mxu1  ;;  %v2249_v15 = vmul.f32 -1.442695, %v968_v11  ;;  %v728_v11 = vadd.f32 %v3379_v41, %v3268_v6 }
 0x134   : > { %v2621_v32 = vpop.eup %2620  ;;  %2640 = vrcp.f32 %v1533_v36  ;;  %v1531_v53 = vadd.f32 1.0, %v2619_v22  ;;  %v3483_v42 = vpop.f32.mrb[37].mxu0  ;;  %v2244_v36 = vmul.f32 -1.442695, %v947_v55  ;;  %v2183_v19 = vmul.f32 -1.442695, %v704_v16 }
 0x135   : > { %v2623_v37 = vpop.eup %2622  ;;  %2642 = vrcp.f32 %v1597_v27  ;;  %v1595_v54 = vadd.f32 1.0, %v2621_v32  ;;  %v3485_v47 = vpop.f32.mrb[37].mxu1  ;;  %v2185_v32 = vmul.f32 -1.442695, %v712_v0  ;;  %v984_v16 = vadd.f32 %v3383_v45, %v3268_v6 }
 0x136   : > { %v2625_v58 = vpop.eup %2624  ;;  %2644 = vrcp.f32 %v1531_v53  ;;  %v1536_v43 = vadd.f32 1.0, %v2623_v37  ;;  %v3487_v59 = vpop.f32.mrb[38].mxu0  ;;  %v720_v41 = vadd.f32 %v3268_v6, %v3385_v46  ;;  %v2189_v45 = vmul.f32 -1.442695, %v728_v11 }
 0x137   : > { %v2627_v48 = vpop.eup %2626  ;;  %2646 = vrcp.f32 %v1595_v54  ;;  %v1600_v50 = vadd.f32 1.0, %v2625_v58  ;;  %v3491_v56 = vpop.f32.mrb[38].mxu1  ;;  %v971_v54 = vadd.f32 %v3373_v23, %v3268_v6  ;;  %v2247_v23 = vmul.f32 -1.442695, %v960_v12 }
 0x138   : > { %v3493_v63 = vpop.f32.mrb[39].mxu0  ;;  %v2629_v20 = vpop.eup %2628  ;;  %2648 = vrcp.f32 %v1536_v43  ;;  %v1534_v61 = vadd.f32 1.0, %v2627_v48  ;;  %v707_v48 = vadd.f32 %v3268_v6, %v3375_v26  ;;  %v2186_v26 = vmul.f32 -1.442695, %v715_v14 }
 0x139   : > { %v3497_v24 = vpop.f32.mrb[39].mxu1  ;;  %v2631_v5 = vpop.eup %2630  ;;  %2650 = vrcp.f32 %v1600_v50  ;;  %v1598_v8 = vadd.f32 1.0, %v2629_v20  ;;  %v2253_v46 = vmul.f32 -1.442695, %v984_v16 }
 0x13a   : > { %v2633_v30 = vpop.eup %2632  ;;  %2652 = vrcp.f32 %v1534_v61  ;;  %v1537_v3 = vadd.f32 1.0, %v2631_v5  ;;  %v3507_v53 = vpop.f32.mrb[40].mxu0  ;;  %v963_v61 = vadd.f32 %v3268_v6, %v3377_v29  ;;  %v2250_v29 = vmul.f32 -1.442695, %v971_v54 }
 0x13b   : > { %v2635_v31 = vpop.eup %2634  ;;  %2654 = vrcp.f32 %v1598_v8  ;;  %v1601_v17 = vadd.f32 1.0, %v2633_v30  ;;  %v3513_v58 = vpop.f32.mrb[40].mxu1 }
 0x13c   : > { %v2637_v22 = vpop.eup %2636  ;;  %2656 = vrcp.f32 %v1537_v3  ;;  %v1535_v27 = vadd.f32 1.0, %v2635_v31  ;;  %v3515_v18 = vpop.f32.mrb[41].mxu0  ;;  %v2248_v12 = vmul.f32 -1.442695, %v963_v61 }
 0x13d   : > { %v2639_v37 = vpop.eup %2638  ;;  %1915 = vst.msk [vmem:[%s3297_s27 + $0x60] sm:$0xff] %vm1902_vm3, %v2637_v22  ;;  %2658 = vrcp.f32 %v1601_v17  ;;  %v3521_v50 = vpop.f32.mrb[41].mxu1  ;;  %v2184_v17 = vmul.f32 -1.442695, %v707_v48  ;;  %v976_v22 = vadd.f32 %v3268_v6, %v3389_v51  ;;  %v2187_v51 = vmul.f32 -1.442695, %v720_v41 }
 0x13e   : > { %v2641_v43 = vpop.eup %2640  ;;  %1979 = vst.msk [vmem:[%s3297_s27 + $0x260] sm:$0xff] %vm1902_vm3, %v2639_v37  ;;  %2660 = vrcp.f32 %v1535_v27  ;;  %v3523_v55 = vpop.f32.mrb[42].mxu0 }
 0x13f   : > { %v2643_v20 = vpop.eup %2642  ;;  %1918 = vst.msk [vmem:[%s3297_s27 + $0x78] sm:$0xff] %vm1902_vm3, %v2641_v43  ;;  %2662 = vpow2.f32 %v2244_v36  ;;  %v3529_v0 = vpop.f32.mrb[42].mxu1 }
 0x140   : > { %v3531_v5 = vpop.f32.mrb[43].mxu0  ;;  %v2645_v8 = vpop.eup %2644  ;;  %1982 = vst.msk [vmem:[%s3297_s27 + $0x278] sm:$0xff] %vm1902_vm3, %v2643_v20  ;;  %2664 = vpow2.f32 %v2185_v32  ;;  %v2251_v20 = vmul.f32 -1.442695, %v976_v22 }
 0x141   : > { %v3537_v30 = vpop.f32.mrb[43].mxu1  ;;  %v2647_v3 = vpop.eup %2646  ;;  %1916 = vst.msk [vmem:[%s3297_s27 + $0x68] sm:$0xff] %vm1902_vm3, %v2645_v8  ;;  %2666 = vpow2.f32 %v2249_v15 }
 0x142   : > { %v2649_v31 = vpop.eup %2648  ;;  %1980 = vst.msk [vmem:[%s3297_s27 + $0x268] sm:$0xff] %vm1902_vm3, %v2647_v3  ;;  %2668 = vpow2.f32 %v2183_v19  ;;  %v3553_v32 = vpop.f32.mrb[44].mxu0 }
 0x143   : > { %v2651_v36 = vpop.eup %2650  ;;  %1921 = vst.msk [vmem:[%s3297_s27 + $0x90] sm:$0xff] %vm1902_vm3, %v2649_v31  ;;  %2670 = vpow2.f32 %v2247_v23  ;;  %v3557_v37 = vpop.f32.mrb[44].mxu1 }
 0x144   : > { %v2653_v27 = vpop.eup %2652  ;;  %1985 = vst.msk [vmem:[%s3297_s27 + $0x290] sm:$0xff] %vm1902_vm3, %v2651_v36  ;;  %2672 = vpow2.f32 %v2186_v26  ;;  %v3559_v15 = vpop.f32.mrb[45].mxu0 }
 0x145   : > { %v2655_v14 = vpop.eup %2654  ;;  %1919 = vst.msk [vmem:[%s3297_s27 + $0x80] sm:$0xff] %vm1902_vm3, %v2653_v27  ;;  %2674 = vpow2.f32 %v2250_v29  ;;  %v3563_v43 = vpop.f32.mrb[45].mxu1 }
 0x146   : > { %v2657_v54 = vpop.eup %2656  ;;  %1983 = vst.msk [vmem:[%s3297_s27 + $0x280] sm:$0xff] %vm1902_vm3, %v2655_v14  ;;  %2676 = vpow2.f32 %v2184_v17  ;;  %v3565_v19 = vpop.f32.mrb[46].mxu0 }
 0x147   : > { %v2659_v48 = vpop.eup %2658  ;;  %1922 = vst.msk [vmem:[%s3297_s27 + $0x98] sm:$0xff] %vm1902_vm3, %v2657_v54  ;;  %2678 = vpow2.f32 %v2248_v12  ;;  %v3569_v23 = vpop.f32.mrb[46].mxu1 }
 0x148   : > { %v3571_v61 = vpop.f32.mrb[47].mxu0  ;;  %v2661_v8 = vpop.eup %2660  ;;  %1986 = vst.msk [vmem:[%s3297_s27 + $0x298] sm:$0xff] %vm1902_vm3, %v2659_v48  ;;  %2680 = vpow2.f32 %v2189_v45 }
 0x149   : > { %v3575_v26 = vpop.f32.mrb[47].mxu1  ;;  %v2663_v11 = vpop.eup %2662  ;;  %1920 = vst.msk [vmem:[%s3297_s27 + $0x88] sm:$0xff] %vm1902_vm3, %v2661_v8  ;;  %2682 = vpow2.f32 %v2253_v46 }
 0x14a   : > { %v2665_v3 = vpop.eup %2664  ;;  %v1599_v29 = vadd.f32 1.0, %v2663_v11  ;;  %2684 = vpow2.f32 %v2187_v51  ;;  %v3579_v36 = vpop.f32.mrb[48].mxu0 }
 0x14b   : > { %v2667_v16 = vpop.eup %2666  ;;  %v1540_v31 = vadd.f32 1.0, %v2665_v3  ;;  %2686 = vpow2.f32 %v2251_v20  ;;  %v3581_v27 = vpop.f32.mrb[48].mxu1 }
 0x14c   : > { %v2669_v17 = vpop.eup %2668  ;;  %2688 = vrcp.f32 %v1599_v29  ;;  %v1604_v41 = vadd.f32 1.0, %v2667_v16  ;;  %v3583_v45 = vpop.f32.mrb[49].mxu0 }
 0x14d   : > { %v2671_v12 = vpop.eup %2670  ;;  %2690 = vrcp.f32 %v1540_v31  ;;  %v1538_v22 = vadd.f32 1.0, %v2669_v17  ;;  %v3585_v54 = vpop.f32.mrb[49].mxu1 }
 0x14e   : > { %v2673_v14 = vpop.eup %2672  ;;  %2692 = vrcp.f32 %v1604_v41  ;;  %v1602_v46 = vadd.f32 1.0, %v2671_v12  ;;  %v3587_v51 = vpop.f32.mrb[50].mxu0  ;;  %v731_v41 = vadd.f32 %v3391_v52, %v3268_v6 }
 0x14f   : > { %3977 = vst [vmem:[#allocation2_spill] sm:$0xff] %v3587_v51  ;;  %v2675_v48 = vpop.eup %2674  ;;  %2694 = vrcp.f32 %v1538_v22  ;;  %v1541_v20 = vadd.f32 1.0, %v2673_v14  ;;  %v3589_v8 = vpop.f32.mrb[50].mxu1  ;;  %v987_v22 = vadd.f32 %v3395_v57, %v3268_v6  ;;  %v744_v57 = vadd.f32 %v3415_v21, %v3268_v6 }
 0x150   : > { %v3591_v11 = vpop.f32.mrb[51].mxu0  ;;  %v2677_v3 = vpop.eup %2676  ;;  %2696 = vrcp.f32 %v1602_v46  ;;  %v1605_v29 = vadd.f32 1.0, %v2675_v48  ;;  %v723_v46 = vadd.f32 %v3268_v6, %v3397_v60 }
 0x151   : > { %3978 = vst [vmem:[#allocation3_spill] sm:$0xff] %v3591_v11  ;;  %v3593_v16 = vpop.f32.mrb[51].mxu1  ;;  %v2679_v31 = vpop.eup %2678  ;;  %2698 = vrcp.f32 %v1541_v20  ;;  %v1539_v17 = vadd.f32 1.0, %v2677_v3  ;;  %v979_v20 = vadd.f32 %v3268_v6, %v3401_v1  ;;  %v1000_v1 = vadd.f32 %v3421_v49, %v3268_v6 }
 0x152   : > { %3979 = vst [vmem:[#allocation4_spill] sm:$0xff] %v3593_v16  ;;  %v2681_v12 = vpop.eup %2680  ;;  %2700 = vrcp.f32 %v1605_v29  ;;  %v1603_v51 = vadd.f32 1.0, %v2679_v31  ;;  %v3603_v3 = vpop.f32.mrb[52].mxu0  ;;  %v2190_v31 = vmul.f32 -1.442695, %v731_v41 }
 0x153   : > { %v2683_v14 = vpop.eup %2682  ;;  %2702 = vrcp.f32 %v1539_v17  ;;  %v1544_v11 = vadd.f32 1.0, %v2681_v12  ;;  %3980 = vst [vmem:[#allocation5_spill] sm:$0xff] %v3603_v3  ;;  %v3607_v17 = vpop.f32.mrb[52].mxu1  ;;  %v2188_v21 = vmul.f32 -1.442695, %v723_v46 }
 0x154   : > { %v2685_v48 = vpop.eup %2684  ;;  %2704 = vrcp.f32 %v1603_v51  ;;  %v1608_v16 = vadd.f32 1.0, %v2683_v14  ;;  %v3609_v12 = vpop.f32.mrb[53].mxu0  ;;  %v2254_v14 = vmul.f32 -1.442695, %v987_v22 }
 0x155   : > { %v2687_v52 = vpop.eup %2686  ;;  %2706 = vrcp.f32 %v1544_v11  ;;  %v1542_v29 = vadd.f32 1.0, %v2685_v48  ;;  %v3613_v3 = vpop.f32.mrb[53].mxu1  ;;  %v3622_v48 = vld [vmem:[%s3975_s2] ss:$0 sm:$0xff] }
 0x156   : > { %v2689_v60 = vpop.eup %2688  ;;  %2708 = vrcp.f32 %v1608_v16  ;;  %v1606_v51 = vadd.f32 1.0, %v2687_v52  ;;  %v3615_v11 = vpop.f32.mrb[54].mxu0  ;;  %v736_v16 = vadd.f32 %v3622_v48, %v3423_v28  ;;  %v2252_v52 = vmul.f32 -1.442695, %v979_v20 }
 0x157   : > { %v2691_v41 = vpop.eup %2690  ;;  %1984 = vst.msk [vmem:[%s3297_s27 + $0x288] sm:$0xff] %vm1902_vm3, %v2689_v60  ;;  %2710 = vrcp.f32 %v1542_v29  ;;  %v3626_v6 = vpop.f32.mrb[54].mxu1  ;;  %v992_v46 = vadd.f32 %v3622_v48, %v3429_v34  ;;  %v2193_v28 = vmul.f32 -1.442695, %v744_v57  ;;  %v2257_v20 = vmul.f32 -1.442695, %v1000_v1 }
 0x158   : > { %3981 = vst [vmem:[#allocation6_spill] sm:$0xff] %v3626_v6  ;;  %v3628_v49 = vpop.f32.mrb[55].mxu0  ;;  %v2693_v22 = vpop.eup %2692  ;;  %1925 = vst.msk [vmem:[%s3297_s27 + $0xb0] sm:$0xff] %vm1902_vm3, %v2691_v41  ;;  %2712 = vrcp.f32 %v1606_v51  ;;  %v1003_v34 = vadd.f32 %v3622_v48, %v3437_v39  ;;  %v2191_v41 = vmul.f32 -1.442695, %v736_v16  ;;  %v760_v16 = vadd.f32 %v3622_v48, %v3457_v62 }
 0x159   : > { %3982 = vst [vmem:[#allocation7_spill] sm:$0xff] %v3628_v49  ;;  %v3634_v29 = vpop.f32.mrb[55].mxu1  ;;  %v2695_v60 = vpop.eup %2694  ;;  %1989 = vst.msk [vmem:[%s3297_s27 + $0x2b0] sm:$0xff] %vm1902_vm3, %v2693_v22  ;;  %2714 = vpow2.f32 %v2190_v31  ;;  %v747_v49 = vadd.f32 %v3622_v48, %v3431_v35  ;;  %v739_v31 = vadd.f32 %v3622_v48, %v3439_v40  ;;  %v2255_v35 = vmul.f32 -1.442695, %v992_v46 }
 0x15a   : > { %v2697_v6 = vpop.eup %2696  ;;  %1923 = vst.msk [vmem:[%s3297_s27 + $0xa0] sm:$0xff] %vm1902_vm3, %v2695_v60  ;;  %2716 = vpow2.f32 %v2254_v14  ;;  %v995_v14 = vadd.f32 %v3622_v48, %v3445_v44  ;;  %v3652_v1 = vpop.f32.mrb[56].mxu0  ;;  %v2258_v44 = vmul.f32 -1.442695, %v1003_v34 }
 0x15b   : > { %v2699_v51 = vpop.eup %2698  ;;  %1987 = vst.msk [vmem:[%s3297_s27 + $0x2a0] sm:$0xff] %vm1902_vm3, %v2697_v6  ;;  %2718 = vpow2.f32 %v2188_v21  ;;  %v2194_v21 = vmul.f32 -1.442695, %v747_v49  ;;  %v3658_v40 = vpop.f32.mrb[56].mxu1  ;;  %v2192_v62 = vmul.f32 -1.442695, %v739_v31 }
 0x15c   : > { %v2701_v57 = vpop.eup %2700  ;;  %1926 = vst.msk [vmem:[%s3297_s27 + $0xb8] sm:$0xff] %vm1902_vm3, %v2699_v51  ;;  %2720 = vpow2.f32 %v2252_v52  ;;  %v3660_v6 = vpop.f32.mrb[57].mxu0 }
 0x15d   : > { %v2703_v39 = vpop.eup %2702  ;;  %1990 = vst.msk [vmem:[%s3297_s27 + $0x2b8] sm:$0xff] %vm1902_vm3, %v2701_v57  ;;  %2722 = vpow2.f32 %v2193_v28  ;;  %v3664_v52 = vpop.f32.mrb[57].mxu1 }
 0x15e   : > { %v2705_v22 = vpop.eup %2704  ;;  %1924 = vst.msk [vmem:[%s3297_s27 + $0xa8] sm:$0xff] %vm1902_vm3, %v2703_v39  ;;  %2724 = vpow2.f32 %v2257_v20  ;;  %v3666_v46 = vpop.f32.mrb[58].mxu0  ;;  %v2256_v20 = vmul.f32 -1.442695, %v995_v14  ;;  %v2197_v39 = vmul.f32 -1.442695, %v760_v16 }
 0x15f   : > { %v2707_v60 = vpop.eup %2706  ;;  %1988 = vst.msk [vmem:[%s3297_s27 + $0x2a8] sm:$0xff] %vm1902_vm3, %v2705_v22  ;;  %2726 = vpow2.f32 %v2191_v41  ;;  %v3670_v49 = vpop.f32.mrb[58].mxu1 }
 0x160   : > { %v3672_v28 = vpop.f32.mrb[59].mxu0  ;;  %v2709_v51 = vpop.eup %2708  ;;  %1929 = vst.msk [vmem:[%s3297_s27 + $0xd0] sm:$0xff] %vm1902_vm3, %v2707_v60  ;;  %2728 = vpow2.f32 %v2255_v35 }
 0x161   : > { %3983 = vst [vmem:[#allocation8_spill] sm:$0xff] %v3672_v28  ;;  %v3676_v34 = vpop.f32.mrb[59].mxu1  ;;  %v2711_v57 = vpop.eup %2710  ;;  %1993 = vst.msk [vmem:[%s3297_s27 + $0x2d0] sm:$0xff] %vm1902_vm3, %v2709_v51  ;;  %2730 = vpow2.f32 %v2194_v21 }
 0x162   : > { %3984 = vst [vmem:[#allocation9_spill] sm:$0xff] %v3676_v34  ;;  %v2713_v22 = vpop.eup %2712  ;;  %1927 = vst.msk [vmem:[%s3297_s27 + $0xc0] sm:$0xff] %vm1902_vm3, %v2711_v57  ;;  %2732 = vpow2.f32 %v2258_v44  ;;  %v3684_v35 = vpop.f32.mrb[60].mxu0 }
 0x163   : > { %v2715_v41 = vpop.eup %2714  ;;  %1991 = vst.msk [vmem:[%s3297_s27 + $0x2c0] sm:$0xff] %vm1902_vm3, %v2713_v22  ;;  %2734 = vpow2.f32 %v2192_v62  ;;  %3985 = vst [vmem:[#allocation10_spill] sm:$0xff] %v3684_v35  ;;  %v3686_v34 = vpop.f32.mrb[60].mxu1 }
 0x164   : > { %v2717_v31 = vpop.eup %2716  ;;  %v1545_v28 = vadd.f32 1.0, %v2715_v41  ;;  %2736 = vpow2.f32 %v2256_v20  ;;  %3986 = vst [vmem:[#allocation11_spill] sm:$0xff] %v3686_v34  ;;  %v3688_v21 = vpop.f32.mrb[61].mxu0 }
 0x165   : > { %v2719_v14 = vpop.eup %2718  ;;  %v1609_v60 = vadd.f32 1.0, %v2717_v31  ;;  %2738 = vpow2.f32 %v2197_v39  ;;  %3987 = vst [vmem:[#allocation12_spill] sm:$0xff] %v3688_v21  ;;  %v3690_v44 = vpop.f32.mrb[61].mxu1 }
 0x166   : > { %v2721_v16 = vpop.eup %2720  ;;  %2740 = vrcp.f32 %v1545_v28  ;;  %v1543_v51 = vadd.f32 1.0, %v2719_v14  ;;  %3988 = vst [vmem:[#allocation13_spill] sm:$0xff] %v3690_v44  ;;  %v3692_v57 = vpop.f32.mrb[62].mxu0 }
 0x167   : > { %3989 = vst [vmem:[#allocation14_spill] sm:$0xff] %v3692_v57  ;;  %v2723_v62 = vpop.eup %2722  ;;  %2742 = vrcp.f32 %v1609_v60  ;;  %v1607_v22 = vadd.f32 1.0, %v2721_v16  ;;  %v3694_v20 = vpop.f32.mrb[62].mxu1  ;;  %v1016_v60 = vadd.f32 %v3622_v48, %v3461_v2 }
 0x168   : > { %v3696_v41 = vpop.f32.mrb[63].mxu0  ;;  %v2725_v31 = vpop.eup %2724  ;;  %2744 = vrcp.f32 %v1543_v51  ;;  %v1548_v39 = vadd.f32 1.0, %v2723_v62  ;;  %v752_v51 = vadd.f32 %v3622_v48, %v3463_v4  ;;  %v1019_v4 = vadd.f32 %v3622_v48, %v3473_v9 }
 0x169   : > { %3990 = vst [vmem:[#allocation15_spill] sm:$0xff] %v3696_v41  ;;  %v3698_v34 = vpop.f32.mrb[63].mxu1  ;;  %v2727_v21 = vpop.eup %2726  ;;  %2746 = vrcp.f32 %v1607_v22  ;;  %v1612_v28 = vadd.f32 1.0, %v2725_v31  ;;  %v1008_v22 = vadd.f32 %v3622_v48, %v3467_v25 }
 0x16a   : > { %3991 = vst [vmem:[#allocation16_spill] sm:$0xff] %v3698_v34  ;;  %v2729_v14 = vpop.eup %2728  ;;  %2748 = vrcp.f32 %v1548_v39  ;;  %v1546_v44 = vadd.f32 1.0, %v2727_v21  ;;  %v763_v39 = vadd.f32 %v3622_v48, %v3469_v7  ;;  %v2195_v25 = vmul.f32 -1.442695, %v752_v51 }
 0x16b   : > { %v2731_v35 = vpop.eup %2730  ;;  %2750 = vrcp.f32 %v1612_v28  ;;  %v1610_v57 = vadd.f32 1.0, %v2729_v14  ;;  %v2259_v7 = vmul.f32 -1.442695, %v1008_v22 }
 0x16c   : > { %v2733_v16 = vpop.eup %2732  ;;  %2752 = vrcp.f32 %v1546_v44  ;;  %v1549_v41 = vadd.f32 1.0, %v2731_v35  ;;  %v2261_v44 = vmul.f32 -1.442695, %v1016_v60  ;;  %v2198_v9 = vmul.f32 -1.442695, %v763_v39 }
 0x16d   : > { %v2735_v62 = vpop.eup %2734  ;;  %2754 = vrcp.f32 %v1610_v57  ;;  %v1613_v34 = vadd.f32 1.0, %v2733_v16  ;;  %v776_v16 = vadd.f32 %v3622_v48, %v3479_v33  ;;  %v1024_v39 = vadd.f32 %v3622_v48, %v3485_v47 }
 0x16e   : > { %v2737_v21 = vpop.eup %2736  ;;  %2756 = vrcp.f32 %v1549_v41  ;;  %v1547_v31 = vadd.f32 1.0, %v2735_v62  ;;  %v755_v41 = vadd.f32 %v3622_v48, %v3475_v10  ;;  %v2262_v10 = vmul.f32 -1.442695, %v1019_v4 }
 0x16f   : > { %v2739_v2 = vpop.eup %2738  ;;  %2758 = vrcp.f32 %v1613_v34  ;;  %v1611_v35 = vadd.f32 1.0, %v2737_v21  ;;  %v1011_v34 = vadd.f32 %v3622_v48, %v3477_v13  ;;  %v1032_v62 = vadd.f32 %v3622_v48, %v3481_v38 }
 0x170   : > { %v2741_v57 = vpop.eup %2740  ;;  %2760 = vrcp.f32 %v1547_v31  ;;  %v1552_v28 = vadd.f32 1.0, %v2739_v2  ;;  %v2196_v13 = vmul.f32 -1.442695, %v755_v41  ;;  %v768_v21 = vadd.f32 %v3622_v48, %v3483_v42 }
 0x171   : > { %v2743_v14 = vpop.eup %2742  ;;  %1930 = vst.msk [vmem:[%s3297_s27 + $0xd8] sm:$0xff] %vm1902_vm3, %v2741_v57  ;;  %2762 = vrcp.f32 %v1611_v35  ;;  %v2260_v33 = vmul.f32 -1.442695, %v1011_v34  ;;  %v2201_v2 = vmul.f32 -1.442695, %v776_v16  ;;  %v779_v35 = vadd.f32 %v3622_v48, %v3487_v59 }
 0x172   : > { %v2745_v60 = vpop.eup %2744  ;;  %1994 = vst.msk [vmem:[%s3297_s27 + $0x2d8] sm:$0xff] %vm1902_vm3, %v2743_v14  ;;  %2764 = vrcp.f32 %v1552_v28  ;;  %v1035_v4 = vadd.f32 %v3622_v48, %v3491_v56  ;;  %v2199_v57 = vmul.f32 -1.442695, %v768_v21  ;;  %v2263_v59 = vmul.f32 -1.442695, %v1024_v39 }
 0x173   : > { %v2747_v51 = vpop.eup %2746  ;;  %1928 = vst.msk [vmem:[%s3297_s27 + $0xc8] sm:$0xff] %vm1902_vm3, %v2745_v60  ;;  %2766 = vpow2.f32 %v2261_v44  ;;  %v2265_v44 = vmul.f32 -1.442695, %v1032_v62  ;;  %v2202_v41 = vmul.f32 -1.442695, %v779_v35 }
 0x174   : > { %v2749_v22 = vpop.eup %2748  ;;  %1992 = vst.msk [vmem:[%s3297_s27 + $0x2c8] sm:$0xff] %vm1902_vm3, %v2747_v51  ;;  %2768 = vpow2.f32 %v2195_v25  ;;  %v2266_v56 = vmul.f32 -1.442695, %v1035_v4 }
 0x175   : > { %v2751_v31 = vpop.eup %2750  ;;  %1933 = vst.msk [vmem:[%s3297_s27 + $0xf0] sm:$0xff] %vm1902_vm3, %v2749_v22  ;;  %2770 = vpow2.f32 %v2259_v7 }
 0x176   : > { %v2753_v38 = vpop.eup %2752  ;;  %1997 = vst.msk [vmem:[%s3297_s27 + $0x2f0] sm:$0xff] %vm1902_vm3, %v2751_v31  ;;  %2772 = vpow2.f32 %v2198_v9 }
 0x177   : > { %v2755_v42 = vpop.eup %2754  ;;  %1931 = vst.msk [vmem:[%s3297_s27 + $0xe0] sm:$0xff] %vm1902_vm3, %v2753_v38  ;;  %2774 = vpow2.f32 %v2262_v10 }
 0x178   : > { %v2757_v47 = vpop.eup %2756  ;;  %1995 = vst.msk [vmem:[%s3297_s27 + $0x2e0] sm:$0xff] %vm1902_vm3, %v2755_v42  ;;  %2776 = vpow2.f32 %v2196_v13 }
 0x179   : > { %v2759_v28 = vpop.eup %2758  ;;  %1934 = vst.msk [vmem:[%s3297_s27 + $0xf8] sm:$0xff] %vm1902_vm3, %v2757_v47  ;;  %2778 = vpow2.f32 %v2260_v33 }
 0x17a   : > { %v2761_v25 = vpop.eup %2760  ;;  %1998 = vst.msk [vmem:[%s3297_s27 + $0x2f8] sm:$0xff] %vm1902_vm3, %v2759_v28  ;;  %2780 = vpow2.f32 %v2201_v2 }
 0x17b   : > { %v2763_v14 = vpop.eup %2762  ;;  %1932 = vst.msk [vmem:[%s3297_s27 + $0xe8] sm:$0xff] %vm1902_vm3, %v2761_v25  ;;  %2782 = vpow2.f32 %v2265_v44  ;;  %v771_v44 = vadd.f32 %v3622_v48, %v3493_v63  ;;  %v792_v25 = vadd.f32 %v3622_v48, %v3507_v53 }
 0x17c   : > { %v2765_v7 = vpop.eup %2764  ;;  %1996 = vst.msk [vmem:[%s3297_s27 + $0x2e8] sm:$0xff] %vm1902_vm3, %v2763_v14  ;;  %2784 = vpow2.f32 %v2199_v57  ;;  %v1027_v57 = vadd.f32 %v3622_v48, %v3497_v24  ;;  %v784_v24 = vadd.f32 %v3622_v48, %v3515_v18 }
 0x17d   : > { %v2767_v34 = vpop.eup %2766  ;;  %1937 = vst.msk [vmem:[%s3297_s27 + $0x110] sm:$0xff] %vm1902_vm3, %v2765_v7  ;;  %2786 = vpow2.f32 %v2263_v59 }
 0x17e   : > { %v2769_v60 = vpop.eup %2768  ;;  %v1616_v9 = vadd.f32 1.0, %v2767_v34  ;;  %2788 = vpow2.f32 %v2202_v41  ;;  %v2200_v34 = vmul.f32 -1.442695, %v771_v44  ;;  %v2264_v53 = vmul.f32 -1.442695, %v1027_v57 }
 0x17f   : > { %v2771_v16 = vpop.eup %2770  ;;  %v1550_v51 = vadd.f32 1.0, %v2769_v60  ;;  %2790 = vpow2.f32 %v2266_v56  ;;  %v1048_v56 = vadd.f32 %v3622_v48, %v3513_v58  ;;  %v2205_v58 = vmul.f32 -1.442695, %v792_v25 }
 0x180   : > { %v2773_v10 = vpop.eup %2772  ;;  %2792 = vrcp.f32 %v1616_v9  ;;  %v1614_v62 = vadd.f32 1.0, %v2771_v16  ;;  %v1040_v16 = vadd.f32 %v3622_v48, %v3521_v50  ;;  %v2203_v50 = vmul.f32 -1.442695, %v784_v24 }
 0x181   : > { %v2775_v22 = vpop.eup %2774  ;;  %2794 = vrcp.f32 %v1550_v51  ;;  %v1553_v13 = vadd.f32 1.0, %v2773_v10  ;;  %v795_v10 = vadd.f32 %v3622_v48, %v3523_v55  ;;  %v2269_v18 = vmul.f32 -1.442695, %v1048_v56 }
 0x182   : > { %v2777_v21 = vpop.eup %2776  ;;  %2796 = vrcp.f32 %v1614_v62  ;;  %v1617_v31 = vadd.f32 1.0, %v2775_v22  ;;  %v1051_v22 = vadd.f32 %v3622_v48, %v3529_v0  ;;  %v2267_v55 = vmul.f32 -1.442695, %v1040_v16 }
 0x183   : > { %v2779_v33 = vpop.eup %2778  ;;  %2798 = vrcp.f32 %v1553_v13  ;;  %v1551_v39 = vadd.f32 1.0, %v2777_v21  ;;  %v787_v21 = vadd.f32 %v3622_v48, %v3531_v5  ;;  %v2206_v0 = vmul.f32 -1.442695, %v795_v10 }
 0x184   : > { %v2781_v38 = vpop.eup %2780  ;;  %2800 = vrcp.f32 %v1617_v31  ;;  %v1615_v2 = vadd.f32 1.0, %v2779_v33  ;;  %v1043_v33 = vadd.f32 %v3622_v48, %v3537_v30  ;;  %v800_v44 = vadd.f32 %v3622_v48, %v3559_v15 }
 0x185   : > { %v2783_v35 = vpop.eup %2782  ;;  %2802 = vrcp.f32 %v1551_v39  ;;  %v1556_v42 = vadd.f32 1.0, %v2781_v38  ;;  %v808_v38 = vadd.f32 %v3622_v48, %v3553_v32 }
 0x186   : > { %v2785_v4 = vpop.eup %2784  ;;  %2804 = vrcp.f32 %v1615_v2  ;;  %v1620_v47 = vadd.f32 1.0, %v2783_v35  ;;  %v2270_v2 = vmul.f32 -1.442695, %v1051_v22  ;;  %v1064_v35 = vadd.f32 %v3622_v48, %v3557_v37 }
 0x187   : > { %v2787_v28 = vpop.eup %2786  ;;  %2806 = vrcp.f32 %v1556_v42  ;;  %v1554_v59 = vadd.f32 1.0, %v2785_v4  ;;  %v2204_v42 = vmul.f32 -1.442695, %v787_v21  ;;  %v2268_v4 = vmul.f32 -1.442695, %v1043_v33 }
 0x188   : > { %v2789_v41 = vpop.eup %2788  ;;  %2808 = vrcp.f32 %v1620_v47  ;;  %v1618_v14 = vadd.f32 1.0, %v2787_v28  ;;  %v2209_v37 = vmul.f32 -1.442695, %v808_v38  ;;  %v2273_v28 = vmul.f32 -1.442695, %v1064_v35 }
 0x189   : > { %v2791_v63 = vpop.eup %2790  ;;  %2810 = vrcp.f32 %v1554_v59  ;;  %v1557_v7 = vadd.f32 1.0, %v2789_v41  ;;  %v2207_v15 = vmul.f32 -1.442695, %v800_v44  ;;  %v824_v44 = vadd.f32 %v3622_v48, %v3579_v36 }
 0x18a   : > { %v2793_v60 = vpop.eup %2792  ;;  %2812 = vrcp.f32 %v1618_v14  ;;  %v1621_v9 = vadd.f32 1.0, %v2791_v63 }
 0x18b   : > { %v2795_v51 = vpop.eup %2794  ;;  %2001 = vst.msk [vmem:[%s3297_s27 + $0x310] sm:$0xff] %vm1902_vm3, %v2793_v60  ;;  %2814 = vrcp.f32 %v1557_v7 }
 0x18c   : > { %v2797_v62 = vpop.eup %2796  ;;  %1935 = vst.msk [vmem:[%s3297_s27 + $0x100] sm:$0xff] %vm1902_vm3, %v2795_v51  ;;  %2816 = vrcp.f32 %v1621_v9 }
 0x18d   : > { %v2799_v13 = vpop.eup %2798  ;;  %1999 = vst.msk [vmem:[%s3297_s27 + $0x300] sm:$0xff] %vm1902_vm3, %v2797_v62  ;;  %2818 = vpow2.f32 %v2200_v34 }
 0x18e   : > { %v2801_v31 = vpop.eup %2800  ;;  %1938 = vst.msk [vmem:[%s3297_s27 + $0x118] sm:$0xff] %vm1902_vm3, %v2799_v13  ;;  %2820 = vpow2.f32 %v2264_v53  ;;  %v1056_v13 = vadd.f32 %v3622_v48, %v3563_v43 }
 0x18f   : > { %v2803_v39 = vpop.eup %2802  ;;  %2002 = vst.msk [vmem:[%s3297_s27 + $0x318] sm:$0xff] %vm1902_vm3, %v2801_v31  ;;  %2822 = vpow2.f32 %v2205_v58  ;;  %v811_v31 = vadd.f32 %v3622_v48, %v3565_v19  ;;  %v1059_v19 = vadd.f32 %v3622_v48, %v3575_v26 }
 0x190   : > { %v2805_v5 = vpop.eup %2804  ;;  %1936 = vst.msk [vmem:[%s3297_s27 + $0x108] sm:$0xff] %vm1902_vm3, %v2803_v39  ;;  %2824 = vpow2.f32 %v2269_v18  ;;  %v1067_v39 = vadd.f32 %v3622_v48, %v3569_v23  ;;  %v2271_v35 = vmul.f32 -1.442695, %v1056_v13 }
 0x191   : > { %v2807_v30 = vpop.eup %2806  ;;  %2000 = vst.msk [vmem:[%s3297_s27 + $0x308] sm:$0xff] %vm1902_vm3, %v2805_v5  ;;  %2826 = vpow2.f32 %v2203_v50  ;;  %v803_v5 = vadd.f32 %v3622_v48, %v3571_v61  ;;  %v2210_v23 = vmul.f32 -1.442695, %v811_v31  ;;  %v2272_v36 = vmul.f32 -1.442695, %v1059_v19 }
 0x192   : > { %v2809_v32 = vpop.eup %2808  ;;  %1941 = vst.msk [vmem:[%s3297_s27 + $0x130] sm:$0xff] %vm1902_vm3, %v2807_v30  ;;  %2828 = vpow2.f32 %v2267_v55  ;;  %v2274_v61 = vmul.f32 -1.442695, %v1067_v39 }
 0x193   : > { %v2811_v47 = vpop.eup %2810  ;;  %2005 = vst.msk [vmem:[%s3297_s27 + $0x330] sm:$0xff] %vm1902_vm3, %v2809_v32  ;;  %2830 = vpow2.f32 %v2206_v0  ;;  %v2208_v26 = vmul.f32 -1.442695, %v803_v5 }
 0x194   : > { %v2813_v57 = vpop.eup %2812  ;;  %1939 = vst.msk [vmem:[%s3297_s27 + $0x120] sm:$0xff] %vm1902_vm3, %v2811_v47  ;;  %2832 = vpow2.f32 %v2270_v2 }
 0x195   : > { %v2815_v59 = vpop.eup %2814  ;;  %2003 = vst.msk [vmem:[%s3297_s27 + $0x320] sm:$0xff] %vm1902_vm3, %v2813_v57  ;;  %2834 = vpow2.f32 %v2204_v42 }
 0x196   : > { %v2817_v25 = vpop.eup %2816  ;;  %1942 = vst.msk [vmem:[%s3297_s27 + $0x138] sm:$0xff] %vm1902_vm3, %v2815_v59  ;;  %2836 = vpow2.f32 %v2268_v4  ;;  %v1080_v4 = vadd.f32 %v3622_v48, %v3581_v27  ;;  %v2213_v27 = vmul.f32 -1.442695, %v824_v44  ;;  %v3995_v44 = vld [vmem:[#allocation5_spill] sm:$0xff] }
 0x197   : > { %v2819_v41 = vpop.eup %2818  ;;  %2006 = vst.msk [vmem:[%s3297_s27 + $0x338] sm:$0xff] %vm1902_vm3, %v2817_v25  ;;  %2838 = vpow2.f32 %v2209_v37  ;;  %v816_v37 = vadd.f32 %v3622_v48, %v3583_v45 }
 0x198   : > { %v2821_v14 = vpop.eup %2820  ;;  %v1555_v56 = vadd.f32 1.0, %v2819_v41  ;;  %2840 = vpow2.f32 %v2273_v28  ;;  %v1072_v28 = vadd.f32 %v3622_v48, %v3585_v54  ;;  %v2277_v45 = vmul.f32 -1.442695, %v1080_v4 }
 0x199   : > { %v2823_v63 = vpop.eup %2822  ;;  %v1619_v7 = vadd.f32 1.0, %v2821_v14  ;;  %2842 = vpow2.f32 %v2207_v15  ;;  %v3992_v15 = vld [vmem:[#allocation2_spill] sm:$0xff]  ;;  %v1083_v14 = vadd.f32 %v3622_v48, %v3589_v8 }
 0x19a   : > { %v2825_v34 = vpop.eup %2824  ;;  %2844 = vrcp.f32 %v1555_v56  ;;  %v1560_v24 = vadd.f32 1.0, %v2823_v63  ;;  %v827_v25 = vadd.f32 %v3622_v48, %v3992_v15  ;;  %v2211_v56 = vmul.f32 -1.442695, %v816_v37  ;;  %v3993_v63 = vld [vmem:[#allocation3_spill] sm:$0xff] }
 0x19b   : > { %v2827_v60 = vpop.eup %2826  ;;  %2846 = vrcp.f32 %v1619_v7  ;;  %v1624_v9 = vadd.f32 1.0, %v2825_v34  ;;  %v819_v7 = vadd.f32 %v3622_v48, %v3993_v63  ;;  %v3997_v63 = vld [vmem:[#allocation7_spill] sm:$0xff] }
 0x19c   : > { %v2829_v53 = vpop.eup %2828  ;;  %2848 = vrcp.f32 %v1560_v24  ;;  %v1558_v16 = vadd.f32 1.0, %v2827_v60  ;;  %v2275_v24 = vmul.f32 -1.442695, %v1072_v28  ;;  %v3994_v60 = vld [vmem:[#allocation4_spill] sm:$0xff] }
 0x19d   : > { %v2831_v51 = vpop.eup %2830  ;;  %2850 = vrcp.f32 %v1624_v9  ;;  %v1622_v58 = vadd.f32 1.0, %v2829_v53  ;;  %v1075_v9 = vadd.f32 %v3622_v48, %v3994_v60  ;;  %v2214_v53 = vmul.f32 -1.442695, %v827_v25 }
 0x19e   : > { %v2833_v10 = vpop.eup %2832  ;;  %2852 = vrcp.f32 %v1558_v16  ;;  %v1561_v62 = vadd.f32 1.0, %v2831_v51  ;;  %v2278_v51 = vmul.f32 -1.442695, %v1083_v14  ;;  %v3996_v14 = vld [vmem:[#allocation6_spill] sm:$0xff] }
 0x19f   : > { %v2835_v18 = vpop.eup %2834  ;;  %2854 = vrcp.f32 %v1622_v58  ;;  %v1625_v22 = vadd.f32 1.0, %v2833_v10  ;;  %v2212_v10 = vmul.f32 -1.442695, %v819_v7  ;;  %v835_v7 = vadd.f32 %v3622_v48, %v3997_v63  ;;  %v4001_v63 = vld [vmem:[#allocation11_spill] sm:$0xff] }
 0x1a0   : > { %v2837_v50 = vpop.eup %2836  ;;  %2856 = vrcp.f32 %v1561_v62  ;;  %v1559_v21 = vadd.f32 1.0, %v2835_v18  ;;  %v2276_v18 = vmul.f32 -1.442695, %v1075_v9 }
 0x1a1   : > { %v2839_v55 = vpop.eup %2838  ;;  %2858 = vrcp.f32 %v1625_v22  ;;  %v1623_v33 = vadd.f32 1.0, %v2837_v50 }
 0x1a2   : > { %v2841_v0 = vpop.eup %2840  ;;  %2860 = vrcp.f32 %v1559_v21  ;;  %v1564_v38 = vadd.f32 1.0, %v2839_v55 }
 0x1a3   : > { %v2843_v43 = vpop.eup %2842  ;;  %2862 = vrcp.f32 %v1623_v33  ;;  %v1628_v2 = vadd.f32 1.0, %v2841_v0 }
 0x1a4   : > { %v2845_v30 = vpop.eup %2844  ;;  %2864 = vrcp.f32 %v1564_v38  ;;  %v1562_v42 = vadd.f32 1.0, %v2843_v43 }
 0x1a5   : > { %v2847_v32 = vpop.eup %2846  ;;  %1940 = vst.msk [vmem:[%s3297_s27 + $0x128] sm:$0xff] %vm1902_vm3, %v2845_v30  ;;  %2866 = vrcp.f32 %v1628_v2 }
 0x1a6   : > { %v2849_v47 = vpop.eup %2848  ;;  %2004 = vst.msk [vmem:[%s3297_s27 + $0x328] sm:$0xff] %vm1902_vm3, %v2847_v32  ;;  %2868 = vrcp.f32 %v1562_v42  ;;  %v840_v32 = vadd.f32 %v3622_v48, %v3995_v44 }
 0x1a7   : > { %v2851_v57 = vpop.eup %2850  ;;  %1945 = vst.msk [vmem:[%s3297_s27 + $0x150] sm:$0xff] %vm1902_vm3, %v2849_v47  ;;  %2870 = vpow2.f32 %v2271_v35  ;;  %v1096_v47 = vadd.f32 %v3622_v48, %v3607_v17  ;;  %v843_v17 = vadd.f32 %v3622_v48, %v3615_v11 }
 0x1a8   : > { %v2853_v59 = vpop.eup %2852  ;;  %2009 = vst.msk [vmem:[%s3297_s27 + $0x350] sm:$0xff] %vm1902_vm3, %v2851_v57  ;;  %2872 = vpow2.f32 %v2210_v23  ;;  %v832_v57 = vadd.f32 %v3622_v48, %v3609_v12  ;;  %v2217_v25 = vmul.f32 -1.442695, %v840_v32 }
 0x1a9   : > { %v2855_v41 = vpop.eup %2854  ;;  %1943 = vst.msk [vmem:[%s3297_s27 + $0x140] sm:$0xff] %vm1902_vm3, %v2853_v59  ;;  %2874 = vpow2.f32 %v2274_v61  ;;  %v1088_v59 = vadd.f32 %v3622_v48, %v3613_v3  ;;  %v2281_v12 = vmul.f32 -1.442695, %v1096_v47  ;;  %v2218_v9 = vmul.f32 -1.442695, %v843_v17  ;;  %v3999_v17 = vld [vmem:[#allocation9_spill] sm:$0xff] }
 0x1aa   : > { %v2857_v54 = vpop.eup %2856  ;;  %2007 = vst.msk [vmem:[%s3297_s27 + $0x340] sm:$0xff] %vm1902_vm3, %v2855_v41  ;;  %2876 = vpow2.f32 %v2208_v26  ;;  %v2215_v3 = vmul.f32 -1.442695, %v832_v57 }
 0x1ab   : > { %v2859_v34 = vpop.eup %2858  ;;  %1946 = vst.msk [vmem:[%s3297_s27 + $0x158] sm:$0xff] %vm1902_vm3, %v2857_v54  ;;  %2878 = vpow2.f32 %v2272_v36  ;;  %v1099_v54 = vadd.f32 %v3622_v48, %v3996_v14  ;;  %v2279_v11 = vmul.f32 -1.442695, %v1088_v59  ;;  %v3998_v59 = vld [vmem:[#allocation8_spill] sm:$0xff]  ;;  %v4000_v14 = vld [vmem:[#allocation10_spill] sm:$0xff] }
 0x1ac   : > { %v2861_v8 = vpop.eup %2860  ;;  %2010 = vst.msk [vmem:[%s3297_s27 + $0x358] sm:$0xff] %vm1902_vm3, %v2859_v34  ;;  %2880 = vpow2.f32 %v2213_v27 }
 0x1ad   : > { %v2863_v16 = vpop.eup %2862  ;;  %1944 = vst.msk [vmem:[%s3297_s27 + $0x148] sm:$0xff] %vm1902_vm3, %v2861_v8  ;;  %2882 = vpow2.f32 %v2277_v45  ;;  %v856_v8 = vadd.f32 %v3622_v48, %v3652_v1 }
 0x1ae   : > { %v2865_v58 = vpop.eup %2864  ;;  %2008 = vst.msk [vmem:[%s3297_s27 + $0x348] sm:$0xff] %vm1902_vm3, %v2863_v16  ;;  %2884 = vpow2.f32 %v2211_v56  ;;  %v2282_v16 = vmul.f32 -1.442695, %v1099_v54 }
 0x1af   : > { %v2867_v62 = vpop.eup %2866  ;;  %1949 = vst.msk [vmem:[%s3297_s27 + $0x170] sm:$0xff] %vm1902_vm3, %v2865_v58  ;;  %2886 = vpow2.f32 %v2275_v24  ;;  %v1091_v24 = vadd.f32 %v3622_v48, %v3634_v29  ;;  %v2216_v29 = vmul.f32 -1.442695, %v835_v7 }
 0x1b0   : > { %v2869_v22 = vpop.eup %2868  ;;  %2013 = vst.msk [vmem:[%s3297_s27 + $0x370] sm:$0xff] %vm1902_vm3, %v2867_v62  ;;  %2888 = vpow2.f32 %v2214_v53 }
 0x1b1   : > { %v2871_v13 = vpop.eup %2870  ;;  %1947 = vst.msk [vmem:[%s3297_s27 + $0x160] sm:$0xff] %vm1902_vm3, %v2869_v22  ;;  %2890 = vpow2.f32 %v2278_v51  ;;  %v1112_v51 = vadd.f32 %v3622_v48, %v3658_v40  ;;  %v2280_v62 = vmul.f32 -1.442695, %v1091_v24  ;;  %v2221_v22 = vmul.f32 -1.442695, %v856_v8 }
 0x1b2   : > { %v2873_v50 = vpop.eup %2872  ;;  %v1626_v21 = vadd.f32 1.0, %v2871_v13  ;;  %2892 = vpow2.f32 %v2212_v10  ;;  %v848_v10 = vadd.f32 %v3622_v48, %v3660_v6  ;;  %v859_v13 = vadd.f32 %v3622_v48, %v3666_v46 }
 0x1b3   : > { %v2875_v31 = vpop.eup %2874  ;;  %v1565_v55 = vadd.f32 1.0, %v2873_v50  ;;  %2894 = vpow2.f32 %v2276_v18  ;;  %v1104_v18 = vadd.f32 %v3622_v48, %v3664_v52  ;;  %v2285_v50 = vmul.f32 -1.442695, %v1112_v51 }
 0x1b4   : > { %v2877_v33 = vpop.eup %2876  ;;  %2896 = vrcp.f32 %v1626_v21  ;;  %v1629_v39 = vadd.f32 1.0, %v2875_v31  ;;  %v2219_v52 = vmul.f32 -1.442695, %v848_v10  ;;  %v2222_v48 = vmul.f32 -1.442695, %v859_v13  ;;  %v4004_v10 = vld [vmem:[#allocation14_spill] sm:$0xff] }
 0x1b5   : > { %v2879_v0 = vpop.eup %2878  ;;  %2898 = vrcp.f32 %v1565_v55  ;;  %v1563_v38 = vadd.f32 1.0, %v2877_v33  ;;  %v2283_v55 = vmul.f32 -1.442695, %v1104_v18 }
 0x1b6   : > { %v2881_v5 = vpop.eup %2880  ;;  %2900 = vrcp.f32 %v1629_v39  ;;  %v1627_v43 = vadd.f32 1.0, %v2879_v0 }
 0x1b7   : > { %v2883_v2 = vpop.eup %2882  ;;  %2902 = vrcp.f32 %v1563_v38  ;;  %v1568_v35 = vadd.f32 1.0, %v2881_v5 }
 0x1b8   : > { %v2885_v19 = vpop.eup %2884  ;;  %2904 = vrcp.f32 %v1627_v43  ;;  %v1632_v30 = vadd.f32 1.0, %v2883_v2 }
 0x1b9   : > { %v2887_v42 = vpop.eup %2886  ;;  %2906 = vrcp.f32 %v1568_v35  ;;  %v1566_v23 = vadd.f32 1.0, %v2885_v19 }
 0x1ba   : > { %v2889_v61 = vpop.eup %2888  ;;  %2908 = vrcp.f32 %v1632_v30  ;;  %v1630_v4 = vadd.f32 1.0, %v2887_v42 }
 0x1bb   : > { %v2891_v26 = vpop.eup %2890  ;;  %2910 = vrcp.f32 %v1566_v23  ;;  %v1569_v37 = vadd.f32 1.0, %v2889_v61 }
 0x1bc   : > { %v2893_v36 = vpop.eup %2892  ;;  %2912 = vrcp.f32 %v1630_v4  ;;  %v1633_v28 = vadd.f32 1.0, %v2891_v26 }
 0x1bd   : > { %v2895_v27 = vpop.eup %2894  ;;  %2914 = vrcp.f32 %v1569_v37  ;;  %v1567_v15 = vadd.f32 1.0, %v2893_v36  ;;  %v3019_v37 = vld [vmem:[%s3975_s2] ss:$0 sm:$0xff] }
 0x1be   : > { %v2897_v41 = vpop.eup %2896  ;;  %2916 = vrcp.f32 %v1633_v28  ;;  %v1631_v45 = vadd.f32 1.0, %v2895_v27  ;;  %v1115_v57 = vadd.f32 %v3019_v37, %v3670_v49  ;;  %v851_v27 = vadd.f32 %v3019_v37, %v3998_v59 }
 0x1bf   : > { %v2899_v56 = vpop.eup %2898  ;;  %2011 = vst.msk [vmem:[%s3297_s27 + $0x360] sm:$0xff] %vm1902_vm3, %v2897_v41  ;;  %2918 = vrcp.f32 %v1567_v15  ;;  %v1107_v41 = vadd.f32 %v3019_v37, %v3999_v17  ;;  %v872_v54 = vadd.f32 %v3019_v37, %v4000_v14  ;;  %v1128_v7 = vadd.f32 %v3019_v37, %v4001_v63 }
 0x1c0   : > { %v2901_v34 = vpop.eup %2900  ;;  %1950 = vst.msk [vmem:[%s3297_s27 + $0x178] sm:$0xff] %vm1902_vm3, %v2899_v56  ;;  %2920 = vrcp.f32 %v1631_v45  ;;  %v2220_v24 = vmul.f32 -1.442695, %v851_v27 }
 0x1c1   : > { %v2903_v60 = vpop.eup %2902  ;;  %2014 = vst.msk [vmem:[%s3297_s27 + $0x378] sm:$0xff] %vm1902_vm3, %v2901_v34  ;;  %2922 = vpow2.f32 %v2217_v25  ;;  %v2289_v18 = vmul.f32 -1.442695, %v1128_v7 }
 0x1c2   : > { %v2905_v53 = vpop.eup %2904  ;;  %1948 = vst.msk [vmem:[%s3297_s27 + $0x168] sm:$0xff] %vm1902_vm3, %v2903_v60  ;;  %2924 = vpow2.f32 %v2281_v12  ;;  %v4002_v60 = vld [vmem:[#allocation12_spill] sm:$0xff] }
 0x1c3   : > { %v2907_v58 = vpop.eup %2906  ;;  %2012 = vst.msk [vmem:[%s3297_s27 + $0x368] sm:$0xff] %vm1902_vm3, %v2905_v53  ;;  %2926 = vpow2.f32 %v2215_v3  ;;  %v2286_v3 = vmul.f32 -1.442695, %v1115_v57  ;;  %v2284_v53 = vmul.f32 -1.442695, %v1107_v41 }
 0x1c4   : > { %v2909_v1 = vpop.eup %2908  ;;  %1953 = vst.msk [vmem:[%s3297_s27 + $0x190] sm:$0xff] %vm1902_vm3, %v2907_v58  ;;  %2928 = vpow2.f32 %v2279_v11 }
 0x1c5   : > { %v2911_v40 = vpop.eup %2910  ;;  %2017 = vst.msk [vmem:[%s3297_s27 + $0x390] sm:$0xff] %vm1902_vm3, %v2909_v1  ;;  %2930 = vpow2.f32 %v2218_v9  ;;  %v864_v9 = vadd.f32 %v3019_v37, %v4002_v60  ;;  %v875_v1 = vadd.f32 %v3019_v37, %v4004_v10 }
 0x1c6   : > { %v2913_v6 = vpop.eup %2912  ;;  %1951 = vst.msk [vmem:[%s3297_s27 + $0x180] sm:$0xff] %vm1902_vm3, %v2911_v40  ;;  %2932 = vpow2.f32 %v2282_v16  ;;  %v4003_v16 = vld [vmem:[#allocation13_spill] sm:$0xff]  ;;  %v1131_v40 = vadd.f32 %v3019_v37, %v3694_v20 }
 0x1c7   : > { %v2915_v21 = vpop.eup %2914  ;;  %2015 = vst.msk [vmem:[%s3297_s27 + $0x380] sm:$0xff] %vm1902_vm3, %v2913_v6  ;;  %2934 = vpow2.f32 %v2216_v29  ;;  %v1120_v51 = vadd.f32 %v3019_v37, %v4003_v16  ;;  %v2225_v29 = vmul.f32 -1.442695, %v872_v54  ;;  %v2223_v13 = vmul.f32 -1.442695, %v864_v9  ;;  %v4005_v6 = vld [vmem:[#allocation15_spill] sm:$0xff] }
 0x1c8   : > { %v2917_v31 = vpop.eup %2916  ;;  %1954 = vst.msk [vmem:[%s3297_s27 + $0x198] sm:$0xff] %vm1902_vm3, %v2915_v21  ;;  %2936 = vpow2.f32 %v2280_v62  ;;  %v2226_v20 = vmul.f32 -1.442695, %v875_v1 }
 0x1c9   : > { %v2919_v33 = vpop.eup %2918  ;;  %2018 = vst.msk [vmem:[%s3297_s27 + $0x398] sm:$0xff] %vm1902_vm3, %v2917_v31  ;;  %2938 = vpow2.f32 %v2221_v22  ;;  %v4006_v31 = vld [vmem:[#allocation16_spill] sm:$0xff] }
 0x1ca   : > { %v2921_v46 = vpop.eup %2920  ;;  %1952 = vst.msk [vmem:[%s3297_s27 + $0x188] sm:$0xff] %vm1902_vm3, %v2919_v33  ;;  %2940 = vpow2.f32 %v2285_v50  ;;  %v867_v50 = vadd.f32 %v3019_v37, %v4005_v6 }
 0x1cb   : > { %v2923_v39 = vpop.eup %2922  ;;  %2016 = vst.msk [vmem:[%s3297_s27 + $0x388] sm:$0xff] %vm1902_vm3, %v2921_v46  ;;  %2942 = vpow2.f32 %v2219_v52  ;;  %v2287_v52 = vmul.f32 -1.442695, %v1120_v51  ;;  %v2290_v46 = vmul.f32 -1.442695, %v1131_v40 }
 0x1cc   : > { %v2925_v0 = vpop.eup %2924  ;;  %v1572_v38 = vadd.f32 1.0, %v2923_v39  ;;  %2944 = vpow2.f32 %v2283_v55  ;;  %v1123_v55 = vadd.f32 %v3019_v37, %v4006_v31 }
 0x1cd   : > { %v2927_v5 = vpop.eup %2926  ;;  %v1636_v43 = vadd.f32 1.0, %v2925_v0  ;;  %2946 = vpow2.f32 %v2222_v48  ;;  %v2224_v0 = vmul.f32 -1.442695, %v867_v50 }
 0x1ce   : > { %v2929_v2 = vpop.eup %2928  ;;  %2948 = vrcp.f32 %v1572_v38  ;;  %v1570_v35 = vadd.f32 1.0, %v2927_v5  ;;  %v2288_v5 = vmul.f32 -1.442695, %v1123_v55 }
 0x1cf   : > { %v2931_v19 = vpop.eup %2930  ;;  %2950 = vrcp.f32 %v1636_v43  ;;  %v1634_v30 = vadd.f32 1.0, %v2929_v2 }
 0x1d0   : > { %v2933_v42 = vpop.eup %2932  ;;  %2952 = vrcp.f32 %v1570_v35  ;;  %v1573_v23 = vadd.f32 1.0, %v2931_v19 }
 0x1d1   : > { %v2935_v44 = vpop.eup %2934  ;;  %2954 = vrcp.f32 %v1634_v30  ;;  %v1637_v32 = vadd.f32 1.0, %v2933_v42 }
 0x1d2   : > { %v2937_v61 = vpop.eup %2936  ;;  %2956 = vrcp.f32 %v1573_v23  ;;  %v1571_v4 = vadd.f32 1.0, %v2935_v44 }
 0x1d3   : > { %v2939_v47 = vpop.eup %2938  ;;  %2958 = vrcp.f32 %v1637_v32  ;;  %v1635_v26 = vadd.f32 1.0, %v2937_v61 }
 0x1d4   : > { %v2941_v36 = vpop.eup %2940  ;;  %2960 = vrcp.f32 %v1571_v4  ;;  %v1576_v28 = vadd.f32 1.0, %v2939_v47 }
 0x1d5   : > { %v2943_v15 = vpop.eup %2942  ;;  %2962 = vrcp.f32 %v1635_v26  ;;  %v1640_v25 = vadd.f32 1.0, %v2941_v36 }
 0x1d6   : > { %v2945_v45 = vpop.eup %2944  ;;  %2964 = vrcp.f32 %v1576_v28  ;;  %v1574_v12 = vadd.f32 1.0, %v2943_v15 }
 0x1d7   : > { %v2947_v56 = vpop.eup %2946  ;;  %2966 = vrcp.f32 %v1640_v25  ;;  %v1638_v49 = vadd.f32 1.0, %v2945_v45 }
 0x1d8   : > { %v2949_v34 = vpop.eup %2948  ;;  %2968 = vrcp.f32 %v1574_v12  ;;  %v1577_v11 = vadd.f32 1.0, %v2947_v56 }
 0x1d9   : > { %v2951_v8 = vpop.eup %2950  ;;  %1957 = vst.msk [vmem:[%s3297_s27 + $0x1b0] sm:$0xff] %vm1902_vm3, %v2949_v34  ;;  %2970 = vrcp.f32 %v1638_v49 }
 0x1da   : > { %v2953_v58 = vpop.eup %2952  ;;  %2021 = vst.msk [vmem:[%s3297_s27 + $0x3b0] sm:$0xff] %vm1902_vm3, %v2951_v8  ;;  %2972 = vrcp.f32 %v1577_v11 }
 0x1db   : > { %v2955_v62 = vpop.eup %2954  ;;  %1955 = vst.msk [vmem:[%s3297_s27 + $0x1a0] sm:$0xff] %vm1902_vm3, %v2953_v58  ;;  %2974 = vpow2.f32 %v2286_v3 }
 0x1dc   : > { %v2957_v22 = vpop.eup %2956  ;;  %2019 = vst.msk [vmem:[%s3297_s27 + $0x3a0] sm:$0xff] %vm1902_vm3, %v2955_v62  ;;  %2976 = vpow2.f32 %v2220_v24 }
 0x1dd   : > { %v2959_v21 = vpop.eup %2958  ;;  %1958 = vst.msk [vmem:[%s3297_s27 + $0x1b8] sm:$0xff] %vm1902_vm3, %v2957_v22  ;;  %2978 = vpow2.f32 %v2284_v53 }
 0x1de   : > { %v2961_v33 = vpop.eup %2960  ;;  %2022 = vst.msk [vmem:[%s3297_s27 + $0x3b8] sm:$0xff] %vm1902_vm3, %v2959_v21  ;;  %2980 = vpow2.f32 %v2225_v29 }
 0x1df   : > { %v2963_v48 = vpop.eup %2962  ;;  %1956 = vst.msk [vmem:[%s3297_s27 + $0x1a8] sm:$0xff] %vm1902_vm3, %v2961_v33  ;;  %2982 = vpow2.f32 %v2289_v18 }
 0x1e0   : > { %v2965_v39 = vpop.eup %2964  ;;  %2020 = vst.msk [vmem:[%s3297_s27 + $0x3a8] sm:$0xff] %vm1902_vm3, %v2963_v48  ;;  %2984 = vpow2.f32 %v2223_v13 }
 0x1e1   : > { %v2967_v38 = vpop.eup %2966  ;;  %1961 = vst.msk [vmem:[%s3297_s27 + $0x1d0] sm:$0xff] %vm1902_vm3, %v2965_v39  ;;  %2986 = vpow2.f32 %v2287_v52 }
 0x1e2   : > { %v2969_v43 = vpop.eup %2968  ;;  %2025 = vst.msk [vmem:[%s3297_s27 + $0x3d0] sm:$0xff] %vm1902_vm3, %v2967_v38  ;;  %2988 = vpow2.f32 %v2226_v20 }
 0x1e3   : > { %v2971_v2 = vpop.eup %2970  ;;  %1959 = vst.msk [vmem:[%s3297_s27 + $0x1c0] sm:$0xff] %vm1902_vm3, %v2969_v43  ;;  %2990 = vpow2.f32 %v2290_v46 }
 0x1e4   : > { %v2973_v35 = vpop.eup %2972  ;;  %2023 = vst.msk [vmem:[%s3297_s27 + $0x3c0] sm:$0xff] %vm1902_vm3, %v2971_v2  ;;  %2992 = vpow2.f32 %v2224_v0 }
 0x1e5   : > { %v2975_v19 = vpop.eup %2974  ;;  %1962 = vst.msk [vmem:[%s3297_s27 + $0x1d8] sm:$0xff] %vm1902_vm3, %v2973_v35  ;;  %2994 = vpow2.f32 %v2288_v5 }
 0x1e6   : > { %v2977_v30 = vpop.eup %2976  ;;  %v1641_v42 = vadd.f32 1.0, %v2975_v19 }
 0x1e7   : > { %v2979_v23 = vpop.eup %2978  ;;  %v1575_v44 = vadd.f32 1.0, %v2977_v30 }
 0x1e8   : > { %v2981_v32 = vpop.eup %2980  ;;  %2996 = vrcp.f32 %v1641_v42  ;;  %v1639_v61 = vadd.f32 1.0, %v2979_v23 }
 0x1e9   : > { %v2983_v4 = vpop.eup %2982  ;;  %2998 = vrcp.f32 %v1575_v44  ;;  %v1580_v47 = vadd.f32 1.0, %v2981_v32 }
 0x1ea   : > { %v2985_v26 = vpop.eup %2984  ;;  %3000 = vrcp.f32 %v1639_v61  ;;  %v1644_v37 = vadd.f32 1.0, %v2983_v4 }
 0x1eb   : > { %v2987_v57 = vpop.eup %2986  ;;  %3002 = vrcp.f32 %v1580_v47  ;;  %v1578_v36 = vadd.f32 1.0, %v2985_v26 }
 0x1ec   : > { %v2989_v28 = vpop.eup %2988  ;;  %3004 = vrcp.f32 %v1644_v37  ;;  %v1642_v59 = vadd.f32 1.0, %v2987_v57 }
 0x1ed   : > { %v2991_v27 = vpop.eup %2990  ;;  %3006 = vrcp.f32 %v1578_v36  ;;  %v1581_v15 = vadd.f32 1.0, %v2989_v28 }
 0x1ee   : > { %v2993_v25 = vpop.eup %2992  ;;  %3008 = vrcp.f32 %v1642_v59  ;;  %v1645_v17 = vadd.f32 1.0, %v2991_v27 }
 0x1ef   : > { %v2995_v41 = vpop.eup %2994  ;;  %3010 = vrcp.f32 %v1581_v15  ;;  %v1579_v45 = vadd.f32 1.0, %v2993_v25 }
 0x1f0   : > { %3012 = vrcp.f32 %v1645_v17  ;;  %v1643_v12 = vadd.f32 1.0, %v2995_v41 }
 0x1f1   : > { %3014 = vrcp.f32 %v1579_v45 }
 0x1f2   : > { %v2997_v14 = vpop.eup %2996  ;;  %3016 = vrcp.f32 %v1643_v12 }
 0x1f3   : > { %v2999_v54 = vpop.eup %2998  ;;  %2026 = vst.msk [vmem:[%s3297_s27 + $0x3d8] sm:$0xff] %vm1902_vm3, %v2997_v14 }
 0x1f4   : > { %v3001_v56 = vpop.eup %3000  ;;  %1960 = vst.msk [vmem:[%s3297_s27 + $0x1c8] sm:$0xff] %vm1902_vm3, %v2999_v54 }
 0x1f5   : > { %v3003_v49 = vpop.eup %3002  ;;  %2024 = vst.msk [vmem:[%s3297_s27 + $0x3c8] sm:$0xff] %vm1902_vm3, %v3001_v56 }
 0x1f6   : > { %v3005_v3 = vpop.eup %3004  ;;  %1965 = vst.msk [vmem:[%s3297_s27 + $0x1f0] sm:$0xff] %vm1902_vm3, %v3003_v49 }
 0x1f7   : > { %v3007_v63 = vpop.eup %3006  ;;  %2029 = vst.msk [vmem:[%s3297_s27 + $0x3f0] sm:$0xff] %vm1902_vm3, %v3005_v3 }
 0x1f8   : > { %v3009_v7 = vpop.eup %3008  ;;  %1963 = vst.msk [vmem:[%s3297_s27 + $0x1e0] sm:$0xff] %vm1902_vm3, %v3007_v63 }
 0x1f9   : > { %v3011_v34 = vpop.eup %3010  ;;  %2027 = vst.msk [vmem:[%s3297_s27 + $0x3e0] sm:$0xff] %vm1902_vm3, %v3009_v7 }
 0x1fa   : > { %v3013_v11 = vpop.eup %3012  ;;  %1966 = vst.msk [vmem:[%s3297_s27 + $0x1f8] sm:$0xff] %vm1902_vm3, %v3011_v34 }
 0x1fb   : > { %v3015_v24 = vpop.eup %3014  ;;  %2030 = vst.msk [vmem:[%s3297_s27 + $0x3f8] sm:$0xff] %vm1902_vm3, %v3013_v11 }
 0x1fc   : > { %v3017_v60 = vpop.eup %3016  ;;  %1964 = vst.msk [vmem:[%s3297_s27 + $0x1e8] sm:$0xff] %vm1902_vm3, %v3015_v24 }
 0x1fd   : > { %2028 = vst.msk [vmem:[%s3297_s27 + $0x3e8] sm:$0xff] %vm1902_vm3, %v3017_v60 }
 0x1fe PF: > { %s13_s12 = sadd.s32 1, %s3026_s12  }
 0x1ff   : > { %p10_p4 = scmp.ge.s32.totalorder %s13_s12, 6  }
 0x201   :  { %12 = sbr.rel (!%p10_p4) target bundleno = 1 (0x1), region = 62 }

</bundles_post_ra>
